<compile_context>
chip_gen: v6e
topology: v6e:2x2x1
jax: 0.10.0
libtpu: 0.0.40
codegen_flags: <defaults>
</compile_context>

<pallas_src>
import functools

import numpy as np

import jax
import jax.numpy as jnp
from jax import lax
from jax.experimental import pallas as pl
from jax.experimental.pallas import tpu as pltpu

TB = 64  # images per grid step

# conv1-output row-group order: even y1 first (0,2,...,12), then odd (1,...,11)
_Y_EVEN_ODD = np.concatenate([np.arange(0, 13, 2), np.arange(1, 13, 2)])

_PREP_ORDER = ("W1", "b1", "W2", "b2", "W3", "b3", "W4", "b4")


# ----------------------------------------------------------------------------
# Fused whole-network kernel
# ----------------------------------------------------------------------------
def _net_kernel(xg_ref, w1_ref, b1_ref, w2_ref, b2_ref, w3_ref, b3_ref,
                w4_ref, b4_ref, out_ref, *, tb):
    f32 = jnp.float32
    bf16 = jnp.bfloat16

    # conv1 + relu1: one (13*tb, 128) x (128, 512) MXU matmul (4 taps stacked
    # along K on the host).  Row = y1_group*tb + b (even y1 in groups 0..6,
    # odd y1 in groups 7..12); lane = x1*32 + c (416 real, padded to 512).
    acc1 = jnp.dot(xg_ref[...], w1_ref[...], preferred_element_type=f32)
    h1 = jnp.maximum(acc1 + b1_ref[...], 0.0).astype(bf16)        # (13*tb, 512)

    # conv2 + relu2: tap ki needs conv1 rows y1 = 2*y2 + ki (y2 = 0..4); with
    # the even/odd row ordering that is a single contiguous block of 5*tb rows
    # -> 4 accumulating (5*tb, 512) x (512, 384) dots, zero gather cost.
    tap_start = (0, 7 * tb, 1 * tb, 8 * tb)                       # ki = 0,1,2,3
    acc2 = jnp.zeros((5 * tb, 384), f32)
    for ki in range(4):
        s = tap_start[ki]
        acc2 = acc2 + jnp.dot(h1[s:s + 5 * tb, :],
                              w2_ref[ki * 512:(ki + 1) * 512, :],
                              preferred_element_type=f32)
    feat = jnp.maximum(acc2 + b2_ref[...], 0.0).astype(bf16)      # (5*tb, 384)
    # feat row = y2*tb + b, lane = x2*64 + c2 (320 real, padded to 384).

    # dropout1 / dropout2: identity (eval mode)

    # layer3 + relu3: sum over the 5 y2 row blocks (static slices), each a
    # (tb, 384) x (384, 128) dot accumulating in f32.
    acc3 = jnp.zeros((tb, 128), f32)
    for y2 in range(5):
        acc3 = acc3 + jnp.dot(feat[y2 * tb:(y2 + 1) * tb, :],
                              w3_ref[y2 * 384:(y2 + 1) * 384, :],
                              preferred_element_type=f32)
    z3 = jnp.maximum(acc3 + b3_ref[...], 0.0)                     # (tb, 128) f32

    # layer4 (10 -> padded 128 lane-dense) + softmax(dim=1), all f32.
    logits = jnp.dot(z3, w4_ref[...], preferred_element_type=f32) + b4_ref[...]
    m = jnp.max(logits, axis=-1, keepdims=True)
    e = jnp.exp(logits - m)
    denom = jnp.sum(e, axis=-1, keepdims=True)
    out_ref[...] = (e * pl.reciprocal(denom, approx=False)).astype(out_ref.dtype)


# ----------------------------------------------------------------------------
# Host-side (numpy, once, outside jit): pack torch-layout weights into the
# structured, lane-padded matmul operands used by the fused kernel.
# ----------------------------------------------------------------------------
def prepare_constants(params):
    w1 = np.asarray(params["w1"], np.float32)   # (32, 1, 4, 4)  OIHW
    b1 = np.asarray(params["b1"], np.float32)
    w2 = np.asarray(params["w2"], np.float32)   # (64, 32, 4, 4) OIHW
    b2 = np.asarray(params["b2"], np.float32)
    w3 = np.asarray(params["w3"], np.float32)   # (128, 1600) NCHW-flatten order
    b3 = np.asarray(params["b3"], np.float32)
    w4 = np.asarray(params["w4"], np.float32)   # (10, 128)
    b4 = np.asarray(params["b4"], np.float32)

    # conv1 taps stacked along K:  W1[ki*28 + x, x1*32 + c] = w1[c,0,ki,x-2*x1]
    # (K padded 112 -> 128, N padded 416 -> 512)
    W1 = np.zeros((128, 512), np.float32)
    for ki in range(4):
        for x1 in range(13):
            for kj in range(4):
                W1[ki * 28 + 2 * x1 + kj, x1 * 32:(x1 + 1) * 32] = w1[:, 0, ki, kj]
    b1row = np.zeros((1, 512), np.float32)
    b1row[0, :416] = np.tile(b1, 13)

    # conv2 taps stacked along rows: W2[ki*512 + x1*32 + c, x2*64 + c2]
    #   = w2[c2, c, ki, x1 - 2*x2]   (rows padded to 512/tap, cols 320 -> 384)
    W2 = np.zeros((4 * 512, 384), np.float32)
    for ki in range(4):
        for x2 in range(5):
            for kj in range(4):
                x1 = 2 * x2 + kj
                W2[ki * 512 + x1 * 32: ki * 512 + (x1 + 1) * 32,
                   x2 * 64:(x2 + 1) * 64] = w2[:, :, ki, kj].T   # [c, c2]
    b2row = np.zeros((1, 384), np.float32)
    b2row[0, :320] = np.tile(b2, 5)

    # fc3 weights permuted from torch (c2, y2, x2) flatten order to the
    # kernel's per-y2 (x2, c2) lane order:  W3[y2*384 + x2*64 + c2, j]
    W3 = np.zeros((5 * 384, 128), np.float32)
    w3r = w3.reshape(128, 64, 5, 5)                   # [j, c2, y2, x2]
    for y2 in range(5):
        W3[y2 * 384: y2 * 384 + 320, :] = (
            w3r[:, :, y2, :].transpose(2, 1, 0).reshape(320, 128))
    b3row = b3[None, :].copy()

    # fc4 padded to 128 lane-dense output columns (pad bias -> -1e30, f32 only)
    W4 = np.zeros((128, 128), np.float32)
    W4[:, :10] = w4.T
    b4row = np.full((1, 128), -1e30, np.float32)
    b4row[0, :10] = b4

    bf = jnp.bfloat16
    return {
        "W1": jnp.asarray(W1, bf), "b1": jnp.asarray(b1row, jnp.float32),
        "W2": jnp.asarray(W2, bf), "b2": jnp.asarray(b2row, jnp.float32),
        "W3": jnp.asarray(W3, bf), "b3": jnp.asarray(b3row, jnp.float32),
        "W4": jnp.asarray(W4, jnp.float32),
        "b4": jnp.asarray(b4row, jnp.float32),
    }


# ----------------------------------------------------------------------------
# Forward pass (single fused pallas_call)
# ----------------------------------------------------------------------------
@jax.jit
def net_forward(x, prep):
    tb = TB
    B = x.shape[0]
    bp = ((B + tb - 1) // tb) * tb
    nsteps = bp // tb

    imgs = x.reshape(B, 28, 28).astype(jnp.float32)
    if bp != B:
        imgs = jnp.pad(imgs, ((0, bp - B), (0, 0), (0, 0)))

    # Layout plumbing (plain XLA, outside the kernel): stride-2 row windows of
    # the 4 conv1 taps stacked along K (112 -> padded 128 lanes), rows ordered
    # (even y1 ..., odd y1 ..., image) per grid-step tile so that conv2's
    # stride-2 row gather is a contiguous static slice inside the kernel.
    g = jnp.stack([imgs[:, ki:ki + 25:2, :] for ki in range(4)], axis=2)
    g = g.reshape(bp, 13, 112)
    g = jnp.pad(g, ((0, 0), (0, 0), (0, 16)))                 # K 112 -> 128
    g = jnp.take(g, jnp.asarray(_Y_EVEN_ODD), axis=1)         # even-y first
    g = g.reshape(nsteps, tb, 13, 128).transpose(0, 2, 1, 3)  # (step, y, b, k)
    xg = g.reshape(nsteps * 13 * tb, 128).astype(jnp.bfloat16)

    kernel = functools.partial(_net_kernel, tb=tb)

    def const_spec(a):  # whole-array, VMEM-resident operand
        return pl.BlockSpec(a.shape, lambda i: (0,) * a.ndim)

    out = pl.pallas_call(
        kernel,
        out_shape=jax.ShapeDtypeStruct((bp, 128), jnp.float32),
        grid=(nsteps,),
        in_specs=[pl.BlockSpec((13 * tb, 128), lambda i: (i, 0))]
                 + [const_spec(prep[k]) for k in _PREP_ORDER],
        out_specs=pl.BlockSpec((tb, 128), lambda i: (i, 0)),
        compiler_params=pltpu.CompilerParams(
            dimension_semantics=("parallel",),
            vmem_limit_bytes=32 * 1024 * 1024,
        ),
    )(xg, *(prep[k] for k in _PREP_ORDER))

    return out[:B, :10]


# ----------------------------------------------------------------------------
# Pure-JAX f32 reference (correctness check only)
# ----------------------------------------------------------------------------
def net_forward_ref(x, params):
    B = x.shape[0]
    x = x.reshape(B, 1, 28, 28)
    x = lax.conv_general_dilated(
        x, params["w1"], (2, 2), "VALID",
        dimension_numbers=("NCHW", "OIHW", "NCHW"),
    ) + params["b1"][None, :, None, None]
    x = jnp.maximum(x, 0.0)
    x = lax.conv_general_dilated(
        x, params["w2"], (2, 2), "VALID",
        dimension_numbers=("NCHW", "OIHW", "NCHW"),
    ) + params["b2"][None, :, None, None]
    x = jnp.maximum(x, 0.0)
    x = x.reshape(B, -1)
    x = jnp.maximum(x @ params["w3"].T + params["b3"], 0.0)
    x = x @ params["w4"].T + params["b4"]
    return jax.nn.softmax(x, axis=1)


def init_params(key):
    ks = jax.random.split(key, 8)
    s = 0.05
    return {
        "w1": s * jax.random.normal(ks[0], (32, 1, 4, 4), jnp.float32),
        "b1": s * jax.random.normal(ks[1], (32,), jnp.float32),
        "w2": s * jax.random.normal(ks[2], (64, 32, 4, 4), jnp.float32),
        "b2": s * jax.random.normal(ks[3], (64,), jnp.float32),
        "w3": s * jax.random.normal(ks[4], (128, 64 * 5 * 5), jnp.float32),
        "b3": s * jax.random.normal(ks[5], (128,), jnp.float32),
        "w4": s * jax.random.normal(ks[6], (10, 128), jnp.float32),
        "b4": s * jax.random.normal(ks[7], (10,), jnp.float32),
    }


if __name__ == "__main__":
    key = jax.random.PRNGKey(0)
    pkey, xkey = jax.random.split(key)
    params = init_params(pkey)
    prep = prepare_constants(params)   # one-time host-side weight packing

    B = 2
    x = jax.random.normal(xkey, (B, 784), jnp.float32)  # viewed as (B,1,28,28)

    out = jax.block_until_ready(net_forward(x, prep))
    ref = net_forward_ref(x, params)

    assert out.shape == (B, 10)
    # exact reciprocal -> rows sum to 1 up to f32 rounding
    assert jnp.allclose(jnp.sum(out, axis=1), 1.0, atol=1e-3)
    err = float(jnp.max(jnp.abs(out - ref)))
    assert err < 2e-2, f"max abs error vs f32 reference: {err}"

    print("KERNEL_OK")
</pallas_src>

<mosaic_0001>
module attributes {stable_mosaic.version = 11 : i64} {
  func.func @_net_kernel(%arg0: i32, %arg1: memref<832x128xbf16, #tpu.memory_space<vmem>>, %arg2: memref<128x512xbf16, #tpu.memory_space<vmem>>, %arg3: memref<1x512xf32, #tpu.memory_space<vmem>>, %arg4: memref<2048x384xbf16, #tpu.memory_space<vmem>>, %arg5: memref<1x384xf32, #tpu.memory_space<vmem>>, %arg6: memref<1920x128xbf16, #tpu.memory_space<vmem>>, %arg7: memref<1x128xf32, #tpu.memory_space<vmem>>, %arg8: memref<128x128xf32, #tpu.memory_space<vmem>>, %arg9: memref<1x128xf32, #tpu.memory_space<vmem>>, %arg10: memref<64x128xf32, #tpu.memory_space<vmem>>) attributes {dimension_semantics = [#tpu.dimension_semantics<parallel>], iteration_bounds = array<i64: 1>, scalar_prefetch = 0 : i64, scratch_operands = 0 : i64, tpu.core_type = #tpu.core_type<tc>, window_params = [{transform_indices = @transform_0, window_bounds = array<i64: 832, 128>}, {pipeline_mode = #tpu.pipeline_mode<synchronous>, transform_indices = @transform_1, window_bounds = array<i64: 128, 512>}, {pipeline_mode = #tpu.pipeline_mode<synchronous>, transform_indices = @transform_2, window_bounds = array<i64: 1, 512>}, {pipeline_mode = #tpu.pipeline_mode<synchronous>, transform_indices = @transform_3, window_bounds = array<i64: 2048, 384>}, {pipeline_mode = #tpu.pipeline_mode<synchronous>, transform_indices = @transform_4, window_bounds = array<i64: 1, 384>}, {pipeline_mode = #tpu.pipeline_mode<synchronous>, transform_indices = @transform_5, window_bounds = array<i64: 1920, 128>}, {pipeline_mode = #tpu.pipeline_mode<synchronous>, transform_indices = @transform_6, window_bounds = array<i64: 1, 128>}, {pipeline_mode = #tpu.pipeline_mode<synchronous>, transform_indices = @transform_7, window_bounds = array<i64: 128, 128>}, {pipeline_mode = #tpu.pipeline_mode<synchronous>, transform_indices = @transform_8, window_bounds = array<i64: 1, 128>}, {transform_indices = @transform_9, window_bounds = array<i64: 64, 128>}]} {
    %c0 = arith.constant 0 : index
    %c0_0 = arith.constant 0 : index
    %0 = vector.load %arg1[%c0, %c0_0] : memref<832x128xbf16, #tpu.memory_space<vmem>>, vector<832x128xbf16>
    %c0_1 = arith.constant 0 : index
    %c0_2 = arith.constant 0 : index
    %1 = vector.load %arg2[%c0_1, %c0_2] : memref<128x512xbf16, #tpu.memory_space<vmem>>, vector<128x512xbf16>
    %cst = arith.constant dense<0.000000e+00> : vector<832x512xf32>
    %2 = tpu.matmul %0, %1, %cst {dimension_numbers = #tpu.dot_dimension_numbers<[1], [0], [0], [1], [0, 0, 1, 1], [], []>} : vector<832x128xbf16>, vector<128x512xbf16>, vector<832x512xf32> -> vector<832x512xf32>
    %c0_3 = arith.constant 0 : index
    %c0_4 = arith.constant 0 : index
    %3 = vector.load %arg3[%c0_3, %c0_4] : memref<1x512xf32, #tpu.memory_space<vmem>>, vector<1x512xf32>
    %4 = vector.broadcast %3 : vector<1x512xf32> to vector<832x512xf32>
    %5 = arith.addf %2, %4 : vector<832x512xf32>
    %cst_5 = arith.constant 0.000000e+00 : f32
    %6 = vector.broadcast %cst_5 : f32 to vector<832x512xf32>
    %7 = arith.maximumf %5, %6 : vector<832x512xf32>
    %8 = arith.truncf %7 : vector<832x512xf32> to vector<832x512xbf16>
    %cst_6 = arith.constant 0.000000e+00 : f32
    %9 = vector.broadcast %cst_6 : f32 to vector<320x384xf32>
    %10 = vector.extract_strided_slice %8 {offsets = [0, 0], sizes = [320, 512], strides = [1, 1]} : vector<832x512xbf16> to vector<320x512xbf16>
    %c0_7 = arith.constant 0 : index
    %c0_8 = arith.constant 0 : index
    %11 = vector.load %arg4[%c0_7, %c0_8] : memref<2048x384xbf16, #tpu.memory_space<vmem>>, vector<512x384xbf16>
    %cst_9 = arith.constant dense<0.000000e+00> : vector<320x384xf32>
    %12 = tpu.matmul %10, %11, %cst_9 {dimension_numbers = #tpu.dot_dimension_numbers<[1], [0], [0], [1], [0, 0, 1, 1], [], []>} : vector<320x512xbf16>, vector<512x384xbf16>, vector<320x384xf32> -> vector<320x384xf32>
    %13 = arith.addf %9, %12 : vector<320x384xf32>
    %14 = vector.extract_strided_slice %8 {offsets = [448, 0], sizes = [320, 512], strides = [1, 1]} : vector<832x512xbf16> to vector<320x512xbf16>
    %c512 = arith.constant 512 : index
    %c0_10 = arith.constant 0 : index
    %15 = vector.load %arg4[%c512, %c0_10] : memref<2048x384xbf16, #tpu.memory_space<vmem>>, vector<512x384xbf16>
    %cst_11 = arith.constant dense<0.000000e+00> : vector<320x384xf32>
    %16 = tpu.matmul %14, %15, %cst_11 {dimension_numbers = #tpu.dot_dimension_numbers<[1], [0], [0], [1], [0, 0, 1, 1], [], []>} : vector<320x512xbf16>, vector<512x384xbf16>, vector<320x384xf32> -> vector<320x384xf32>
    %17 = arith.addf %13, %16 : vector<320x384xf32>
    %18 = vector.extract_strided_slice %8 {offsets = [64, 0], sizes = [320, 512], strides = [1, 1]} : vector<832x512xbf16> to vector<320x512xbf16>
    %c1024 = arith.constant 1024 : index
    %c0_12 = arith.constant 0 : index
    %19 = vector.load %arg4[%c1024, %c0_12] : memref<2048x384xbf16, #tpu.memory_space<vmem>>, vector<512x384xbf16>
    %cst_13 = arith.constant dense<0.000000e+00> : vector<320x384xf32>
    %20 = tpu.matmul %18, %19, %cst_13 {dimension_numbers = #tpu.dot_dimension_numbers<[1], [0], [0], [1], [0, 0, 1, 1], [], []>} : vector<320x512xbf16>, vector<512x384xbf16>, vector<320x384xf32> -> vector<320x384xf32>
    %21 = arith.addf %17, %20 : vector<320x384xf32>
    %22 = vector.extract_strided_slice %8 {offsets = [512, 0], sizes = [320, 512], strides = [1, 1]} : vector<832x512xbf16> to vector<320x512xbf16>
    %c1536 = arith.constant 1536 : index
    %c0_14 = arith.constant 0 : index
    %23 = vector.load %arg4[%c1536, %c0_14] : memref<2048x384xbf16, #tpu.memory_space<vmem>>, vector<512x384xbf16>
    %cst_15 = arith.constant dense<0.000000e+00> : vector<320x384xf32>
    %24 = tpu.matmul %22, %23, %cst_15 {dimension_numbers = #tpu.dot_dimension_numbers<[1], [0], [0], [1], [0, 0, 1, 1], [], []>} : vector<320x512xbf16>, vector<512x384xbf16>, vector<320x384xf32> -> vector<320x384xf32>
    %25 = arith.addf %21, %24 : vector<320x384xf32>
    %c0_16 = arith.constant 0 : index
    %c0_17 = arith.constant 0 : index
    %26 = vector.load %arg5[%c0_16, %c0_17] : memref<1x384xf32, #tpu.memory_space<vmem>>, vector<1x384xf32>
    %27 = vector.broadcast %26 : vector<1x384xf32> to vector<320x384xf32>
    %28 = arith.addf %25, %27 : vector<320x384xf32>
    %cst_18 = arith.constant 0.000000e+00 : f32
    %29 = vector.broadcast %cst_18 : f32 to vector<320x384xf32>
    %30 = arith.maximumf %28, %29 : vector<320x384xf32>
    %31 = arith.truncf %30 : vector<320x384xf32> to vector<320x384xbf16>
    %cst_19 = arith.constant 0.000000e+00 : f32
    %32 = vector.broadcast %cst_19 : f32 to vector<64x128xf32>
    %33 = vector.extract_strided_slice %31 {offsets = [0, 0], sizes = [64, 384], strides = [1, 1]} : vector<320x384xbf16> to vector<64x384xbf16>
    %c0_20 = arith.constant 0 : index
    %c0_21 = arith.constant 0 : index
    %34 = vector.load %arg6[%c0_20, %c0_21] : memref<1920x128xbf16, #tpu.memory_space<vmem>>, vector<384x128xbf16>
    %cst_22 = arith.constant dense<0.000000e+00> : vector<64x128xf32>
    %35 = tpu.matmul %33, %34, %cst_22 {dimension_numbers = #tpu.dot_dimension_numbers<[1], [0], [0], [1], [0, 0, 1, 1], [], []>} : vector<64x384xbf16>, vector<384x128xbf16>, vector<64x128xf32> -> vector<64x128xf32>
    %36 = arith.addf %32, %35 : vector<64x128xf32>
    %37 = vector.extract_strided_slice %31 {offsets = [64, 0], sizes = [64, 384], strides = [1, 1]} : vector<320x384xbf16> to vector<64x384xbf16>
    %c384 = arith.constant 384 : index
    %c0_23 = arith.constant 0 : index
    %38 = vector.load %arg6[%c384, %c0_23] : memref<1920x128xbf16, #tpu.memory_space<vmem>>, vector<384x128xbf16>
    %cst_24 = arith.constant dense<0.000000e+00> : vector<64x128xf32>
    %39 = tpu.matmul %37, %38, %cst_24 {dimension_numbers = #tpu.dot_dimension_numbers<[1], [0], [0], [1], [0, 0, 1, 1], [], []>} : vector<64x384xbf16>, vector<384x128xbf16>, vector<64x128xf32> -> vector<64x128xf32>
    %40 = arith.addf %36, %39 : vector<64x128xf32>
    %41 = vector.extract_strided_slice %31 {offsets = [128, 0], sizes = [64, 384], strides = [1, 1]} : vector<320x384xbf16> to vector<64x384xbf16>
    %c768 = arith.constant 768 : index
    %c0_25 = arith.constant 0 : index
    %42 = vector.load %arg6[%c768, %c0_25] : memref<1920x128xbf16, #tpu.memory_space<vmem>>, vector<384x128xbf16>
    %cst_26 = arith.constant dense<0.000000e+00> : vector<64x128xf32>
    %43 = tpu.matmul %41, %42, %cst_26 {dimension_numbers = #tpu.dot_dimension_numbers<[1], [0], [0], [1], [0, 0, 1, 1], [], []>} : vector<64x384xbf16>, vector<384x128xbf16>, vector<64x128xf32> -> vector<64x128xf32>
    %44 = arith.addf %40, %43 : vector<64x128xf32>
    %45 = vector.extract_strided_slice %31 {offsets = [192, 0], sizes = [64, 384], strides = [1, 1]} : vector<320x384xbf16> to vector<64x384xbf16>
    %c1152 = arith.constant 1152 : index
    %c0_27 = arith.constant 0 : index
    %46 = vector.load %arg6[%c1152, %c0_27] : memref<1920x128xbf16, #tpu.memory_space<vmem>>, vector<384x128xbf16>
    %cst_28 = arith.constant dense<0.000000e+00> : vector<64x128xf32>
    %47 = tpu.matmul %45, %46, %cst_28 {dimension_numbers = #tpu.dot_dimension_numbers<[1], [0], [0], [1], [0, 0, 1, 1], [], []>} : vector<64x384xbf16>, vector<384x128xbf16>, vector<64x128xf32> -> vector<64x128xf32>
    %48 = arith.addf %44, %47 : vector<64x128xf32>
    %49 = vector.extract_strided_slice %31 {offsets = [256, 0], sizes = [64, 384], strides = [1, 1]} : vector<320x384xbf16> to vector<64x384xbf16>
    %c1536_29 = arith.constant 1536 : index
    %c0_30 = arith.constant 0 : index
    %50 = vector.load %arg6[%c1536_29, %c0_30] : memref<1920x128xbf16, #tpu.memory_space<vmem>>, vector<384x128xbf16>
    %cst_31 = arith.constant dense<0.000000e+00> : vector<64x128xf32>
    %51 = tpu.matmul %49, %50, %cst_31 {dimension_numbers = #tpu.dot_dimension_numbers<[1], [0], [0], [1], [0, 0, 1, 1], [], []>} : vector<64x384xbf16>, vector<384x128xbf16>, vector<64x128xf32> -> vector<64x128xf32>
    %52 = arith.addf %48, %51 : vector<64x128xf32>
    %c0_32 = arith.constant 0 : index
    %c0_33 = arith.constant 0 : index
    %53 = vector.load %arg7[%c0_32, %c0_33] : memref<1x128xf32, #tpu.memory_space<vmem>>, vector<1x128xf32>
    %54 = vector.broadcast %53 : vector<1x128xf32> to vector<64x128xf32>
    %55 = arith.addf %52, %54 : vector<64x128xf32>
    %cst_34 = arith.constant 0.000000e+00 : f32
    %56 = vector.broadcast %cst_34 : f32 to vector<64x128xf32>
    %57 = arith.maximumf %55, %56 : vector<64x128xf32>
    %c0_35 = arith.constant 0 : index
    %c0_36 = arith.constant 0 : index
    %58 = vector.load %arg8[%c0_35, %c0_36] : memref<128x128xf32, #tpu.memory_space<vmem>>, vector<128x128xf32>
    %cst_37 = arith.constant dense<0.000000e+00> : vector<64x128xf32>
    %59 = tpu.matmul %57, %58, %cst_37 {dimension_numbers = #tpu.dot_dimension_numbers<[1], [0], [0], [1], [0, 0, 1, 1], [], []>} : vector<64x128xf32>, vector<128x128xf32>, vector<64x128xf32> -> vector<64x128xf32>
    %c0_38 = arith.constant 0 : index
    %c0_39 = arith.constant 0 : index
    %60 = vector.load %arg9[%c0_38, %c0_39] : memref<1x128xf32, #tpu.memory_space<vmem>>, vector<1x128xf32>
    %61 = vector.broadcast %60 : vector<1x128xf32> to vector<64x128xf32>
    %62 = arith.addf %59, %61 : vector<64x128xf32>
    %cst_40 = arith.constant dense<0xFF800000> : vector<64xf32>
    %63 = vector.multi_reduction <maximumf>, %62, %cst_40 [1] : vector<64x128xf32> to vector<64xf32>
    %64 = vector.shape_cast %63 : vector<64xf32> to vector<64x1xf32>
    %65 = vector.broadcast %64 : vector<64x1xf32> to vector<64x128xf32>
    %66 = arith.subf %62, %65 : vector<64x128xf32>
    %67 = math.exp %66 : vector<64x128xf32>
    %cst_41 = arith.constant dense<0.000000e+00> : vector<64xf32>
    %68 = vector.multi_reduction <add>, %67, %cst_41 [1] : vector<64x128xf32> to vector<64xf32>
    %69 = vector.shape_cast %68 : vector<64xf32> to vector<64x1xf32>
    %70 = tpu.reciprocal %69 : vector<64x1xf32> -> vector<64x1xf32>
    %71 = vector.broadcast %70 : vector<64x1xf32> to vector<64x128xf32>
    %72 = arith.mulf %67, %71 : vector<64x128xf32>
    %c0_42 = arith.constant 0 : index
    %c0_43 = arith.constant 0 : index
    %73 = vector.load %arg10[%c0_42, %c0_43] : memref<64x128xf32, #tpu.memory_space<vmem>>, vector<64x128xf32>
    tpu.vector_store %arg10[%c0_42, %c0_43], %72 {strides = array<i32>} : memref<64x128xf32, #tpu.memory_space<vmem>>, vector<64x128xf32>,
    return
  }
  func.func @transform_0(%arg0: i32) -> (i32, i32) {
    %c0_i32 = arith.constant 0 : i32
    %c0_i32_0 = arith.constant 0 : i32
    return %arg0, %c0_i32 : i32, i32
  }
  func.func @transform_1(%arg0: i32) -> (i32, i32) {
    %c0_i32 = arith.constant 0 : i32
    %c0_i32_0 = arith.constant 0 : i32
    %c0_i32_1 = arith.constant 0 : i32
    return %c0_i32, %c0_i32_0 : i32, i32
  }
  func.func @transform_2(%arg0: i32) -> (i32, i32) {
    %c0_i32 = arith.constant 0 : i32
    %c0_i32_0 = arith.constant 0 : i32
    %c0_i32_1 = arith.constant 0 : i32
    return %c0_i32, %c0_i32_0 : i32, i32
  }
  func.func @transform_3(%arg0: i32) -> (i32, i32) {
    %c0_i32 = arith.constant 0 : i32
    %c0_i32_0 = arith.constant 0 : i32
    %c0_i32_1 = arith.constant 0 : i32
    return %c0_i32, %c0_i32_0 : i32, i32
  }
  func.func @transform_4(%arg0: i32) -> (i32, i32) {
    %c0_i32 = arith.constant 0 : i32
    %c0_i32_0 = arith.constant 0 : i32
    %c0_i32_1 = arith.constant 0 : i32
    return %c0_i32, %c0_i32_0 : i32, i32
  }
  func.func @transform_5(%arg0: i32) -> (i32, i32) {
    %c0_i32 = arith.constant 0 : i32
    %c0_i32_0 = arith.constant 0 : i32
    %c0_i32_1 = arith.constant 0 : i32
    return %c0_i32, %c0_i32_0 : i32, i32
  }
  func.func @transform_6(%arg0: i32) -> (i32, i32) {
    %c0_i32 = arith.constant 0 : i32
    %c0_i32_0 = arith.constant 0 : i32
    %c0_i32_1 = arith.constant 0 : i32
    return %c0_i32, %c0_i32_0 : i32, i32
  }
  func.func @transform_7(%arg0: i32) -> (i32, i32) {
    %c0_i32 = arith.constant 0 : i32
    %c0_i32_0 = arith.constant 0 : i32
    %c0_i32_1 = arith.constant 0 : i32
    return %c0_i32, %c0_i32_0 : i32, i32
  }
  func.func @transform_8(%arg0: i32) -> (i32, i32) {
    %c0_i32 = arith.constant 0 : i32
    %c0_i32_0 = arith.constant 0 : i32
    %c0_i32_1 = arith.constant 0 : i32
    return %c0_i32, %c0_i32_0 : i32, i32
  }
  func.func @transform_9(%arg0: i32) -> (i32, i32) {
    %c0_i32 = arith.constant 0 : i32
    %c0_i32_0 = arith.constant 0 : i32
    return %arg0, %c0_i32 : i32, i32
  }
}

</mosaic_0001>

<bundles_post_ra>
// kernel: net_forward.1
= control target key start
LH: loop header
LB: loop body
LE: loop exit
PB: predicated region body
PF: predicated region fallthrough
CT: control target
= control target key end

     0   :  { %v17671_v1 = vmov 0   ;;  %s17658_s1 = inlined_call_operand.vmem [shape: bf16[128,512], index: 1, kind: input, shape index: {}]   ;;  %s17659_s0 = inlined_call_operand.vmem [shape: bf16[832,128], index: 0, kind: input, shape index: {}]   ;;  %s17660_s3 = inlined_call_operand.vmem [shape: bf16[2048,384], index: 3, kind: input, shape index: {}]   ;;  %s17661_s2 = inlined_call_operand.vmem [shape: f32[1,512], index: 2, kind: input, shape index: {}]   ;;  %s17662_s5 = inlined_call_operand.vmem [shape: bf16[1920,128], index: 5, kind: input, shape index: {}]   ;;  %s17663_s4 = inlined_call_operand.vmem [shape: f32[1,384], index: 4, kind: input, shape index: {}]   ;;  %s17664_s7 = inlined_call_operand.vmem [shape: f32[128,128], index: 7, kind: input, shape index: {}]   ;;  %s17665_s6 = inlined_call_operand.vmem [shape: f32[1,128], index: 6, kind: input, shape index: {}]   ;;  %s17666_s8 = inlined_call_operand.vmem [shape: f32[1,128], index: 8, kind: input, shape index: {}]   ;;  %s17667_s9 = inlined_call_operand.vmem [shape: f32[64,128], index: 9, kind: output, shape index: {}]  }
   0x1   :  { %v11778_v0 = vld [vmem:[%s17658_s1 + $0xe4] ss:$16 sps:$4 sm:$0xff]   ;;  %695 = vmatprep.mubr.bf16.mxu0 %v17671_v1  ;;  %1232 = vmatprep.mubr.bf16.mxu1 %v17671_v1  ;;  %v11780_v2 = vld [vmem:[%s17658_s1 + $0xec] ss:$16 sps:$4 sm:$0xff]   ;;  %v11782_v3 = vld [vmem:[%s17658_s1 + $0xe0] ss:$16 sps:$4 sm:$0xff]  }
   0x2   :  { %663 = vmatprep.subr.bf16.mxu0 %v11778_v0  ;;  %v11783_v4 = vld [vmem:[%s17658_s1 + $0xe8] ss:$16 sps:$4 sm:$0xff]   ;;  %1200 = vmatprep.subr.bf16.mxu1 %v11780_v2  ;;  %v11784_v5 = vld [vmem:[%s17658_s1 + $0xc4] ss:$16 sps:$4 sm:$0xff]   ;;  %v11786_v6 = vld [vmem:[%s17658_s1 + $0xcc] ss:$16 sps:$4 sm:$0xff]  }
   0x3   :  { %664 = vmatpush1.bf16.msra.mxu0 %v11782_v3  ;;  %1201 = vmatpush1.bf16.msra.mxu1 %v11783_v4  ;;  %v11788_v7 = vld [vmem:[%s17658_s1 + $0xc0] ss:$16 sps:$4 sm:$0xff]   ;;  %v11789_v8 = vld [vmem:[%s17658_s1 + $0xc8] ss:$16 sps:$4 sm:$0xff]   ;;  %v11790_v9 = vld [vmem:[%s17658_s1 + $0xa4] ss:$16 sps:$4 sm:$0xff]  }
   0x4   :  { %665 = vmatprep.subr.bf16.mxu0 %v11784_v5  ;;  %1202 = vmatprep.subr.bf16.mxu1 %v11786_v6  ;;  %v11792_v10 = vld [vmem:[%s17658_s1 + $0xac] ss:$16 sps:$4 sm:$0xff]   ;;  %v11794_v11 = vld [vmem:[%s17658_s1 + $0xa0] ss:$16 sps:$4 sm:$0xff]   ;;  %v11795_v12 = vld [vmem:[%s17658_s1 + $0xa8] ss:$16 sps:$4 sm:$0xff]  }
   0x5   :  { %v11796_v13 = vld [vmem:[%s17658_s1 + $0x84] ss:$16 sps:$4 sm:$0xff]   ;;  %v11798_v14 = vld [vmem:[%s17658_s1 + $0x8c] ss:$16 sps:$4 sm:$0xff]   ;;  %v11800_v15 = vld [vmem:[%s17658_s1 + $0x80] ss:$16 sps:$4 sm:$0xff]  }
   0x6   :  { %v11801_v16 = vld [vmem:[%s17658_s1 + $0x88] ss:$16 sps:$4 sm:$0xff]   ;;  %v11802_v17 = vld [vmem:[%s17658_s1 + $0x64] ss:$16 sps:$4 sm:$0xff]   ;;  %v11804_v18 = vld [vmem:[%s17658_s1 + $0x6c] ss:$16 sps:$4 sm:$0xff]  }
   0x7   :  { %666 = vmatpush1.bf16.msra.mxu0 %v11788_v7  ;;  %1203 = vmatpush1.bf16.msra.mxu1 %v11789_v8  ;;  %v11806_v19 = vld [vmem:[%s17658_s1 + $0x60] ss:$16 sps:$4 sm:$0xff]   ;;  %v11807_v20 = vld [vmem:[%s17658_s1 + $0x68] ss:$16 sps:$4 sm:$0xff]   ;;  %v11808_v21 = vld [vmem:[%s17658_s1 + $0x44] ss:$16 sps:$4 sm:$0xff]  }
   0x8   :  { %667 = vmatprep.subr.bf16.mxu0 %v11790_v9  ;;  %1204 = vmatprep.subr.bf16.mxu1 %v11792_v10  ;;  %v11810_v22 = vld [vmem:[%s17658_s1 + $0x4c] ss:$16 sps:$4 sm:$0xff]   ;;  %v11812_v23 = vld [vmem:[%s17658_s1 + $0x40] ss:$16 sps:$4 sm:$0xff]   ;;  %v11813_v24 = vld [vmem:[%s17658_s1 + $0x48] ss:$16 sps:$4 sm:$0xff]  }
   0x9   :  { %v11814_v25 = vld [vmem:[%s17658_s1 + $0x24] ss:$16 sps:$4 sm:$0xff]   ;;  %v11816_v26 = vld [vmem:[%s17658_s1 + $0x2c] ss:$16 sps:$4 sm:$0xff]   ;;  %v11818_v27 = vld [vmem:[%s17658_s1 + $0x20] ss:$16 sps:$4 sm:$0xff]  }
   0xa   :  { %v11819_v28 = vld [vmem:[%s17658_s1 + $0x28] ss:$16 sps:$4 sm:$0xff]   ;;  %v11820_v29 = vld [vmem:[%s17658_s1 + $0x4] ss:$16 sps:$4 sm:$0xff]   ;;  %v11822_v30 = vld [vmem:[%s17658_s1 + $0xc] ss:$16 sps:$4 sm:$0xff]  }
   0xb   :  { %668 = vmatpush1.bf16.msra.mxu0 %v11794_v11  ;;  %1205 = vmatpush1.bf16.msra.mxu1 %v11795_v12  ;;  %v11824_v31 = vld [vmem:[%s17658_s1] ss:$16 sps:$4 sm:$0xff]   ;;  %v11825_v32 = vld [vmem:[%s17658_s1 + $0x8] ss:$16 sps:$4 sm:$0xff]  }
   0xc   :  { %669 = vmatprep.subr.bf16.mxu0 %v11796_v13  ;;  %1206 = vmatprep.subr.bf16.mxu1 %v11798_v14  ;;  %v11830_v33 = vld [vmem:[%s17660_s3 + $0x3ac] ss:$12 sps:$4 sm:$0xff]   ;;  %v11826_v35 = vld [vmem:[%s17659_s0] sm:$0xff]   ;;  %v11828_v36 = vld [vmem:[%s17660_s3 + $0x3a8] ss:$12 sps:$4 sm:$0xff]  }
   0xd   :  { %v11833_v34 = vld [vmem:[%s17660_s3 + $0x52c] ss:$12 sps:$4 sm:$0xff]   ;;  %v11831_v37 = vld [vmem:[%s17660_s3 + $0x528] ss:$12 sps:$4 sm:$0xff]   ;;  %v11837_v40 = vld [vmem:[%s17660_s3 + $0x390] ss:$12 sps:$4 sm:$0xff]  }
   0xe   :  { %v11839_v38 = vld [vmem:[%s17660_s3 + $0x394] ss:$12 sps:$4 sm:$0xff]   ;;  %v11840_v41 = vld [vmem:[%s17660_s3 + $0x510] ss:$12 sps:$4 sm:$0xff]   ;;  %v11827_v44 = vld [vmem:[%s17659_s0 + $0x8] sm:$0xff]  }
   0xf   :  { %670 = vmatpush1.bf16.msra.mxu0 %v11800_v15  ;;  %1207 = vmatpush1.bf16.msra.mxu1 %v11801_v16  ;;  %v11842_v39 = vld [vmem:[%s17660_s3 + $0x514] ss:$12 sps:$4 sm:$0xff]   ;;  %v11849_v42 = vld [vmem:[%s17660_s3 + $0x37c] ss:$12 sps:$4 sm:$0xff]   ;;  %v11847_v45 = vld [vmem:[%s17660_s3 + $0x378] ss:$12 sps:$4 sm:$0xff]  }
  0x10   :  { %671 = vmatprep.subr.bf16.mxu0 %v11802_v17  ;;  %1208 = vmatprep.subr.bf16.mxu1 %v11804_v18  ;;  %v11852_v43 = vld [vmem:[%s17660_s3 + $0x4fc] ss:$12 sps:$4 sm:$0xff]   ;;  %v11850_v46 = vld [vmem:[%s17660_s3 + $0x4f8] ss:$12 sps:$4 sm:$0xff]   ;;  %v11856_v49 = vld [vmem:[%s17660_s3 + $0x360] ss:$12 sps:$4 sm:$0xff]  }
  0x11   :  { %v11858_v47 = vld [vmem:[%s17660_s3 + $0x364] ss:$12 sps:$4 sm:$0xff]   ;;  %v11859_v50 = vld [vmem:[%s17660_s3 + $0x4e0] ss:$12 sps:$4 sm:$0xff]   ;;  %v11865_v53 = vld [vmem:[%s17660_s3 + $0x348] ss:$12 sps:$4 sm:$0xff]  }
  0x12   :  { %v11861_v48 = vld [vmem:[%s17660_s3 + $0x4e4] ss:$12 sps:$4 sm:$0xff]   ;;  %v11867_v52 = vld [vmem:[%s17660_s3 + $0x34c] ss:$12 sps:$4 sm:$0xff]   ;;  %v11868_v55 = vld [vmem:[%s17660_s3 + $0x4c8] ss:$12 sps:$4 sm:$0xff]  }
  0x13   :  { %672 = vmatpush1.bf16.msra.mxu0 %v11806_v19  ;;  %1209 = vmatpush1.bf16.msra.mxu1 %v11807_v20  ;;  %v11834_v51 = vld [vmem:[%s17659_s0 + $0x10] sm:$0xff]   ;;  %v11870_v54 = vld [vmem:[%s17660_s3 + $0x4cc] ss:$12 sps:$4 sm:$0xff]   ;;  %v11836_v61 = vld [vmem:[%s17659_s0 + $0x20] sm:$0xff]  }
  0x14   :  { %673 = vmatprep.subr.bf16.mxu0 %v11808_v21  ;;  %1210 = vmatprep.subr.bf16.mxu1 %v11810_v22  ;;  %v11835_v56 = vld [vmem:[%s17659_s0 + $0x18] sm:$0xff]   ;;  %v11876_v58 = vld [vmem:[%s17660_s3 + $0x334] ss:$12 sps:$4 sm:$0xff]   ;;  %v11843_v62 = vld [vmem:[%s17659_s0 + $0x28] sm:$0xff]  }
  0x15   :  { %v11874_v57 = vld [vmem:[%s17660_s3 + $0x330] ss:$12 sps:$4 sm:$0xff]   ;;  %v11879_v60 = vld [vmem:[%s17660_s3 + $0x4b4] ss:$12 sps:$4 sm:$0xff]   ;;  %v11884_v63 = vld [vmem:[%s17660_s3 + $0x318] ss:$12 sps:$4 sm:$0xff]  }
  0x16   :  { %v11877_v59 = vld [vmem:[%s17660_s3 + $0x4b0] ss:$12 sps:$4 sm:$0xff]   ;;  %v11887_v2 = vld [vmem:[%s17660_s3 + $0x498] ss:$12 sps:$4 sm:$0xff]   ;;  %v11853_v7 = vld [vmem:[%s17659_s0 + $0x48] sm:$0xff]  }
  0x17   :  { %674 = vmatpush1.bf16.msra.mxu0 %v11812_v23  ;;  %1211 = vmatpush1.bf16.msra.mxu1 %v11813_v24  ;;  %v11886_v0 = vld [vmem:[%s17660_s3 + $0x31c] ss:$12 sps:$4 sm:$0xff]   ;;  %v11844_v4 = vld [vmem:[%s17659_s0 + $0x30] sm:$0xff]   ;;  %v11846_v6 = vld [vmem:[%s17659_s0 + $0x40] sm:$0xff]  }
  0x18   :  { %675 = vmatprep.subr.bf16.mxu0 %v11814_v25  ;;  %1212 = vmatprep.subr.bf16.mxu1 %v11816_v26  ;;  %v11889_v3 = vld [vmem:[%s17660_s3 + $0x49c] ss:$12 sps:$4 sm:$0xff]   ;;  %v11893_v8 = vld [vmem:[%s17660_s3 + $0x300] ss:$12 sps:$4 sm:$0xff]   ;;  %v11895_v9 = vld [vmem:[%s17660_s3 + $0x304] ss:$12 sps:$4 sm:$0xff]  }
  0x19   :  { %v11845_v5 = vld [vmem:[%s17659_s0 + $0x38] sm:$0xff]   ;;  %v11898_v10 = vld [vmem:[%s17660_s3 + $0x484] ss:$12 sps:$4 sm:$0xff]   ;;  %v11896_v11 = vld [vmem:[%s17660_s3 + $0x480] ss:$12 sps:$4 sm:$0xff]  }
  0x1a   :  { %v11854_v12 = vld [vmem:[%s17659_s0 + $0x50] sm:$0xff]   ;;  %v11855_v13 = vld [vmem:[%s17659_s0 + $0x58] sm:$0xff]   ;;  %v11862_v14 = vld [vmem:[%s17659_s0 + $0x60] sm:$0xff]  }
  0x1b   :  { %676 = vmatpush1.bf16.msra.mxu0 %v11818_v27  ;;  %1213 = vmatpush1.bf16.msra.mxu1 %v11819_v28  ;;  %v11902_v15 = vld [vmem:[%s17660_s3 + $0x468] ss:$12 sps:$4 sm:$0xff]   ;;  %v11904_v16 = vld [vmem:[%s17660_s3 + $0x46c] ss:$12 sps:$4 sm:$0xff]   ;;  %v11872_v22 = vld [vmem:[%s17659_s0 + $0x80] sm:$0xff]  }
  0x1c   :  { %677 = vmatprep.subr.bf16.mxu0 %v11820_v29  ;;  %1214 = vmatprep.subr.bf16.mxu1 %v11822_v30  ;;  %v11905_v17 = vld [vmem:[%s17660_s3 + $0x5e8] ss:$12 sps:$4 sm:$0xff]   ;;  %v11907_v19 = vld [vmem:[%s17660_s3 + $0x5ec] ss:$12 sps:$4 sm:$0xff]   ;;  %v11911_v23 = vld [vmem:[%s17660_s3 + $0x450] ss:$12 sps:$4 sm:$0xff]  }
  0x1d   :  { %v11863_v18 = vld [vmem:[%s17659_s0 + $0x68] sm:$0xff]   ;;  %v11864_v20 = vld [vmem:[%s17659_s0 + $0x70] sm:$0xff]   ;;  %v11871_v21 = vld [vmem:[%s17659_s0 + $0x78] sm:$0xff]  }
  0x1e   :  { %v11913_v24 = vld [vmem:[%s17660_s3 + $0x454] ss:$12 sps:$4 sm:$0xff]   ;;  %v11914_v25 = vld [vmem:[%s17660_s3 + $0x5d0] ss:$12 sps:$4 sm:$0xff]   ;;  %v11873_v27 = vld [vmem:[%s17659_s0 + $0x88] sm:$0xff]  }
  0x1f   :  { %678 = vmatpush1.bf16.msra.mxu0 %v11824_v31  ;;  %1215 = vmatpush1.bf16.msra.mxu1 %v11825_v32  ;;  %v11916_v26 = vld [vmem:[%s17660_s3 + $0x5d4] ss:$12 sps:$4 sm:$0xff]   ;;  %v11881_v29 = vld [vmem:[%s17659_s0 + $0x98] sm:$0xff]  }
  0x20   :  { %3081 = vmatprep.subr.bf16.mxu0 %v11830_v33  ;;  %3314 = vmatprep.subr.bf16.mxu1 %v11833_v34  ;;  %v11880_v28 = vld [vmem:[%s17659_s0 + $0x90] sm:$0xff]   ;;  %v11921_v30 = vld [vmem:[%s17660_s3 + $0x438] ss:$12 sps:$4 sm:$0xff]   ;;  %v11923_v31 = vld [vmem:[%s17660_s3 + $0x43c] ss:$12 sps:$4 sm:$0xff]  }
  0x21   :  { %v11924_v32 = vld [vmem:[%s17660_s3 + $0x5b8] ss:$12 sps:$4 sm:$0xff]   ;;  %v11926_v33 = vld [vmem:[%s17660_s3 + $0x5bc] ss:$12 sps:$4 sm:$0xff]  }
  0x22   :  { %696 = vmatmul.mubr.bf16.vlgmr.msra.gmra.mxu0 %v11826_v35  ;;  %1233 = vmatmul.mubr.bf16.vlgmr.msra.gmra.mxu1 %v11826_v35  ;;  %v11882_v34 = vld [vmem:[%s17659_s0 + $0xa0] sm:$0xff]   ;;  %v11883_v35 = vld [vmem:[%s17659_s0 + $0xa8] sm:$0xff]  }
  0x23   :  { %705 = vmatprep.mubr.bf16.mxu0 %v17671_v1  ;;  %1242 = vmatprep.mubr.bf16.mxu1 %v17671_v1 }
  0x24   :  { %3082 = vmatpush1.bf16.msra.mxu0 %v11828_v36  ;;  %3315 = vmatpush1.bf16.msra.mxu1 %v11831_v37  ;;  %v11890_v36 = vld [vmem:[%s17659_s0 + $0xb0] sm:$0xff]   ;;  %v11930_v37 = vld [vmem:[%s17660_s3 + $0x420] ss:$12 sps:$4 sm:$0xff]  }
  0x25   :  { %3083 = vmatprep.subr.bf16.mxu0 %v11839_v38  ;;  %3316 = vmatprep.subr.bf16.mxu1 %v11842_v39  ;;  %v11932_v38 = vld [vmem:[%s17660_s3 + $0x424] ss:$12 sps:$4 sm:$0xff]  }
  0x26   :  { %v11935_v39 = vld [vmem:[%s17660_s3 + $0x5a4] ss:$12 sps:$4 sm:$0xff]  }
  0x28   :  { %3084 = vmatpush1.bf16.msra.mxu0 %v11837_v40  ;;  %3317 = vmatpush1.bf16.msra.mxu1 %v11840_v41  ;;  %v11933_v40 = vld [vmem:[%s17660_s3 + $0x5a0] ss:$12 sps:$4 sm:$0xff]   ;;  %v11891_v41 = vld [vmem:[%s17659_s0 + $0xb8] sm:$0xff]  }
  0x29   :  { %3085 = vmatprep.subr.bf16.mxu0 %v11849_v42  ;;  %3318 = vmatprep.subr.bf16.mxu1 %v11852_v43  ;;  %v171_v42 = vlaneseq }
  0x2a   :  { %706 = vmatmul.mubr.bf16.gmra.mxu0 %v11827_v44  ;;  %1243 = vmatmul.mubr.bf16.gmra.mxu1 %v11827_v44  ;;  %v169_v44 = vld [vmem:[%s17661_s2] sm:$0xf] }
  0x2b   :  { %715 = vmatprep.mubr.bf16.mxu0 %v17671_v1  ;;  %1252 = vmatprep.mubr.bf16.mxu1 %v17671_v1  ;;  %v12954_v43 = vshrl.u32 %v171_v42, 7 }
  0x2c   :  { %3086 = vmatpush1.bf16.msra.mxu0 %v11847_v45  ;;  %3319 = vmatpush1.bf16.msra.mxu1 %v11850_v46  ;;  %v11892_v46 = vld [vmem:[%s17659_s0 + $0xc0] sm:$0xff]  }
  0x2d   :  { %3087 = vmatprep.subr.bf16.mxu0 %v11858_v47  ;;  %3320 = vmatprep.subr.bf16.mxu1 %v11861_v48  ;;  %17919 = vst [vmem:[#allocation2_spill] sm:$0xff] %v12954_v43  ;;  %v17670_v45 = vsub.s32 0, %v12954_v43  ;;  %v17668_v47 = vsub.s32 2, %v12954_v43  ;;  %v17669_v48 = vsub.s32 1, %v12954_v43 }
  0x30   :  { %3088 = vmatpush1.bf16.msra.mxu0 %v11856_v49  ;;  %3321 = vmatpush1.bf16.msra.mxu1 %v11859_v50  ;;  %v185_v49 = vsub.s32 3, %v12954_v43  ;;  %v12970_v50 = vrot.slane %v169_v44, %v17670_v45 }
  0x31   :  { %3089 = vmatprep.subr.bf16.mxu0 %v11867_v52  ;;  %3322 = vmatprep.subr.bf16.mxu1 %v11870_v54  ;;  %v12978_v54 = vrot.slane %v169_v44, %v17669_v48 }
  0x32   :  { %716 = vmatmul.mubr.bf16.gmra.mxu0 %v11834_v51  ;;  %1253 = vmatmul.mubr.bf16.gmra.mxu1 %v11834_v51  ;;  %v12974_v51 = vrot.slane %v169_v44, %v17668_v47 }
  0x33   :  { %725 = vmatprep.mubr.bf16.mxu0 %v17671_v1  ;;  %1262 = vmatprep.mubr.bf16.mxu1 %v17671_v1 }
  0x34   :  { %3090 = vmatpush1.bf16.msra.mxu0 %v11865_v53  ;;  %3323 = vmatpush1.bf16.msra.mxu1 %v11868_v55  ;;  %v12980_v55 = vrot.slane %v169_v44, %v185_v49 }
  0x35   :  { %3091 = vmatprep.subr.bf16.mxu0 %v11876_v58  ;;  %3324 = vmatprep.subr.bf16.mxu1 %v11879_v60  ;;  %v11899_v60 = vld [vmem:[%s17659_s0 + $0xc8] sm:$0xff]  }
  0x38   :  { %3092 = vmatpush1.bf16.msra.mxu0 %v11874_v57  ;;  %3325 = vmatpush1.bf16.msra.mxu1 %v11877_v59 }
  0x39   :  { %3093 = vmatprep.subr.bf16.mxu0 %v11886_v0  ;;  %3326 = vmatprep.subr.bf16.mxu1 %v11889_v3 }
  0x3a   :  { %726 = vmatmul.mubr.bf16.gmra.mxu0 %v11835_v56  ;;  %1263 = vmatmul.mubr.bf16.gmra.mxu1 %v11835_v56 }
  0x3b   :  { %735 = vmatprep.mubr.bf16.mxu0 %v17671_v1  ;;  %1272 = vmatprep.mubr.bf16.mxu1 %v17671_v1 }
  0x3c   :  { %3094 = vmatpush1.bf16.msra.mxu0 %v11884_v63  ;;  %3327 = vmatpush1.bf16.msra.mxu1 %v11887_v2 }
  0x3d   :  { %3095 = vmatprep.subr.bf16.mxu0 %v11895_v9  ;;  %3328 = vmatprep.subr.bf16.mxu1 %v11898_v10 }
  0x40   :  { %3096 = vmatpush1.bf16.msra.mxu0 %v11893_v8  ;;  %3329 = vmatpush1.bf16.msra.mxu1 %v11896_v11 }
  0x41   :  { %3097 = vmatprep.subr.bf16.mxu0 %v11904_v16  ;;  %3330 = vmatprep.subr.bf16.mxu1 %v11907_v19 }
  0x42   :  { %736 = vmatmul.mubr.bf16.gmra.mxu0 %v11836_v61  ;;  %1273 = vmatmul.mubr.bf16.gmra.mxu1 %v11836_v61 }
  0x43   :  { %745 = vmatprep.mubr.bf16.mxu0 %v17671_v1  ;;  %1282 = vmatprep.mubr.bf16.mxu1 %v17671_v1 }
  0x44   :  { %3098 = vmatpush2.bf16.msra.mxu0 %v11902_v15  ;;  %3331 = vmatpush2.bf16.msra.mxu1 %v11905_v17 }
  0x45   :  { %3099 = vmatprep.subr.bf16.mxu0 %v11913_v24  ;;  %3332 = vmatprep.subr.bf16.mxu1 %v11916_v26  ;;  %v11900_v26 = vld [vmem:[%s17659_s0 + $0xd0] sm:$0xff]  }
  0x48   :  { %3100 = vmatpush2.bf16.msra.mxu0 %v11911_v23  ;;  %3333 = vmatpush2.bf16.msra.mxu1 %v11914_v25 }
  0x49   :  { %3101 = vmatprep.subr.bf16.mxu0 %v11923_v31  ;;  %3334 = vmatprep.subr.bf16.mxu1 %v11926_v33 }
  0x4a   :  { %746 = vmatmul.mubr.bf16.gmra.mxu0 %v11843_v62  ;;  %1283 = vmatmul.mubr.bf16.gmra.mxu1 %v11843_v62 }
  0x4b   :  { %755 = vmatprep.mubr.bf16.mxu0 %v17671_v1  ;;  %1292 = vmatprep.mubr.bf16.mxu1 %v17671_v1 }
  0x4c   :  { %3102 = vmatpush2.bf16.msra.mxu0 %v11921_v30  ;;  %3335 = vmatpush2.bf16.msra.mxu1 %v11924_v32 }
  0x4d   :  { %3103 = vmatprep.subr.bf16.mxu0 %v11932_v38  ;;  %3336 = vmatprep.subr.bf16.mxu1 %v11935_v39 }
  0x50   :  { %3104 = vmatpush2.bf16.msra.mxu0 %v11930_v37  ;;  %3337 = vmatpush2.bf16.msra.mxu1 %v11933_v40 }
  0x52   :  { %756 = vmatmul.mubr.bf16.gmra.mxu0 %v11844_v4  ;;  %1293 = vmatmul.mubr.bf16.gmra.mxu1 %v11844_v4 }
  0x53   :  { %765 = vmatprep.mubr.bf16.mxu0 %v17671_v1  ;;  %1302 = vmatprep.mubr.bf16.mxu1 %v17671_v1 }
  0x5a   :  { %766 = vmatmul.mubr.bf16.gmra.mxu0 %v11845_v5  ;;  %1303 = vmatmul.mubr.bf16.gmra.mxu1 %v11845_v5 }
  0x5b   :  { %775 = vmatprep.mubr.bf16.mxu0 %v17671_v1  ;;  %1312 = vmatprep.mubr.bf16.mxu1 %v17671_v1 }
  0x62   :  { %776 = vmatmul.mubr.bf16.gmra.mxu0 %v11846_v6  ;;  %1313 = vmatmul.mubr.bf16.gmra.mxu1 %v11846_v6 }
  0x63   :  { %785 = vmatprep.mubr.bf16.mxu0 %v17671_v1  ;;  %1322 = vmatprep.mubr.bf16.mxu1 %v17671_v1 }
  0x6a   :  { %786 = vmatmul.mubr.bf16.gmra.mxu0 %v11853_v7  ;;  %1323 = vmatmul.mubr.bf16.gmra.mxu1 %v11853_v7 }
  0x6b   :  { %795 = vmatprep.mubr.bf16.mxu0 %v17671_v1  ;;  %1332 = vmatprep.mubr.bf16.mxu1 %v17671_v1 }
  0x72   :  { %796 = vmatmul.mubr.bf16.gmra.mxu0 %v11854_v12  ;;  %1333 = vmatmul.mubr.bf16.gmra.mxu1 %v11854_v12 }
  0x73   :  { %805 = vmatprep.mubr.bf16.mxu0 %v17671_v1  ;;  %1342 = vmatprep.mubr.bf16.mxu1 %v17671_v1 }
  0x7a   :  { %806 = vmatmul.mubr.bf16.gmra.mxu0 %v11855_v13  ;;  %1343 = vmatmul.mubr.bf16.gmra.mxu1 %v11855_v13 }
  0x7b   :  { %815 = vmatprep.mubr.bf16.mxu0 %v17671_v1  ;;  %1352 = vmatprep.mubr.bf16.mxu1 %v17671_v1 }
  0x82   :  { %816 = vmatmul.mubr.bf16.gmra.mxu0 %v11862_v14  ;;  %1353 = vmatmul.mubr.bf16.gmra.mxu1 %v11862_v14 }
  0x83   :  { %825 = vmatprep.mubr.bf16.mxu0 %v17671_v1  ;;  %1362 = vmatprep.mubr.bf16.mxu1 %v17671_v1 }
  0x8a   :  { %826 = vmatmul.mubr.bf16.gmra.mxu0 %v11863_v18  ;;  %1363 = vmatmul.mubr.bf16.gmra.mxu1 %v11863_v18 }
  0x8b   :  { %835 = vmatprep.mubr.bf16.mxu0 %v17671_v1  ;;  %1372 = vmatprep.mubr.bf16.mxu1 %v17671_v1 }
  0x92   :  { %836 = vmatmul.mubr.bf16.gmra.mxu0 %v11864_v20  ;;  %1373 = vmatmul.mubr.bf16.gmra.mxu1 %v11864_v20  ;;  %v11939_v20 = vld [vmem:[%s17660_s3 + $0x408] ss:$12 sps:$4 sm:$0xff]  }
  0x93   :  { %845 = vmatprep.mubr.bf16.mxu0 %v17671_v1  ;;  %1382 = vmatprep.mubr.bf16.mxu1 %v17671_v1 }
  0x9a   :  { %846 = vmatmul.mubr.bf16.gmra.mxu0 %v11871_v21  ;;  %1383 = vmatmul.mubr.bf16.gmra.mxu1 %v11871_v21  ;;  %v11941_v21 = vld [vmem:[%s17660_s3 + $0x40c] ss:$12 sps:$4 sm:$0xff]  }
  0x9b   :  { %855 = vmatprep.mubr.bf16.mxu0 %v17671_v1  ;;  %1392 = vmatprep.mubr.bf16.mxu1 %v17671_v1 }
  0x9c   :  { %3105 = vmatprep.subr.bf16.mxu0 %v11941_v21 }
  0x9d   :  { %3106 = vmatpush2.bf16.msra.mxu0 %v11939_v20 }
  0xa2   :  { %856 = vmatmul.mubr.bf16.gmra.mxu0 %v11872_v22  ;;  %1393 = vmatmul.mubr.bf16.gmra.mxu1 %v11872_v22 }
  0xa3   :  { %865 = vmatprep.mubr.bf16.mxu0 %v17671_v1  ;;  %1402 = vmatprep.mubr.bf16.mxu1 %v17671_v1 }
  0xaa   :  { %866 = vmatmul.mubr.bf16.gmra.mxu0 %v11873_v27  ;;  %1403 = vmatmul.mubr.bf16.gmra.mxu1 %v11873_v27  ;;  %v11942_v27 = vld [vmem:[%s17660_s3 + $0x588] ss:$12 sps:$4 sm:$0xff]  }
  0xab   :  { %875 = vmatprep.mubr.bf16.mxu0 %v17671_v1  ;;  %1412 = vmatprep.mubr.bf16.mxu1 %v17671_v1 }
  0xb2   :  { %876 = vmatmul.mubr.bf16.gmra.mxu0 %v11880_v28  ;;  %1413 = vmatmul.mubr.bf16.gmra.mxu1 %v11880_v28  ;;  %v11944_v28 = vld [vmem:[%s17660_s3 + $0x58c] ss:$12 sps:$4 sm:$0xff]  }
  0xb3   :  { %885 = vmatprep.mubr.bf16.mxu0 %v17671_v1  ;;  %1422 = vmatprep.mubr.bf16.mxu1 %v17671_v1 }
  0xb4   :  { %3338 = vmatprep.subr.bf16.mxu1 %v11944_v28 }
  0xb5   :  { %3339 = vmatpush2.bf16.msra.mxu1 %v11942_v27 }
  0xba   :  { %886 = vmatmul.mubr.bf16.gmra.mxu0 %v11881_v29  ;;  %1423 = vmatmul.mubr.bf16.gmra.mxu1 %v11881_v29 }
  0xbb   :  { %895 = vmatprep.mubr.bf16.mxu0 %v17671_v1  ;;  %1432 = vmatprep.mubr.bf16.mxu1 %v17671_v1 }
  0xc2   :  { %896 = vmatmul.mubr.bf16.gmra.mxu0 %v11882_v34  ;;  %1433 = vmatmul.mubr.bf16.gmra.mxu1 %v11882_v34 }
  0xc3   :  { %905 = vmatprep.mubr.bf16.mxu0 %v17671_v1  ;;  %1442 = vmatprep.mubr.bf16.mxu1 %v17671_v1 }
  0xca   :  { %906 = vmatmul.mubr.bf16.gmra.mxu0 %v11883_v35  ;;  %1443 = vmatmul.mubr.bf16.gmra.mxu1 %v11883_v35 }
  0xcb   :  { %915 = vmatprep.mubr.bf16.mxu0 %v17671_v1  ;;  %1452 = vmatprep.mubr.bf16.mxu1 %v17671_v1 }
  0xd2   :  { %916 = vmatmul.mubr.bf16.gmra.mxu0 %v11890_v36  ;;  %1453 = vmatmul.mubr.bf16.gmra.mxu1 %v11890_v36 }
  0xd3   :  { %925 = vmatprep.mubr.bf16.mxu0 %v17671_v1  ;;  %1462 = vmatprep.mubr.bf16.mxu1 %v17671_v1 }
  0xda   :  { %926 = vmatmul.mubr.bf16.gmra.mxu0 %v11891_v41  ;;  %1463 = vmatmul.mubr.bf16.gmra.mxu1 %v11891_v41 }
  0xdb   :  { %935 = vmatprep.mubr.bf16.mxu0 %v17671_v1  ;;  %1472 = vmatprep.mubr.bf16.mxu1 %v17671_v1 }
  0xe2   :  { %v697_v52 = vpop.f32.mrf.mxu0  ;;  %936 = vmatmul.mubr.bf16.gmra.mxu0 %v11892_v46  ;;  %v1234_v53 = vpop.f32.mrf.mxu1  ;;  %1473 = vmatmul.mubr.bf16.gmra.mxu1 %v11892_v46 }
  0xe3   :  { %941 = vmatprep.mubr.bf16.mxu0 %v17671_v1  ;;  %1478 = vmatprep.mubr.bf16.mxu1 %v17671_v1  ;;  %v698_v56 = vadd.f32 %v697_v52, %v12970_v50  ;;  %v1235_v57 = vadd.f32 %v1234_v53, %v12974_v51 }
  0xe4   :  { %v699_v58 = vpop.f32.mrf.mxu0  ;;  %v1236_v59 = vpop.f32.mrf.mxu1 }
  0xe5   :  { %v700_v61 = vadd.f32 %v699_v58, %v12978_v54  ;;  %v1237_v62 = vadd.f32 %v1236_v59, %v12980_v55  ;;  %v1737_v4 = vmax.f32 %v698_v56, 0.0  ;;  %v1739_v5 = vmax.f32 %v1235_v57, 0.0 }
  0xe6   :  { %v701_v63 = vpop.f32.mrf.mxu0  ;;  %v1238_v0 = vpop.f32.mrf.mxu1 }
  0xe7   :  { %v702_v2 = vadd.f32 %v701_v63, %v12970_v50  ;;  %v1239_v3 = vadd.f32 %v1238_v0, %v12974_v51  ;;  %v1738_v12 = vmax.f32 %v700_v61, 0.0  ;;  %v1740_v13 = vmax.f32 %v1237_v62, 0.0 }
  0xe8   :  { %v703_v6 = vpop.f32.mrf.mxu0  ;;  %v1240_v7 = vpop.f32.mrf.mxu1 }
  0xe9   :  { %v1741_v8 = vmax.f32 %v702_v2, 0.0  ;;  %v1743_v9 = vmax.f32 %v1239_v3, 0.0  ;;  %v704_v10 = vadd.f32 %v703_v6, %v12978_v54  ;;  %v1241_v11 = vadd.f32 %v1240_v7, %v12980_v55  ;;  %v11901_v2 = vld [vmem:[%s17659_s0 + $0xd8] sm:$0xff]  }
  0xea   :  { %v707_v14 = vpop.f32.mrf.mxu0  ;;  %942 = vmatmul.mubr.bf16.gmra.mxu0 %v11899_v60  ;;  %v1244_v15 = vpop.f32.mrf.mxu1  ;;  %1479 = vmatmul.mubr.bf16.gmra.mxu1 %v11899_v60 }
  0xeb   :  { %v12995_v16 = vpack.c.bf16 %v1741_v8, %v1737_v4  ;;  %v12997_v17 = vpack.c.bf16 %v1743_v9, %v1739_v5  ;;  %v1742_v18 = vmax.f32 %v704_v10, 0.0  ;;  %v1744_v19 = vmax.f32 %v1241_v11, 0.0  ;;  %947 = vmatprep.mubr.bf16.mxu0 %v17671_v1  ;;  %1484 = vmatprep.mubr.bf16.mxu1 %v17671_v1 }
  0xec   :  { %v708_v22 = vadd.f32 %v707_v14, %v12970_v50  ;;  %v1245_v23 = vadd.f32 %v1244_v15, %v12974_v51  ;;  %v709_v24 = vpop.f32.mrf.mxu0  ;;  %v1246_v25 = vpop.f32.mrf.mxu1 }
  0xed   :  { %17920 = vst [vmem:[#allocation3_spill] sm:$0xff] %v12995_v16  ;;  %17921 = vst [vmem:[#allocation4_spill] sm:$0xff] %v12997_v17  ;;  %v710_v29 = vadd.f32 %v709_v24, %v12978_v54  ;;  %v1247_v30 = vadd.f32 %v1246_v25, %v12980_v55  ;;  %v13020_v31 = vpack.c.bf16 %v1742_v18, %v1738_v12  ;;  %v12011_v17 = vld [vmem:[%s17660_s3 + $0x22c] ss:$12 sps:$4 sm:$0xff]  }
  0xee   :  { %v13022_v32 = vpack.c.bf16 %v1744_v19, %v1740_v13  ;;  %v1745_v33 = vmax.f32 %v708_v22, 0.0  ;;  %v1747_v34 = vmax.f32 %v1245_v23, 0.0  ;;  %v711_v35 = vpop.f32.mrf.mxu0  ;;  %v1248_v36 = vpop.f32.mrf.mxu1 }
  0xef   :  { %17922 = vst [vmem:[#allocation5_spill] sm:$0xff] %v13020_v31  ;;  %v1746_v37 = vmax.f32 %v710_v29, 0.0  ;;  %v1748_v38 = vmax.f32 %v1247_v30, 0.0  ;;  %v712_v39 = vadd.f32 %v711_v35, %v12970_v50  ;;  %v1249_v40 = vadd.f32 %v1248_v36, %v12974_v51  ;;  %v11908_v35 = vld [vmem:[%s17659_s0 + $0xe0] sm:$0xff]  }
  0xf0   :  { %17923 = vst [vmem:[#allocation6_spill] sm:$0xff] %v13022_v32  ;;  %v713_v41 = vpop.f32.mrf.mxu0  ;;  %v1250_v42 = vpop.f32.mrf.mxu1 }
  0xf1   :  { %v1749_v44 = vmax.f32 %v712_v39, 0.0  ;;  %v1751_v46 = vmax.f32 %v1249_v40, 0.0  ;;  %v714_v49 = vadd.f32 %v713_v41, %v12978_v54  ;;  %v1251_v52 = vadd.f32 %v1250_v42, %v12980_v55 }
  0xf2   :  { %v717_v53 = vpop.f32.mrf.mxu0  ;;  %948 = vmatmul.mubr.bf16.gmra.mxu0 %v11900_v26  ;;  %v1254_v56 = vpop.f32.mrf.mxu1  ;;  %1485 = vmatmul.mubr.bf16.gmra.mxu1 %v11900_v26 }
  0xf3   :  { %v13028_v57 = vpack.c.bf16 %v1749_v44, %v1745_v33  ;;  %v13030_v58 = vpack.c.bf16 %v1751_v46, %v1747_v34  ;;  %v1750_v59 = vmax.f32 %v714_v49, 0.0  ;;  %v1752_v60 = vmax.f32 %v1251_v52, 0.0  ;;  %953 = vmatprep.mubr.bf16.mxu0 %v17671_v1  ;;  %1490 = vmatprep.mubr.bf16.mxu1 %v17671_v1 }
  0xf4   :  { %v718_v61 = vadd.f32 %v717_v53, %v12970_v50  ;;  %v1255_v62 = vadd.f32 %v1254_v56, %v12974_v51  ;;  %v719_v63 = vpop.f32.mrf.mxu0  ;;  %v1256_v0 = vpop.f32.mrf.mxu1 }
  0xf5   :  { %17924 = vst [vmem:[#allocation7_spill] sm:$0xff] %v13028_v57  ;;  %17925 = vst [vmem:[#allocation8_spill] sm:$0xff] %v13030_v58  ;;  %v720_v3 = vadd.f32 %v719_v63, %v12978_v54  ;;  %v1257_v4 = vadd.f32 %v1256_v0, %v12980_v55  ;;  %v13041_v5 = vpack.c.bf16 %v1750_v59, %v1746_v37 }
  0xf6   :  { %v13043_v6 = vpack.c.bf16 %v1752_v60, %v1748_v38  ;;  %v1753_v7 = vmax.f32 %v718_v61, 0.0  ;;  %v1755_v8 = vmax.f32 %v1255_v62, 0.0  ;;  %v721_v9 = vpop.f32.mrf.mxu0  ;;  %v1258_v10 = vpop.f32.mrf.mxu1 }
  0xf7   :  { %17926 = vst [vmem:[#allocation9_spill] sm:$0xff] %v13041_v5  ;;  %v1754_v11 = vmax.f32 %v720_v3, 0.0  ;;  %v1756_v12 = vmax.f32 %v1257_v4, 0.0  ;;  %v722_v13 = vadd.f32 %v721_v9, %v12970_v50  ;;  %v1259_v14 = vadd.f32 %v1258_v10, %v12974_v51 }
  0xf8   :  { %17927 = vst [vmem:[#allocation10_spill] sm:$0xff] %v13043_v6  ;;  %v723_v15 = vpop.f32.mrf.mxu0  ;;  %v1260_v18 = vpop.f32.mrf.mxu1 }
  0xf9   :  { %v1757_v19 = vmax.f32 %v722_v13, 0.0  ;;  %v1759_v20 = vmax.f32 %v1259_v14, 0.0  ;;  %v724_v21 = vadd.f32 %v723_v15, %v12978_v54  ;;  %v1261_v22 = vadd.f32 %v1260_v18, %v12980_v55  ;;  %v11948_v13 = vld [vmem:[%s17660_s3 + $0x3f0] ss:$12 sps:$4 sm:$0xff]   ;;  %v11950_v14 = vld [vmem:[%s17660_s3 + $0x3f4] ss:$12 sps:$4 sm:$0xff]  }
  0xfa   :  { %v727_v23 = vpop.f32.mrf.mxu0  ;;  %954 = vmatmul.mubr.bf16.gmra.mxu0 %v11901_v2  ;;  %v1264_v24 = vpop.f32.mrf.mxu1  ;;  %1491 = vmatmul.mubr.bf16.gmra.mxu1 %v11901_v2  ;;  %v11951_v15 = vld [vmem:[%s17660_s3 + $0x570] ss:$12 sps:$4 sm:$0xff]  }
  0xfb   :  { %v13049_v25 = vpack.c.bf16 %v1757_v19, %v1753_v7  ;;  %v13051_v26 = vpack.c.bf16 %v1759_v20, %v1755_v8  ;;  %v1758_v27 = vmax.f32 %v724_v21, 0.0  ;;  %v1760_v28 = vmax.f32 %v1261_v22, 0.0  ;;  %959 = vmatprep.mubr.bf16.mxu0 %v17671_v1  ;;  %1496 = vmatprep.mubr.bf16.mxu1 %v17671_v1 }
  0xfc   :  { %v728_v29 = vadd.f32 %v727_v23, %v12970_v50  ;;  %v1265_v30 = vadd.f32 %v1264_v24, %v12974_v51  ;;  %v729_v33 = vpop.f32.mrf.mxu0  ;;  %v1266_v34 = vpop.f32.mrf.mxu1  ;;  %v11909_v24 = vld [vmem:[%s17659_s0 + $0xe8] sm:$0xff]   ;;  %3107 = vmatprep.subr.bf16.mxu0 %v11950_v14 }
  0xfd   :  { %17928 = vst [vmem:[#allocation11_spill] sm:$0xff] %v13049_v25  ;;  %17929 = vst [vmem:[#allocation12_spill] sm:$0xff] %v13051_v26  ;;  %v730_v36 = vadd.f32 %v729_v33, %v12978_v54  ;;  %v1267_v37 = vadd.f32 %v1266_v34, %v12980_v55  ;;  %v13062_v38 = vpack.c.bf16 %v1758_v27, %v1754_v11  ;;  %v11953_v27 = vld [vmem:[%s17660_s3 + $0x574] ss:$12 sps:$4 sm:$0xff]   ;;  %3108 = vmatpush2.bf16.msra.mxu0 %v11948_v13 }
  0xfe   :  { %v13064_v39 = vpack.c.bf16 %v1760_v28, %v1756_v12  ;;  %v1761_v40 = vmax.f32 %v728_v29, 0.0  ;;  %v1763_v41 = vmax.f32 %v1265_v30, 0.0  ;;  %v731_v42 = vpop.f32.mrf.mxu0  ;;  %v1268_v44 = vpop.f32.mrf.mxu1  ;;  %3340 = vmatprep.subr.bf16.mxu1 %v11953_v27 }
  0xff   :  { %17930 = vst [vmem:[#allocation13_spill] sm:$0xff] %v13062_v38  ;;  %v1762_v46 = vmax.f32 %v730_v36, 0.0  ;;  %v1764_v49 = vmax.f32 %v1267_v37, 0.0  ;;  %v732_v52 = vadd.f32 %v731_v42, %v12970_v50  ;;  %v1269_v53 = vadd.f32 %v1268_v44, %v12974_v51  ;;  %3341 = vmatpush2.bf16.msra.mxu1 %v11951_v15 }
 0x100   :  { %17931 = vst [vmem:[#allocation14_spill] sm:$0xff] %v13064_v39  ;;  %v733_v56 = vpop.f32.mrf.mxu0  ;;  %v1270_v59 = vpop.f32.mrf.mxu1 }
 0x101   :  { %v1765_v60 = vmax.f32 %v732_v52, 0.0  ;;  %v1767_v61 = vmax.f32 %v1269_v53, 0.0  ;;  %v734_v62 = vadd.f32 %v733_v56, %v12978_v54  ;;  %v1271_v63 = vadd.f32 %v1270_v59, %v12980_v55 }
 0x102   :  { %v737_v0 = vpop.f32.mrf.mxu0  ;;  %960 = vmatmul.mubr.bf16.gmra.mxu0 %v11908_v35  ;;  %v1274_v2 = vpop.f32.mrf.mxu1  ;;  %1497 = vmatmul.mubr.bf16.gmra.mxu1 %v11908_v35 }
 0x103   :  { %v13070_v3 = vpack.c.bf16 %v1765_v60, %v1761_v40  ;;  %v13072_v4 = vpack.c.bf16 %v1767_v61, %v1763_v41  ;;  %v1766_v7 = vmax.f32 %v734_v62, 0.0  ;;  %v1768_v8 = vmax.f32 %v1271_v63, 0.0  ;;  %969 = vmatprep.mubr.bf16.mxu0 %v17671_v1  ;;  %1506 = vmatprep.mubr.bf16.mxu1 %v17671_v1 }
 0x104   :  { %v738_v9 = vadd.f32 %v737_v0, %v12970_v50  ;;  %v1275_v10 = vadd.f32 %v1274_v2, %v12974_v51  ;;  %v739_v11 = vpop.f32.mrf.mxu0  ;;  %v1276_v12 = vpop.f32.mrf.mxu1 }
 0x105   :  { %17932 = vst [vmem:[#allocation15_spill] sm:$0xff] %v13070_v3  ;;  %17933 = vst [vmem:[#allocation16_spill] sm:$0xff] %v13072_v4  ;;  %v13087_v18 = vpack.c.bf16 %v1766_v7, %v1762_v46  ;;  %v13089_v19 = vpack.c.bf16 %v1768_v8, %v1764_v49  ;;  %v740_v20 = vadd.f32 %v739_v11, %v12978_v54  ;;  %v11910_v11 = vld [vmem:[%s17659_s0 + $0xf0] sm:$0xff]  }
 0x106   :  { %v1277_v21 = vadd.f32 %v1276_v12, %v12980_v55  ;;  %v741_v22 = vpop.f32.mrf.mxu0  ;;  %v1278_v23 = vpop.f32.mrf.mxu1  ;;  %v1769_v28 = vmax.f32 %v738_v9, 0.0  ;;  %v1771_v29 = vmax.f32 %v1275_v10, 0.0 }
 0x107   :  { %17934 = vst [vmem:[#allocation17_spill] sm:$0xff] %v13087_v18  ;;  %17935 = vst [vmem:[#allocation18_spill] sm:$0xff] %v13089_v19  ;;  %v742_v30 = vadd.f32 %v741_v22, %v12970_v50  ;;  %v1279_v33 = vadd.f32 %v1278_v23, %v12974_v51  ;;  %v1770_v42 = vmax.f32 %v740_v20, 0.0 }
 0x108   :  { %v743_v34 = vpop.f32.mrf.mxu0  ;;  %v1280_v35 = vpop.f32.mrf.mxu1  ;;  %v1772_v44 = vmax.f32 %v1277_v21, 0.0 }
 0x109   :  { %v1773_v36 = vmax.f32 %v742_v30, 0.0  ;;  %v1775_v37 = vmax.f32 %v1279_v33, 0.0  ;;  %v744_v40 = vadd.f32 %v743_v34, %v12978_v54  ;;  %v1281_v41 = vadd.f32 %v1280_v35, %v12980_v55 }
 0x10a   :  { %v747_v46 = vpop.f32.mrf.mxu0  ;;  %970 = vmatmul.mubr.bf16.gmra.mxu0 %v11909_v24  ;;  %v1284_v49 = vpop.f32.mrf.mxu1  ;;  %1507 = vmatmul.mubr.bf16.gmra.mxu1 %v11909_v24 }
 0x10b   :  { %v13103_v52 = vpack.c.bf16 %v1773_v36, %v1769_v28  ;;  %v13105_v53 = vpack.c.bf16 %v1775_v37, %v1771_v29  ;;  %v1774_v56 = vmax.f32 %v744_v40, 0.0  ;;  %v1776_v59 = vmax.f32 %v1281_v41, 0.0  ;;  %979 = vmatprep.mubr.bf16.mxu0 %v17671_v1  ;;  %1516 = vmatprep.mubr.bf16.mxu1 %v17671_v1 }
 0x10c   :  { %v748_v60 = vadd.f32 %v747_v46, %v12970_v50  ;;  %v1285_v61 = vadd.f32 %v1284_v49, %v12974_v51  ;;  %v749_v62 = vpop.f32.mrf.mxu0  ;;  %v1286_v63 = vpop.f32.mrf.mxu1 }
 0x10d   :  { %17936 = vst [vmem:[#allocation19_spill] sm:$0xff] %v13103_v52  ;;  %17937 = vst [vmem:[#allocation20_spill] sm:$0xff] %v13105_v53  ;;  %v13111_v0 = vpack.c.bf16 %v1774_v56, %v1770_v42  ;;  %v13113_v2 = vpack.c.bf16 %v1776_v59, %v1772_v44  ;;  %v750_v7 = vadd.f32 %v749_v62, %v12978_v54  ;;  %v11917_v62 = vld [vmem:[%s17659_s0 + $0xf8] sm:$0xff]  }
 0x10e   :  { %v1287_v8 = vadd.f32 %v1286_v63, %v12980_v55  ;;  %v751_v9 = vpop.f32.mrf.mxu0  ;;  %v1288_v10 = vpop.f32.mrf.mxu1  ;;  %v1777_v14 = vmax.f32 %v748_v60, 0.0  ;;  %v1779_v15 = vmax.f32 %v1285_v61, 0.0 }
 0x10f   :  { %17938 = vst [vmem:[#allocation21_spill] sm:$0xff] %v13111_v0  ;;  %17939 = vst [vmem:[#allocation22_spill] sm:$0xff] %v13113_v2  ;;  %v752_v12 = vadd.f32 %v751_v9, %v12970_v50  ;;  %v1289_v13 = vadd.f32 %v1288_v10, %v12974_v51  ;;  %v1778_v28 = vmax.f32 %v750_v7, 0.0 }
 0x110   :  { %v753_v20 = vpop.f32.mrf.mxu0  ;;  %v1290_v21 = vpop.f32.mrf.mxu1  ;;  %v1780_v29 = vmax.f32 %v1287_v8, 0.0 }
 0x111   :  { %v1781_v22 = vmax.f32 %v752_v12, 0.0  ;;  %v1783_v23 = vmax.f32 %v1289_v13, 0.0  ;;  %v754_v24 = vadd.f32 %v753_v20, %v12978_v54  ;;  %v1291_v27 = vadd.f32 %v1290_v21, %v12980_v55 }
 0x112   :  { %v757_v30 = vpop.f32.mrf.mxu0  ;;  %980 = vmatmul.mubr.bf16.gmra.mxu0 %v11910_v11  ;;  %v1294_v33 = vpop.f32.mrf.mxu1  ;;  %1517 = vmatmul.mubr.bf16.gmra.mxu1 %v11910_v11 }
 0x113   :  { %v13124_v34 = vpack.c.bf16 %v1781_v22, %v1777_v14  ;;  %v13126_v35 = vpack.c.bf16 %v1783_v23, %v1779_v15  ;;  %v1782_v36 = vmax.f32 %v754_v24, 0.0  ;;  %v1784_v37 = vmax.f32 %v1291_v27, 0.0  ;;  %989 = vmatprep.mubr.bf16.mxu0 %v17671_v1  ;;  %1526 = vmatprep.mubr.bf16.mxu1 %v17671_v1 }
 0x114   :  { %v758_v40 = vadd.f32 %v757_v30, %v12970_v50  ;;  %v1295_v41 = vadd.f32 %v1294_v33, %v12974_v51  ;;  %v759_v42 = vpop.f32.mrf.mxu0  ;;  %v1296_v44 = vpop.f32.mrf.mxu1 }
 0x115   :  { %17940 = vst [vmem:[#allocation23_spill] sm:$0xff] %v13124_v34  ;;  %17941 = vst [vmem:[#allocation24_spill] sm:$0xff] %v13126_v35  ;;  %v13132_v46 = vpack.c.bf16 %v1782_v36, %v1778_v28  ;;  %v13134_v49 = vpack.c.bf16 %v1784_v37, %v1780_v29  ;;  %v760_v56 = vadd.f32 %v759_v42, %v12978_v54 }
 0x116   :  { %v1297_v59 = vadd.f32 %v1296_v44, %v12980_v55  ;;  %v761_v60 = vpop.f32.mrf.mxu0  ;;  %v1298_v61 = vpop.f32.mrf.mxu1  ;;  %v1785_v8 = vmax.f32 %v758_v40, 0.0  ;;  %v1787_v9 = vmax.f32 %v1295_v41, 0.0 }
 0x117   :  { %17942 = vst [vmem:[#allocation25_spill] sm:$0xff] %v13132_v46  ;;  %17943 = vst [vmem:[#allocation26_spill] sm:$0xff] %v13134_v49  ;;  %v762_v63 = vadd.f32 %v761_v60, %v12970_v50  ;;  %v1299_v7 = vadd.f32 %v1298_v61, %v12974_v51  ;;  %v1786_v20 = vmax.f32 %v760_v56, 0.0  ;;  %v11918_v60 = vld [vmem:[%s17659_s0 + $0x100] sm:$0xff]  }
 0x118   :  { %v763_v10 = vpop.f32.mrf.mxu0  ;;  %v1300_v11 = vpop.f32.mrf.mxu1  ;;  %v1788_v21 = vmax.f32 %v1297_v59, 0.0  ;;  %v11958_v61 = vld [vmem:[%s17660_s3 + $0x3d8] ss:$12 sps:$4 sm:$0xff]  }
 0x119   :  { %v1789_v12 = vmax.f32 %v762_v63, 0.0  ;;  %v1791_v13 = vmax.f32 %v1299_v7, 0.0  ;;  %v764_v14 = vadd.f32 %v763_v10, %v12978_v54  ;;  %v1301_v15 = vadd.f32 %v1300_v11, %v12980_v55 }
 0x11a   :  { %v767_v22 = vpop.f32.mrf.mxu0  ;;  %990 = vmatmul.mubr.bf16.gmra.mxu0 %v11917_v62  ;;  %v1304_v23 = vpop.f32.mrf.mxu1  ;;  %1527 = vmatmul.mubr.bf16.gmra.mxu1 %v11917_v62  ;;  %v11960_v62 = vld [vmem:[%s17660_s3 + $0x3dc] ss:$12 sps:$4 sm:$0xff]  }
 0x11b   :  { %v13145_v24 = vpack.c.bf16 %v1789_v12, %v1785_v8  ;;  %v13147_v27 = vpack.c.bf16 %v1791_v13, %v1787_v9  ;;  %v1790_v28 = vmax.f32 %v764_v14, 0.0  ;;  %v1792_v29 = vmax.f32 %v1301_v15, 0.0  ;;  %999 = vmatprep.mubr.bf16.mxu0 %v17671_v1  ;;  %1536 = vmatprep.mubr.bf16.mxu1 %v17671_v1  ;;  %v11963_v8 = vld [vmem:[%s17660_s3 + $0x55c] ss:$12 sps:$4 sm:$0xff]   ;;  %v11961_v13 = vld [vmem:[%s17660_s3 + $0x558] ss:$12 sps:$4 sm:$0xff]  }
 0x11c   :  { %v768_v30 = vadd.f32 %v767_v22, %v12970_v50  ;;  %v1305_v33 = vadd.f32 %v1304_v23, %v12974_v51  ;;  %v769_v36 = vpop.f32.mrf.mxu0  ;;  %v1306_v37 = vpop.f32.mrf.mxu1  ;;  %3109 = vmatprep.subr.bf16.mxu0 %v11960_v62  ;;  %3342 = vmatprep.subr.bf16.mxu1 %v11963_v8 }
 0x11d   :  { %17944 = vst [vmem:[#allocation27_spill] sm:$0xff] %v13145_v24  ;;  %17945 = vst [vmem:[#allocation28_spill] sm:$0xff] %v13147_v27  ;;  %v13153_v40 = vpack.c.bf16 %v1790_v28, %v1786_v20  ;;  %v13155_v41 = vpack.c.bf16 %v1792_v29, %v1788_v21  ;;  %v770_v42 = vadd.f32 %v769_v36, %v12978_v54  ;;  %3110 = vmatpush2.bf16.msra.mxu0 %v11958_v61 }
 0x11e   :  { %v1307_v44 = vadd.f32 %v1306_v37, %v12980_v55  ;;  %v771_v56 = vpop.f32.mrf.mxu0  ;;  %v1308_v59 = vpop.f32.mrf.mxu1  ;;  %v1793_v9 = vmax.f32 %v768_v30, 0.0  ;;  %v1795_v10 = vmax.f32 %v1305_v33, 0.0  ;;  %3343 = vmatpush2.bf16.msra.mxu1 %v11961_v13 }
 0x11f   :  { %17946 = vst [vmem:[#allocation29_spill] sm:$0xff] %v13153_v40  ;;  %17947 = vst [vmem:[#allocation30_spill] sm:$0xff] %v13155_v41  ;;  %v772_v63 = vadd.f32 %v771_v56, %v12970_v50  ;;  %v1309_v7 = vadd.f32 %v1308_v59, %v12974_v51  ;;  %v1794_v22 = vmax.f32 %v770_v42, 0.0 }
 0x120   :  { %v773_v11 = vpop.f32.mrf.mxu0  ;;  %v1310_v12 = vpop.f32.mrf.mxu1  ;;  %v1796_v23 = vmax.f32 %v1307_v44, 0.0 }
 0x121   :  { %v1797_v14 = vmax.f32 %v772_v63, 0.0  ;;  %v1799_v15 = vmax.f32 %v1309_v7, 0.0  ;;  %v774_v20 = vadd.f32 %v773_v11, %v12978_v54  ;;  %v1311_v21 = vadd.f32 %v1310_v12, %v12980_v55 }
 0x122   :  { %v777_v28 = vpop.f32.mrf.mxu0  ;;  %1000 = vmatmul.mubr.bf16.gmra.mxu0 %v11918_v60  ;;  %v1314_v29 = vpop.f32.mrf.mxu1  ;;  %1537 = vmatmul.mubr.bf16.gmra.mxu1 %v11918_v60 }
 0x123   :  { %v13178_v30 = vpack.c.bf16 %v1797_v14, %v1793_v9  ;;  %v13180_v33 = vpack.c.bf16 %v1799_v15, %v1795_v10  ;;  %v1798_v36 = vmax.f32 %v774_v20, 0.0  ;;  %v1800_v37 = vmax.f32 %v1311_v21, 0.0  ;;  %1009 = vmatprep.mubr.bf16.mxu0 %v17671_v1  ;;  %1546 = vmatprep.mubr.bf16.mxu1 %v17671_v1  ;;  %v11919_v9 = vld [vmem:[%s17659_s0 + $0x108] sm:$0xff]  }
 0x124   :  { %v778_v56 = vadd.f32 %v777_v28, %v12970_v50  ;;  %v1315_v59 = vadd.f32 %v1314_v29, %v12974_v51  ;;  %v779_v42 = vpop.f32.mrf.mxu0  ;;  %v1316_v44 = vpop.f32.mrf.mxu1 }
 0x125   :  { %17948 = vst [vmem:[#allocation31_spill] sm:$0xff] %v13178_v30  ;;  %17949 = vst [vmem:[#allocation32_spill] sm:$0xff] %v13180_v33  ;;  %v13186_v61 = vpack.c.bf16 %v1798_v36, %v1794_v22  ;;  %v13188_v60 = vpack.c.bf16 %v1800_v37, %v1796_v23  ;;  %v780_v62 = vadd.f32 %v779_v42, %v12978_v54 }
 0x126   :  { %v1317_v63 = vadd.f32 %v1316_v44, %v12980_v55  ;;  %v781_v7 = vpop.f32.mrf.mxu0  ;;  %v1318_v8 = vpop.f32.mrf.mxu1  ;;  %v1801_v12 = vmax.f32 %v778_v56, 0.0  ;;  %v1803_v13 = vmax.f32 %v1315_v59, 0.0 }
 0x127   :  { %17950 = vst [vmem:[#allocation33_spill] sm:$0xff] %v13186_v61  ;;  %17951 = vst [vmem:[#allocation34_spill] sm:$0xff] %v13188_v60  ;;  %v782_v10 = vadd.f32 %v781_v7, %v12970_v50  ;;  %v1319_v11 = vadd.f32 %v1318_v8, %v12974_v51  ;;  %v1802_v28 = vmax.f32 %v780_v62, 0.0 }
 0x128   :  { %v783_v14 = vpop.f32.mrf.mxu0  ;;  %v1320_v15 = vpop.f32.mrf.mxu1  ;;  %v1804_v29 = vmax.f32 %v1317_v63, 0.0 }
 0x129   :  { %v1805_v20 = vmax.f32 %v782_v10, 0.0  ;;  %v1807_v21 = vmax.f32 %v1319_v11, 0.0  ;;  %v784_v22 = vadd.f32 %v783_v14, %v12978_v54  ;;  %v1321_v23 = vadd.f32 %v1320_v15, %v12980_v55  ;;  %v11920_v15 = vld [vmem:[%s17659_s0 + $0x110] sm:$0xff]  }
 0x12a   :  { %v787_v36 = vpop.f32.mrf.mxu0  ;;  %1010 = vmatmul.mubr.bf16.gmra.mxu0 %v11919_v9  ;;  %v1324_v37 = vpop.f32.mrf.mxu1  ;;  %1547 = vmatmul.mubr.bf16.gmra.mxu1 %v11919_v9 }
 0x12b   :  { %v13199_v42 = vpack.c.bf16 %v1805_v20, %v1801_v12  ;;  %v13201_v44 = vpack.c.bf16 %v1807_v21, %v1803_v13  ;;  %v1806_v56 = vmax.f32 %v784_v22, 0.0  ;;  %v1808_v59 = vmax.f32 %v1321_v23, 0.0  ;;  %1019 = vmatprep.mubr.bf16.mxu0 %v17671_v1  ;;  %1556 = vmatprep.mubr.bf16.mxu1 %v17671_v1 }
 0x12c   :  { %v788_v7 = vadd.f32 %v787_v36, %v12970_v50  ;;  %v1325_v8 = vadd.f32 %v1324_v37, %v12974_v51  ;;  %v789_v62 = vpop.f32.mrf.mxu0  ;;  %v1326_v63 = vpop.f32.mrf.mxu1 }
 0x12d   :  { %17952 = vst [vmem:[#allocation35_spill] sm:$0xff] %v13199_v42  ;;  %17953 = vst [vmem:[#allocation36_spill] sm:$0xff] %v13201_v44  ;;  %v13207_v10 = vpack.c.bf16 %v1806_v56, %v1802_v28  ;;  %v13209_v11 = vpack.c.bf16 %v1808_v59, %v1804_v29  ;;  %v790_v9 = vadd.f32 %v789_v62, %v12978_v54 }
 0x12e   :  { %v1327_v12 = vadd.f32 %v1326_v63, %v12980_v55  ;;  %v791_v13 = vpop.f32.mrf.mxu0  ;;  %v1328_v14 = vpop.f32.mrf.mxu1  ;;  %v1809_v22 = vmax.f32 %v788_v7, 0.0  ;;  %v1811_v23 = vmax.f32 %v1325_v8, 0.0 }
 0x12f   :  { %17954 = vst [vmem:[#allocation37_spill] sm:$0xff] %v13207_v10  ;;  %17955 = vst [vmem:[#allocation38_spill] sm:$0xff] %v13209_v11  ;;  %v792_v20 = vadd.f32 %v791_v13, %v12970_v50  ;;  %v1329_v21 = vadd.f32 %v1328_v14, %v12974_v51  ;;  %v1810_v62 = vmax.f32 %v790_v9, 0.0  ;;  %v11978_v10 = vld [vmem:[%s17660_s3 + $0x380] ss:$12 sps:$4 sm:$0xff]  }
 0x130   :  { %v793_v28 = vpop.f32.mrf.mxu0  ;;  %v1330_v36 = vpop.f32.mrf.mxu1  ;;  %v1812_v63 = vmax.f32 %v1327_v12, 0.0 }
 0x131   :  { %v1813_v29 = vmax.f32 %v792_v20, 0.0  ;;  %v1815_v37 = vmax.f32 %v1329_v21, 0.0  ;;  %v794_v56 = vadd.f32 %v793_v28, %v12978_v54  ;;  %v1331_v59 = vadd.f32 %v1330_v36, %v12980_v55  ;;  %v11968_v21 = vld [vmem:[%s17660_s3 + $0x3c4] ss:$12 sps:$4 sm:$0xff]  }
 0x132   :  { %v797_v47 = vpop.f32.mrf.mxu0  ;;  %1020 = vmatmul.mubr.bf16.gmra.mxu0 %v11920_v15  ;;  %v1334_v48 = vpop.f32.mrf.mxu1  ;;  %1557 = vmatmul.mubr.bf16.gmra.mxu1 %v11920_v15  ;;  %v11966_v15 = vld [vmem:[%s17660_s3 + $0x3c0] ss:$12 sps:$4 sm:$0xff]  }
 0x133   :  { %v13220_v45 = vpack.c.bf16 %v1813_v29, %v1809_v22  ;;  %v13222_v13 = vpack.c.bf16 %v1815_v37, %v1811_v23  ;;  %v1814_v7 = vmax.f32 %v794_v56, 0.0  ;;  %v1816_v8 = vmax.f32 %v1331_v59, 0.0  ;;  %1029 = vmatprep.mubr.bf16.mxu0 %v17671_v1  ;;  %1566 = vmatprep.mubr.bf16.mxu1 %v17671_v1  ;;  %v11969_v22 = vld [vmem:[%s17660_s3 + $0x540] ss:$12 sps:$4 sm:$0xff]   ;;  %v11927_v56 = vld [vmem:[%s17659_s0 + $0x118] sm:$0xff]  }
 0x134   :  { %v798_v14 = vadd.f32 %v797_v47, %v12970_v50  ;;  %v1335_v20 = vadd.f32 %v1334_v48, %v12974_v51  ;;  %v799_v9 = vpop.f32.mrf.mxu0  ;;  %v1336_v12 = vpop.f32.mrf.mxu1  ;;  %v11971_v47 = vld [vmem:[%s17660_s3 + $0x544] ss:$12 sps:$4 sm:$0xff]   ;;  %3111 = vmatprep.subr.bf16.mxu0 %v11968_v21 }
 0x135   :  { %17956 = vst [vmem:[#allocation39_spill] sm:$0xff] %v13220_v45  ;;  %17957 = vst [vmem:[#allocation40_spill] sm:$0xff] %v13222_v13  ;;  %v13237_v23 = vpack.c.bf16 %v1814_v7, %v1810_v62  ;;  %v13239_v28 = vpack.c.bf16 %v1816_v8, %v1812_v63  ;;  %v800_v48 = vadd.f32 %v799_v9, %v12978_v54  ;;  %3344 = vmatprep.subr.bf16.mxu1 %v11971_v47  ;;  %v17960_v9 = vmov 0  }
 0x136   :  { %v1337_v36 = vadd.f32 %v1336_v12, %v12980_v55  ;;  %v801_v29 = vpop.f32.mrf.mxu0  ;;  %v1338_v37 = vpop.f32.mrf.mxu1  ;;  %3112 = vmatpush2.bf16.msra.mxu0 %v11966_v15  ;;  %v1817_v63 = vmax.f32 %v798_v14, 0.0  ;;  %v1819_v7 = vmax.f32 %v1335_v20, 0.0  ;;  %3345 = vmatpush2.bf16.msra.mxu1 %v11969_v22 }
 0x137   :  { %17958 = vst [vmem:[#allocation41_spill] sm:$0xff] %v13237_v23  ;;  %17959 = vst [vmem:[#allocation42_spill] sm:$0xff] %v13239_v28  ;;  %v802_v59 = vadd.f32 %v801_v29, %v12970_v50  ;;  %v1339_v62 = vadd.f32 %v1338_v37, %v12974_v51  ;;  %3547 = vmatprep.subr.bf16.mxu0 %v17960_v9  ;;  %3740 = vmatprep.subr.bf16.mxu1 %v17960_v9  ;;  %v1818_v21 = vmax.f32 %v800_v48, 0.0 }
 0x138   :  { %v803_v8 = vpop.f32.mrf.mxu0  ;;  %v1340_v1 = vpop.f32.mrf.mxu1  ;;  %v1820_v29 = vmax.f32 %v1337_v36, 0.0 }
 0x139   :  { %v1821_v12 = vmax.f32 %v802_v59, 0.0  ;;  %v1823_v43 = vmax.f32 %v1339_v62, 0.0  ;;  %v804_v13 = vadd.f32 %v803_v8, %v12978_v54  ;;  %v1341_v45 = vadd.f32 %v1340_v1, %v12980_v55 }
 0x13a   :  { %v807_v37 = vpop.f32.mrf.mxu0  ;;  %1030 = vmatmul.mubr.bf16.gmra.mxu0 %v11927_v56  ;;  %v1344_v15 = vpop.f32.mrf.mxu1  ;;  %1567 = vmatmul.mubr.bf16.gmra.mxu1 %v11927_v56 }
 0x13b   :  { %v13255_v14 = vpack.c.bf16 %v1821_v12, %v1817_v63  ;;  %v13257_v20 = vpack.c.bf16 %v1823_v43, %v1819_v7  ;;  %v1822_v22 = vmax.f32 %v804_v13, 0.0  ;;  %v1824_v47 = vmax.f32 %v1341_v45, 0.0  ;;  %1039 = vmatprep.mubr.bf16.mxu0 %v17960_v9  ;;  %1576 = vmatprep.mubr.bf16.mxu1 %v17960_v9  ;;  %v11928_v63 = vld [vmem:[%s17659_s0 + $0x120] sm:$0xff]  }
 0x13c   :  { %v808_v1 = vadd.f32 %v807_v37, %v12970_v50  ;;  %v1345_v59 = vadd.f32 %v1344_v15, %v12974_v51  ;;  %v809_v48 = vpop.f32.mrf.mxu0  ;;  %v1346_v36 = vpop.f32.mrf.mxu1 }
 0x13d   :  { %17961 = vst [vmem:[#allocation43_spill] sm:$0xff] %v13255_v14  ;;  %17962 = vst [vmem:[#allocation44_spill] sm:$0xff] %v13257_v20  ;;  %v13263_v62 = vpack.c.bf16 %v1822_v22, %v1818_v21  ;;  %v13265_v8 = vpack.c.bf16 %v1824_v47, %v1820_v29  ;;  %v810_v56 = vadd.f32 %v809_v48, %v12978_v54 }
 0x13e   :  { %v1347_v43 = vadd.f32 %v1346_v36, %v12980_v55  ;;  %v811_v13 = vpop.f32.mrf.mxu0  ;;  %v1348_v45 = vpop.f32.mrf.mxu1  ;;  %v1825_v37 = vmax.f32 %v808_v1, 0.0  ;;  %v1827_v15 = vmax.f32 %v1345_v59, 0.0 }
 0x13f   :  { %17963 = vst [vmem:[#allocation45_spill] sm:$0xff] %v13263_v62  ;;  %17964 = vst [vmem:[#allocation46_spill] sm:$0xff] %v13265_v8  ;;  %v812_v7 = vadd.f32 %v811_v13, %v12970_v50  ;;  %v1349_v12 = vadd.f32 %v1348_v45, %v12974_v51  ;;  %v1826_v20 = vmax.f32 %v810_v56, 0.0 }
 0x140   :  { %v813_v21 = vpop.f32.mrf.mxu0  ;;  %v1350_v22 = vpop.f32.mrf.mxu1  ;;  %v1828_v14 = vmax.f32 %v1347_v43, 0.0 }
 0x141   :  { %v1829_v29 = vmax.f32 %v812_v7, 0.0  ;;  %v1831_v47 = vmax.f32 %v1349_v12, 0.0  ;;  %v814_v48 = vadd.f32 %v813_v21, %v12978_v54  ;;  %v1351_v36 = vadd.f32 %v1350_v22, %v12980_v55 }
 0x142   :  { %v817_v8 = vpop.f32.mrf.mxu0  ;;  %1040 = vmatmul.mubr.bf16.gmra.mxu0 %v11928_v63  ;;  %v1354_v62 = vpop.f32.mrf.mxu1  ;;  %1577 = vmatmul.mubr.bf16.gmra.mxu1 %v11928_v63 }
 0x143   :  { %v13276_v28 = vpack.c.bf16 %v1829_v29, %v1825_v37  ;;  %v13278_v13 = vpack.c.bf16 %v1831_v47, %v1827_v15  ;;  %v1830_v1 = vmax.f32 %v814_v48, 0.0  ;;  %v1832_v59 = vmax.f32 %v1351_v36, 0.0  ;;  %1049 = vmatprep.mubr.bf16.mxu0 %v17960_v9  ;;  %1586 = vmatprep.mubr.bf16.mxu1 %v17960_v9  ;;  %v11929_v29 = vld [vmem:[%s17659_s0 + $0x128] sm:$0xff]  }
 0x144   :  { %v818_v45 = vadd.f32 %v817_v8, %v12970_v50  ;;  %v1355_v7 = vadd.f32 %v1354_v62, %v12974_v51  ;;  %v819_v56 = vpop.f32.mrf.mxu0  ;;  %v1356_v43 = vpop.f32.mrf.mxu1 }
 0x145   :  { %17965 = vst [vmem:[#allocation47_spill] sm:$0xff] %v13276_v28  ;;  %17966 = vst [vmem:[#allocation48_spill] sm:$0xff] %v13278_v13  ;;  %v13284_v12 = vpack.c.bf16 %v1830_v1, %v1826_v20  ;;  %v13286_v21 = vpack.c.bf16 %v1832_v59, %v1828_v14  ;;  %v820_v63 = vadd.f32 %v819_v56, %v12978_v54 }
 0x146   :  { %v1357_v37 = vadd.f32 %v1356_v43, %v12980_v55  ;;  %v821_v15 = vpop.f32.mrf.mxu0  ;;  %v1358_v22 = vpop.f32.mrf.mxu1  ;;  %v1833_v47 = vmax.f32 %v818_v45, 0.0  ;;  %v1835_v48 = vmax.f32 %v1355_v7, 0.0 }
 0x147   :  { %17967 = vst [vmem:[#allocation49_spill] sm:$0xff] %v13284_v12  ;;  %17968 = vst [vmem:[#allocation50_spill] sm:$0xff] %v13286_v21  ;;  %v822_v8 = vadd.f32 %v821_v15, %v12970_v50  ;;  %v1359_v62 = vadd.f32 %v1358_v22, %v12974_v51  ;;  %v1834_v43 = vmax.f32 %v820_v63, 0.0 }
 0x148   :  { %v823_v20 = vpop.f32.mrf.mxu0  ;;  %v1360_v36 = vpop.f32.mrf.mxu1  ;;  %v1836_v13 = vmax.f32 %v1357_v37, 0.0 }
 0x149   :  { %v1837_v14 = vmax.f32 %v822_v8, 0.0  ;;  %v1839_v1 = vmax.f32 %v1359_v62, 0.0  ;;  %v824_v59 = vadd.f32 %v823_v20, %v12978_v54  ;;  %v1361_v56 = vadd.f32 %v1360_v36, %v12980_v55 }
 0x14a   :  { %v827_v28 = vpop.f32.mrf.mxu0  ;;  %1050 = vmatmul.mubr.bf16.gmra.mxu0 %v11929_v29  ;;  %v1364_v21 = vpop.f32.mrf.mxu1  ;;  %1587 = vmatmul.mubr.bf16.gmra.mxu1 %v11929_v29 }
 0x14b   :  { %v13297_v12 = vpack.c.bf16 %v1837_v14, %v1833_v47  ;;  %v13299_v15 = vpack.c.bf16 %v1839_v1, %v1835_v48  ;;  %v1838_v45 = vmax.f32 %v824_v59, 0.0  ;;  %v1840_v7 = vmax.f32 %v1361_v56, 0.0  ;;  %1059 = vmatprep.mubr.bf16.mxu0 %v17960_v9  ;;  %1596 = vmatprep.mubr.bf16.mxu1 %v17960_v9  ;;  %v11936_v14 = vld [vmem:[%s17659_s0 + $0x130] sm:$0xff]  }
 0x14c   :  { %v828_v22 = vadd.f32 %v827_v28, %v12970_v50  ;;  %v1365_v8 = vadd.f32 %v1364_v21, %v12974_v51  ;;  %v829_v63 = vpop.f32.mrf.mxu0  ;;  %v1366_v37 = vpop.f32.mrf.mxu1 }
 0x14d   :  { %17969 = vst [vmem:[#allocation51_spill] sm:$0xff] %v13297_v12  ;;  %17970 = vst [vmem:[#allocation52_spill] sm:$0xff] %v13299_v15  ;;  %v13305_v62 = vpack.c.bf16 %v1838_v45, %v1834_v43  ;;  %v13307_v20 = vpack.c.bf16 %v1840_v7, %v1836_v13  ;;  %v830_v29 = vadd.f32 %v829_v63, %v12978_v54 }
 0x14e   :  { %v1367_v47 = vadd.f32 %v1366_v37, %v12980_v55  ;;  %v831_v48 = vpop.f32.mrf.mxu0  ;;  %v1368_v36 = vpop.f32.mrf.mxu1  ;;  %v1841_v1 = vmax.f32 %v828_v22, 0.0  ;;  %v1843_v59 = vmax.f32 %v1365_v8, 0.0 }
 0x14f   :  { %17971 = vst [vmem:[#allocation53_spill] sm:$0xff] %v13305_v62  ;;  %17972 = vst [vmem:[#allocation54_spill] sm:$0xff] %v13307_v20  ;;  %v832_v28 = vadd.f32 %v831_v48, %v12970_v50  ;;  %v1369_v21 = vadd.f32 %v1368_v36, %v12974_v51  ;;  %v1842_v37 = vmax.f32 %v830_v29, 0.0 }
 0x150   :  { %v833_v56 = vpop.f32.mrf.mxu0  ;;  %v1370_v43 = vpop.f32.mrf.mxu1  ;;  %v1844_v15 = vmax.f32 %v1367_v47, 0.0 }
 0x151   :  { %v1845_v13 = vmax.f32 %v832_v28, 0.0  ;;  %v1847_v45 = vmax.f32 %v1369_v21, 0.0  ;;  %v834_v7 = vadd.f32 %v833_v56, %v12978_v54  ;;  %v1371_v63 = vadd.f32 %v1370_v43, %v12980_v55 }
 0x152   :  { %v837_v12 = vpop.f32.mrf.mxu0  ;;  %1060 = vmatmul.mubr.bf16.gmra.mxu0 %v11936_v14  ;;  %v1374_v20 = vpop.f32.mrf.mxu1  ;;  %1597 = vmatmul.mubr.bf16.gmra.mxu1 %v11936_v14 }
 0x153   :  { %v13318_v62 = vpack.c.bf16 %v1845_v13, %v1841_v1  ;;  %v13320_v48 = vpack.c.bf16 %v1847_v45, %v1843_v59  ;;  %v1846_v22 = vmax.f32 %v834_v7, 0.0  ;;  %v1848_v8 = vmax.f32 %v1371_v63, 0.0  ;;  %1069 = vmatprep.mubr.bf16.mxu0 %v17960_v9  ;;  %1606 = vmatprep.mubr.bf16.mxu1 %v17960_v9  ;;  %v11937_v13 = vld [vmem:[%s17659_s0 + $0x138] sm:$0xff]  }
 0x154   :  { %v838_v36 = vadd.f32 %v837_v12, %v12970_v50  ;;  %v1375_v28 = vadd.f32 %v1374_v20, %v12974_v51  ;;  %v839_v29 = vpop.f32.mrf.mxu0  ;;  %v1376_v47 = vpop.f32.mrf.mxu1 }
 0x155   :  { %17973 = vst [vmem:[#allocation55_spill] sm:$0xff] %v13318_v62  ;;  %17974 = vst [vmem:[#allocation56_spill] sm:$0xff] %v13320_v48  ;;  %v13326_v21 = vpack.c.bf16 %v1846_v22, %v1842_v37  ;;  %v13328_v56 = vpack.c.bf16 %v1848_v8, %v1844_v15  ;;  %v840_v14 = vadd.f32 %v839_v29, %v12978_v54 }
 0x156   :  { %v1377_v1 = vadd.f32 %v1376_v47, %v12980_v55  ;;  %v841_v59 = vpop.f32.mrf.mxu0  ;;  %v1378_v43 = vpop.f32.mrf.mxu1  ;;  %v1849_v45 = vmax.f32 %v838_v36, 0.0  ;;  %v1851_v7 = vmax.f32 %v1375_v28, 0.0 }
 0x157   :  { %17975 = vst [vmem:[#allocation57_spill] sm:$0xff] %v13326_v21  ;;  %17976 = vst [vmem:[#allocation58_spill] sm:$0xff] %v13328_v56  ;;  %v842_v12 = vadd.f32 %v841_v59, %v12970_v50  ;;  %v1379_v20 = vadd.f32 %v1378_v43, %v12974_v51  ;;  %v1850_v47 = vmax.f32 %v840_v14, 0.0 }
 0x158   :  { %v843_v63 = vpop.f32.mrf.mxu0  ;;  %v1380_v37 = vpop.f32.mrf.mxu1  ;;  %v1852_v48 = vmax.f32 %v1377_v1, 0.0 }
 0x159   :  { %v1853_v15 = vmax.f32 %v842_v12, 0.0  ;;  %v1855_v22 = vmax.f32 %v1379_v20, 0.0  ;;  %v844_v8 = vadd.f32 %v843_v63, %v12978_v54  ;;  %v1381_v29 = vadd.f32 %v1380_v37, %v12980_v55 }
 0x15a   :  { %v847_v62 = vpop.f32.mrf.mxu0  ;;  %1070 = vmatmul.mubr.bf16.gmra.mxu0 %v11937_v13  ;;  %v1384_v56 = vpop.f32.mrf.mxu1  ;;  %1607 = vmatmul.mubr.bf16.gmra.mxu1 %v11937_v13 }
 0x15b   :  { %v13339_v21 = vpack.c.bf16 %v1853_v15, %v1849_v45  ;;  %v13341_v59 = vpack.c.bf16 %v1855_v22, %v1851_v7  ;;  %v1854_v36 = vmax.f32 %v844_v8, 0.0  ;;  %v1856_v28 = vmax.f32 %v1381_v29, 0.0  ;;  %1079 = vmatprep.mubr.bf16.mxu0 %v17960_v9  ;;  %1616 = vmatprep.mubr.bf16.mxu1 %v17960_v9  ;;  %v11938_v15 = vld [vmem:[%s17659_s0 + $0x140] sm:$0xff]  }
 0x15c   :  { %v848_v43 = vadd.f32 %v847_v62, %v12970_v50  ;;  %v1385_v12 = vadd.f32 %v1384_v56, %v12974_v51  ;;  %v849_v14 = vpop.f32.mrf.mxu0  ;;  %v1386_v1 = vpop.f32.mrf.mxu1 }
 0x15d   :  { %17977 = vst [vmem:[#allocation59_spill] sm:$0xff] %v13339_v21  ;;  %17978 = vst [vmem:[#allocation60_spill] sm:$0xff] %v13341_v59  ;;  %v13347_v20 = vpack.c.bf16 %v1854_v36, %v1850_v47  ;;  %v13349_v63 = vpack.c.bf16 %v1856_v28, %v1852_v48  ;;  %v850_v13 = vadd.f32 %v849_v14, %v12978_v54 }
 0x15e   :  { %v1387_v45 = vadd.f32 %v1386_v1, %v12980_v55  ;;  %v851_v7 = vpop.f32.mrf.mxu0  ;;  %v1388_v37 = vpop.f32.mrf.mxu1  ;;  %v1857_v22 = vmax.f32 %v848_v43, 0.0  ;;  %v1859_v8 = vmax.f32 %v1385_v12, 0.0 }
 0x15f   :  { %17979 = vst [vmem:[#allocation61_spill] sm:$0xff] %v13347_v20  ;;  %17980 = vst [vmem:[#allocation62_spill] sm:$0xff] %v13349_v63  ;;  %v852_v62 = vadd.f32 %v851_v7, %v12970_v50  ;;  %v1389_v56 = vadd.f32 %v1388_v37, %v12974_v51  ;;  %v1858_v1 = vmax.f32 %v850_v13, 0.0 }
 0x160   :  { %v853_v29 = vpop.f32.mrf.mxu0  ;;  %v1390_v47 = vpop.f32.mrf.mxu1  ;;  %v1860_v59 = vmax.f32 %v1387_v45, 0.0 }
 0x161   :  { %v1861_v48 = vmax.f32 %v852_v62, 0.0  ;;  %v1863_v36 = vmax.f32 %v1389_v56, 0.0  ;;  %v854_v28 = vadd.f32 %v853_v29, %v12978_v54  ;;  %v1391_v14 = vadd.f32 %v1390_v47, %v12980_v55 }
 0x162   :  { %v857_v21 = vpop.f32.mrf.mxu0  ;;  %1080 = vmatmul.mubr.bf16.gmra.mxu0 %v11938_v15  ;;  %v1394_v63 = vpop.f32.mrf.mxu1  ;;  %1617 = vmatmul.mubr.bf16.gmra.mxu1 %v11938_v15 }
 0x163   :  { %v13360_v20 = vpack.c.bf16 %v1861_v48, %v1857_v22  ;;  %v13362_v7 = vpack.c.bf16 %v1863_v36, %v1859_v8  ;;  %v1862_v43 = vmax.f32 %v854_v28, 0.0  ;;  %v1864_v12 = vmax.f32 %v1391_v14, 0.0  ;;  %1089 = vmatprep.mubr.bf16.mxu0 %v17960_v9  ;;  %1626 = vmatprep.mubr.bf16.mxu1 %v17960_v9  ;;  %v11945_v48 = vld [vmem:[%s17659_s0 + $0x148] sm:$0xff]  }
 0x164   :  { %v858_v37 = vadd.f32 %v857_v21, %v12970_v50  ;;  %v1395_v62 = vadd.f32 %v1394_v63, %v12974_v51  ;;  %v859_v13 = vpop.f32.mrf.mxu0  ;;  %v1396_v45 = vpop.f32.mrf.mxu1 }
 0x165   :  { %17981 = vst [vmem:[#allocation63_spill] sm:$0xff] %v13360_v20  ;;  %17982 = vst [vmem:[#allocation64_spill] sm:$0xff] %v13362_v7  ;;  %v13368_v56 = vpack.c.bf16 %v1862_v43, %v1858_v1  ;;  %v13370_v29 = vpack.c.bf16 %v1864_v12, %v1860_v59  ;;  %v860_v15 = vadd.f32 %v859_v13, %v12978_v54 }
 0x166   :  { %v1397_v22 = vadd.f32 %v1396_v45, %v12980_v55  ;;  %v861_v8 = vpop.f32.mrf.mxu0  ;;  %v1398_v47 = vpop.f32.mrf.mxu1  ;;  %v1865_v36 = vmax.f32 %v858_v37, 0.0  ;;  %v1867_v28 = vmax.f32 %v1395_v62, 0.0 }
 0x167   :  { %17983 = vst [vmem:[#allocation65_spill] sm:$0xff] %v13368_v56  ;;  %17984 = vst [vmem:[#allocation66_spill] sm:$0xff] %v13370_v29  ;;  %v862_v21 = vadd.f32 %v861_v8, %v12970_v50  ;;  %v1399_v63 = vadd.f32 %v1398_v47, %v12974_v51  ;;  %v1866_v45 = vmax.f32 %v860_v15, 0.0 }
 0x168   :  { %v863_v14 = vpop.f32.mrf.mxu0  ;;  %v1400_v1 = vpop.f32.mrf.mxu1  ;;  %v1868_v7 = vmax.f32 %v1397_v22, 0.0 }
 0x169   :  { %v1869_v59 = vmax.f32 %v862_v21, 0.0  ;;  %v1871_v43 = vmax.f32 %v1399_v63, 0.0  ;;  %v864_v12 = vadd.f32 %v863_v14, %v12978_v54  ;;  %v1401_v13 = vadd.f32 %v1400_v1, %v12980_v55 }
 0x16a   :  { %v867_v20 = vpop.f32.mrf.mxu0  ;;  %1090 = vmatmul.mubr.bf16.gmra.mxu0 %v11945_v48  ;;  %v1404_v29 = vpop.f32.mrf.mxu1  ;;  %1627 = vmatmul.mubr.bf16.gmra.mxu1 %v11945_v48 }
 0x16b   :  { %v13381_v56 = vpack.c.bf16 %v1869_v59, %v1865_v36  ;;  %v13383_v8 = vpack.c.bf16 %v1871_v43, %v1867_v28  ;;  %v1870_v37 = vmax.f32 %v864_v12, 0.0  ;;  %v1872_v62 = vmax.f32 %v1401_v13, 0.0  ;;  %1099 = vmatprep.mubr.bf16.mxu0 %v17960_v9  ;;  %1636 = vmatprep.mubr.bf16.mxu1 %v17960_v9  ;;  %v11946_v59 = vld [vmem:[%s17659_s0 + $0x150] sm:$0xff]  }
 0x16c   :  { %v868_v47 = vadd.f32 %v867_v20, %v12970_v50  ;;  %v1405_v21 = vadd.f32 %v1404_v29, %v12974_v51  ;;  %v869_v15 = vpop.f32.mrf.mxu0  ;;  %v1406_v22 = vpop.f32.mrf.mxu1 }
 0x16d   :  { %17985 = vst [vmem:[#allocation67_spill] sm:$0xff] %v13381_v56  ;;  %17986 = vst [vmem:[#allocation68_spill] sm:$0xff] %v13383_v8  ;;  %v13389_v63 = vpack.c.bf16 %v1870_v37, %v1866_v45  ;;  %v13391_v14 = vpack.c.bf16 %v1872_v62, %v1868_v7  ;;  %v870_v48 = vadd.f32 %v869_v15, %v12978_v54 }
 0x16e   :  { %v1407_v36 = vadd.f32 %v1406_v22, %v12980_v55  ;;  %v871_v28 = vpop.f32.mrf.mxu0  ;;  %v1408_v1 = vpop.f32.mrf.mxu1  ;;  %v1873_v43 = vmax.f32 %v868_v47, 0.0  ;;  %v1875_v12 = vmax.f32 %v1405_v21, 0.0 }
 0x16f   :  { %17987 = vst [vmem:[#allocation69_spill] sm:$0xff] %v13389_v63  ;;  %17988 = vst [vmem:[#allocation70_spill] sm:$0xff] %v13391_v14  ;;  %v872_v20 = vadd.f32 %v871_v28, %v12970_v50  ;;  %v1409_v29 = vadd.f32 %v1408_v1, %v12974_v51  ;;  %v1874_v22 = vmax.f32 %v870_v48, 0.0 }
 0x170   :  { %v873_v13 = vpop.f32.mrf.mxu0  ;;  %v1410_v45 = vpop.f32.mrf.mxu1  ;;  %v1876_v8 = vmax.f32 %v1407_v36, 0.0 }
 0x171   :  { %v1877_v7 = vmax.f32 %v872_v20, 0.0  ;;  %v1879_v37 = vmax.f32 %v1409_v29, 0.0  ;;  %v874_v62 = vadd.f32 %v873_v13, %v12978_v54  ;;  %v1411_v15 = vadd.f32 %v1410_v45, %v12980_v55 }
 0x172   :  { %v877_v56 = vpop.f32.mrf.mxu0  ;;  %1100 = vmatmul.mubr.bf16.gmra.mxu0 %v11946_v59  ;;  %v1414_v14 = vpop.f32.mrf.mxu1  ;;  %1637 = vmatmul.mubr.bf16.gmra.mxu1 %v11946_v59 }
 0x173   :  { %v13402_v63 = vpack.c.bf16 %v1877_v7, %v1873_v43  ;;  %v13404_v28 = vpack.c.bf16 %v1879_v37, %v1875_v12  ;;  %v1878_v47 = vmax.f32 %v874_v62, 0.0  ;;  %v1880_v21 = vmax.f32 %v1411_v15, 0.0  ;;  %1109 = vmatprep.mubr.bf16.mxu0 %v17960_v9  ;;  %1646 = vmatprep.mubr.bf16.mxu1 %v17960_v9  ;;  %v11947_v7 = vld [vmem:[%s17659_s0 + $0x158] sm:$0xff]  }
 0x174   :  { %v878_v1 = vadd.f32 %v877_v56, %v12970_v50  ;;  %v1415_v20 = vadd.f32 %v1414_v14, %v12974_v51  ;;  %v879_v48 = vpop.f32.mrf.mxu0  ;;  %v1416_v36 = vpop.f32.mrf.mxu1 }
 0x175   :  { %17989 = vst [vmem:[#allocation71_spill] sm:$0xff] %v13402_v63  ;;  %17990 = vst [vmem:[#allocation72_spill] sm:$0xff] %v13404_v28  ;;  %v13410_v29 = vpack.c.bf16 %v1878_v47, %v1874_v22  ;;  %v13412_v13 = vpack.c.bf16 %v1880_v21, %v1876_v8  ;;  %v880_v59 = vadd.f32 %v879_v48, %v12978_v54 }
 0x176   :  { %v1417_v43 = vadd.f32 %v1416_v36, %v12980_v55  ;;  %v881_v12 = vpop.f32.mrf.mxu0  ;;  %v1418_v45 = vpop.f32.mrf.mxu1  ;;  %v1881_v37 = vmax.f32 %v878_v1, 0.0  ;;  %v1883_v62 = vmax.f32 %v1415_v20, 0.0 }
 0x177   :  { %17991 = vst [vmem:[#allocation73_spill] sm:$0xff] %v13410_v29  ;;  %17992 = vst [vmem:[#allocation74_spill] sm:$0xff] %v13412_v13  ;;  %v882_v56 = vadd.f32 %v881_v12, %v12970_v50  ;;  %v1419_v14 = vadd.f32 %v1418_v45, %v12974_v51  ;;  %v1882_v36 = vmax.f32 %v880_v59, 0.0 }
 0x178   :  { %v883_v15 = vpop.f32.mrf.mxu0  ;;  %v1420_v22 = vpop.f32.mrf.mxu1  ;;  %v1884_v28 = vmax.f32 %v1417_v43, 0.0 }
 0x179   :  { %v1885_v8 = vmax.f32 %v882_v56, 0.0  ;;  %v1887_v47 = vmax.f32 %v1419_v14, 0.0  ;;  %v884_v21 = vadd.f32 %v883_v15, %v12978_v54  ;;  %v1421_v48 = vadd.f32 %v1420_v22, %v12980_v55 }
 0x17a   :  { %v887_v63 = vpop.f32.mrf.mxu0  ;;  %1110 = vmatmul.mubr.bf16.gmra.mxu0 %v11947_v7  ;;  %v1424_v13 = vpop.f32.mrf.mxu1  ;;  %1647 = vmatmul.mubr.bf16.gmra.mxu1 %v11947_v7 }
 0x17b   :  { %v13423_v29 = vpack.c.bf16 %v1885_v8, %v1881_v37  ;;  %v13425_v12 = vpack.c.bf16 %v1887_v47, %v1883_v62  ;;  %v1886_v1 = vmax.f32 %v884_v21, 0.0  ;;  %v1888_v20 = vmax.f32 %v1421_v48, 0.0  ;;  %1119 = vmatprep.mubr.bf16.mxu0 %v17960_v9  ;;  %1656 = vmatprep.mubr.bf16.mxu1 %v17960_v9  ;;  %v11954_v8 = vld [vmem:[%s17659_s0 + $0x160] sm:$0xff]  }
 0x17c   :  { %v888_v45 = vadd.f32 %v887_v63, %v12970_v50  ;;  %v1425_v56 = vadd.f32 %v1424_v13, %v12974_v51  ;;  %v889_v59 = vpop.f32.mrf.mxu0  ;;  %v1426_v43 = vpop.f32.mrf.mxu1 }
 0x17d   :  { %17993 = vst [vmem:[#allocation75_spill] sm:$0xff] %v13423_v29  ;;  %17994 = vst [vmem:[#allocation76_spill] sm:$0xff] %v13425_v12  ;;  %v13431_v14 = vpack.c.bf16 %v1886_v1, %v1882_v36  ;;  %v13433_v15 = vpack.c.bf16 %v1888_v20, %v1884_v28  ;;  %v890_v7 = vadd.f32 %v889_v59, %v12978_v54 }
 0x17e   :  { %v1427_v37 = vadd.f32 %v1426_v43, %v12980_v55  ;;  %v891_v62 = vpop.f32.mrf.mxu0  ;;  %v1428_v22 = vpop.f32.mrf.mxu1  ;;  %v1889_v47 = vmax.f32 %v888_v45, 0.0  ;;  %v1891_v21 = vmax.f32 %v1425_v56, 0.0 }
 0x17f   :  { %17995 = vst [vmem:[#allocation77_spill] sm:$0xff] %v13431_v14  ;;  %17996 = vst [vmem:[#allocation78_spill] sm:$0xff] %v13433_v15  ;;  %v892_v63 = vadd.f32 %v891_v62, %v12970_v50  ;;  %v1429_v13 = vadd.f32 %v1428_v22, %v12974_v51  ;;  %v1890_v43 = vmax.f32 %v890_v7, 0.0 }
 0x180   :  { %v893_v48 = vpop.f32.mrf.mxu0  ;;  %v1430_v36 = vpop.f32.mrf.mxu1  ;;  %v1892_v12 = vmax.f32 %v1427_v37, 0.0 }
 0x181   :  { %v1893_v28 = vmax.f32 %v892_v63, 0.0  ;;  %v1895_v1 = vmax.f32 %v1429_v13, 0.0  ;;  %v894_v20 = vadd.f32 %v893_v48, %v12978_v54  ;;  %v1431_v59 = vadd.f32 %v1430_v36, %v12980_v55 }
 0x182   :  { %v897_v29 = vpop.f32.mrf.mxu0  ;;  %1120 = vmatmul.mubr.bf16.gmra.mxu0 %v11954_v8  ;;  %v1434_v15 = vpop.f32.mrf.mxu1  ;;  %1657 = vmatmul.mubr.bf16.gmra.mxu1 %v11954_v8 }
 0x183   :  { %v13444_v14 = vpack.c.bf16 %v1893_v28, %v1889_v47  ;;  %v13446_v62 = vpack.c.bf16 %v1895_v1, %v1891_v21  ;;  %v1894_v45 = vmax.f32 %v894_v20, 0.0  ;;  %v1896_v56 = vmax.f32 %v1431_v59, 0.0  ;;  %1129 = vmatprep.mubr.bf16.mxu0 %v17960_v9  ;;  %1666 = vmatprep.mubr.bf16.mxu1 %v17960_v9  ;;  %v11955_v28 = vld [vmem:[%s17659_s0 + $0x168] sm:$0xff]  }
 0x184   :  { %v898_v22 = vadd.f32 %v897_v29, %v12970_v50  ;;  %v1435_v63 = vadd.f32 %v1434_v15, %v12974_v51  ;;  %v899_v7 = vpop.f32.mrf.mxu0  ;;  %v1436_v37 = vpop.f32.mrf.mxu1 }
 0x185   :  { %17997 = vst [vmem:[#allocation79_spill] sm:$0xff] %v13444_v14  ;;  %17998 = vst [vmem:[#allocation80_spill] sm:$0xff] %v13446_v62  ;;  %v13452_v13 = vpack.c.bf16 %v1894_v45, %v1890_v43  ;;  %v13454_v48 = vpack.c.bf16 %v1896_v56, %v1892_v12  ;;  %v900_v8 = vadd.f32 %v899_v7, %v12978_v54 }
 0x186   :  { %v1437_v47 = vadd.f32 %v1436_v37, %v12980_v55  ;;  %v901_v21 = vpop.f32.mrf.mxu0  ;;  %v1438_v36 = vpop.f32.mrf.mxu1  ;;  %v1897_v1 = vmax.f32 %v898_v22, 0.0  ;;  %v1899_v20 = vmax.f32 %v1435_v63, 0.0 }
 0x187   :  { %17999 = vst [vmem:[#allocation81_spill] sm:$0xff] %v13452_v13  ;;  %18000 = vst [vmem:[#allocation82_spill] sm:$0xff] %v13454_v48  ;;  %v902_v29 = vadd.f32 %v901_v21, %v12970_v50  ;;  %v1439_v15 = vadd.f32 %v1438_v36, %v12974_v51  ;;  %v1898_v37 = vmax.f32 %v900_v8, 0.0 }
 0x188   :  { %v903_v59 = vpop.f32.mrf.mxu0  ;;  %v1440_v43 = vpop.f32.mrf.mxu1  ;;  %v1900_v62 = vmax.f32 %v1437_v47, 0.0 }
 0x189   :  { %v1901_v12 = vmax.f32 %v902_v29, 0.0  ;;  %v1903_v45 = vmax.f32 %v1439_v15, 0.0  ;;  %v904_v56 = vadd.f32 %v903_v59, %v12978_v54  ;;  %v1441_v7 = vadd.f32 %v1440_v43, %v12980_v55 }
 0x18a   :  { %v907_v14 = vpop.f32.mrf.mxu0  ;;  %1130 = vmatmul.mubr.bf16.gmra.mxu0 %v11955_v28  ;;  %v1444_v48 = vpop.f32.mrf.mxu1  ;;  %1667 = vmatmul.mubr.bf16.gmra.mxu1 %v11955_v28 }
 0x18b   :  { %v13465_v13 = vpack.c.bf16 %v1901_v12, %v1897_v1  ;;  %v13467_v21 = vpack.c.bf16 %v1903_v45, %v1899_v20  ;;  %v1902_v22 = vmax.f32 %v904_v56, 0.0  ;;  %v1904_v63 = vmax.f32 %v1441_v7, 0.0  ;;  %1139 = vmatprep.mubr.bf16.mxu0 %v17960_v9  ;;  %1676 = vmatprep.mubr.bf16.mxu1 %v17960_v9  ;;  %v11956_v12 = vld [vmem:[%s17659_s0 + $0x170] sm:$0xff]  }
 0x18c   :  { %v908_v36 = vadd.f32 %v907_v14, %v12970_v50  ;;  %v1445_v29 = vadd.f32 %v1444_v48, %v12974_v51  ;;  %v909_v8 = vpop.f32.mrf.mxu0  ;;  %v1446_v47 = vpop.f32.mrf.mxu1 }
 0x18d   :  { %18001 = vst [vmem:[#allocation83_spill] sm:$0xff] %v13465_v13  ;;  %18002 = vst [vmem:[#allocation84_spill] sm:$0xff] %v13467_v21  ;;  %v13473_v15 = vpack.c.bf16 %v1902_v22, %v1898_v37  ;;  %v13475_v59 = vpack.c.bf16 %v1904_v63, %v1900_v62  ;;  %v910_v28 = vadd.f32 %v909_v8, %v12978_v54 }
 0x18e   :  { %v1447_v1 = vadd.f32 %v1446_v47, %v12980_v55  ;;  %v911_v20 = vpop.f32.mrf.mxu0  ;;  %v1448_v43 = vpop.f32.mrf.mxu1  ;;  %v1905_v45 = vmax.f32 %v908_v36, 0.0  ;;  %v1907_v56 = vmax.f32 %v1445_v29, 0.0 }
 0x18f   :  { %18003 = vst [vmem:[#allocation85_spill] sm:$0xff] %v13473_v15  ;;  %18004 = vst [vmem:[#allocation86_spill] sm:$0xff] %v13475_v59  ;;  %v912_v14 = vadd.f32 %v911_v20, %v12970_v50  ;;  %v1449_v48 = vadd.f32 %v1448_v43, %v12974_v51  ;;  %v1906_v47 = vmax.f32 %v910_v28, 0.0 }
 0x190   :  { %v913_v7 = vpop.f32.mrf.mxu0  ;;  %v1450_v37 = vpop.f32.mrf.mxu1  ;;  %v1908_v21 = vmax.f32 %v1447_v1, 0.0 }
 0x191   :  { %v1909_v62 = vmax.f32 %v912_v14, 0.0  ;;  %v1911_v22 = vmax.f32 %v1449_v48, 0.0  ;;  %v914_v63 = vadd.f32 %v913_v7, %v12978_v54  ;;  %v1451_v8 = vadd.f32 %v1450_v37, %v12980_v55 }
 0x192   :  { %v917_v13 = vpop.f32.mrf.mxu0  ;;  %1140 = vmatmul.mubr.bf16.gmra.mxu0 %v11956_v12  ;;  %v1454_v59 = vpop.f32.mrf.mxu1  ;;  %1677 = vmatmul.mubr.bf16.gmra.mxu1 %v11956_v12 }
 0x193   :  { %v13486_v15 = vpack.c.bf16 %v1909_v62, %v1905_v45  ;;  %v13488_v20 = vpack.c.bf16 %v1911_v22, %v1907_v56  ;;  %v1910_v36 = vmax.f32 %v914_v63, 0.0  ;;  %v1912_v29 = vmax.f32 %v1451_v8, 0.0  ;;  %1149 = vmatprep.mubr.bf16.mxu0 %v17960_v9  ;;  %1686 = vmatprep.mubr.bf16.mxu1 %v17960_v9  ;;  %v11957_v62 = vld [vmem:[%s17659_s0 + $0x178] sm:$0xff]  }
 0x194   :  { %v918_v43 = vadd.f32 %v917_v13, %v12970_v50  ;;  %v1455_v14 = vadd.f32 %v1454_v59, %v12974_v51  ;;  %v919_v28 = vpop.f32.mrf.mxu0  ;;  %v1456_v1 = vpop.f32.mrf.mxu1 }
 0x195   :  { %18005 = vst [vmem:[#allocation87_spill] sm:$0xff] %v13486_v15  ;;  %18006 = vst [vmem:[#allocation88_spill] sm:$0xff] %v13488_v20  ;;  %v13494_v48 = vpack.c.bf16 %v1910_v36, %v1906_v47  ;;  %v13496_v7 = vpack.c.bf16 %v1912_v29, %v1908_v21  ;;  %v920_v12 = vadd.f32 %v919_v28, %v12978_v54 }
 0x196   :  { %v1457_v45 = vadd.f32 %v1456_v1, %v12980_v55  ;;  %v921_v56 = vpop.f32.mrf.mxu0  ;;  %v1458_v37 = vpop.f32.mrf.mxu1  ;;  %v1913_v22 = vmax.f32 %v918_v43, 0.0  ;;  %v1915_v63 = vmax.f32 %v1455_v14, 0.0 }
 0x197   :  { %18007 = vst [vmem:[#allocation89_spill] sm:$0xff] %v13494_v48  ;;  %18008 = vst [vmem:[#allocation90_spill] sm:$0xff] %v13496_v7  ;;  %v922_v13 = vadd.f32 %v921_v56, %v12970_v50  ;;  %v1459_v59 = vadd.f32 %v1458_v37, %v12974_v51  ;;  %v1914_v1 = vmax.f32 %v920_v12, 0.0 }
 0x198   :  { %v923_v8 = vpop.f32.mrf.mxu0  ;;  %v1460_v47 = vpop.f32.mrf.mxu1  ;;  %v1916_v20 = vmax.f32 %v1457_v45, 0.0 }
 0x199   :  { %v1917_v21 = vmax.f32 %v922_v13, 0.0  ;;  %v1919_v36 = vmax.f32 %v1459_v59, 0.0  ;;  %v924_v29 = vadd.f32 %v923_v8, %v12978_v54  ;;  %v1461_v28 = vadd.f32 %v1460_v47, %v12980_v55 }
 0x19a   :  { %v927_v15 = vpop.f32.mrf.mxu0  ;;  %1150 = vmatmul.mubr.bf16.gmra.mxu0 %v11957_v62  ;;  %v1464_v7 = vpop.f32.mrf.mxu1  ;;  %1687 = vmatmul.mubr.bf16.gmra.mxu1 %v11957_v62 }
 0x19b   :  { %v13507_v48 = vpack.c.bf16 %v1917_v21, %v1913_v22  ;;  %v13509_v56 = vpack.c.bf16 %v1919_v36, %v1915_v63  ;;  %v1918_v43 = vmax.f32 %v924_v29, 0.0  ;;  %v1920_v14 = vmax.f32 %v1461_v28, 0.0  ;;  %1159 = vmatprep.mubr.bf16.mxu0 %v17960_v9  ;;  %1696 = vmatprep.mubr.bf16.mxu1 %v17960_v9  ;;  %v11964_v21 = vld [vmem:[%s17659_s0 + $0x180] sm:$0xff]  }
 0x19c   :  { %v928_v37 = vadd.f32 %v927_v15, %v12970_v50  ;;  %v1465_v13 = vadd.f32 %v1464_v7, %v12974_v51  ;;  %v929_v12 = vpop.f32.mrf.mxu0  ;;  %v1466_v45 = vpop.f32.mrf.mxu1 }
 0x19d   :  { %18009 = vst [vmem:[#allocation91_spill] sm:$0xff] %v13507_v48  ;;  %18010 = vst [vmem:[#allocation92_spill] sm:$0xff] %v13509_v56  ;;  %v13515_v59 = vpack.c.bf16 %v1918_v43, %v1914_v1  ;;  %v13517_v8 = vpack.c.bf16 %v1920_v14, %v1916_v20  ;;  %v930_v62 = vadd.f32 %v929_v12, %v12978_v54 }
 0x19e   :  { %v1467_v22 = vadd.f32 %v1466_v45, %v12980_v55  ;;  %v931_v63 = vpop.f32.mrf.mxu0  ;;  %v1468_v47 = vpop.f32.mrf.mxu1  ;;  %v1921_v36 = vmax.f32 %v928_v37, 0.0  ;;  %v1923_v29 = vmax.f32 %v1465_v13, 0.0 }
 0x19f   :  { %18011 = vst [vmem:[#allocation93_spill] sm:$0xff] %v13515_v59  ;;  %18012 = vst [vmem:[#allocation94_spill] sm:$0xff] %v13517_v8  ;;  %v932_v15 = vadd.f32 %v931_v63, %v12970_v50  ;;  %v1469_v7 = vadd.f32 %v1468_v47, %v12974_v51  ;;  %v1922_v45 = vmax.f32 %v930_v62, 0.0 }
 0x1a0   :  { %v933_v28 = vpop.f32.mrf.mxu0  ;;  %v1470_v1 = vpop.f32.mrf.mxu1  ;;  %v1924_v56 = vmax.f32 %v1467_v22, 0.0  ;;  %v11965_v22 = vld [vmem:[%s17659_s0 + $0x188] sm:$0xff]  }
 0x1a1   :  { %v1925_v20 = vmax.f32 %v932_v15, 0.0  ;;  %v1927_v43 = vmax.f32 %v1469_v7, 0.0  ;;  %v934_v14 = vadd.f32 %v933_v28, %v12978_v54  ;;  %v1471_v12 = vadd.f32 %v1470_v1, %v12980_v55 }
 0x1a2   :  { %v937_v48 = vpop.f32.mrf.mxu0  ;;  %v1474_v8 = vpop.f32.mrf.mxu1  ;;  %1160 = vmatmul.mubr.bf16.gmra.mxu0 %v11964_v21  ;;  %1697 = vmatmul.mubr.bf16.gmra.mxu1 %v11964_v21 }
 0x1a3   :  { %v13528_v59 = vpack.c.bf16 %v1925_v20, %v1921_v36  ;;  %v13530_v63 = vpack.c.bf16 %v1927_v43, %v1923_v29  ;;  %v1926_v37 = vmax.f32 %v934_v14, 0.0  ;;  %v1928_v13 = vmax.f32 %v1471_v12, 0.0  ;;  %1169 = vmatprep.mubr.bf16.mxu0 %v17960_v9  ;;  %1706 = vmatprep.mubr.bf16.mxu1 %v17960_v9  ;;  %v11972_v14 = vld [vmem:[%s17659_s0 + $0x190] sm:$0xff]  }
 0x1a4   :  { %v938_v47 = vpop.f32.mrf.mxu0  ;;  %v1475_v15 = vpop.f32.mrf.mxu1 }
 0x1a5   :  { %18013 = vst [vmem:[#allocation95_spill] sm:$0xff] %v13528_v59  ;;  %18014 = vst [vmem:[#allocation96_spill] sm:$0xff] %v13530_v63  ;;  %v13534_v7 = vpack.c.bf16 %v1926_v37, %v1922_v45  ;;  %v13536_v62 = vpack.c.bf16 %v1928_v13, %v1924_v56 }
 0x1a6   :  { %v939_v48 = vpop.f32.mrf.mxu0  ;;  %v1476_v8 = vpop.f32.mrf.mxu1 }
 0x1a7   :  { %18015 = vst [vmem:[#allocation97_spill] sm:$0xff] %v13534_v7  ;;  %18016 = vst [vmem:[#allocation98_spill] sm:$0xff] %v13536_v62 }
 0x1a8   :  { %v940_v21 = vpop.f32.mrf.mxu0  ;;  %v1477_v36 = vpop.f32.mrf.mxu1 }
 0x1aa   :  { %v943_v29 = vpop.f32.mrf.mxu0  ;;  %v1480_v28 = vpop.f32.mrf.mxu1  ;;  %1170 = vmatmul.mubr.bf16.gmra.mxu0 %v11965_v22  ;;  %1707 = vmatmul.mubr.bf16.gmra.mxu1 %v11965_v22  ;;  %v11973_v22 = vld [vmem:[%s17659_s0 + $0x198] sm:$0xff]  }
 0x1ab   :  { %1179 = vmatprep.mubr.bf16.mxu0 %v17960_v9  ;;  %1716 = vmatprep.mubr.bf16.mxu1 %v17960_v9 }
 0x1ac   :  { %v944_v1 = vpop.f32.mrf.mxu0  ;;  %v1481_v20 = vpop.f32.mrf.mxu1 }
 0x1ae   :  { %v945_v56 = vpop.f32.mrf.mxu0  ;;  %v1482_v43 = vpop.f32.mrf.mxu1 }
 0x1b0   :  { %v946_v12 = vpop.f32.mrf.mxu0  ;;  %v1483_v45 = vpop.f32.mrf.mxu1 }
 0x1b2   :  { %v949_v37 = vpop.f32.mrf.mxu0  ;;  %v1486_v13 = vpop.f32.mrf.mxu1  ;;  %1180 = vmatmul.mubr.bf16.gmra.mxu0 %v11972_v14  ;;  %1717 = vmatmul.mubr.bf16.gmra.mxu1 %v11972_v14 }
 0x1b3   :  { %1189 = vmatprep.mubr.bf16.mxu0 %v17960_v9  ;;  %1726 = vmatprep.mubr.bf16.mxu1 %v17960_v9 }
 0x1b4   :  { %v950_v47 = vpop.f32.mrf.mxu0  ;;  %v1487_v15 = vpop.f32.mrf.mxu1 }
 0x1b6   :  { %v951_v48 = vpop.f32.mrf.mxu0  ;;  %v1488_v8 = vpop.f32.mrf.mxu1 }
 0x1b8   :  { %v952_v21 = vpop.f32.mrf.mxu0  ;;  %v1489_v36 = vpop.f32.mrf.mxu1 }
 0x1ba   :  { %v955_v29 = vpop.f32.mrf.mxu0  ;;  %v1492_v28 = vpop.f32.mrf.mxu1  ;;  %1190 = vmatmul.mubr.bf16.gmra.mxu0 %v11973_v22  ;;  %1727 = vmatmul.mubr.bf16.gmra.mxu1 %v11973_v22 }
 0x1bc   :  { %v956_v1 = vpop.f32.mrf.mxu0  ;;  %v1493_v20 = vpop.f32.mrf.mxu1 }
 0x1be   :  { %v957_v56 = vpop.f32.mrf.mxu0  ;;  %v1494_v43 = vpop.f32.mrf.mxu1 }
 0x1c0   :  { %v958_v14 = vpop.f32.mrf.mxu0  ;;  %v1495_v12 = vpop.f32.mrf.mxu1 }
 0x1c2   :  { %v961_v45 = vpop.f32.mrf.mxu0  ;;  %v1498_v37 = vpop.f32.mrf.mxu1 }
 0x1c3   :  { %v962_v29 = vadd.f32 %v961_v45, %v12970_v50  ;;  %v1499_v28 = vadd.f32 %v1498_v37, %v12974_v51 }
 0x1c4   :  { %v963_v13 = vpop.f32.mrf.mxu0  ;;  %v1500_v47 = vpop.f32.mrf.mxu1 }
 0x1c5   :  { %v964_v8 = vadd.f32 %v963_v13, %v12978_v54  ;;  %v1501_v21 = vadd.f32 %v1500_v47, %v12980_v55  ;;  %v1929_v7 = vmax.f32 %v962_v29, 0.0 }
 0x1c6   :  { %v965_v15 = vpop.f32.mrf.mxu0  ;;  %v1502_v48 = vpop.f32.mrf.mxu1 }
 0x1c7   :  { %v966_v36 = vadd.f32 %v965_v15, %v12970_v50  ;;  %v1503_v22 = vadd.f32 %v1502_v48, %v12974_v51  ;;  %v1930_v59 = vmax.f32 %v964_v8, 0.0  ;;  %v1932_v47 = vmax.f32 %v1501_v21, 0.0 }
 0x1c8   :  { %v967_v1 = vpop.f32.mrf.mxu0  ;;  %v1504_v20 = vpop.f32.mrf.mxu1  ;;  %v1931_v48 = vmax.f32 %v1499_v28, 0.0 }
 0x1c9   :  { %v968_v56 = vadd.f32 %v967_v1, %v12978_v54  ;;  %v1505_v43 = vadd.f32 %v1504_v20, %v12980_v55  ;;  %v1933_v14 = vmax.f32 %v966_v36, 0.0  ;;  %v1935_v12 = vmax.f32 %v1503_v22, 0.0  ;;  %v11974_v1 = vld [vmem:[%s17660_s3 + $0x3b0] ss:$12 sps:$4 sm:$0xff]  }
 0x1ca   :  { %v971_v63 = vpop.f32.mrf.mxu0  ;;  %v1508_v13 = vpop.f32.mrf.mxu1  ;;  %v11975_v36 = vld [vmem:[%s17660_s3 + $0x530] ss:$12 sps:$4 sm:$0xff]  }
 0x1cb   :  { %v1934_v62 = vmax.f32 %v968_v56, 0.0  ;;  %v1936_v15 = vmax.f32 %v1505_v43, 0.0  ;;  %v13569_v8 = vpack.c.bf16 %v1933_v14, %v1929_v7  ;;  %v13571_v21 = vpack.c.bf16 %v1935_v12, %v1931_v48 }
 0x1cc   :  { %v973_v23 = vpop.f32.mrf.mxu0  ;;  %v1510_v45 = vpop.f32.mrf.mxu1  ;;  %v972_v56 = vadd.f32 %v971_v63, %v12970_v50  ;;  %v1509_v7 = vadd.f32 %v1508_v13, %v12974_v51 }
 0x1cd   :  { %v13559_v44 = vpack.c.bf16 %v1934_v62, %v1930_v59  ;;  %v13561_v37 = vpack.c.bf16 %v1936_v15, %v1932_v47  ;;  %v974_v22 = vadd.f32 %v973_v23, %v12978_v54  ;;  %v1511_v59 = vadd.f32 %v1510_v45, %v12980_v55  ;;  %v11976_v47 = vld [vmem:[%s17660_s3 + $0x398] ss:$12 sps:$4 sm:$0xff]  }
 0x1ce   :  { %v975_v29 = vpop.f32.mrf.mxu0  ;;  %v1512_v28 = vpop.f32.mrf.mxu1  ;;  %v11977_v45 = vld [vmem:[%s17660_s3 + $0x518] ss:$12 sps:$4 sm:$0xff]  }
 0x1cf   :  { %v976_v62 = vadd.f32 %v975_v29, %v12970_v50  ;;  %v1513_v20 = vadd.f32 %v1512_v28, %v12974_v51  ;;  %3113 = vmatprep.mubr.bf16.mxu0 %v13559_v44  ;;  %3346 = vmatprep.mubr.bf16.mxu1 %v13561_v37  ;;  %v1938_v29 = vmax.f32 %v974_v22, 0.0  ;;  %v1940_v28 = vmax.f32 %v1511_v59, 0.0 }
 0x1d0   :  { %v977_v43 = vpop.f32.mrf.mxu0  ;;  %v1514_v14 = vpop.f32.mrf.mxu1  ;;  %3114 = vmatmul.mubr.bf16.vlgmr.msra.gmra.mxu0 %v13569_v8  ;;  %3347 = vmatmul.mubr.bf16.vlgmr.msra.gmra.mxu1 %v13571_v21 }
 0x1d1   :  { %v978_v23 = vadd.f32 %v977_v43, %v12978_v54  ;;  %v1515_v12 = vadd.f32 %v1514_v14, %v12980_v55  ;;  %3548 = vmatpush1.bf16.msra.mxu0 %v11974_v1  ;;  %3741 = vmatpush1.bf16.msra.mxu1 %v11975_v36  ;;  %v1941_v15 = vmax.f32 %v976_v62, 0.0  ;;  %v1943_v63 = vmax.f32 %v1513_v20, 0.0 }
 0x1d2   :  { %v981_v48 = vpop.f32.mrf.mxu0  ;;  %v1518_v13 = vpop.f32.mrf.mxu1  ;;  %3549 = vmatprep.subr.bf16.mxu0 %v17960_v9  ;;  %3742 = vmatprep.subr.bf16.mxu1 %v17960_v9  ;;  %v1937_v43 = vmax.f32 %v972_v56, 0.0  ;;  %v1939_v14 = vmax.f32 %v1509_v7, 0.0  ;;  %v11979_v7 = vld [vmem:[%s17660_s3 + $0x500] ss:$12 sps:$4 sm:$0xff]  }
 0x1d3   :  { %v1942_v1 = vmax.f32 %v978_v23, 0.0  ;;  %v1944_v36 = vmax.f32 %v1515_v12, 0.0 }
 0x1d4   :  { %v983_v42 = vpop.f32.mrf.mxu0  ;;  %v1520_v11 = vpop.f32.mrf.mxu1  ;;  %v13600_v33 = vpack.c.bf16 %v1941_v15, %v1937_v43  ;;  %v13602_v30 = vpack.c.bf16 %v1943_v63, %v1939_v14  ;;  %v1519_v15 = vadd.f32 %v1518_v13, %v12974_v51  ;;  %v11981_v43 = vld [vmem:[%s17660_s3 + $0x4e8] ss:$12 sps:$4 sm:$0xff]  }
 0x1d5   :  { %v13593_v62 = vpack.c.bf16 %v1942_v1, %v1938_v29  ;;  %v13595_v20 = vpack.c.bf16 %v1944_v36, %v1940_v28  ;;  %3550 = vmatpush1.bf16.msra.mxu0 %v11976_v47  ;;  %v984_v22 = vadd.f32 %v983_v42, %v12978_v54  ;;  %3743 = vmatpush1.bf16.msra.mxu1 %v11977_v45  ;;  %v11980_v28 = vld [vmem:[%s17660_s3 + $0x368] ss:$12 sps:$4 sm:$0xff]  }
 0x1d6   :  { %v985_v59 = vpop.f32.mrf.mxu0  ;;  %v1522_v56 = vpop.f32.mrf.mxu1  ;;  %3551 = vmatprep.subr.bf16.mxu0 %v17960_v9  ;;  %v1521_v23 = vadd.f32 %v1520_v11, %v12980_v55  ;;  %v982_v42 = vadd.f32 %v981_v48, %v12970_v50  ;;  %3744 = vmatprep.subr.bf16.mxu1 %v17960_v9 }
 0x1d7   :  { %v986_v12 = vadd.f32 %v985_v59, %v12970_v50  ;;  %v1523_v47 = vadd.f32 %v1522_v56, %v12974_v51  ;;  %3123 = vmatprep.mubr.bf16.mxu0 %v13593_v62  ;;  %3356 = vmatprep.mubr.bf16.mxu1 %v13595_v20  ;;  %v1946_v14 = vmax.f32 %v984_v22, 0.0 }
 0x1d8   :  { %v987_v63 = vpop.f32.mrf.mxu0  ;;  %v1524_v45 = vpop.f32.mrf.mxu1  ;;  %3124 = vmatmul.mubr.bf16.gmra.mxu0 %v13600_v33  ;;  %3357 = vmatmul.mubr.bf16.gmra.mxu1 %v13602_v30  ;;  %v1948_v59 = vmax.f32 %v1521_v23, 0.0 }
 0x1d9   :  { %v988_v11 = vadd.f32 %v987_v63, %v12978_v54  ;;  %v1525_v29 = vadd.f32 %v1524_v45, %v12980_v55  ;;  %3552 = vmatpush1.bf16.msra.mxu0 %v11978_v10  ;;  %v1949_v48 = vmax.f32 %v986_v12, 0.0  ;;  %v1951_v1 = vmax.f32 %v1523_v47, 0.0  ;;  %3745 = vmatpush1.bf16.msra.mxu1 %v11979_v7  ;;  %v11982_v7 = vld [vmem:[%s17660_s3 + $0x350] ss:$12 sps:$4 sm:$0xff]  }
 0x1da   :  { %v991_v13 = vpop.f32.mrf.mxu0  ;;  %v1528_v36 = vpop.f32.mrf.mxu1  ;;  %3553 = vmatprep.subr.bf16.mxu0 %v17960_v9  ;;  %3746 = vmatprep.subr.bf16.mxu1 %v17960_v9  ;;  %v1945_v10 = vmax.f32 %v982_v42, 0.0  ;;  %v1947_v45 = vmax.f32 %v1519_v15, 0.0  ;;  %v11983_v15 = vld [vmem:[%s17660_s3 + $0x4d0] ss:$12 sps:$4 sm:$0xff]  }
 0x1db   :  { %v1950_v56 = vmax.f32 %v988_v11, 0.0  ;;  %v1952_v63 = vmax.f32 %v1525_v29, 0.0 }
 0x1dc   :  { %v993_v60 = vpop.f32.mrf.mxu0  ;;  %v1530_v12 = vpop.f32.mrf.mxu1  ;;  %v13636_v27 = vpack.c.bf16 %v1949_v48, %v1945_v10  ;;  %v13638_v22 = vpack.c.bf16 %v1951_v1, %v1947_v45  ;;  %v1529_v1 = vadd.f32 %v1528_v36, %v12974_v51 }
 0x1dd   :  { %v13629_v47 = vpack.c.bf16 %v1950_v56, %v1946_v14  ;;  %v13631_v61 = vpack.c.bf16 %v1952_v63, %v1948_v59  ;;  %3554 = vmatpush1.bf16.msra.mxu0 %v11980_v28  ;;  %v994_v23 = vadd.f32 %v993_v60, %v12978_v54  ;;  %3747 = vmatpush1.bf16.msra.mxu1 %v11981_v43  ;;  %v11984_v63 = vld [vmem:[%s17660_s3 + $0x338] ss:$12 sps:$4 sm:$0xff]  }
 0x1de   :  { %v995_v11 = vpop.f32.mrf.mxu0  ;;  %v1532_v42 = vpop.f32.mrf.mxu1  ;;  %3555 = vmatprep.subr.bf16.mxu0 %v17960_v9  ;;  %v1531_v29 = vadd.f32 %v1530_v12, %v12980_v55  ;;  %v992_v60 = vadd.f32 %v991_v13, %v12970_v50  ;;  %3748 = vmatprep.subr.bf16.mxu1 %v17960_v9  ;;  %v11985_v12 = vld [vmem:[%s17660_s3 + $0x4b8] ss:$12 sps:$4 sm:$0xff]   ;;  %v1955_v24 = vmax.f32 %v1529_v1, 0.0  ;;  %v11987_v1 = vld [vmem:[%s17660_s3 + $0x4a0] ss:$12 sps:$4 sm:$0xff]  }
 0x1df   :  { %v996_v28 = vadd.f32 %v995_v11, %v12970_v50  ;;  %v1533_v48 = vadd.f32 %v1532_v42, %v12974_v51  ;;  %3133 = vmatprep.mubr.bf16.mxu0 %v13629_v47  ;;  %3366 = vmatprep.mubr.bf16.mxu1 %v13631_v61  ;;  %v1954_v11 = vmax.f32 %v994_v23, 0.0 }
 0x1e0   :  { %v997_v43 = vpop.f32.mrf.mxu0  ;;  %v1534_v14 = vpop.f32.mrf.mxu1  ;;  %3134 = vmatmul.mubr.bf16.gmra.mxu0 %v13636_v27  ;;  %3367 = vmatmul.mubr.bf16.gmra.mxu1 %v13638_v22  ;;  %v1956_v42 = vmax.f32 %v1531_v29, 0.0 }
 0x1e1   :  { %v998_v59 = vadd.f32 %v997_v43, %v12978_v54  ;;  %v1535_v56 = vadd.f32 %v1534_v14, %v12980_v55  ;;  %3556 = vmatpush1.bf16.msra.mxu0 %v11982_v7  ;;  %v1957_v13 = vmax.f32 %v996_v28, 0.0  ;;  %v1959_v10 = vmax.f32 %v1533_v48, 0.0  ;;  %3749 = vmatpush1.bf16.msra.mxu1 %v11983_v15  ;;  %v11986_v15 = vld [vmem:[%s17660_s3 + $0x320] ss:$12 sps:$4 sm:$0xff]  }
 0x1e2   :  { %v1001_v36 = vpop.f32.mrf.mxu0  ;;  %v1538_v45 = vpop.f32.mrf.mxu1  ;;  %3557 = vmatprep.subr.bf16.mxu0 %v17960_v9  ;;  %3750 = vmatprep.subr.bf16.mxu1 %v17960_v9  ;;  %v1953_v7 = vmax.f32 %v992_v60, 0.0 }
 0x1e3   :  { %v1958_v43 = vmax.f32 %v998_v59, 0.0  ;;  %v1960_v14 = vmax.f32 %v1535_v56, 0.0  ;;  %v13674_v23 = vpack.c.bf16 %v1959_v10, %v1955_v24  ;;  %v1002_v24 = vadd.f32 %v1001_v36, %v12970_v50 }
 0x1e4   :  { %v1003_v41 = vpop.f32.mrf.mxu0  ;;  %v1540_v28 = vpop.f32.mrf.mxu1  ;;  %v13672_v35 = vpack.c.bf16 %v1957_v13, %v1953_v7 }
 0x1e5   :  { %v13665_v48 = vpack.c.bf16 %v1958_v43, %v1954_v11  ;;  %v13667_v40 = vpack.c.bf16 %v1960_v14, %v1956_v42  ;;  %3558 = vmatpush1.bf16.msra.mxu0 %v11984_v63  ;;  %v1004_v29 = vadd.f32 %v1003_v41, %v12978_v54  ;;  %3751 = vmatpush1.bf16.msra.mxu1 %v11985_v12  ;;  %v11988_v43 = vld [vmem:[%s17660_s3 + $0x308] ss:$12 sps:$4 sm:$0xff]  }
 0x1e6   :  { %v1005_v59 = vpop.f32.mrf.mxu0  ;;  %v1542_v60 = vpop.f32.mrf.mxu1  ;;  %3559 = vmatprep.subr.bf16.mxu0 %v17960_v9  ;;  %v1541_v56 = vadd.f32 %v1540_v28, %v12980_v55  ;;  %v1539_v41 = vadd.f32 %v1538_v45, %v12974_v51  ;;  %3752 = vmatprep.subr.bf16.mxu1 %v17960_v9  ;;  %v11989_v28 = vld [vmem:[%s17660_s3 + $0x488] ss:$12 sps:$4 sm:$0xff]  }
 0x1e7   :  { %v1006_v63 = vadd.f32 %v1005_v59, %v12970_v50  ;;  %v1543_v13 = vadd.f32 %v1542_v60, %v12974_v51  ;;  %3143 = vmatprep.mubr.bf16.mxu0 %v13665_v48  ;;  %3376 = vmatprep.mubr.bf16.mxu1 %v13667_v40  ;;  %v1962_v59 = vmax.f32 %v1004_v29, 0.0 }
 0x1e8   :  { %v1007_v10 = vpop.f32.mrf.mxu0  ;;  %v1544_v12 = vpop.f32.mrf.mxu1  ;;  %3144 = vmatmul.mubr.bf16.gmra.mxu0 %v13672_v35  ;;  %3377 = vmatmul.mubr.bf16.gmra.mxu1 %v13674_v23  ;;  %v1964_v60 = vmax.f32 %v1541_v56, 0.0  ;;  %v1963_v34 = vmax.f32 %v1539_v41, 0.0  ;;  %v11991_v41 = vld [vmem:[%s17660_s3 + $0x5f0] ss:$12 sps:$4 sm:$0xff]  }
 0x1e9   :  { %v1008_v11 = vadd.f32 %v1007_v10, %v12978_v54  ;;  %v1545_v42 = vadd.f32 %v1544_v12, %v12980_v55  ;;  %3560 = vmatpush1.bf16.msra.mxu0 %v11986_v15  ;;  %v1965_v36 = vmax.f32 %v1006_v63, 0.0  ;;  %v1967_v14 = vmax.f32 %v1543_v13, 0.0  ;;  %3753 = vmatpush1.bf16.msra.mxu1 %v11987_v1  ;;  %v11990_v1 = vld [vmem:[%s17660_s3 + $0x470] ss:$12 sps:$4 sm:$0xff]  }
 0x1ea   :  { %v1011_v45 = vpop.f32.mrf.mxu0  ;;  %v1548_v7 = vpop.f32.mrf.mxu1  ;;  %3561 = vmatprep.subr.bf16.mxu0 %v17960_v9  ;;  %3754 = vmatprep.subr.bf16.mxu1 %v17960_v9  ;;  %v1961_v15 = vmax.f32 %v1002_v24, 0.0 }
 0x1eb   :  { %v1966_v10 = vmax.f32 %v1008_v11, 0.0  ;;  %v1968_v12 = vmax.f32 %v1545_v42, 0.0  ;;  %v13710_v29 = vpack.c.bf16 %v1967_v14, %v1963_v34  ;;  %v1012_v34 = vadd.f32 %v1011_v45, %v12970_v50 }
 0x1ec   :  { %v1013_v49 = vpop.f32.mrf.mxu0  ;;  %v1550_v63 = vpop.f32.mrf.mxu1  ;;  %v13708_v53 = vpack.c.bf16 %v1965_v36, %v1961_v15 }
 0x1ed   :  { %v13701_v13 = vpack.c.bf16 %v1966_v10, %v1962_v59  ;;  %v13703_v46 = vpack.c.bf16 %v1968_v12, %v1964_v60  ;;  %3562 = vmatpush1.bf16.msra.mxu0 %v11988_v43  ;;  %18020 = vst [vmem:[#allocation102_spill] sm:$0xff] %v13710_v29  ;;  %v1014_v56 = vadd.f32 %v1013_v49, %v12978_v54  ;;  %v11992_v10 = vld [vmem:[%s17660_s3 + $0x458] ss:$12 sps:$4 sm:$0xff]  }
 0x1ee   :  { %18019 = vst [vmem:[#allocation101_spill] sm:$0xff] %v13708_v53  ;;  %v1015_v11 = vpop.f32.mrf.mxu0  ;;  %v1552_v24 = vpop.f32.mrf.mxu1  ;;  %3755 = vmatpush1.bf16.msra.mxu1 %v11989_v28  ;;  %3563 = vmatprep.subr.bf16.mxu0 %v17960_v9  ;;  %v1551_v42 = vadd.f32 %v1550_v63, %v12980_v55  ;;  %v1549_v49 = vadd.f32 %v1548_v7, %v12974_v51  ;;  %v11993_v63 = vld [vmem:[%s17660_s3 + $0x5d8] ss:$12 sps:$4 sm:$0xff]  }
 0x1ef   :  { %18017 = vst [vmem:[#allocation99_spill] sm:$0xff] %v13701_v13  ;;  %18018 = vst [vmem:[#allocation100_spill] sm:$0xff] %v13703_v46  ;;  %v1016_v43 = vadd.f32 %v1015_v11, %v12970_v50  ;;  %v1553_v36 = vadd.f32 %v1552_v24, %v12974_v51  ;;  %3153 = vmatprep.mubr.bf16.mxu0 %v13701_v13  ;;  %3386 = vmatprep.mubr.bf16.mxu1 %v13703_v46  ;;  %v1970_v11 = vmax.f32 %v1014_v56, 0.0 }
 0x1f0   :  { %v1017_v14 = vpop.f32.mrf.mxu0  ;;  %v1554_v28 = vpop.f32.mrf.mxu1  ;;  %3154 = vmatmul.mubr.bf16.gmra.mxu0 %v13708_v53  ;;  %3387 = vmatmul.mubr.bf16.gmra.mxu1 %v13710_v29  ;;  %v1972_v24 = vmax.f32 %v1551_v42, 0.0  ;;  %v1971_v52 = vmax.f32 %v1549_v49, 0.0  ;;  %v11995_v49 = vld [vmem:[%s17660_s3 + $0x5c0] ss:$12 sps:$4 sm:$0xff]  }
 0x1f1   :  { %v1018_v59 = vadd.f32 %v1017_v14, %v12978_v54  ;;  %v1555_v60 = vadd.f32 %v1554_v28, %v12980_v55  ;;  %3756 = vmatprep.subr.bf16.mxu1 %v17960_v9  ;;  %3564 = vmatpush2.bf16.msra.mxu0 %v11990_v1  ;;  %v1973_v45 = vmax.f32 %v1016_v43, 0.0  ;;  %v1975_v12 = vmax.f32 %v1553_v36, 0.0 }
 0x1f2   :  { %v1021_v7 = vpop.f32.mrf.mxu0  ;;  %v1558_v15 = vpop.f32.mrf.mxu1  ;;  %3757 = vmatpush2.bf16.msra.mxu1 %v11991_v41  ;;  %3565 = vmatprep.subr.bf16.mxu0 %v17960_v9  ;;  %v1969_v1 = vmax.f32 %v1012_v34, 0.0  ;;  %v11994_v41 = vld [vmem:[%s17660_s3 + $0x440] ss:$12 sps:$4 sm:$0xff]  }
 0x1f3   :  { %v1974_v14 = vmax.f32 %v1018_v59, 0.0  ;;  %v1976_v28 = vmax.f32 %v1555_v60, 0.0  ;;  %3758 = vmatprep.subr.bf16.mxu1 %v17960_v9  ;;  %v13746_v56 = vpack.c.bf16 %v1975_v12, %v1971_v52  ;;  %v1022_v52 = vadd.f32 %v1021_v7, %v12970_v50 }
 0x1f4   :  { %v1023_v2 = vpop.f32.mrf.mxu0  ;;  %v1560_v43 = vpop.f32.mrf.mxu1  ;;  %v13744_v4 = vpack.c.bf16 %v1973_v45, %v1969_v1 }
 0x1f5   :  { %v13737_v36 = vpack.c.bf16 %v1974_v14, %v1970_v11  ;;  %v13739_v0 = vpack.c.bf16 %v1976_v28, %v1972_v24  ;;  %3566 = vmatpush2.bf16.msra.mxu0 %v11992_v10  ;;  %18024 = vst [vmem:[#allocation106_spill] sm:$0xff] %v13746_v56  ;;  %v1024_v42 = vadd.f32 %v1023_v2, %v12978_v54  ;;  %v11996_v14 = vld [vmem:[%s17660_s3 + $0x428] ss:$12 sps:$4 sm:$0xff]  }
 0x1f6   :  { %18023 = vst [vmem:[#allocation105_spill] sm:$0xff] %v13744_v4  ;;  %v1025_v59 = vpop.f32.mrf.mxu0  ;;  %v1562_v34 = vpop.f32.mrf.mxu1  ;;  %3759 = vmatpush2.bf16.msra.mxu1 %v11993_v63  ;;  %3567 = vmatprep.subr.bf16.mxu0 %v17960_v9  ;;  %v1561_v60 = vadd.f32 %v1560_v43, %v12980_v55  ;;  %v1559_v2 = vadd.f32 %v1558_v15, %v12974_v51  ;;  %v11997_v43 = vld [vmem:[%s17660_s3 + $0x5a8] ss:$12 sps:$4 sm:$0xff]  }
 0x1f7   :  { %18021 = vst [vmem:[#allocation103_spill] sm:$0xff] %v13737_v36  ;;  %18022 = vst [vmem:[#allocation104_spill] sm:$0xff] %v13739_v0  ;;  %v1026_v10 = vadd.f32 %v1025_v59, %v12970_v50  ;;  %v1563_v45 = vadd.f32 %v1562_v34, %v12974_v51  ;;  %3163 = vmatprep.mubr.bf16.mxu0 %v13737_v36  ;;  %3396 = vmatprep.mubr.bf16.mxu1 %v13739_v0  ;;  %v1978_v59 = vmax.f32 %v1024_v42, 0.0 }
 0x1f8   :  { %v1027_v12 = vpop.f32.mrf.mxu0  ;;  %v1564_v63 = vpop.f32.mrf.mxu1  ;;  %3164 = vmatmul.mubr.bf16.gmra.mxu0 %v13744_v4  ;;  %3397 = vmatmul.mubr.bf16.gmra.mxu1 %v13746_v56  ;;  %v1980_v34 = vmax.f32 %v1561_v60, 0.0  ;;  %v1979_v3 = vmax.f32 %v1559_v2, 0.0  ;;  %v11999_v2 = vld [vmem:[%s17660_s3 + $0x590] ss:$12 sps:$4 sm:$0xff]  }
 0x1f9   :  { %v1028_v11 = vadd.f32 %v1027_v12, %v12978_v54  ;;  %v1565_v24 = vadd.f32 %v1564_v63, %v12980_v55  ;;  %3760 = vmatprep.subr.bf16.mxu1 %v17960_v9  ;;  %3568 = vmatpush2.bf16.msra.mxu0 %v11994_v41  ;;  %v1981_v7 = vmax.f32 %v1026_v10, 0.0  ;;  %v1983_v28 = vmax.f32 %v1563_v45, 0.0 }
 0x1fa   :  { %v1031_v15 = vpop.f32.mrf.mxu0  ;;  %v1568_v1 = vpop.f32.mrf.mxu1  ;;  %3761 = vmatpush2.bf16.msra.mxu1 %v11995_v49  ;;  %3569 = vmatprep.subr.bf16.mxu0 %v17960_v9  ;;  %v1977_v41 = vmax.f32 %v1022_v52, 0.0  ;;  %v11998_v49 = vld [vmem:[%s17660_s3 + $0x410] ss:$12 sps:$4 sm:$0xff]  }
 0x1fb   :  { %v1982_v12 = vmax.f32 %v1028_v11, 0.0  ;;  %v1984_v63 = vmax.f32 %v1565_v24, 0.0  ;;  %3762 = vmatprep.subr.bf16.mxu1 %v17960_v9  ;;  %v13782_v42 = vpack.c.bf16 %v1983_v28, %v1979_v3  ;;  %v1032_v3 = vadd.f32 %v1031_v15, %v12970_v50 }
 0x1fc   :  { %v1033_v19 = vpop.f32.mrf.mxu0  ;;  %v1570_v10 = vpop.f32.mrf.mxu1  ;;  %v13780_v26 = vpack.c.bf16 %v1981_v7, %v1977_v41 }
 0x1fd   :  { %v13773_v45 = vpack.c.bf16 %v1982_v12, %v1978_v59  ;;  %v13775_v18 = vpack.c.bf16 %v1984_v63, %v1980_v34  ;;  %3570 = vmatpush2.bf16.msra.mxu0 %v11996_v14  ;;  %18028 = vst [vmem:[#allocation110_spill] sm:$0xff] %v13782_v42  ;;  %v1034_v60 = vadd.f32 %v1033_v19, %v12978_v54  ;;  %v12000_v12 = vld [vmem:[%s17660_s3 + $0x3f8] ss:$12 sps:$4 sm:$0xff]  }
 0x1fe   :  { %18027 = vst [vmem:[#allocation109_spill] sm:$0xff] %v13780_v26  ;;  %v1035_v11 = vpop.f32.mrf.mxu0  ;;  %v1572_v52 = vpop.f32.mrf.mxu1  ;;  %3763 = vmatpush2.bf16.msra.mxu1 %v11997_v43  ;;  %3571 = vmatprep.subr.bf16.mxu0 %v17960_v9  ;;  %v1571_v24 = vadd.f32 %v1570_v10, %v12980_v55  ;;  %v1569_v19 = vadd.f32 %v1568_v1, %v12974_v51  ;;  %v12001_v10 = vld [vmem:[%s17660_s3 + $0x578] ss:$12 sps:$4 sm:$0xff]  }
 0x1ff   :  { %18025 = vst [vmem:[#allocation107_spill] sm:$0xff] %v13773_v45  ;;  %18026 = vst [vmem:[#allocation108_spill] sm:$0xff] %v13775_v18  ;;  %v1036_v14 = vadd.f32 %v1035_v11, %v12970_v50  ;;  %v1573_v7 = vadd.f32 %v1572_v52, %v12974_v51  ;;  %3173 = vmatprep.mubr.bf16.mxu0 %v13773_v45  ;;  %3406 = vmatprep.mubr.bf16.mxu1 %v13775_v18  ;;  %v1986_v11 = vmax.f32 %v1034_v60, 0.0 }
 0x200   :  { %v1037_v28 = vpop.f32.mrf.mxu0  ;;  %v1574_v43 = vpop.f32.mrf.mxu1  ;;  %3174 = vmatmul.mubr.bf16.gmra.mxu0 %v13780_v26  ;;  %3407 = vmatmul.mubr.bf16.gmra.mxu1 %v13782_v42  ;;  %v1988_v52 = vmax.f32 %v1571_v24, 0.0  ;;  %v1987_v25 = vmax.f32 %v1569_v19, 0.0  ;;  %v12003_v19 = vld [vmem:[%s17660_s3 + $0x560] ss:$12 sps:$4 sm:$0xff]  }
 0x201   :  { %v1038_v59 = vadd.f32 %v1037_v28, %v12978_v54  ;;  %v1575_v34 = vadd.f32 %v1574_v43, %v12980_v55  ;;  %3764 = vmatprep.subr.bf16.mxu1 %v17960_v9  ;;  %3572 = vmatpush2.bf16.msra.mxu0 %v11998_v49  ;;  %v1989_v15 = vmax.f32 %v1036_v14, 0.0  ;;  %v1991_v63 = vmax.f32 %v1573_v7, 0.0 }
 0x202   :  { %v1041_v1 = vpop.f32.mrf.mxu0  ;;  %v1578_v41 = vpop.f32.mrf.mxu1  ;;  %3765 = vmatpush2.bf16.msra.mxu1 %v11999_v2  ;;  %3573 = vmatprep.subr.bf16.mxu0 %v17960_v9  ;;  %v1985_v49 = vmax.f32 %v1032_v3, 0.0  ;;  %v12002_v2 = vld [vmem:[%s17660_s3 + $0x3e0] ss:$12 sps:$4 sm:$0xff]  }
 0x203   :  { %v1990_v28 = vmax.f32 %v1038_v59, 0.0  ;;  %v1992_v43 = vmax.f32 %v1575_v34, 0.0  ;;  %3766 = vmatprep.subr.bf16.mxu1 %v17960_v9  ;;  %v13818_v60 = vpack.c.bf16 %v1991_v63, %v1987_v25  ;;  %v1042_v25 = vadd.f32 %v1041_v1, %v12970_v50 }
 0x204   :  { %v1043_v39 = vpop.f32.mrf.mxu0  ;;  %v1580_v14 = vpop.f32.mrf.mxu1  ;;  %v13816_v58 = vpack.c.bf16 %v1989_v15, %v1985_v49 }
 0x205   :  { %v13809_v7 = vpack.c.bf16 %v1990_v28, %v1986_v11  ;;  %v13811_v38 = vpack.c.bf16 %v1992_v43, %v1988_v52  ;;  %3574 = vmatpush2.bf16.msra.mxu0 %v12000_v12  ;;  %18032 = vst [vmem:[#allocation114_spill] sm:$0xff] %v13818_v60  ;;  %v1044_v24 = vadd.f32 %v1043_v39, %v12978_v54  ;;  %v12004_v28 = vld [vmem:[%s17660_s3 + $0x3c8] ss:$12 sps:$4 sm:$0xff]  }
 0x206   :  { %18031 = vst [vmem:[#allocation113_spill] sm:$0xff] %v13816_v58  ;;  %v1045_v59 = vpop.f32.mrf.mxu0  ;;  %v1582_v3 = vpop.f32.mrf.mxu1  ;;  %3767 = vmatpush2.bf16.msra.mxu1 %v12001_v10  ;;  %3575 = vmatprep.subr.bf16.mxu0 %v17960_v9  ;;  %v1581_v34 = vadd.f32 %v1580_v14, %v12980_v55  ;;  %v1579_v39 = vadd.f32 %v1578_v41, %v12974_v51  ;;  %v12005_v14 = vld [vmem:[%s17660_s3 + $0x548] ss:$12 sps:$4 sm:$0xff]  }
 0x207   :  { %18029 = vst [vmem:[#allocation111_spill] sm:$0xff] %v13809_v7  ;;  %18030 = vst [vmem:[#allocation112_spill] sm:$0xff] %v13811_v38  ;;  %v1046_v12 = vadd.f32 %v1045_v59, %v12970_v50  ;;  %v1583_v15 = vadd.f32 %v1582_v3, %v12974_v51  ;;  %3183 = vmatprep.mubr.bf16.mxu0 %v13809_v7  ;;  %3416 = vmatprep.mubr.bf16.mxu1 %v13811_v38  ;;  %v12008_v59 = vld [vmem:[%s17660_s3 + $0xac] ss:$12 sps:$4 sm:$0xff]  }
 0x208   :  { %v1047_v63 = vpop.f32.mrf.mxu0  ;;  %v1584_v10 = vpop.f32.mrf.mxu1  ;;  %3184 = vmatmul.mubr.bf16.gmra.mxu0 %v13816_v58  ;;  %3417 = vmatmul.mubr.bf16.gmra.mxu1 %v13818_v60  ;;  %v1996_v3 = vmax.f32 %v1581_v34, 0.0 }
 0x209   :  { %v1048_v11 = vadd.f32 %v1047_v63, %v12978_v54  ;;  %v1585_v52 = vadd.f32 %v1584_v10, %v12980_v55  ;;  %3768 = vmatprep.subr.bf16.mxu1 %v17960_v9  ;;  %3576 = vmatpush2.bf16.msra.mxu0 %v12002_v2  ;;  %v1997_v1 = vmax.f32 %v1046_v12, 0.0  ;;  %v1999_v43 = vmax.f32 %v1583_v15, 0.0 }
 0x20a   :  { %v1051_v41 = vpop.f32.mrf.mxu0  ;;  %v1588_v49 = vpop.f32.mrf.mxu1  ;;  %3769 = vmatpush2.bf16.msra.mxu1 %v12003_v19  ;;  %3577 = vmatprep.subr.bf16.mxu0 %v17960_v9  ;;  %v1994_v2 = vmax.f32 %v1044_v24, 0.0  ;;  %v1993_v12 = vmax.f32 %v1042_v25, 0.0  ;;  %v1995_v15 = vmax.f32 %v1579_v39, 0.0 }
 0x20b   :  { %v1998_v63 = vmax.f32 %v1048_v11, 0.0  ;;  %v2000_v10 = vmax.f32 %v1585_v52, 0.0  ;;  %3770 = vmatprep.subr.bf16.mxu1 %v17960_v9 }
 0x20c   :  { %v1053_v57 = vpop.f32.mrf.mxu0  ;;  %v1590_v19 = vpop.f32.mrf.mxu1  ;;  %v13855_v16 = vpack.c.bf16 %v1997_v1, %v1993_v12  ;;  %v13857_v24 = vpack.c.bf16 %v1999_v43, %v1995_v15  ;;  %v1052_v1 = vadd.f32 %v1051_v41, %v12970_v50  ;;  %v1589_v43 = vadd.f32 %v1588_v49, %v12974_v51 }
 0x20d   :  { %v13848_v6 = vpack.c.bf16 %v1998_v63, %v1994_v2  ;;  %v13850_v5 = vpack.c.bf16 %v2000_v10, %v1996_v3  ;;  %3578 = vmatpush2.bf16.msra.mxu0 %v12004_v28  ;;  %v1054_v34 = vadd.f32 %v1053_v57, %v12978_v54  ;;  %v1591_v39 = vadd.f32 %v1590_v19, %v12980_v55 }
 0x20e   :  { %18035 = vst [vmem:[#allocation117_spill] sm:$0xff] %v13855_v16  ;;  %18036 = vst [vmem:[#allocation118_spill] sm:$0xff] %v13857_v24  ;;  %v1055_v11 = vpop.f32.mrf.mxu0  ;;  %v1592_v25 = vpop.f32.mrf.mxu1  ;;  %3771 = vmatpush2.bf16.msra.mxu1 %v12005_v14  ;;  %4445 = vmatprep.subr.bf16.mxu0 %v12008_v59  ;;  %v2001_v49 = vmax.f32 %v1052_v1, 0.0 }
 0x20f   :  { %18033 = vst [vmem:[#allocation115_spill] sm:$0xff] %v13848_v6  ;;  %18034 = vst [vmem:[#allocation116_spill] sm:$0xff] %v13850_v5  ;;  %v1056_v52 = vadd.f32 %v1055_v11, %v12970_v50  ;;  %v1593_v28 = vadd.f32 %v1592_v25, %v12974_v51  ;;  %3193 = vmatprep.mubr.bf16.mxu0 %v13848_v6  ;;  %3426 = vmatprep.mubr.bf16.mxu1 %v13850_v5  ;;  %v2002_v15 = vmax.f32 %v1054_v34, 0.0 }
 0x210   :  { %v1057_v2 = vpop.f32.mrf.mxu0  ;;  %v1594_v57 = vpop.f32.mrf.mxu1  ;;  %3194 = vmatmul.mubr.bf16.gmra.mxu0 %v13855_v16  ;;  %3427 = vmatmul.mubr.bf16.gmra.mxu1 %v13857_v24  ;;  %v2004_v19 = vmax.f32 %v1591_v39, 0.0  ;;  %v2003_v25 = vmax.f32 %v1589_v43, 0.0 }
 0x211   :  { %v1058_v14 = vadd.f32 %v1057_v2, %v12978_v54  ;;  %v1595_v59 = vadd.f32 %v1594_v57, %v12980_v55  ;;  %4678 = vmatprep.subr.bf16.mxu1 %v12011_v17  ;;  %v2005_v3 = vmax.f32 %v1056_v52, 0.0  ;;  %v2007_v63 = vmax.f32 %v1593_v28, 0.0 }
 0x212   :  { %v1061_v10 = vpop.f32.mrf.mxu0  ;;  %v1598_v12 = vpop.f32.mrf.mxu1 }
 0x213   :  { %v2006_v41 = vmax.f32 %v1058_v14, 0.0  ;;  %v2008_v11 = vmax.f32 %v1595_v59, 0.0  ;;  %v13875_v2 = vpack.c.bf16 %v2005_v3, %v2001_v49  ;;  %v13877_v57 = vpack.c.bf16 %v2007_v63, %v2003_v25 }
 0x214   :  { %v1063_v32 = vpop.f32.mrf.mxu0  ;;  %v1600_v31 = vpop.f32.mrf.mxu1  ;;  %v1062_v43 = vadd.f32 %v1061_v10, %v12970_v50  ;;  %v1599_v14 = vadd.f32 %v1598_v12, %v12974_v51 }
 0x215   :  { %v13871_v16 = vpack.c.bf16 %v2006_v41, %v2002_v15  ;;  %v13873_v24 = vpack.c.bf16 %v2008_v11, %v2004_v19  ;;  %18039 = vst [vmem:[#allocation121_spill] sm:$0xff] %v13875_v2  ;;  %18040 = vst [vmem:[#allocation122_spill] sm:$0xff] %v13877_v57  ;;  %v1064_v17 = vadd.f32 %v1063_v32, %v12978_v54 }
 0x216   :  { %v1065_v52 = vpop.f32.mrf.mxu0  ;;  %v1602_v28 = vpop.f32.mrf.mxu1  ;;  %v1601_v34 = vadd.f32 %v1600_v31, %v12980_v55  ;;  %v2011_v12 = vmax.f32 %v1599_v14, 0.0 }
 0x217   :  { %18037 = vst [vmem:[#allocation119_spill] sm:$0xff] %v13871_v16  ;;  %18038 = vst [vmem:[#allocation120_spill] sm:$0xff] %v13873_v24  ;;  %v1066_v39 = vadd.f32 %v1065_v52, %v12970_v50  ;;  %v1603_v1 = vadd.f32 %v1602_v28, %v12974_v51  ;;  %3203 = vmatprep.mubr.bf16.mxu0 %v13871_v16  ;;  %3436 = vmatprep.mubr.bf16.mxu1 %v13873_v24  ;;  %v2010_v11 = vmax.f32 %v1064_v17, 0.0 }
 0x218   :  { %v1067_v59 = vpop.f32.mrf.mxu0  ;;  %v1604_v3 = vpop.f32.mrf.mxu1  ;;  %3204 = vmatmul.mubr.bf16.gmra.mxu0 %v13875_v2  ;;  %3437 = vmatmul.mubr.bf16.gmra.mxu1 %v13877_v57  ;;  %v2012_v49 = vmax.f32 %v1601_v34, 0.0  ;;  %v2009_v52 = vmax.f32 %v1062_v43, 0.0 }
 0x219   :  { %v1068_v31 = vadd.f32 %v1067_v59, %v12978_v54  ;;  %v1605_v32 = vadd.f32 %v1604_v3, %v12980_v55  ;;  %v2013_v63 = vmax.f32 %v1066_v39, 0.0  ;;  %v2015_v15 = vmax.f32 %v1603_v1, 0.0 }
 0x21a   :  { %v1071_v19 = vpop.f32.mrf.mxu0  ;;  %v1608_v41 = vpop.f32.mrf.mxu1 }
 0x21b   :  { %v2014_v25 = vmax.f32 %v1068_v31, 0.0  ;;  %v2016_v10 = vmax.f32 %v1605_v32, 0.0  ;;  %v13895_v57 = vpack.c.bf16 %v2013_v63, %v2009_v52  ;;  %v13897_v59 = vpack.c.bf16 %v2015_v15, %v2011_v12 }
 0x21c   :  { %v1073_v28 = vpop.f32.mrf.mxu0  ;;  %v1610_v24 = vpop.f32.mrf.mxu1  ;;  %v1072_v14 = vadd.f32 %v1071_v19, %v12970_v50  ;;  %v1609_v31 = vadd.f32 %v1608_v41, %v12974_v51 }
 0x21d   :  { %v13891_v16 = vpack.c.bf16 %v2014_v25, %v2010_v11  ;;  %v13893_v2 = vpack.c.bf16 %v2016_v10, %v2012_v49  ;;  %18043 = vst [vmem:[#allocation125_spill] sm:$0xff] %v13895_v57  ;;  %18044 = vst [vmem:[#allocation126_spill] sm:$0xff] %v13897_v59  ;;  %v1074_v39 = vadd.f32 %v1073_v28, %v12978_v54 }
 0x21e   :  { %v1075_v1 = vpop.f32.mrf.mxu0  ;;  %v1612_v3 = vpop.f32.mrf.mxu1  ;;  %v1611_v17 = vadd.f32 %v1610_v24, %v12980_v55  ;;  %v2019_v41 = vmax.f32 %v1609_v31, 0.0 }
 0x21f   :  { %18041 = vst [vmem:[#allocation123_spill] sm:$0xff] %v13891_v16  ;;  %18042 = vst [vmem:[#allocation124_spill] sm:$0xff] %v13893_v2  ;;  %v1076_v34 = vadd.f32 %v1075_v1, %v12970_v50  ;;  %v1613_v43 = vadd.f32 %v1612_v3, %v12974_v51  ;;  %3213 = vmatprep.mubr.bf16.mxu0 %v13891_v16  ;;  %3446 = vmatprep.mubr.bf16.mxu1 %v13893_v2  ;;  %v2018_v52 = vmax.f32 %v1074_v39, 0.0 }
 0x220   :  { %v1077_v32 = vpop.f32.mrf.mxu0  ;;  %v1614_v63 = vpop.f32.mrf.mxu1  ;;  %3214 = vmatmul.mubr.bf16.gmra.mxu0 %v13895_v57  ;;  %3447 = vmatmul.mubr.bf16.gmra.mxu1 %v13897_v59  ;;  %v2020_v12 = vmax.f32 %v1611_v17, 0.0  ;;  %v2017_v1 = vmax.f32 %v1072_v14, 0.0 }
 0x221   :  { %v1078_v24 = vadd.f32 %v1077_v32, %v12978_v54  ;;  %v1615_v15 = vadd.f32 %v1614_v63, %v12980_v55  ;;  %v2021_v11 = vmax.f32 %v1076_v34, 0.0  ;;  %v2023_v49 = vmax.f32 %v1613_v43, 0.0 }
 0x222   :  { %v1081_v25 = vpop.f32.mrf.mxu0  ;;  %v1618_v10 = vpop.f32.mrf.mxu1 }
 0x223   :  { %v2022_v28 = vmax.f32 %v1078_v24, 0.0  ;;  %v2024_v19 = vmax.f32 %v1615_v15, 0.0  ;;  %v13915_v59 = vpack.c.bf16 %v2021_v11, %v2017_v1  ;;  %v13917_v32 = vpack.c.bf16 %v2023_v49, %v2019_v41 }
 0x224   :  { %v1083_v3 = vpop.f32.mrf.mxu0  ;;  %v1620_v2 = vpop.f32.mrf.mxu1  ;;  %v1082_v31 = vadd.f32 %v1081_v25, %v12970_v50  ;;  %v1619_v24 = vadd.f32 %v1618_v10, %v12974_v51 }
 0x225   :  { %v13911_v16 = vpack.c.bf16 %v2022_v28, %v2018_v52  ;;  %v13913_v57 = vpack.c.bf16 %v2024_v19, %v2020_v12  ;;  %18047 = vst [vmem:[#allocation129_spill] sm:$0xff] %v13915_v59  ;;  %18048 = vst [vmem:[#allocation130_spill] sm:$0xff] %v13917_v32  ;;  %v1084_v34 = vadd.f32 %v1083_v3, %v12978_v54 }
 0x226   :  { %v1085_v43 = vpop.f32.mrf.mxu0  ;;  %v1622_v63 = vpop.f32.mrf.mxu1  ;;  %v1621_v39 = vadd.f32 %v1620_v2, %v12980_v55  ;;  %v2027_v10 = vmax.f32 %v1619_v24, 0.0 }
 0x227   :  { %18045 = vst [vmem:[#allocation127_spill] sm:$0xff] %v13911_v16  ;;  %18046 = vst [vmem:[#allocation128_spill] sm:$0xff] %v13913_v57  ;;  %v1086_v17 = vadd.f32 %v1085_v43, %v12970_v50  ;;  %v1623_v14 = vadd.f32 %v1622_v63, %v12974_v51  ;;  %3223 = vmatprep.mubr.bf16.mxu0 %v13911_v16  ;;  %3456 = vmatprep.mubr.bf16.mxu1 %v13913_v57  ;;  %v2026_v1 = vmax.f32 %v1084_v34, 0.0 }
 0x228   :  { %v1087_v15 = vpop.f32.mrf.mxu0  ;;  %v1624_v11 = vpop.f32.mrf.mxu1  ;;  %3224 = vmatmul.mubr.bf16.gmra.mxu0 %v13915_v59  ;;  %3457 = vmatmul.mubr.bf16.gmra.mxu1 %v13917_v32  ;;  %v2028_v41 = vmax.f32 %v1621_v39, 0.0  ;;  %v2025_v43 = vmax.f32 %v1082_v31, 0.0 }
 0x229   :  { %v1088_v2 = vadd.f32 %v1087_v15, %v12978_v54  ;;  %v1625_v49 = vadd.f32 %v1624_v11, %v12980_v55  ;;  %v2029_v52 = vmax.f32 %v1086_v17, 0.0  ;;  %v2031_v12 = vmax.f32 %v1623_v14, 0.0 }
 0x22a   :  { %v1091_v28 = vpop.f32.mrf.mxu0  ;;  %v1628_v19 = vpop.f32.mrf.mxu1 }
 0x22b   :  { %v2030_v3 = vmax.f32 %v1088_v2, 0.0  ;;  %v2032_v25 = vmax.f32 %v1625_v49, 0.0  ;;  %v13935_v32 = vpack.c.bf16 %v2029_v52, %v2025_v43  ;;  %v13937_v15 = vpack.c.bf16 %v2031_v12, %v2027_v10 }
 0x22c   :  { %v1093_v63 = vpop.f32.mrf.mxu0  ;;  %v1630_v57 = vpop.f32.mrf.mxu1  ;;  %v1092_v24 = vadd.f32 %v1091_v28, %v12970_v50  ;;  %v1629_v2 = vadd.f32 %v1628_v19, %v12974_v51 }
 0x22d   :  { %v13931_v16 = vpack.c.bf16 %v2030_v3, %v2026_v1  ;;  %v13933_v59 = vpack.c.bf16 %v2032_v25, %v2028_v41  ;;  %18051 = vst [vmem:[#allocation133_spill] sm:$0xff] %v13935_v32  ;;  %18052 = vst [vmem:[#allocation134_spill] sm:$0xff] %v13937_v15  ;;  %v1094_v17 = vadd.f32 %v1093_v63, %v12978_v54 }
 0x22e   :  { %v1095_v14 = vpop.f32.mrf.mxu0  ;;  %v1632_v11 = vpop.f32.mrf.mxu1  ;;  %v1631_v34 = vadd.f32 %v1630_v57, %v12980_v55  ;;  %v2035_v19 = vmax.f32 %v1629_v2, 0.0 }
 0x22f   :  { %18049 = vst [vmem:[#allocation131_spill] sm:$0xff] %v13931_v16  ;;  %18050 = vst [vmem:[#allocation132_spill] sm:$0xff] %v13933_v59  ;;  %v1096_v39 = vadd.f32 %v1095_v14, %v12970_v50  ;;  %v1633_v31 = vadd.f32 %v1632_v11, %v12974_v51  ;;  %3233 = vmatprep.mubr.bf16.mxu0 %v13931_v16  ;;  %3466 = vmatprep.mubr.bf16.mxu1 %v13933_v59  ;;  %v2034_v43 = vmax.f32 %v1094_v17, 0.0 }
 0x230   :  { %v1097_v49 = vpop.f32.mrf.mxu0  ;;  %v1634_v52 = vpop.f32.mrf.mxu1  ;;  %3234 = vmatmul.mubr.bf16.gmra.mxu0 %v13935_v32  ;;  %3467 = vmatmul.mubr.bf16.gmra.mxu1 %v13937_v15  ;;  %v2036_v10 = vmax.f32 %v1631_v34, 0.0  ;;  %v2033_v14 = vmax.f32 %v1092_v24, 0.0 }
 0x231   :  { %v1098_v57 = vadd.f32 %v1097_v49, %v12978_v54  ;;  %v1635_v12 = vadd.f32 %v1634_v52, %v12980_v55  ;;  %v2037_v1 = vmax.f32 %v1096_v39, 0.0  ;;  %v2039_v41 = vmax.f32 %v1633_v31, 0.0 }
 0x232   :  { %v1101_v3 = vpop.f32.mrf.mxu0  ;;  %v1638_v25 = vpop.f32.mrf.mxu1 }
 0x233   :  { %v2038_v63 = vmax.f32 %v1098_v57, 0.0  ;;  %v2040_v28 = vmax.f32 %v1635_v12, 0.0  ;;  %v13955_v15 = vpack.c.bf16 %v2037_v1, %v2033_v14  ;;  %v13957_v49 = vpack.c.bf16 %v2039_v41, %v2035_v19 }
 0x234   :  { %v1103_v11 = vpop.f32.mrf.mxu0  ;;  %v1640_v59 = vpop.f32.mrf.mxu1  ;;  %v1102_v2 = vadd.f32 %v1101_v3, %v12970_v50  ;;  %v1639_v57 = vadd.f32 %v1638_v25, %v12974_v51 }
 0x235   :  { %v13951_v16 = vpack.c.bf16 %v2038_v63, %v2034_v43  ;;  %v13953_v32 = vpack.c.bf16 %v2040_v28, %v2036_v10  ;;  %18055 = vst [vmem:[#allocation137_spill] sm:$0xff] %v13955_v15  ;;  %18056 = vst [vmem:[#allocation138_spill] sm:$0xff] %v13957_v49  ;;  %v1104_v39 = vadd.f32 %v1103_v11, %v12978_v54 }
 0x236   :  { %v1105_v31 = vpop.f32.mrf.mxu0  ;;  %v1642_v52 = vpop.f32.mrf.mxu1  ;;  %v1641_v17 = vadd.f32 %v1640_v59, %v12980_v55  ;;  %v2043_v25 = vmax.f32 %v1639_v57, 0.0 }
 0x237   :  { %18053 = vst [vmem:[#allocation135_spill] sm:$0xff] %v13951_v16  ;;  %18054 = vst [vmem:[#allocation136_spill] sm:$0xff] %v13953_v32  ;;  %v1106_v34 = vadd.f32 %v1105_v31, %v12970_v50  ;;  %v1643_v24 = vadd.f32 %v1642_v52, %v12974_v51  ;;  %3243 = vmatprep.mubr.bf16.mxu0 %v13951_v16  ;;  %3476 = vmatprep.mubr.bf16.mxu1 %v13953_v32  ;;  %v2042_v14 = vmax.f32 %v1104_v39, 0.0 }
 0x238   :  { %v1107_v12 = vpop.f32.mrf.mxu0  ;;  %v1644_v1 = vpop.f32.mrf.mxu1  ;;  %3244 = vmatmul.mubr.bf16.gmra.mxu0 %v13955_v15  ;;  %3477 = vmatmul.mubr.bf16.gmra.mxu1 %v13957_v49  ;;  %v2044_v19 = vmax.f32 %v1641_v17, 0.0  ;;  %v2041_v31 = vmax.f32 %v1102_v2, 0.0 }
 0x239   :  { %v1108_v59 = vadd.f32 %v1107_v12, %v12978_v54  ;;  %v1645_v41 = vadd.f32 %v1644_v1, %v12980_v55  ;;  %v2045_v43 = vmax.f32 %v1106_v34, 0.0  ;;  %v2047_v10 = vmax.f32 %v1643_v24, 0.0 }
 0x23a   :  { %v1111_v63 = vpop.f32.mrf.mxu0  ;;  %v1648_v28 = vpop.f32.mrf.mxu1 }
 0x23b   :  { %v2046_v11 = vmax.f32 %v1108_v59, 0.0  ;;  %v2048_v3 = vmax.f32 %v1645_v41, 0.0  ;;  %v13975_v49 = vpack.c.bf16 %v2045_v43, %v2041_v31  ;;  %v13977_v12 = vpack.c.bf16 %v2047_v10, %v2043_v25 }
 0x23c   :  { %v1113_v52 = vpop.f32.mrf.mxu0  ;;  %v1650_v32 = vpop.f32.mrf.mxu1  ;;  %v1112_v57 = vadd.f32 %v1111_v63, %v12970_v50  ;;  %v1649_v59 = vadd.f32 %v1648_v28, %v12974_v51 }
 0x23d   :  { %v13971_v16 = vpack.c.bf16 %v2046_v11, %v2042_v14  ;;  %v13973_v15 = vpack.c.bf16 %v2048_v3, %v2044_v19  ;;  %18059 = vst [vmem:[#allocation141_spill] sm:$0xff] %v13975_v49  ;;  %18060 = vst [vmem:[#allocation142_spill] sm:$0xff] %v13977_v12  ;;  %v1114_v34 = vadd.f32 %v1113_v52, %v12978_v54 }
 0x23e   :  { %v1115_v24 = vpop.f32.mrf.mxu0  ;;  %v1652_v1 = vpop.f32.mrf.mxu1  ;;  %v1651_v39 = vadd.f32 %v1650_v32, %v12980_v55  ;;  %v2051_v28 = vmax.f32 %v1649_v59, 0.0 }
 0x23f   :  { %18057 = vst [vmem:[#allocation139_spill] sm:$0xff] %v13971_v16  ;;  %18058 = vst [vmem:[#allocation140_spill] sm:$0xff] %v13973_v15  ;;  %v1116_v17 = vadd.f32 %v1115_v24, %v12970_v50  ;;  %v1653_v2 = vadd.f32 %v1652_v1, %v12974_v51  ;;  %3253 = vmatprep.mubr.bf16.mxu0 %v13971_v16  ;;  %3486 = vmatprep.mubr.bf16.mxu1 %v13973_v15  ;;  %v2050_v31 = vmax.f32 %v1114_v34, 0.0 }
 0x240   :  { %v1117_v41 = vpop.f32.mrf.mxu0  ;;  %v1654_v43 = vpop.f32.mrf.mxu1  ;;  %3254 = vmatmul.mubr.bf16.gmra.mxu0 %v13975_v49  ;;  %3487 = vmatmul.mubr.bf16.gmra.mxu1 %v13977_v12  ;;  %v2052_v25 = vmax.f32 %v1651_v39, 0.0  ;;  %v2049_v24 = vmax.f32 %v1112_v57, 0.0 }
 0x241   :  { %v1118_v32 = vadd.f32 %v1117_v41, %v12978_v54  ;;  %v1655_v10 = vadd.f32 %v1654_v43, %v12980_v55  ;;  %v2053_v14 = vmax.f32 %v1116_v17, 0.0  ;;  %v2055_v19 = vmax.f32 %v1653_v2, 0.0 }
 0x242   :  { %v1121_v11 = vpop.f32.mrf.mxu0  ;;  %v1658_v3 = vpop.f32.mrf.mxu1 }
 0x243   :  { %v2054_v52 = vmax.f32 %v1118_v32, 0.0  ;;  %v2056_v63 = vmax.f32 %v1655_v10, 0.0  ;;  %v13995_v12 = vpack.c.bf16 %v2053_v14, %v2049_v24  ;;  %v13997_v41 = vpack.c.bf16 %v2055_v19, %v2051_v28 }
 0x244   :  { %v1123_v1 = vpop.f32.mrf.mxu0  ;;  %v1660_v15 = vpop.f32.mrf.mxu1  ;;  %v1122_v59 = vadd.f32 %v1121_v11, %v12970_v50  ;;  %v1659_v32 = vadd.f32 %v1658_v3, %v12974_v51 }
 0x245   :  { %v13991_v16 = vpack.c.bf16 %v2054_v52, %v2050_v31  ;;  %v13993_v49 = vpack.c.bf16 %v2056_v63, %v2052_v25  ;;  %18063 = vst [vmem:[#allocation145_spill] sm:$0xff] %v13995_v12  ;;  %18064 = vst [vmem:[#allocation146_spill] sm:$0xff] %v13997_v41  ;;  %v1124_v17 = vadd.f32 %v1123_v1, %v12978_v54 }
 0x246   :  { %v1125_v2 = vpop.f32.mrf.mxu0  ;;  %v1662_v43 = vpop.f32.mrf.mxu1  ;;  %v1661_v34 = vadd.f32 %v1660_v15, %v12980_v55  ;;  %v2059_v3 = vmax.f32 %v1659_v32, 0.0 }
 0x247   :  { %18061 = vst [vmem:[#allocation143_spill] sm:$0xff] %v13991_v16  ;;  %18062 = vst [vmem:[#allocation144_spill] sm:$0xff] %v13993_v49  ;;  %v1126_v39 = vadd.f32 %v1125_v2, %v12970_v50  ;;  %v1663_v57 = vadd.f32 %v1662_v43, %v12974_v51  ;;  %3263 = vmatprep.mubr.bf16.mxu0 %v13991_v16  ;;  %3496 = vmatprep.mubr.bf16.mxu1 %v13993_v49  ;;  %v2058_v24 = vmax.f32 %v1124_v17, 0.0 }
 0x248   :  { %v1127_v10 = vpop.f32.mrf.mxu0  ;;  %v1664_v14 = vpop.f32.mrf.mxu1  ;;  %3264 = vmatmul.mubr.bf16.gmra.mxu0 %v13995_v12  ;;  %3497 = vmatmul.mubr.bf16.gmra.mxu1 %v13997_v41  ;;  %v2060_v28 = vmax.f32 %v1661_v34, 0.0  ;;  %v2057_v2 = vmax.f32 %v1122_v59, 0.0 }
 0x249   :  { %v1128_v15 = vadd.f32 %v1127_v10, %v12978_v54  ;;  %v1665_v19 = vadd.f32 %v1664_v14, %v12980_v55  ;;  %v2061_v31 = vmax.f32 %v1126_v39, 0.0  ;;  %v2063_v25 = vmax.f32 %v1663_v57, 0.0 }
 0x24a   :  { %v1131_v52 = vpop.f32.mrf.mxu0  ;;  %v1668_v63 = vpop.f32.mrf.mxu1 }
 0x24b   :  { %v2062_v1 = vmax.f32 %v1128_v15, 0.0  ;;  %v2064_v11 = vmax.f32 %v1665_v19, 0.0  ;;  %v14015_v41 = vpack.c.bf16 %v2061_v31, %v2057_v2  ;;  %v14017_v10 = vpack.c.bf16 %v2063_v25, %v2059_v3 }
 0x24c   :  { %v1133_v43 = vpop.f32.mrf.mxu0  ;;  %v1670_v49 = vpop.f32.mrf.mxu1  ;;  %v1132_v32 = vadd.f32 %v1131_v52, %v12970_v50  ;;  %v1669_v15 = vadd.f32 %v1668_v63, %v12974_v51 }
 0x24d   :  { %v14011_v16 = vpack.c.bf16 %v2062_v1, %v2058_v24  ;;  %v14013_v12 = vpack.c.bf16 %v2064_v11, %v2060_v28  ;;  %18067 = vst [vmem:[#allocation149_spill] sm:$0xff] %v14015_v41  ;;  %18068 = vst [vmem:[#allocation150_spill] sm:$0xff] %v14017_v10  ;;  %v1134_v39 = vadd.f32 %v1133_v43, %v12978_v54 }
 0x24e   :  { %v1135_v57 = vpop.f32.mrf.mxu0  ;;  %v1672_v14 = vpop.f32.mrf.mxu1  ;;  %v1671_v17 = vadd.f32 %v1670_v49, %v12980_v55  ;;  %v2067_v63 = vmax.f32 %v1669_v15, 0.0 }
 0x24f   :  { %18065 = vst [vmem:[#allocation147_spill] sm:$0xff] %v14011_v16  ;;  %18066 = vst [vmem:[#allocation148_spill] sm:$0xff] %v14013_v12  ;;  %v1136_v34 = vadd.f32 %v1135_v57, %v12970_v50  ;;  %v1673_v59 = vadd.f32 %v1672_v14, %v12974_v51  ;;  %3273 = vmatprep.mubr.bf16.mxu0 %v14011_v16  ;;  %3506 = vmatprep.mubr.bf16.mxu1 %v14013_v12  ;;  %v2066_v2 = vmax.f32 %v1134_v39, 0.0 }
 0x250   :  { %v1137_v19 = vpop.f32.mrf.mxu0  ;;  %v1674_v31 = vpop.f32.mrf.mxu1  ;;  %3274 = vmatmul.mubr.bf16.gmra.mxu0 %v14015_v41  ;;  %3507 = vmatmul.mubr.bf16.gmra.mxu1 %v14017_v10  ;;  %v2068_v3 = vmax.f32 %v1671_v17, 0.0  ;;  %v2065_v57 = vmax.f32 %v1132_v32, 0.0 }
 0x251   :  { %v1138_v49 = vadd.f32 %v1137_v19, %v12978_v54  ;;  %v1675_v25 = vadd.f32 %v1674_v31, %v12980_v55  ;;  %v2069_v24 = vmax.f32 %v1136_v34, 0.0  ;;  %v2071_v28 = vmax.f32 %v1673_v59, 0.0 }
 0x252   :  { %v1141_v1 = vpop.f32.mrf.mxu0  ;;  %v1678_v11 = vpop.f32.mrf.mxu1 }
 0x253   :  { %v2070_v43 = vmax.f32 %v1138_v49, 0.0  ;;  %v2072_v52 = vmax.f32 %v1675_v25, 0.0  ;;  %v14035_v10 = vpack.c.bf16 %v2069_v24, %v2065_v57  ;;  %v14037_v19 = vpack.c.bf16 %v2071_v28, %v2067_v63 }
 0x254   :  { %v1143_v14 = vpop.f32.mrf.mxu0  ;;  %v1680_v12 = vpop.f32.mrf.mxu1  ;;  %v1142_v15 = vadd.f32 %v1141_v1, %v12970_v50  ;;  %v1679_v49 = vadd.f32 %v1678_v11, %v12974_v51 }
 0x255   :  { %v14031_v16 = vpack.c.bf16 %v2070_v43, %v2066_v2  ;;  %v14033_v41 = vpack.c.bf16 %v2072_v52, %v2068_v3  ;;  %18071 = vst [vmem:[#allocation153_spill] sm:$0xff] %v14035_v10  ;;  %18072 = vst [vmem:[#allocation154_spill] sm:$0xff] %v14037_v19  ;;  %v1144_v34 = vadd.f32 %v1143_v14, %v12978_v54 }
 0x256   :  { %v1145_v59 = vpop.f32.mrf.mxu0  ;;  %v1682_v31 = vpop.f32.mrf.mxu1  ;;  %v1681_v39 = vadd.f32 %v1680_v12, %v12980_v55  ;;  %v2075_v11 = vmax.f32 %v1679_v49, 0.0 }
 0x257   :  { %18069 = vst [vmem:[#allocation151_spill] sm:$0xff] %v14031_v16  ;;  %18070 = vst [vmem:[#allocation152_spill] sm:$0xff] %v14033_v41  ;;  %v1146_v17 = vadd.f32 %v1145_v59, %v12970_v50  ;;  %v1683_v32 = vadd.f32 %v1682_v31, %v12974_v51  ;;  %3283 = vmatprep.mubr.bf16.mxu0 %v14031_v16  ;;  %3516 = vmatprep.mubr.bf16.mxu1 %v14033_v41  ;;  %v2074_v57 = vmax.f32 %v1144_v34, 0.0 }
 0x258   :  { %v1147_v25 = vpop.f32.mrf.mxu0  ;;  %v1684_v24 = vpop.f32.mrf.mxu1  ;;  %3284 = vmatmul.mubr.bf16.gmra.mxu0 %v14035_v10  ;;  %3517 = vmatmul.mubr.bf16.gmra.mxu1 %v14037_v19  ;;  %v2076_v63 = vmax.f32 %v1681_v39, 0.0  ;;  %v2073_v59 = vmax.f32 %v1142_v15, 0.0 }
 0x259   :  { %v1148_v12 = vadd.f32 %v1147_v25, %v12978_v54  ;;  %v1685_v28 = vadd.f32 %v1684_v24, %v12980_v55  ;;  %v2077_v2 = vmax.f32 %v1146_v17, 0.0  ;;  %v2079_v3 = vmax.f32 %v1683_v32, 0.0 }
 0x25a   :  { %v1151_v43 = vpop.f32.mrf.mxu0  ;;  %v1688_v52 = vpop.f32.mrf.mxu1 }
 0x25b   :  { %v2078_v14 = vmax.f32 %v1148_v12, 0.0  ;;  %v2080_v1 = vmax.f32 %v1685_v28, 0.0  ;;  %v14055_v19 = vpack.c.bf16 %v2077_v2, %v2073_v59  ;;  %v14057_v25 = vpack.c.bf16 %v2079_v3, %v2075_v11 }
 0x25c   :  { %v1153_v31 = vpop.f32.mrf.mxu0  ;;  %v1690_v41 = vpop.f32.mrf.mxu1  ;;  %v1152_v49 = vadd.f32 %v1151_v43, %v12970_v50  ;;  %v1689_v12 = vadd.f32 %v1688_v52, %v12974_v51 }
 0x25d   :  { %v14051_v16 = vpack.c.bf16 %v2078_v14, %v2074_v57  ;;  %v14053_v10 = vpack.c.bf16 %v2080_v1, %v2076_v63  ;;  %18075 = vst [vmem:[#allocation157_spill] sm:$0xff] %v14055_v19  ;;  %18076 = vst [vmem:[#allocation158_spill] sm:$0xff] %v14057_v25  ;;  %v1154_v17 = vadd.f32 %v1153_v31, %v12978_v54 }
 0x25e   :  { %v1155_v32 = vpop.f32.mrf.mxu0  ;;  %v1692_v24 = vpop.f32.mrf.mxu1  ;;  %v1691_v34 = vadd.f32 %v1690_v41, %v12980_v55  ;;  %v2083_v52 = vmax.f32 %v1689_v12, 0.0 }
 0x25f   :  { %18073 = vst [vmem:[#allocation155_spill] sm:$0xff] %v14051_v16  ;;  %18074 = vst [vmem:[#allocation156_spill] sm:$0xff] %v14053_v10  ;;  %v1156_v39 = vadd.f32 %v1155_v32, %v12970_v50  ;;  %v1693_v15 = vadd.f32 %v1692_v24, %v12974_v51  ;;  %3293 = vmatprep.mubr.bf16.mxu0 %v14051_v16  ;;  %3526 = vmatprep.mubr.bf16.mxu1 %v14053_v10  ;;  %v2082_v59 = vmax.f32 %v1154_v17, 0.0 }
 0x260   :  { %v1157_v28 = vpop.f32.mrf.mxu0  ;;  %v1694_v2 = vpop.f32.mrf.mxu1  ;;  %3294 = vmatmul.mubr.bf16.gmra.mxu0 %v14055_v19  ;;  %3527 = vmatmul.mubr.bf16.gmra.mxu1 %v14057_v25  ;;  %v2084_v11 = vmax.f32 %v1691_v34, 0.0  ;;  %v2081_v32 = vmax.f32 %v1152_v49, 0.0 }
 0x261   :  { %v1158_v41 = vadd.f32 %v1157_v28, %v12978_v54  ;;  %v1695_v3 = vadd.f32 %v1694_v2, %v12980_v55  ;;  %v2085_v57 = vmax.f32 %v1156_v39, 0.0  ;;  %v2087_v63 = vmax.f32 %v1693_v15, 0.0 }
 0x262   :  { %v1161_v14 = vpop.f32.mrf.mxu0  ;;  %v1698_v1 = vpop.f32.mrf.mxu1 }
 0x263   :  { %v2086_v31 = vmax.f32 %v1158_v41, 0.0  ;;  %v2088_v43 = vmax.f32 %v1695_v3, 0.0  ;;  %v1162_v24 = vadd.f32 %v1161_v14, %v12970_v50  ;;  %v1699_v19 = vadd.f32 %v1698_v1, %v12974_v51 }
 0x264   :  { %v1163_v10 = vpop.f32.mrf.mxu0  ;;  %v1700_v25 = vpop.f32.mrf.mxu1  ;;  %v14079_v17 = vpack.c.bf16 %v2085_v57, %v2081_v32  ;;  %v14081_v34 = vpack.c.bf16 %v2087_v63, %v2083_v52 }
 0x265   :  { %v14073_v16 = vpack.c.bf16 %v2086_v31, %v2082_v59  ;;  %v14075_v28 = vpack.c.bf16 %v2088_v43, %v2084_v11  ;;  %v1164_v39 = vadd.f32 %v1163_v10, %v12978_v54  ;;  %v1701_v15 = vadd.f32 %v1700_v25, %v12980_v55 }
 0x266   :  { %18079 = vst [vmem:[#allocation161_spill] sm:$0xff] %v14079_v17  ;;  %18080 = vst [vmem:[#allocation162_spill] sm:$0xff] %v14081_v34  ;;  %v1165_v49 = vpop.f32.mrf.mxu0  ;;  %v1702_v12 = vpop.f32.mrf.mxu1  ;;  %v2089_v2 = vmax.f32 %v1162_v24, 0.0  ;;  %v2091_v41 = vmax.f32 %v1699_v19, 0.0 }
 0x267   :  { %18077 = vst [vmem:[#allocation159_spill] sm:$0xff] %v14073_v16  ;;  %18078 = vst [vmem:[#allocation160_spill] sm:$0xff] %v14075_v28  ;;  %3303 = vmatprep.mubr.bf16.mxu0 %v14073_v16  ;;  %3536 = vmatprep.mubr.bf16.mxu1 %v14075_v28  ;;  %v1166_v3 = vadd.f32 %v1165_v49, %v12970_v50  ;;  %v1703_v14 = vadd.f32 %v1702_v12, %v12974_v51  ;;  %v2090_v10 = vmax.f32 %v1164_v39, 0.0  ;;  %v12006_v12 = vld [vmem:[%s17660_s3 + $0xa8] ss:$12 sps:$4 sm:$0xff]  }
 0x268   :  { %3304 = vmatmul.mubr.bf16.gmra.mxu0 %v14079_v17  ;;  %3537 = vmatmul.mubr.bf16.gmra.mxu1 %v14081_v34  ;;  %v2092_v25 = vmax.f32 %v1701_v15, 0.0  ;;  %v1167_v57 = vpop.f32.mrf.mxu0  ;;  %v1704_v63 = vpop.f32.mrf.mxu1 }
 0x269   :  { %3579 = vmatprep.mubr.bf16.mxu0 %v13559_v44  ;;  %3772 = vmatprep.mubr.bf16.mxu1 %v13561_v37  ;;  %v2093_v1 = vmax.f32 %v1166_v3, 0.0  ;;  %v2095_v59 = vmax.f32 %v1703_v14, 0.0  ;;  %v1168_v19 = vadd.f32 %v1167_v57, %v12978_v54  ;;  %v1705_v11 = vadd.f32 %v1704_v63, %v12980_v55  ;;  %v12009_v3 = vld [vmem:[%s17660_s3 + $0x228] ss:$12 sps:$4 sm:$0xff]  }
 0x26a   :  { %v1171_v31 = vpop.f32.mrf.mxu0  ;;  %v1708_v43 = vpop.f32.mrf.mxu1 }
 0x26b   :  { %v14093_v32 = vpack.c.bf16 %v2093_v1, %v2089_v2  ;;  %v14095_v52 = vpack.c.bf16 %v2095_v59, %v2091_v41  ;;  %v2094_v24 = vmax.f32 %v1168_v19, 0.0  ;;  %v2096_v39 = vmax.f32 %v1705_v11, 0.0 }
 0x26c   :  { %v1172_v15 = vadd.f32 %v1171_v31, %v12970_v50  ;;  %v1709_v44 = vadd.f32 %v1708_v43, %v12974_v51  ;;  %v1173_v49 = vpop.f32.mrf.mxu0  ;;  %v1710_v37 = vpop.f32.mrf.mxu1  ;;  %v12014_v43 = vld [vmem:[%s17660_s3 + $0x94] ss:$12 sps:$4 sm:$0xff]  }
 0x26d   :  { %18081 = vst [vmem:[#allocation163_spill] sm:$0xff] %v14093_v32  ;;  %18082 = vst [vmem:[#allocation164_spill] sm:$0xff] %v14095_v52  ;;  %v1174_v2 = vadd.f32 %v1173_v49, %v12978_v54  ;;  %v14106_v41 = vpack.c.bf16 %v2094_v24, %v2090_v10  ;;  %v14108_v14 = vpack.c.bf16 %v2096_v39, %v2092_v25  ;;  %v12017_v10 = vld [vmem:[%s17660_s3 + $0x214] ss:$12 sps:$4 sm:$0xff]  }
 0x26e   :  { %v1711_v57 = vadd.f32 %v1710_v37, %v12980_v55  ;;  %v1175_v63 = vpop.f32.mrf.mxu0  ;;  %v1712_v1 = vpop.f32.mrf.mxu1  ;;  %v2097_v59 = vmax.f32 %v1172_v15, 0.0  ;;  %v2099_v19 = vmax.f32 %v1709_v44, 0.0 }
 0x26f   :  { %18083 = vst [vmem:[#allocation165_spill] sm:$0xff] %v14106_v41  ;;  %18084 = vst [vmem:[#allocation166_spill] sm:$0xff] %v14108_v14  ;;  %v1176_v11 = vadd.f32 %v1175_v63, %v12970_v50  ;;  %v1713_v31 = vadd.f32 %v1712_v1, %v12974_v51  ;;  %v2098_v25 = vmax.f32 %v1174_v2, 0.0  ;;  %v12012_v63 = vld [vmem:[%s17660_s3 + $0x90] ss:$12 sps:$4 sm:$0xff]  }
 0x270   :  { %3580 = vmatmul.mubr.bf16.vlgmr.msra.gmra.mxu0 %v13569_v8  ;;  %3773 = vmatmul.mubr.bf16.vlgmr.msra.gmra.mxu1 %v13571_v21  ;;  %v1177_v24 = vpop.f32.mrf.mxu0  ;;  %v1714_v39 = vpop.f32.mrf.mxu1  ;;  %v12015_v8 = vld [vmem:[%s17660_s3 + $0x210] ss:$12 sps:$4 sm:$0xff]   ;;  %v2100_v21 = vmax.f32 %v1711_v57, 0.0 }
 0x271   :  { %4446 = vmatpush1.bf16.msra.mxu0 %v12006_v12  ;;  %4679 = vmatpush1.bf16.msra.mxu1 %v12009_v3  ;;  %v2101_v15 = vmax.f32 %v1176_v11, 0.0  ;;  %v2103_v44 = vmax.f32 %v1713_v31, 0.0  ;;  %v1178_v49 = vadd.f32 %v1177_v24, %v12978_v54  ;;  %v1715_v37 = vadd.f32 %v1714_v39, %v12980_v55  ;;  %v12020_v2 = vld [vmem:[%s17660_s3 + $0x7c] ss:$12 sps:$4 sm:$0xff]  }
 0x272   :  { %3587 = vmatprep.mubr.bf16.mxu0 %v13593_v62  ;;  %3780 = vmatprep.mubr.bf16.mxu1 %v13595_v20  ;;  %v1181_v12 = vpop.f32.mrf.mxu0  ;;  %v1718_v3 = vpop.f32.mrf.mxu1  ;;  %v12023_v1 = vld [vmem:[%s17660_s3 + $0x1fc] ss:$12 sps:$4 sm:$0xff]  }
 0x273   :  { %v14137_v11 = vpack.c.bf16 %v2101_v15, %v2097_v59  ;;  %v14139_v31 = vpack.c.bf16 %v2103_v44, %v2099_v19  ;;  %v2102_v24 = vmax.f32 %v1178_v49, 0.0  ;;  %v2104_v39 = vmax.f32 %v1715_v37, 0.0  ;;  %4447 = vmatprep.subr.bf16.mxu0 %v12014_v43  ;;  %4680 = vmatprep.subr.bf16.mxu1 %v12017_v10  ;;  %v12018_v43 = vld [vmem:[%s17660_s3 + $0x78] ss:$12 sps:$4 sm:$0xff]  }
 0x274   :  { %v1182_v62 = vadd.f32 %v1181_v12, %v12970_v50  ;;  %v1719_v20 = vadd.f32 %v1718_v3, %v12974_v51  ;;  %v1183_v57 = vpop.f32.mrf.mxu0  ;;  %v1720_v52 = vpop.f32.mrf.mxu1  ;;  %v12021_v10 = vld [vmem:[%s17660_s3 + $0x1f8] ss:$12 sps:$4 sm:$0xff]  }
 0x275   :  { %18085 = vst [vmem:[#allocation167_spill] sm:$0xff] %v14137_v11  ;;  %18086 = vst [vmem:[#allocation168_spill] sm:$0xff] %v14139_v31  ;;  %4448 = vmatpush1.bf16.msra.mxu0 %v12012_v63  ;;  %4681 = vmatpush1.bf16.msra.mxu1 %v12015_v8  ;;  %v1184_v32 = vadd.f32 %v1183_v57, %v12978_v54  ;;  %v1721_v14 = vadd.f32 %v1720_v52, %v12980_v55  ;;  %v12026_v63 = vld [vmem:[%s17660_s3 + $0x64] ss:$12 sps:$4 sm:$0xff]  }
 0x276   :  { %v14145_v59 = vpack.c.bf16 %v2102_v24, %v2098_v25  ;;  %v1185_v19 = vpop.f32.mrf.mxu0  ;;  %v1722_v15 = vpop.f32.mrf.mxu1  ;;  %4449 = vmatprep.subr.bf16.mxu0 %v12020_v2  ;;  %4682 = vmatprep.subr.bf16.mxu1 %v12023_v1  ;;  %v14153_v44 = vpack.c.bf16 %v2104_v39, %v2100_v21  ;;  %v2105_v49 = vmax.f32 %v1182_v62, 0.0  ;;  %v2107_v37 = vmax.f32 %v1719_v20, 0.0  ;;  %v12029_v8 = vld [vmem:[%s17660_s3 + $0x1e4] ss:$12 sps:$4 sm:$0xff]  }
 0x277   :  { %v1186_v52 = vadd.f32 %v1185_v19, %v12970_v50  ;;  %v1723_v25 = vadd.f32 %v1722_v15, %v12974_v51  ;;  %v2106_v21 = vmax.f32 %v1184_v32, 0.0  ;;  %v2108_v12 = vmax.f32 %v1721_v14, 0.0  ;;  %v12032_v19 = vld [vmem:[%s17660_s3 + $0x4c] ss:$12 sps:$4 sm:$0xff]  }
 0x278   :  { %18087 = vst [vmem:[#allocation169_spill] sm:$0xff] %v14145_v59  ;;  %18088 = vst [vmem:[#allocation170_spill] sm:$0xff] %v14153_v44  ;;  %3588 = vmatmul.mubr.bf16.gmra.mxu0 %v13600_v33  ;;  %3781 = vmatmul.mubr.bf16.gmra.mxu1 %v13602_v30  ;;  %v1187_v3 = vpop.f32.mrf.mxu0  ;;  %v1724_v2 = vpop.f32.mrf.mxu1  ;;  %v12024_v30 = vld [vmem:[%s17660_s3 + $0x60] ss:$12 sps:$4 sm:$0xff]  }
 0x279   :  { %3595 = vmatprep.mubr.bf16.mxu0 %v13629_v47  ;;  %3788 = vmatprep.mubr.bf16.mxu1 %v13631_v61  ;;  %v2109_v1 = vmax.f32 %v1186_v52, 0.0  ;;  %v2111_v24 = vmax.f32 %v1723_v25, 0.0  ;;  %v1188_v39 = vadd.f32 %v1187_v3, %v12978_v54  ;;  %v1725_v62 = vadd.f32 %v1724_v2, %v12980_v55  ;;  %v12027_v33 = vld [vmem:[%s17660_s3 + $0x1e0] ss:$12 sps:$4 sm:$0xff]  }
 0x27a   :  { %v1191_v20 = vpop.f32.mrf.mxu0  ;;  %v1728_v57 = vpop.f32.mrf.mxu1  ;;  %4450 = vmatpush1.bf16.msra.mxu0 %v12018_v43  ;;  %4683 = vmatpush1.bf16.msra.mxu1 %v12021_v10  ;;  %v12035_v15 = vld [vmem:[%s17660_s3 + $0x1cc] ss:$12 sps:$4 sm:$0xff]  }
 0x27b   :  { %v14175_v47 = vpack.c.bf16 %v2109_v1, %v2105_v49  ;;  %v14177_v61 = vpack.c.bf16 %v2111_v24, %v2107_v37  ;;  %v2110_v32 = vmax.f32 %v1188_v39, 0.0  ;;  %v2112_v14 = vmax.f32 %v1725_v62, 0.0  ;;  %4451 = vmatprep.subr.bf16.mxu0 %v12026_v63  ;;  %4684 = vmatprep.subr.bf16.mxu1 %v12029_v8  ;;  %v12030_v1 = vld [vmem:[%s17660_s3 + $0x48] ss:$12 sps:$4 sm:$0xff]  }
 0x27c   :  { %v1192_v43 = vadd.f32 %v1191_v20, %v12970_v50  ;;  %v1729_v10 = vadd.f32 %v1728_v57, %v12974_v51  ;;  %v1193_v49 = vpop.f32.mrf.mxu0  ;;  %v1730_v52 = vpop.f32.mrf.mxu1  ;;  %v12033_v24 = vld [vmem:[%s17660_s3 + $0x1c8] ss:$12 sps:$4 sm:$0xff]  }
 0x27d   :  { %18089 = vst [vmem:[#allocation171_spill] sm:$0xff] %v14175_v47  ;;  %18090 = vst [vmem:[#allocation172_spill] sm:$0xff] %v14177_v61  ;;  %v1194_v37 = vadd.f32 %v1193_v49, %v12978_v54  ;;  %v1731_v25 = vadd.f32 %v1730_v52, %v12980_v55  ;;  %v14189_v63 = vpack.c.bf16 %v2110_v32, %v2106_v21  ;;  %v12041_v57 = vld [vmem:[%s17660_s3 + $0x1b4] ss:$12 sps:$4 sm:$0xff]  }
 0x27e   :  { %v14191_v8 = vpack.c.bf16 %v2112_v14, %v2108_v12  ;;  %v1195_v3 = vpop.f32.mrf.mxu0  ;;  %v1732_v2 = vpop.f32.mrf.mxu1  ;;  %4452 = vmatpush1.bf16.msra.mxu0 %v12024_v30  ;;  %4685 = vmatpush1.bf16.msra.mxu1 %v12027_v33  ;;  %v2113_v39 = vmax.f32 %v1192_v43, 0.0  ;;  %v2115_v62 = vmax.f32 %v1729_v10, 0.0  ;;  %v12038_v12 = vld [vmem:[%s17660_s3 + $0x34] ss:$12 sps:$4 sm:$0xff]  }
 0x27f   :  { %18091 = vst [vmem:[#allocation173_spill] sm:$0xff] %v14189_v63  ;;  %v1196_v20 = vadd.f32 %v1195_v3, %v12970_v50  ;;  %v1733_v21 = vadd.f32 %v1732_v2, %v12974_v51  ;;  %4453 = vmatprep.subr.bf16.mxu0 %v12032_v19  ;;  %4686 = vmatprep.subr.bf16.mxu1 %v12035_v15  ;;  %v2114_v30 = vmax.f32 %v1194_v37, 0.0  ;;  %v2116_v33 = vmax.f32 %v1731_v25, 0.0  ;;  %v12042_v37 = vld [vmem:[%s17660_s3 + $0x18] ss:$12 sps:$4 sm:$0xff]   ;;  %v18111_v63 = vld [vmem:[#allocation123_spill] sm:$0xff] }
 0x280   :  { %18092 = vst [vmem:[#allocation174_spill] sm:$0xff] %v14191_v8  ;;  %3596 = vmatmul.mubr.bf16.gmra.mxu0 %v13636_v27  ;;  %3789 = vmatmul.mubr.bf16.gmra.mxu1 %v13638_v22  ;;  %v1197_v32 = vpop.f32.mrf.mxu0  ;;  %v1734_v50 = vpop.f32.mrf.mxu1  ;;  %v12036_v27 = vld [vmem:[%s17660_s3 + $0x30] ss:$12 sps:$4 sm:$0xff]   ;;  %v12045_v25 = vld [vmem:[%s17660_s3 + $0x198] ss:$12 sps:$4 sm:$0xff]  }
 0x281   :  { %3603 = vmatprep.mubr.bf16.mxu0 %v13665_v48  ;;  %3796 = vmatprep.mubr.bf16.mxu1 %v13667_v40  ;;  %v2117_v51 = vmax.f32 %v1196_v20, 0.0  ;;  %v2119_v14 = vmax.f32 %v1733_v21, 0.0  ;;  %v1198_v19 = vadd.f32 %v1197_v32, %v12978_v54  ;;  %v1735_v15 = vadd.f32 %v1734_v50, %v12980_v55  ;;  %v12039_v22 = vld [vmem:[%s17660_s3 + $0x1b0] ss:$12 sps:$4 sm:$0xff]   ;;  %v12062_v20 = vld [vmem:[%s17660_s3 + $0x154] ss:$12 sps:$4 sm:$0xff]  }
 0x282   :  { %4454 = vmatpush1.bf16.msra.mxu0 %v12030_v1  ;;  %4687 = vmatpush1.bf16.msra.mxu1 %v12033_v24  ;;  %v12044_v54 = vld [vmem:[%s17660_s3 + $0x1c] ss:$12 sps:$4 sm:$0xff]   ;;  %v12050_v3 = vld [vmem:[%s17660_s3 + $0x4] ss:$12 sps:$4 sm:$0xff]   ;;  %v12048_v1 = vld [vmem:[%s17660_s3] ss:$12 sps:$4 sm:$0xff]  }
 0x283   :  { %v14219_v43 = vpack.c.bf16 %v2117_v51, %v2113_v39  ;;  %v14221_v48 = vpack.c.bf16 %v2119_v14, %v2115_v62  ;;  %v2118_v40 = vmax.f32 %v1198_v19, 0.0  ;;  %v2120_v10 = vmax.f32 %v1735_v15, 0.0  ;;  %4455 = vmatprep.subr.bf16.mxu0 %v12038_v12  ;;  %4688 = vmatprep.subr.bf16.mxu1 %v12041_v57  ;;  %v12047_v55 = vld [vmem:[%s17660_s3 + $0x19c] ss:$12 sps:$4 sm:$0xff]   ;;  %v12053_v2 = vld [vmem:[%s17660_s3 + $0x184] ss:$12 sps:$4 sm:$0xff]  }
 0x284   :  { %v12051_v24 = vld [vmem:[%s17660_s3 + $0x180] ss:$12 sps:$4 sm:$0xff]   ;;  %v12054_v39 = vld [vmem:[%s17660_s3 + $0x168] ss:$12 sps:$4 sm:$0xff]   ;;  %v12060_v50 = vld [vmem:[%s17660_s3 + $0x150] ss:$12 sps:$4 sm:$0xff]  }
 0x285   :  { %18093 = vst [vmem:[#allocation175_spill] sm:$0xff] %v14219_v43  ;;  %18094 = vst [vmem:[#allocation176_spill] sm:$0xff] %v14221_v48  ;;  %v14229_v49 = vpack.c.bf16 %v2118_v40, %v2114_v30  ;;  %v14231_v52 = vpack.c.bf16 %v2120_v10, %v2116_v33  ;;  %v12057_v62 = vld [vmem:[%s17660_s3 + $0x2e8] ss:$12 sps:$4 sm:$0xff]   ;;  %v12063_v51 = vld [vmem:[%s17660_s3 + $0x2d0] ss:$12 sps:$4 sm:$0xff]  }
 0x286   :  { %4456 = vmatpush1.bf16.msra.mxu0 %v12036_v27  ;;  %4689 = vmatpush1.bf16.msra.mxu1 %v12039_v22  ;;  %v12065_v21 = vld [vmem:[%s17660_s3 + $0x2d4] ss:$12 sps:$4 sm:$0xff]   ;;  %v12068_v19 = vld [vmem:[%s17660_s3 + $0x13c] ss:$12 sps:$4 sm:$0xff]  }
 0x287   :  { %18095 = vst [vmem:[#allocation177_spill] sm:$0xff] %v14229_v49  ;;  %18096 = vst [vmem:[#allocation178_spill] sm:$0xff] %v14231_v52  ;;  %4457 = vmatprep.subr.bf16.mxu0 %v12044_v54  ;;  %4690 = vmatprep.subr.bf16.mxu1 %v12047_v55  ;;  %v12071_v15 = vld [vmem:[%s17660_s3 + $0x2bc] ss:$12 sps:$4 sm:$0xff]   ;;  %v12066_v55 = vld [vmem:[%s17660_s3 + $0x138] ss:$12 sps:$4 sm:$0xff]  }
 0x288   :  { %3604 = vmatmul.mubr.bf16.gmra.mxu0 %v13672_v35  ;;  %3797 = vmatmul.mubr.bf16.gmra.mxu1 %v13674_v23  ;;  %v12056_v35 = vld [vmem:[%s17660_s3 + $0x16c] ss:$12 sps:$4 sm:$0xff]  }
 0x289   :  { %3611 = vmatprep.mubr.bf16.mxu0 %v13701_v13  ;;  %3804 = vmatprep.mubr.bf16.mxu1 %v13703_v46  ;;  %v12059_v23 = vld [vmem:[%s17660_s3 + $0x2ec] ss:$12 sps:$4 sm:$0xff]  }
 0x28a   :  { %4458 = vmatpush1.bf16.msra.mxu0 %v12042_v37  ;;  %4691 = vmatpush1.bf16.msra.mxu1 %v12045_v25  ;;  %v12069_v37 = vld [vmem:[%s17660_s3 + $0x2b8] ss:$12 sps:$4 sm:$0xff]  }
 0x28b   :  { %4459 = vmatprep.subr.bf16.mxu0 %v12050_v3  ;;  %4692 = vmatprep.subr.bf16.mxu1 %v12053_v2  ;;  %v12074_v3 = vld [vmem:[%s17660_s3 + $0x124] ss:$12 sps:$4 sm:$0xff]  }
 0x28c   :  { %v12077_v2 = vld [vmem:[%s17660_s3 + $0x2a4] ss:$12 sps:$4 sm:$0xff]  }
 0x28e   :  { %4460 = vmatpush1.bf16.msra.mxu0 %v12048_v1  ;;  %4693 = vmatpush1.bf16.msra.mxu1 %v12051_v24 }
 0x28f   :  { %4461 = vmatprep.subr.bf16.mxu0 %v12056_v35  ;;  %4694 = vmatprep.subr.bf16.mxu1 %v12059_v23 }
 0x290   :  { %v3115_v12 = vpop.f32.mrf.mxu0  ;;  %v3348_v57 = vpop.f32.mrf.mxu1  ;;  %3612 = vmatmul.mubr.bf16.gmra.mxu0 %v13708_v53  ;;  %3805 = vmatmul.mubr.bf16.gmra.mxu1 %v13710_v29 }
 0x291   :  { %v14275_v30 = vadd.f32 %v3348_v57, %v3115_v12  ;;  %3619 = vmatprep.mubr.bf16.mxu0 %v13737_v36  ;;  %3812 = vmatprep.mubr.bf16.mxu1 %v13739_v0  ;;  %v12080_v12 = vld [vmem:[%s17660_s3 + $0x10c] ss:$12 sps:$4 sm:$0xff]  }
 0x292   :  { %v3117_v33 = vpop.f32.mrf.mxu0  ;;  %v3350_v32 = vpop.f32.mrf.mxu1  ;;  %4462 = vmatpush2.bf16.msra.mxu0 %v12054_v39  ;;  %4695 = vmatpush2.bf16.msra.mxu1 %v12057_v62  ;;  %v12072_v62 = vld [vmem:[%s17660_s3 + $0x120] ss:$12 sps:$4 sm:$0xff]  }
 0x293   :  { %v14285_v14 = vadd.f32 %v3350_v32, %v3117_v33  ;;  %4463 = vmatprep.subr.bf16.mxu0 %v12062_v20  ;;  %4696 = vmatprep.subr.bf16.mxu1 %v12065_v21  ;;  %v12075_v20 = vld [vmem:[%s17660_s3 + $0x2a0] ss:$12 sps:$4 sm:$0xff]  }
 0x294   :  { %v3119_v27 = vpop.f32.mrf.mxu0  ;;  %v3352_v22 = vpop.f32.mrf.mxu1  ;;  %v12083_v57 = vld [vmem:[%s17660_s3 + $0x28c] ss:$12 sps:$4 sm:$0xff]  }
 0x295   :  { %v14293_v40 = vadd.f32 %v3352_v22, %v3119_v27  ;;  %v12081_v27 = vld [vmem:[%s17660_s3 + $0x288] ss:$12 sps:$4 sm:$0xff]  }
 0x296   :  { %v3121_v10 = vpop.f32.mrf.mxu0  ;;  %v3354_v54 = vpop.f32.mrf.mxu1  ;;  %4464 = vmatpush2.bf16.msra.mxu0 %v12060_v50  ;;  %4697 = vmatpush2.bf16.msra.mxu1 %v12063_v51 }
 0x297   :  { %v14301_v25 = vadd.f32 %v3354_v54, %v3121_v10  ;;  %4465 = vmatprep.subr.bf16.mxu0 %v12068_v19  ;;  %4698 = vmatprep.subr.bf16.mxu1 %v12071_v15  ;;  %v12078_v15 = vld [vmem:[%s17660_s3 + $0x108] ss:$12 sps:$4 sm:$0xff]  }
 0x298   :  { %v3125_v1 = vpop.f32.mrf.mxu0  ;;  %v3358_v24 = vpop.f32.mrf.mxu1  ;;  %3620 = vmatmul.mubr.bf16.gmra.mxu0 %v13744_v4  ;;  %3813 = vmatmul.mubr.bf16.gmra.mxu1 %v13746_v56  ;;  %v12086_v10 = vld [vmem:[%s17660_s3 + $0xf4] ss:$12 sps:$4 sm:$0xff]  }
 0x299   :  { %v14311_v35 = vadd.f32 %v3358_v24, %v3125_v1  ;;  %3627 = vmatprep.mubr.bf16.mxu0 %v13773_v45  ;;  %3820 = vmatprep.mubr.bf16.mxu1 %v13775_v18  ;;  %v12089_v54 = vld [vmem:[%s17660_s3 + $0x274] ss:$12 sps:$4 sm:$0xff]   ;;  %v12084_v24 = vld [vmem:[%s17660_s3 + $0xf0] ss:$12 sps:$4 sm:$0xff]  }
 0x29a   :  { %v3127_v23 = vpop.f32.mrf.mxu0  ;;  %v3360_v39 = vpop.f32.mrf.mxu1  ;;  %4466 = vmatpush2.bf16.msra.mxu0 %v12066_v55  ;;  %4699 = vmatpush2.bf16.msra.mxu1 %v12069_v37 }
 0x29b   :  { %v14321_v21 = vadd.f32 %v3360_v39, %v3127_v23  ;;  %4467 = vmatprep.subr.bf16.mxu0 %v12074_v3  ;;  %4700 = vmatprep.subr.bf16.mxu1 %v12077_v2  ;;  %v12087_v23 = vld [vmem:[%s17660_s3 + $0x270] ss:$12 sps:$4 sm:$0xff]  }
 0x29c   :  { %v3129_v33 = vpop.f32.mrf.mxu0  ;;  %v3362_v32 = vpop.f32.mrf.mxu1 }
 0x29d   :  { %v14329_v50 = vadd.f32 %v3362_v32, %v3129_v33 }
 0x29e   :  { %v3131_v51 = vpop.f32.mrf.mxu0  ;;  %v3364_v19 = vpop.f32.mrf.mxu1  ;;  %4468 = vmatpush2.bf16.msra.mxu0 %v12072_v62  ;;  %4701 = vmatpush2.bf16.msra.mxu1 %v12075_v20  ;;  %v12092_v62 = vld [vmem:[%s17660_s3 + $0xdc] ss:$12 sps:$4 sm:$0xff]  }
 0x29f   :  { %v14337_v22 = vadd.f32 %v3364_v19, %v3131_v51  ;;  %4469 = vmatprep.subr.bf16.mxu0 %v12080_v12  ;;  %4702 = vmatprep.subr.bf16.mxu1 %v12083_v57  ;;  %v12095_v20 = vld [vmem:[%s17660_s3 + $0x25c] ss:$12 sps:$4 sm:$0xff]   ;;  %v12090_v19 = vld [vmem:[%s17660_s3 + $0xd8] ss:$12 sps:$4 sm:$0xff]  }
 0x2a0   :  { %v3135_v55 = vpop.f32.mrf.mxu0  ;;  %v3368_v37 = vpop.f32.mrf.mxu1  ;;  %3628 = vmatmul.mubr.bf16.gmra.mxu0 %v13780_v26  ;;  %3821 = vmatmul.mubr.bf16.gmra.mxu1 %v13782_v42 }
 0x2a1   :  { %v14347_v3 = vadd.f32 %v3368_v37, %v3135_v55  ;;  %3635 = vmatprep.mubr.bf16.mxu0 %v13809_v7  ;;  %3828 = vmatprep.mubr.bf16.mxu1 %v13811_v38 }
 0x2a2   :  { %v3137_v2 = vpop.f32.mrf.mxu0  ;;  %v3370_v1 = vpop.f32.mrf.mxu1  ;;  %4470 = vmatpush2.bf16.msra.mxu0 %v12078_v15  ;;  %4703 = vmatpush2.bf16.msra.mxu1 %v12081_v27  ;;  %v12093_v15 = vld [vmem:[%s17660_s3 + $0x258] ss:$12 sps:$4 sm:$0xff]  }
 0x2a3   :  { %v14357_v39 = vadd.f32 %v3370_v1, %v3137_v2  ;;  %4471 = vmatprep.subr.bf16.mxu0 %v12086_v10  ;;  %4704 = vmatprep.subr.bf16.mxu1 %v12089_v54  ;;  %v12098_v10 = vld [vmem:[%s17660_s3 + $0xc4] ss:$12 sps:$4 sm:$0xff]  }
 0x2a4   :  { %v3139_v12 = vpop.f32.mrf.mxu0  ;;  %v3372_v57 = vpop.f32.mrf.mxu1  ;;  %v12101_v54 = vld [vmem:[%s17660_s3 + $0x244] ss:$12 sps:$4 sm:$0xff]  }
 0x2a5   :  { %v14365_v33 = vadd.f32 %v3372_v57, %v3139_v12 }
 0x2a6   :  { %v3141_v32 = vpop.f32.mrf.mxu0  ;;  %v3374_v51 = vpop.f32.mrf.mxu1  ;;  %4472 = vmatpush2.bf16.msra.mxu0 %v12084_v24  ;;  %4705 = vmatpush2.bf16.msra.mxu1 %v12087_v23  ;;  %v12096_v23 = vld [vmem:[%s17660_s3 + $0xc0] ss:$12 sps:$4 sm:$0xff]  }
 0x2a7   :  { %v14373_v27 = vadd.f32 %v3374_v51, %v3141_v32  ;;  %4473 = vmatprep.subr.bf16.mxu0 %v12092_v62  ;;  %4706 = vmatprep.subr.bf16.mxu1 %v12095_v20  ;;  %v12099_v62 = vld [vmem:[%s17660_s3 + $0x240] ss:$12 sps:$4 sm:$0xff]  }
 0x2a8   :  { %v3145_v55 = vpop.f32.mrf.mxu0  ;;  %v3378_v37 = vpop.f32.mrf.mxu1  ;;  %3636 = vmatmul.mubr.bf16.gmra.mxu0 %v13816_v58  ;;  %3829 = vmatmul.mubr.bf16.gmra.mxu1 %v13818_v60 }
 0x2a9   :  { %v14383_v2 = vadd.f32 %v3378_v37, %v3145_v55  ;;  %3643 = vmatprep.mubr.bf16.mxu0 %v13848_v6  ;;  %3836 = vmatprep.mubr.bf16.mxu1 %v13850_v5 }
 0x2aa   :  { %v3147_v1 = vpop.f32.mrf.mxu0  ;;  %v3380_v24 = vpop.f32.mrf.mxu1  ;;  %4474 = vmatpush2.bf16.msra.mxu0 %v12090_v19  ;;  %4707 = vmatpush2.bf16.msra.mxu1 %v12093_v15 }
 0x2ab   :  { %v14393_v20 = vadd.f32 %v3380_v24, %v3147_v1  ;;  %4475 = vmatprep.subr.bf16.mxu0 %v12098_v10  ;;  %4708 = vmatprep.subr.bf16.mxu1 %v12101_v54  ;;  %v18100_v1 = vld [vmem:[#allocation117_spill] sm:$0xff]  ;;  %v18101_v10 = vld [vmem:[#allocation118_spill] sm:$0xff]  ;;  %v18103_v24 = vld [vmem:[#allocation119_spill] sm:$0xff] }
 0x2ac   :  { %v3149_v12 = vpop.f32.mrf.mxu0  ;;  %v3382_v57 = vpop.f32.mrf.mxu1 }
 0x2ad   :  { %18097 = vst [vmem:[#allocation179_spill] sm:$0xff] %v14393_v20  ;;  %v14395_v32 = vadd.f32 %v3382_v57, %v3149_v12  ;;  %v18104_v12 = vld [vmem:[#allocation120_spill] sm:$0xff]  ;;  %v18254_v20 = vld [vmem:[#allocation39_spill] sm:$0xff] }
 0x2ae   :  { %v3151_v51 = vpop.f32.mrf.mxu0  ;;  %v3384_v55 = vpop.f32.mrf.mxu1  ;;  %4476 = vmatpush2.bf16.msra.mxu0 %v12096_v23  ;;  %4709 = vmatpush2.bf16.msra.mxu1 %v12099_v62 }
 0x2af   :  { %18098 = vst [vmem:[#allocation180_spill] sm:$0xff] %v14395_v32  ;;  %v14397_v19 = vadd.f32 %v3384_v55, %v3151_v51  ;;  %4911 = vmatprep.subr.bf16.mxu0 %v17960_v9  ;;  %5104 = vmatprep.subr.bf16.mxu1 %v17960_v9  ;;  %v18252_v32 = vld [vmem:[#allocation42_spill] sm:$0xff] }
 0x2b0   :  { %v3155_v15 = vpop.f32.mrf.mxu0  ;;  %v3388_v37 = vpop.f32.mrf.mxu1  ;;  %3644 = vmatmul.mubr.bf16.gmra.mxu0 %v18100_v1  ;;  %3837 = vmatmul.mubr.bf16.gmra.mxu1 %v18101_v10 }
 0x2b1   :  { %18099 = vst [vmem:[#allocation181_spill] sm:$0xff] %v14397_v19  ;;  %v14403_v54 = vadd.f32 %v3388_v37, %v3155_v15  ;;  %3651 = vmatprep.mubr.bf16.mxu0 %v18103_v24  ;;  %3844 = vmatprep.mubr.bf16.mxu1 %v18104_v12  ;;  %v18108_v15 = vld [vmem:[#allocation121_spill] sm:$0xff]  ;;  %v18109_v37 = vld [vmem:[#allocation122_spill] sm:$0xff] }
 0x2b2   :  { %v3157_v23 = vpop.f32.mrf.mxu0  ;;  %v3390_v62 = vpop.f32.mrf.mxu1  ;;  %v18251_v19 = vld [vmem:[#allocation41_spill] sm:$0xff] }
 0x2b3   :  { %18102 = vst [vmem:[#allocation182_spill] sm:$0xff] %v14403_v54  ;;  %v14407_v57 = vadd.f32 %v3390_v62, %v3157_v23  ;;  %v18112_v23 = vld [vmem:[#allocation124_spill] sm:$0xff] }
 0x2b4   :  { %v3159_v51 = vpop.f32.mrf.mxu0  ;;  %v3392_v55 = vpop.f32.mrf.mxu1  ;;  %v18249_v54 = vld [vmem:[#allocation36_spill] sm:$0xff] }
 0x2b5   :  { %18105 = vst [vmem:[#allocation183_spill] sm:$0xff] %v14407_v57  ;;  %v14409_v48 = vadd.f32 %v3392_v55, %v3159_v51  ;;  %v18248_v57 = vld [vmem:[#allocation35_spill] sm:$0xff] }
 0x2b6   :  { %v3161_v43 = vpop.f32.mrf.mxu0  ;;  %v3394_v52 = vpop.f32.mrf.mxu1 }
 0x2b7   :  { %18106 = vst [vmem:[#allocation184_spill] sm:$0xff] %v14409_v48  ;;  %v14411_v49 = vadd.f32 %v3394_v52, %v3161_v43 }
 0x2b8   :  { %v3165_v61 = vpop.f32.mrf.mxu0  ;;  %v3398_v47 = vpop.f32.mrf.mxu1  ;;  %3652 = vmatmul.mubr.bf16.gmra.mxu0 %v18108_v15  ;;  %3845 = vmatmul.mubr.bf16.gmra.mxu1 %v18109_v37 }
 0x2b9   :  { %18107 = vst [vmem:[#allocation185_spill] sm:$0xff] %v14411_v49  ;;  %v14415_v8 = vadd.f32 %v3398_v47, %v3165_v61  ;;  %3659 = vmatprep.mubr.bf16.mxu0 %v18111_v63  ;;  %3852 = vmatprep.mubr.bf16.mxu1 %v18112_v23  ;;  %v18116_v47 = vld [vmem:[#allocation125_spill] sm:$0xff]  ;;  %v18117_v61 = vld [vmem:[#allocation126_spill] sm:$0xff]  ;;  %v18119_v23 = vld [vmem:[#allocation127_spill] sm:$0xff] }
 0x2ba   :  { %v3167_v62 = vpop.f32.mrf.mxu0  ;;  %v3400_v31 = vpop.f32.mrf.mxu1 }
 0x2bb   :  { %18110 = vst [vmem:[#allocation186_spill] sm:$0xff] %v14415_v8  ;;  %v14419_v51 = vadd.f32 %v3400_v31, %v3167_v62  ;;  %v18120_v31 = vld [vmem:[#allocation128_spill] sm:$0xff] }
 0x2bc   :  { %v3169_v55 = vpop.f32.mrf.mxu0  ;;  %v3402_v11 = vpop.f32.mrf.mxu1  ;;  %v12133_v8 = vld [vmem:[%s17660_s3 + $0x248] ss:$12 sps:$4 sm:$0xff]  }
 0x2bd   :  { %18113 = vst [vmem:[#allocation187_spill] sm:$0xff] %v14419_v51  ;;  %v14421_v43 = vadd.f32 %v3402_v11, %v3169_v55  ;;  %v12132_v51 = vld [vmem:[%s17660_s3 + $0xc8] ss:$12 sps:$4 sm:$0xff]  }
 0x2be   :  { %v3171_v52 = vpop.f32.mrf.mxu0  ;;  %v3404_v44 = vpop.f32.mrf.mxu1 }
 0x2bf   :  { %18114 = vst [vmem:[#allocation188_spill] sm:$0xff] %v14421_v43  ;;  %v14423_v59 = vadd.f32 %v3404_v44, %v3171_v52 }
 0x2c0   :  { %v3175_v41 = vpop.f32.mrf.mxu0  ;;  %v3408_v37 = vpop.f32.mrf.mxu1  ;;  %3660 = vmatmul.mubr.bf16.gmra.mxu0 %v18116_v47  ;;  %3853 = vmatmul.mubr.bf16.gmra.mxu1 %v18117_v61 }
 0x2c1   :  { %18115 = vst [vmem:[#allocation189_spill] sm:$0xff] %v14423_v59  ;;  %v14427_v63 = vadd.f32 %v3408_v37, %v3175_v41  ;;  %3667 = vmatprep.mubr.bf16.mxu0 %v18119_v23  ;;  %3860 = vmatprep.mubr.bf16.mxu1 %v18120_v31  ;;  %v18124_v41 = vld [vmem:[#allocation129_spill] sm:$0xff]  ;;  %v18125_v37 = vld [vmem:[#allocation130_spill] sm:$0xff]  ;;  %v18127_v31 = vld [vmem:[#allocation131_spill] sm:$0xff] }
 0x2c2   :  { %v3177_v62 = vpop.f32.mrf.mxu0  ;;  %v3410_v15 = vpop.f32.mrf.mxu1 }
 0x2c3   :  { %18118 = vst [vmem:[#allocation190_spill] sm:$0xff] %v14427_v63  ;;  %v14431_v11 = vadd.f32 %v3410_v15, %v3177_v62  ;;  %v18128_v15 = vld [vmem:[#allocation132_spill] sm:$0xff]  ;;  %v12129_v63 = vld [vmem:[%s17660_s3 + $0x278] ss:$12 sps:$4 sm:$0xff]  }
 0x2c4   :  { %v3179_v55 = vpop.f32.mrf.mxu0  ;;  %v3412_v12 = vpop.f32.mrf.mxu1 }
 0x2c5   :  { %18121 = vst [vmem:[#allocation191_spill] sm:$0xff] %v14431_v11  ;;  %v14433_v44 = vadd.f32 %v3412_v12, %v3179_v55  ;;  %v12128_v11 = vld [vmem:[%s17660_s3 + $0xf8] ss:$12 sps:$4 sm:$0xff]  }
 0x2c6   :  { %v3181_v52 = vpop.f32.mrf.mxu0  ;;  %v3414_v24 = vpop.f32.mrf.mxu1 }
 0x2c7   :  { %18122 = vst [vmem:[#allocation192_spill] sm:$0xff] %v14433_v44  ;;  %v14435_v10 = vadd.f32 %v3414_v24, %v3181_v52 }
 0x2c8   :  { %v3185_v47 = vpop.f32.mrf.mxu0  ;;  %v3418_v61 = vpop.f32.mrf.mxu1  ;;  %3668 = vmatmul.mubr.bf16.gmra.mxu0 %v18124_v41  ;;  %3861 = vmatmul.mubr.bf16.gmra.mxu1 %v18125_v37 }
 0x2c9   :  { %18123 = vst [vmem:[#allocation193_spill] sm:$0xff] %v14435_v10  ;;  %v14439_v23 = vadd.f32 %v3418_v61, %v3185_v47  ;;  %3675 = vmatprep.mubr.bf16.mxu0 %v18127_v31  ;;  %3868 = vmatprep.mubr.bf16.mxu1 %v18128_v15  ;;  %v18132_v47 = vld [vmem:[#allocation133_spill] sm:$0xff]  ;;  %v18133_v61 = vld [vmem:[#allocation134_spill] sm:$0xff]  ;;  %v18135_v15 = vld [vmem:[#allocation135_spill] sm:$0xff] }
 0x2ca   :  { %v3187_v62 = vpop.f32.mrf.mxu0  ;;  %v3420_v1 = vpop.f32.mrf.mxu1 }
 0x2cb   :  { %18126 = vst [vmem:[#allocation194_spill] sm:$0xff] %v14439_v23  ;;  %v14443_v12 = vadd.f32 %v3420_v1, %v3187_v62  ;;  %v18136_v1 = vld [vmem:[#allocation136_spill] sm:$0xff] }
 0x2cc   :  { %v3189_v55 = vpop.f32.mrf.mxu0  ;;  %v3422_v5 = vpop.f32.mrf.mxu1  ;;  %v12125_v23 = vld [vmem:[%s17660_s3 + $0x2a8] ss:$12 sps:$4 sm:$0xff]  }
 0x2cd   :  { %18129 = vst [vmem:[#allocation195_spill] sm:$0xff] %v14443_v12  ;;  %v14445_v24 = vadd.f32 %v3422_v5, %v3189_v55  ;;  %v12124_v12 = vld [vmem:[%s17660_s3 + $0x128] ss:$12 sps:$4 sm:$0xff]  }
 0x2ce   :  { %v3191_v52 = vpop.f32.mrf.mxu0  ;;  %v3424_v6 = vpop.f32.mrf.mxu1 }
 0x2cf   :  { %18130 = vst [vmem:[#allocation196_spill] sm:$0xff] %v14445_v24  ;;  %v14447_v60 = vadd.f32 %v3424_v6, %v3191_v52 }
 0x2d0   :  { %v3195_v41 = vpop.f32.mrf.mxu0  ;;  %v3428_v37 = vpop.f32.mrf.mxu1  ;;  %3676 = vmatmul.mubr.bf16.gmra.mxu0 %v18132_v47  ;;  %3869 = vmatmul.mubr.bf16.gmra.mxu1 %v18133_v61 }
 0x2d1   :  { %18131 = vst [vmem:[#allocation197_spill] sm:$0xff] %v14447_v60  ;;  %v14451_v31 = vadd.f32 %v3428_v37, %v3195_v41  ;;  %3683 = vmatprep.mubr.bf16.mxu0 %v18135_v15  ;;  %3876 = vmatprep.mubr.bf16.mxu1 %v18136_v1  ;;  %v18140_v41 = vld [vmem:[#allocation137_spill] sm:$0xff]  ;;  %v18141_v37 = vld [vmem:[#allocation138_spill] sm:$0xff]  ;;  %v18143_v1 = vld [vmem:[#allocation139_spill] sm:$0xff] }
 0x2d2   :  { %v3197_v62 = vpop.f32.mrf.mxu0  ;;  %v3430_v58 = vpop.f32.mrf.mxu1 }
 0x2d3   :  { %18134 = vst [vmem:[#allocation198_spill] sm:$0xff] %v14451_v31  ;;  %v14455_v5 = vadd.f32 %v3430_v58, %v3197_v62  ;;  %v18144_v58 = vld [vmem:[#allocation140_spill] sm:$0xff] }
 0x2d4   :  { %v3199_v55 = vpop.f32.mrf.mxu0  ;;  %v3432_v38 = vpop.f32.mrf.mxu1 }
 0x2d5   :  { %18137 = vst [vmem:[#allocation199_spill] sm:$0xff] %v14455_v5  ;;  %v14457_v6 = vadd.f32 %v3432_v38, %v3199_v55  ;;  %v18228_v5 = vld [vmem:[#allocation26_spill] sm:$0xff] }
 0x2d6   :  { %v3201_v52 = vpop.f32.mrf.mxu0  ;;  %v3434_v7 = vpop.f32.mrf.mxu1 }
 0x2d7   :  { %18138 = vst [vmem:[#allocation200_spill] sm:$0xff] %v14457_v6  ;;  %v14459_v42 = vadd.f32 %v3434_v7, %v3201_v52  ;;  %v12118_v6 = vld [vmem:[%s17660_s3 + $0x170] ss:$12 sps:$4 sm:$0xff]  }
 0x2d8   :  { %v3205_v47 = vpop.f32.mrf.mxu0  ;;  %v3438_v61 = vpop.f32.mrf.mxu1  ;;  %3684 = vmatmul.mubr.bf16.gmra.mxu0 %v18140_v41  ;;  %3877 = vmatmul.mubr.bf16.gmra.mxu1 %v18141_v37 }
 0x2d9   :  { %18139 = vst [vmem:[#allocation201_spill] sm:$0xff] %v14459_v42  ;;  %v14463_v15 = vadd.f32 %v3438_v61, %v3205_v47  ;;  %3691 = vmatprep.mubr.bf16.mxu0 %v18143_v1  ;;  %3884 = vmatprep.mubr.bf16.mxu1 %v18144_v58  ;;  %v18148_v47 = vld [vmem:[#allocation141_spill] sm:$0xff]  ;;  %v18149_v61 = vld [vmem:[#allocation142_spill] sm:$0xff]  ;;  %v18151_v58 = vld [vmem:[#allocation143_spill] sm:$0xff] }
 0x2da   :  { %v3207_v62 = vpop.f32.mrf.mxu0  ;;  %v3440_v26 = vpop.f32.mrf.mxu1 }
 0x2db   :  { %18142 = vst [vmem:[#allocation202_spill] sm:$0xff] %v14463_v15  ;;  %v14467_v38 = vadd.f32 %v3440_v26, %v3207_v62  ;;  %v18152_v26 = vld [vmem:[#allocation144_spill] sm:$0xff] }
 0x2dc   :  { %v3209_v55 = vpop.f32.mrf.mxu0  ;;  %v3442_v18 = vpop.f32.mrf.mxu1 }
 0x2dd   :  { %18145 = vst [vmem:[#allocation203_spill] sm:$0xff] %v14467_v38  ;;  %v14469_v7 = vadd.f32 %v3442_v18, %v3209_v55  ;;  %v18220_v38 = vld [vmem:[#allocation22_spill] sm:$0xff] }
 0x2de   :  { %v3211_v52 = vpop.f32.mrf.mxu0  ;;  %v3444_v45 = vpop.f32.mrf.mxu1 }
 0x2df   :  { %18146 = vst [vmem:[#allocation204_spill] sm:$0xff] %v14469_v7  ;;  %v14471_v56 = vadd.f32 %v3444_v45, %v3211_v52  ;;  %v12114_v7 = vld [vmem:[%s17660_s3 + $0x20] ss:$12 sps:$4 sm:$0xff]  }
 0x2e0   :  { %v3215_v41 = vpop.f32.mrf.mxu0  ;;  %v3448_v37 = vpop.f32.mrf.mxu1  ;;  %3692 = vmatmul.mubr.bf16.gmra.mxu0 %v18148_v47  ;;  %3885 = vmatmul.mubr.bf16.gmra.mxu1 %v18149_v61 }
 0x2e1   :  { %18147 = vst [vmem:[#allocation205_spill] sm:$0xff] %v14471_v56  ;;  %v14475_v1 = vadd.f32 %v3448_v37, %v3215_v41  ;;  %3699 = vmatprep.mubr.bf16.mxu0 %v18151_v58  ;;  %3892 = vmatprep.mubr.bf16.mxu1 %v18152_v26  ;;  %v18156_v41 = vld [vmem:[#allocation145_spill] sm:$0xff]  ;;  %v18157_v37 = vld [vmem:[#allocation146_spill] sm:$0xff]  ;;  %v18159_v26 = vld [vmem:[#allocation147_spill] sm:$0xff] }
 0x2e2   :  { %v3217_v62 = vpop.f32.mrf.mxu0  ;;  %v3450_v4 = vpop.f32.mrf.mxu1 }
 0x2e3   :  { %18150 = vst [vmem:[#allocation206_spill] sm:$0xff] %v14475_v1  ;;  %v14479_v18 = vadd.f32 %v3450_v4, %v3217_v62  ;;  %v18160_v4 = vld [vmem:[#allocation148_spill] sm:$0xff] }
 0x2e4   :  { %v3219_v55 = vpop.f32.mrf.mxu0  ;;  %v3452_v0 = vpop.f32.mrf.mxu1 }
 0x2e5   :  { %18153 = vst [vmem:[#allocation207_spill] sm:$0xff] %v14479_v18  ;;  %v14481_v45 = vadd.f32 %v3452_v0, %v3219_v55  ;;  %v18212_v18 = vld [vmem:[#allocation18_spill] sm:$0xff] }
 0x2e6   :  { %v3221_v52 = vpop.f32.mrf.mxu0  ;;  %v3454_v36 = vpop.f32.mrf.mxu1 }
 0x2e7   :  { %18154 = vst [vmem:[#allocation208_spill] sm:$0xff] %v14481_v45  ;;  %v14483_v29 = vadd.f32 %v3454_v36, %v3221_v52  ;;  %v12110_v45 = vld [vmem:[%s17660_s3 + $0x50] ss:$12 sps:$4 sm:$0xff]  }
 0x2e8   :  { %v3225_v47 = vpop.f32.mrf.mxu0  ;;  %v3458_v61 = vpop.f32.mrf.mxu1  ;;  %3700 = vmatmul.mubr.bf16.gmra.mxu0 %v18156_v41  ;;  %3893 = vmatmul.mubr.bf16.gmra.mxu1 %v18157_v37 }
 0x2e9   :  { %18155 = vst [vmem:[#allocation209_spill] sm:$0xff] %v14483_v29  ;;  %v14487_v58 = vadd.f32 %v3458_v61, %v3225_v47  ;;  %3707 = vmatprep.mubr.bf16.mxu0 %v18159_v26  ;;  %3900 = vmatprep.mubr.bf16.mxu1 %v18160_v4  ;;  %v18164_v47 = vld [vmem:[#allocation149_spill] sm:$0xff]  ;;  %v18165_v61 = vld [vmem:[#allocation150_spill] sm:$0xff]  ;;  %v18167_v4 = vld [vmem:[#allocation151_spill] sm:$0xff] }
 0x2ea   :  { %v3227_v62 = vpop.f32.mrf.mxu0  ;;  %v3460_v53 = vpop.f32.mrf.mxu1 }
 0x2eb   :  { %18158 = vst [vmem:[#allocation210_spill] sm:$0xff] %v14487_v58  ;;  %v14491_v0 = vadd.f32 %v3460_v53, %v3227_v62  ;;  %v18168_v53 = vld [vmem:[#allocation152_spill] sm:$0xff] }
 0x2ec   :  { %v3229_v55 = vpop.f32.mrf.mxu0  ;;  %v3462_v46 = vpop.f32.mrf.mxu1 }
 0x2ed   :  { %18161 = vst [vmem:[#allocation211_spill] sm:$0xff] %v14491_v0  ;;  %v14493_v36 = vadd.f32 %v3462_v46, %v3229_v55 }
 0x2ee   :  { %v3231_v52 = vpop.f32.mrf.mxu0  ;;  %v3464_v13 = vpop.f32.mrf.mxu1 }
 0x2ef   :  { %18162 = vst [vmem:[#allocation212_spill] sm:$0xff] %v14493_v36  ;;  %v14495_v29 = vadd.f32 %v3464_v13, %v3231_v52 }
 0x2f0   :  { %v3235_v41 = vpop.f32.mrf.mxu0  ;;  %v3468_v37 = vpop.f32.mrf.mxu1  ;;  %3708 = vmatmul.mubr.bf16.gmra.mxu0 %v18164_v47  ;;  %3901 = vmatmul.mubr.bf16.gmra.mxu1 %v18165_v61 }
 0x2f1   :  { %18163 = vst [vmem:[#allocation213_spill] sm:$0xff] %v14495_v29  ;;  %v14499_v26 = vadd.f32 %v3468_v37, %v3235_v41  ;;  %3715 = vmatprep.mubr.bf16.mxu0 %v18167_v4  ;;  %3908 = vmatprep.mubr.bf16.mxu1 %v18168_v53  ;;  %v18172_v41 = vld [vmem:[#allocation153_spill] sm:$0xff]  ;;  %v18173_v37 = vld [vmem:[#allocation154_spill] sm:$0xff]  ;;  %v18175_v53 = vld [vmem:[#allocation155_spill] sm:$0xff] }
 0x2f2   :  { %v3237_v62 = vpop.f32.mrf.mxu0  ;;  %v3470_v0 = vpop.f32.mrf.mxu1 }
 0x2f3   :  { %18166 = vst [vmem:[#allocation214_spill] sm:$0xff] %v14499_v26  ;;  %v14503_v46 = vadd.f32 %v3470_v0, %v3237_v62  ;;  %v18176_v0 = vld [vmem:[#allocation156_spill] sm:$0xff] }
 0x2f4   :  { %v3239_v55 = vpop.f32.mrf.mxu0  ;;  %v3472_v36 = vpop.f32.mrf.mxu1 }
 0x2f5   :  { %18169 = vst [vmem:[#allocation215_spill] sm:$0xff] %v14503_v46  ;;  %v14505_v13 = vadd.f32 %v3472_v36, %v3239_v55 }
 0x2f6   :  { %v3241_v52 = vpop.f32.mrf.mxu0  ;;  %v3474_v29 = vpop.f32.mrf.mxu1 }
 0x2f7   :  { %18170 = vst [vmem:[#allocation216_spill] sm:$0xff] %v14505_v13  ;;  %v14507_v58 = vadd.f32 %v3474_v29, %v3241_v52 }
 0x2f8   :  { %v3245_v47 = vpop.f32.mrf.mxu0  ;;  %v3478_v61 = vpop.f32.mrf.mxu1  ;;  %3716 = vmatmul.mubr.bf16.gmra.mxu0 %v18172_v41  ;;  %3909 = vmatmul.mubr.bf16.gmra.mxu1 %v18173_v37 }
 0x2f9   :  { %18171 = vst [vmem:[#allocation217_spill] sm:$0xff] %v14507_v58  ;;  %v14511_v4 = vadd.f32 %v3478_v61, %v3245_v47  ;;  %3723 = vmatprep.mubr.bf16.mxu0 %v18175_v53  ;;  %3916 = vmatprep.mubr.bf16.mxu1 %v18176_v0  ;;  %v18180_v47 = vld [vmem:[#allocation157_spill] sm:$0xff]  ;;  %v18181_v61 = vld [vmem:[#allocation158_spill] sm:$0xff] }
 0x2fa   :  { %v3247_v62 = vpop.f32.mrf.mxu0  ;;  %v3480_v46 = vpop.f32.mrf.mxu1 }
 0x2fb   :  { %18174 = vst [vmem:[#allocation218_spill] sm:$0xff] %v14511_v4  ;;  %v14515_v36 = vadd.f32 %v3480_v46, %v3247_v62 }
 0x2fc   :  { %v3249_v55 = vpop.f32.mrf.mxu0  ;;  %v3482_v13 = vpop.f32.mrf.mxu1 }
 0x2fd   :  { %18177 = vst [vmem:[#allocation219_spill] sm:$0xff] %v14515_v36  ;;  %v14517_v29 = vadd.f32 %v3482_v13, %v3249_v55 }
 0x2fe   :  { %v3251_v52 = vpop.f32.mrf.mxu0  ;;  %v3484_v58 = vpop.f32.mrf.mxu1 }
 0x2ff   :  { %18178 = vst [vmem:[#allocation220_spill] sm:$0xff] %v14517_v29  ;;  %v14519_v26 = vadd.f32 %v3484_v58, %v3251_v52 }
 0x300   :  { %v3255_v41 = vpop.f32.mrf.mxu0  ;;  %v3488_v37 = vpop.f32.mrf.mxu1  ;;  %3724 = vmatmul.mubr.bf16.gmra.mxu0 %v18180_v47  ;;  %3917 = vmatmul.mubr.bf16.gmra.mxu1 %v18181_v61 }
 0x301   :  { %18179 = vst [vmem:[#allocation221_spill] sm:$0xff] %v14519_v26  ;;  %v14523_v53 = vadd.f32 %v3488_v37, %v3255_v41  ;;  %3731 = vmatprep.mubr.bf16.mxu0 %v14073_v16  ;;  %3924 = vmatprep.mubr.bf16.mxu1 %v14075_v28  ;;  %v18187_v37 = vld [vmem:[#allocation5_spill] sm:$0xff] }
 0x302   :  { %v3257_v46 = vpop.f32.mrf.mxu0  ;;  %v3490_v62 = vpop.f32.mrf.mxu1 }
 0x303   :  { %18182 = vst [vmem:[#allocation222_spill] sm:$0xff] %v14523_v53  ;;  %v14527_v13 = vadd.f32 %v3490_v62, %v3257_v46  ;;  %v18188_v46 = vld [vmem:[#allocation6_spill] sm:$0xff] }
 0x304   :  { %v3259_v55 = vpop.f32.mrf.mxu0  ;;  %v3492_v0 = vpop.f32.mrf.mxu1  ;;  %v18204_v53 = vld [vmem:[#allocation14_spill] sm:$0xff] }
 0x305   :  { %18183 = vst [vmem:[#allocation223_spill] sm:$0xff] %v14527_v13  ;;  %v14529_v58 = vadd.f32 %v3492_v0, %v3259_v55  ;;  %v18203_v13 = vld [vmem:[#allocation13_spill] sm:$0xff] }
 0x306   :  { %v3261_v52 = vpop.f32.mrf.mxu0  ;;  %v3494_v26 = vpop.f32.mrf.mxu1 }
 0x307   :  { %18184 = vst [vmem:[#allocation224_spill] sm:$0xff] %v14529_v58  ;;  %v14531_v29 = vadd.f32 %v3494_v26, %v3261_v52  ;;  %v12102_v52 = vld [vmem:[%s17660_s3 + $0xb0] ss:$12 sps:$4 sm:$0xff]  }
 0x308   :  { %v3265_v47 = vpop.f32.mrf.mxu0  ;;  %v3498_v61 = vpop.f32.mrf.mxu1  ;;  %3732 = vmatmul.mubr.bf16.gmra.mxu0 %v14079_v17  ;;  %3925 = vmatmul.mubr.bf16.gmra.mxu1 %v14081_v34 }
 0x309   :  { %18185 = vst [vmem:[#allocation225_spill] sm:$0xff] %v14531_v29  ;;  %v14535_v41 = vadd.f32 %v3498_v61, %v3265_v47  ;;  %4477 = vmatprep.mubr.bf16.mxu0 %v18187_v37  ;;  %4710 = vmatprep.mubr.bf16.mxu1 %v18188_v46  ;;  %v12103_v47 = vld [vmem:[%s17660_s3 + $0x230] ss:$12 sps:$4 sm:$0xff]  }
 0x30a   :  { %v3267_v62 = vpop.f32.mrf.mxu0  ;;  %v3500_v28 = vpop.f32.mrf.mxu1 }
 0x30b   :  { %18186 = vst [vmem:[#allocation226_spill] sm:$0xff] %v14535_v41  ;;  %v14539_v0 = vadd.f32 %v3500_v28, %v3267_v62  ;;  %v18192_v28 = vld [vmem:[#allocation3_spill] sm:$0xff]  ;;  %v18193_v62 = vld [vmem:[#allocation4_spill] sm:$0xff] }
 0x30c   :  { %v3269_v55 = vpop.f32.mrf.mxu0  ;;  %v3502_v16 = vpop.f32.mrf.mxu1 }
 0x30d   :  { %18189 = vst [vmem:[#allocation5_spill] sm:$0xff] %v14539_v0  ;;  %v14541_v26 = vadd.f32 %v3502_v16, %v3269_v55  ;;  %v12104_v55 = vld [vmem:[%s17660_s3 + $0x98] ss:$12 sps:$4 sm:$0xff]  }
 0x30e   :  { %v3271_v61 = vpop.f32.mrf.mxu0  ;;  %v3504_v34 = vpop.f32.mrf.mxu1 }
 0x30f   :  { %18190 = vst [vmem:[#allocation6_spill] sm:$0xff] %v14541_v26  ;;  %v14549_v17 = vadd.f32 %v3504_v34, %v3271_v61  ;;  %v12105_v26 = vld [vmem:[%s17660_s3 + $0x218] ss:$12 sps:$4 sm:$0xff]  }
 0x310   :  { %v3275_v41 = vpop.f32.mrf.mxu0  ;;  %v3508_v29 = vpop.f32.mrf.mxu1  ;;  %4478 = vmatmul.mubr.bf16.vlgmr.msra.gmra.mxu0 %v18192_v28  ;;  %4711 = vmatmul.mubr.bf16.vlgmr.msra.gmra.mxu1 %v18193_v62  ;;  %v18195_v34 = vld [vmem:[#allocation9_spill] sm:$0xff]  ;;  %v18196_v61 = vld [vmem:[#allocation10_spill] sm:$0xff] }
 0x311   :  { %18191 = vst [vmem:[#allocation227_spill] sm:$0xff] %v14549_v17  ;;  %v14553_v16 = vadd.f32 %v3508_v29, %v3275_v41  ;;  %4912 = vmatpush1.bf16.msra.mxu0 %v12102_v52  ;;  %5105 = vmatpush1.bf16.msra.mxu1 %v12103_v47 }
 0x312   :  { %4487 = vmatprep.mubr.bf16.mxu0 %v18195_v34  ;;  %4720 = vmatprep.mubr.bf16.mxu1 %v18196_v61  ;;  %v3277_v17 = vpop.f32.mrf.mxu0  ;;  %v3510_v0 = vpop.f32.mrf.mxu1 }
 0x313   :  { %18194 = vst [vmem:[#allocation3_spill] sm:$0xff] %v14553_v16  ;;  %v14563_v58 = vadd.f32 %v3510_v0, %v3277_v17  ;;  %4913 = vmatprep.subr.bf16.mxu0 %v17960_v9  ;;  %5106 = vmatprep.subr.bf16.mxu1 %v17960_v9  ;;  %v12106_v17 = vld [vmem:[%s17660_s3 + $0x80] ss:$12 sps:$4 sm:$0xff]  }
 0x314   :  { %v3279_v29 = vpop.f32.mrf.mxu0  ;;  %v3512_v41 = vpop.f32.mrf.mxu1  ;;  %v12107_v0 = vld [vmem:[%s17660_s3 + $0x200] ss:$12 sps:$4 sm:$0xff]  }
 0x315   :  { %18197 = vst [vmem:[#allocation4_spill] sm:$0xff] %v14563_v58  ;;  %v14567_v52 = vadd.f32 %v3512_v41, %v3279_v29  ;;  %4914 = vmatpush1.bf16.msra.mxu0 %v12104_v55  ;;  %5107 = vmatpush1.bf16.msra.mxu1 %v12105_v26  ;;  %v18200_v55 = vld [vmem:[#allocation7_spill] sm:$0xff]  ;;  %v18201_v26 = vld [vmem:[#allocation8_spill] sm:$0xff] }
 0x316   :  { %v3281_v47 = vpop.f32.mrf.mxu0  ;;  %v3514_v16 = vpop.f32.mrf.mxu1  ;;  %4915 = vmatprep.subr.bf16.mxu0 %v17960_v9  ;;  %5108 = vmatprep.subr.bf16.mxu1 %v17960_v9 }
 0x317   :  { %18198 = vst [vmem:[#allocation9_spill] sm:$0xff] %v14567_v52  ;;  %v14577_v58 = vadd.f32 %v3514_v16, %v3281_v47  ;;  %v12108_v16 = vld [vmem:[%s17660_s3 + $0x68] ss:$12 sps:$4 sm:$0xff]  }
 0x318   :  { %v3285_v29 = vpop.f32.mrf.mxu0  ;;  %v3518_v41 = vpop.f32.mrf.mxu1  ;;  %4488 = vmatmul.mubr.bf16.gmra.mxu0 %v18200_v55  ;;  %4721 = vmatmul.mubr.bf16.gmra.mxu1 %v18201_v26  ;;  %v12109_v47 = vld [vmem:[%s17660_s3 + $0x1e8] ss:$12 sps:$4 sm:$0xff]  }
 0x319   :  { %18199 = vst [vmem:[#allocation10_spill] sm:$0xff] %v14577_v58  ;;  %v14581_v52 = vadd.f32 %v3518_v41, %v3285_v29  ;;  %4497 = vmatprep.mubr.bf16.mxu0 %v18203_v13  ;;  %4730 = vmatprep.mubr.bf16.mxu1 %v18204_v53 }
 0x31a   :  { %v3287_v36 = vpop.f32.mrf.mxu0  ;;  %v3520_v4 = vpop.f32.mrf.mxu1  ;;  %4916 = vmatpush1.bf16.msra.mxu0 %v12106_v17  ;;  %5109 = vmatpush1.bf16.msra.mxu1 %v12107_v0 }
 0x31b   :  { %18202 = vst [vmem:[#allocation7_spill] sm:$0xff] %v14581_v52  ;;  %v14591_v58 = vadd.f32 %v3520_v4, %v3287_v36  ;;  %4917 = vmatprep.subr.bf16.mxu0 %v17960_v9  ;;  %5110 = vmatprep.subr.bf16.mxu1 %v17960_v9  ;;  %v12111_v4 = vld [vmem:[%s17660_s3 + $0x1d0] ss:$12 sps:$4 sm:$0xff]  }
 0x31c   :  { %v3289_v29 = vpop.f32.mrf.mxu0  ;;  %v3522_v41 = vpop.f32.mrf.mxu1 }
 0x31d   :  { %18205 = vst [vmem:[#allocation8_spill] sm:$0xff] %v14591_v58  ;;  %v14595_v52 = vadd.f32 %v3522_v41, %v3289_v29  ;;  %v18211_v58 = vld [vmem:[#allocation17_spill] sm:$0xff] }
 0x31e   :  { %v3291_v17 = vpop.f32.mrf.mxu0  ;;  %v3524_v0 = vpop.f32.mrf.mxu1  ;;  %4918 = vmatpush1.bf16.msra.mxu0 %v12108_v16  ;;  %5111 = vmatpush1.bf16.msra.mxu1 %v12109_v47  ;;  %v18209_v16 = vld [vmem:[#allocation12_spill] sm:$0xff] }
 0x31f   :  { %18206 = vst [vmem:[#allocation13_spill] sm:$0xff] %v14595_v52  ;;  %v14603_v36 = vadd.f32 %v3524_v0, %v3291_v17  ;;  %4919 = vmatprep.subr.bf16.mxu0 %v17960_v9  ;;  %5112 = vmatprep.subr.bf16.mxu1 %v17960_v9  ;;  %v18208_v52 = vld [vmem:[#allocation11_spill] sm:$0xff]  ;;  %v12112_v17 = vld [vmem:[%s17660_s3 + $0x38] ss:$12 sps:$4 sm:$0xff]  }
 0x320   :  { %v3295_v29 = vpop.f32.mrf.mxu0  ;;  %v3528_v41 = vpop.f32.mrf.mxu1  ;;  %4498 = vmatmul.mubr.bf16.gmra.mxu0 %v18208_v52  ;;  %4731 = vmatmul.mubr.bf16.gmra.mxu1 %v18209_v16  ;;  %v12113_v0 = vld [vmem:[%s17660_s3 + $0x1b8] ss:$12 sps:$4 sm:$0xff]  }
 0x321   :  { %18207 = vst [vmem:[#allocation14_spill] sm:$0xff] %v14603_v36  ;;  %v14609_v47 = vadd.f32 %v3528_v41, %v3295_v29  ;;  %4507 = vmatprep.mubr.bf16.mxu0 %v18211_v58  ;;  %4740 = vmatprep.mubr.bf16.mxu1 %v18212_v18 }
 0x322   :  { %v3297_v1 = vpop.f32.mrf.mxu0  ;;  %v3530_v56 = vpop.f32.mrf.mxu1  ;;  %4920 = vmatpush1.bf16.msra.mxu0 %v12110_v45  ;;  %5113 = vmatpush1.bf16.msra.mxu1 %v12111_v4 }
 0x323   :  { %18210 = vst [vmem:[#allocation11_spill] sm:$0xff] %v14609_v47  ;;  %v14619_v36 = vadd.f32 %v3530_v56, %v3297_v1  ;;  %4921 = vmatprep.subr.bf16.mxu0 %v17960_v9  ;;  %5114 = vmatprep.subr.bf16.mxu1 %v17960_v9  ;;  %v12115_v56 = vld [vmem:[%s17660_s3 + $0x1a0] ss:$12 sps:$4 sm:$0xff]  }
 0x324   :  { %v3299_v29 = vpop.f32.mrf.mxu0  ;;  %v3532_v41 = vpop.f32.mrf.mxu1 }
 0x325   :  { %18213 = vst [vmem:[#allocation12_spill] sm:$0xff] %v14619_v36  ;;  %v14623_v47 = vadd.f32 %v3532_v41, %v3299_v29  ;;  %v18219_v36 = vld [vmem:[#allocation21_spill] sm:$0xff] }
 0x326   :  { %v3301_v45 = vpop.f32.mrf.mxu0  ;;  %v3534_v4 = vpop.f32.mrf.mxu1  ;;  %4922 = vmatpush1.bf16.msra.mxu0 %v12112_v17  ;;  %5115 = vmatpush1.bf16.msra.mxu1 %v12113_v0  ;;  %v18217_v17 = vld [vmem:[#allocation16_spill] sm:$0xff] }
 0x327   :  { %18214 = vst [vmem:[#allocation17_spill] sm:$0xff] %v14623_v47  ;;  %v14631_v1 = vadd.f32 %v3534_v4, %v3301_v45  ;;  %4923 = vmatprep.subr.bf16.mxu0 %v17960_v9  ;;  %5116 = vmatprep.subr.bf16.mxu1 %v17960_v9  ;;  %v18216_v47 = vld [vmem:[#allocation15_spill] sm:$0xff] }
 0x328   :  { %v3305_v29 = vpop.f32.mrf.mxu0  ;;  %v3538_v41 = vpop.f32.mrf.mxu1  ;;  %4508 = vmatmul.mubr.bf16.gmra.mxu0 %v18216_v47  ;;  %4741 = vmatmul.mubr.bf16.gmra.mxu1 %v18217_v17  ;;  %v12116_v45 = vld [vmem:[%s17660_s3 + $0x8] ss:$12 sps:$4 sm:$0xff]  }
 0x329   :  { %18215 = vst [vmem:[#allocation18_spill] sm:$0xff] %v14631_v1  ;;  %v14637_v0 = vadd.f32 %v3538_v41, %v3305_v29  ;;  %4517 = vmatprep.mubr.bf16.mxu0 %v18219_v36  ;;  %4750 = vmatprep.mubr.bf16.mxu1 %v18220_v38  ;;  %v12117_v4 = vld [vmem:[%s17660_s3 + $0x188] ss:$12 sps:$4 sm:$0xff]  }
 0x32a   :  { %v3307_v15 = vpop.f32.mrf.mxu0  ;;  %v3540_v42 = vpop.f32.mrf.mxu1  ;;  %4924 = vmatpush1.bf16.msra.mxu0 %v12114_v7  ;;  %5117 = vmatpush1.bf16.msra.mxu1 %v12115_v56 }
 0x32b   :  { %18218 = vst [vmem:[#allocation15_spill] sm:$0xff] %v14637_v0  ;;  %v14647_v1 = vadd.f32 %v3540_v42, %v3307_v15  ;;  %4925 = vmatprep.subr.bf16.mxu0 %v17960_v9  ;;  %5118 = vmatprep.subr.bf16.mxu1 %v17960_v9  ;;  %v12119_v42 = vld [vmem:[%s17660_s3 + $0x2f0] ss:$12 sps:$4 sm:$0xff]  }
 0x32c   :  { %v3309_v29 = vpop.f32.mrf.mxu0  ;;  %v3542_v41 = vpop.f32.mrf.mxu1 }
 0x32d   :  { %18221 = vst [vmem:[#allocation16_spill] sm:$0xff] %v14647_v1  ;;  %v14651_v0 = vadd.f32 %v3542_v41, %v3309_v29  ;;  %v18227_v1 = vld [vmem:[#allocation25_spill] sm:$0xff] }
 0x32e   :  { %v3311_v7 = vpop.f32.mrf.mxu0  ;;  %v3544_v56 = vpop.f32.mrf.mxu1  ;;  %4926 = vmatpush1.bf16.msra.mxu0 %v12116_v45  ;;  %5119 = vmatpush1.bf16.msra.mxu1 %v12117_v4  ;;  %v18225_v45 = vld [vmem:[#allocation20_spill] sm:$0xff] }
 0x32f   :  { %18222 = vst [vmem:[#allocation21_spill] sm:$0xff] %v14651_v0  ;;  %v14659_v15 = vadd.f32 %v3544_v56, %v3311_v7  ;;  %4927 = vmatprep.subr.bf16.mxu0 %v17960_v9  ;;  %5120 = vmatprep.subr.bf16.mxu1 %v17960_v9  ;;  %v18224_v0 = vld [vmem:[#allocation19_spill] sm:$0xff]  ;;  %v12120_v7 = vld [vmem:[%s17660_s3 + $0x158] ss:$12 sps:$4 sm:$0xff]  }
 0x330   :  { %v3581_v29 = vpop.f32.mrf.mxu0  ;;  %v3774_v41 = vpop.f32.mrf.mxu1  ;;  %4518 = vmatmul.mubr.bf16.gmra.mxu0 %v18224_v0  ;;  %4751 = vmatmul.mubr.bf16.gmra.mxu1 %v18225_v45  ;;  %v12121_v56 = vld [vmem:[%s17660_s3 + $0x2d8] ss:$12 sps:$4 sm:$0xff]  }
 0x331   :  { %18223 = vst [vmem:[#allocation22_spill] sm:$0xff] %v14659_v15  ;;  %v14665_v4 = vadd.f32 %v3774_v41, %v3581_v29  ;;  %4527 = vmatprep.mubr.bf16.mxu0 %v18227_v1  ;;  %4760 = vmatprep.mubr.bf16.mxu1 %v18228_v5 }
 0x332   :  { %v3583_v31 = vpop.f32.mrf.mxu0  ;;  %v3776_v60 = vpop.f32.mrf.mxu1  ;;  %4928 = vmatpush2.bf16.msra.mxu0 %v12118_v6  ;;  %5121 = vmatpush2.bf16.msra.mxu1 %v12119_v42  ;;  %v12122_v6 = vld [vmem:[%s17660_s3 + $0x140] ss:$12 sps:$4 sm:$0xff]  }
 0x333   :  { %18226 = vst [vmem:[#allocation19_spill] sm:$0xff] %v14665_v4  ;;  %4929 = vmatprep.subr.bf16.mxu0 %v17960_v9  ;;  %5122 = vmatprep.subr.bf16.mxu1 %v17960_v9  ;;  %v12123_v42 = vld [vmem:[%s17660_s3 + $0x2c0] ss:$12 sps:$4 sm:$0xff]  }
 0x334   :  { %v3584_v29 = vpop.f32.mrf.mxu0  ;;  %v3777_v41 = vpop.f32.mrf.mxu1 }
 0x335   :  { %v14677_v4 = vadd.f32 %v3777_v41, %v3584_v29  ;;  %v18230_v29 = vld [vmem:[#allocation23_spill] sm:$0xff]  ;;  %v18231_v41 = vld [vmem:[#allocation24_spill] sm:$0xff] }
 0x336   :  { %v3586_v31 = vpop.f32.mrf.mxu0  ;;  %v3779_v60 = vpop.f32.mrf.mxu1  ;;  %4930 = vmatpush2.bf16.msra.mxu0 %v12120_v7  ;;  %5123 = vmatpush2.bf16.msra.mxu1 %v12121_v56  ;;  %v18233_v56 = vld [vmem:[#allocation29_spill] sm:$0xff] }
 0x337   :  { %18229 = vst [vmem:[#allocation20_spill] sm:$0xff] %v14677_v4  ;;  %4931 = vmatprep.subr.bf16.mxu0 %v17960_v9  ;;  %5124 = vmatprep.subr.bf16.mxu1 %v17960_v9  ;;  %v18234_v31 = vld [vmem:[#allocation30_spill] sm:$0xff] }
 0x338   :  { %v3589_v15 = vpop.f32.mrf.mxu0  ;;  %v3782_v24 = vpop.f32.mrf.mxu1  ;;  %4528 = vmatmul.mubr.bf16.gmra.mxu0 %v18230_v29  ;;  %4761 = vmatmul.mubr.bf16.gmra.mxu1 %v18231_v41 }
 0x339   :  { %v14689_v7 = vadd.f32 %v3782_v24, %v3589_v15  ;;  %4537 = vmatprep.mubr.bf16.mxu0 %v18233_v56  ;;  %4770 = vmatprep.mubr.bf16.mxu1 %v18234_v31 }
 0x33a   :  { %v3591_v60 = vpop.f32.mrf.mxu0  ;;  %v3784_v4 = vpop.f32.mrf.mxu1  ;;  %4932 = vmatpush2.bf16.msra.mxu0 %v12122_v6  ;;  %5125 = vmatpush2.bf16.msra.mxu1 %v12123_v42  ;;  %v12126_v6 = vld [vmem:[%s17660_s3 + $0x110] ss:$12 sps:$4 sm:$0xff]  }
 0x33b   :  { %18232 = vst [vmem:[#allocation25_spill] sm:$0xff] %v14689_v7  ;;  %4933 = vmatprep.subr.bf16.mxu0 %v17960_v9  ;;  %5126 = vmatprep.subr.bf16.mxu1 %v17960_v9  ;;  %v12127_v42 = vld [vmem:[%s17660_s3 + $0x290] ss:$12 sps:$4 sm:$0xff]  }
 0x33c   :  { %v3592_v24 = vpop.f32.mrf.mxu0  ;;  %v3785_v15 = vpop.f32.mrf.mxu1 }
 0x33d   :  { %v14701_v7 = vadd.f32 %v3785_v15, %v3592_v24  ;;  %v18236_v24 = vld [vmem:[#allocation27_spill] sm:$0xff]  ;;  %v18237_v15 = vld [vmem:[#allocation28_spill] sm:$0xff] }
 0x33e   :  { %v3594_v60 = vpop.f32.mrf.mxu0  ;;  %v3787_v4 = vpop.f32.mrf.mxu1  ;;  %4934 = vmatpush2.bf16.msra.mxu0 %v12124_v12  ;;  %5127 = vmatpush2.bf16.msra.mxu1 %v12125_v23  ;;  %v18239_v23 = vld [vmem:[#allocation33_spill] sm:$0xff] }
 0x33f   :  { %18235 = vst [vmem:[#allocation26_spill] sm:$0xff] %v14701_v7  ;;  %4935 = vmatprep.subr.bf16.mxu0 %v17960_v9  ;;  %5128 = vmatprep.subr.bf16.mxu1 %v17960_v9  ;;  %v18240_v60 = vld [vmem:[#allocation34_spill] sm:$0xff] }
 0x340   :  { %v3597_v10 = vpop.f32.mrf.mxu0  ;;  %v3790_v44 = vpop.f32.mrf.mxu1  ;;  %4538 = vmatmul.mubr.bf16.gmra.mxu0 %v18236_v24  ;;  %4771 = vmatmul.mubr.bf16.gmra.mxu1 %v18237_v15 }
 0x341   :  { %v14713_v12 = vadd.f32 %v3790_v44, %v3597_v10  ;;  %4547 = vmatprep.mubr.bf16.mxu0 %v18239_v23  ;;  %4780 = vmatprep.mubr.bf16.mxu1 %v18240_v60 }
 0x342   :  { %v3599_v4 = vpop.f32.mrf.mxu0  ;;  %v3792_v7 = vpop.f32.mrf.mxu1  ;;  %4936 = vmatpush2.bf16.msra.mxu0 %v12126_v6  ;;  %5129 = vmatpush2.bf16.msra.mxu1 %v12127_v42  ;;  %v12130_v6 = vld [vmem:[%s17660_s3 + $0xe0] ss:$12 sps:$4 sm:$0xff]  }
 0x343   :  { %18238 = vst [vmem:[#allocation23_spill] sm:$0xff] %v14713_v12  ;;  %4937 = vmatprep.subr.bf16.mxu0 %v17960_v9  ;;  %5130 = vmatprep.subr.bf16.mxu1 %v17960_v9  ;;  %v12131_v42 = vld [vmem:[%s17660_s3 + $0x260] ss:$12 sps:$4 sm:$0xff]  }
 0x344   :  { %v3600_v10 = vpop.f32.mrf.mxu0  ;;  %v3793_v44 = vpop.f32.mrf.mxu1 }
 0x345   :  { %v14725_v12 = vadd.f32 %v3793_v44, %v3600_v10  ;;  %v18242_v10 = vld [vmem:[#allocation31_spill] sm:$0xff]  ;;  %v18243_v44 = vld [vmem:[#allocation32_spill] sm:$0xff] }
 0x346   :  { %v3602_v4 = vpop.f32.mrf.mxu0  ;;  %v3795_v7 = vpop.f32.mrf.mxu1  ;;  %4938 = vmatpush2.bf16.msra.mxu0 %v12128_v11  ;;  %5131 = vmatpush2.bf16.msra.mxu1 %v12129_v63  ;;  %v18245_v63 = vld [vmem:[#allocation37_spill] sm:$0xff] }
 0x347   :  { %18241 = vst [vmem:[#allocation24_spill] sm:$0xff] %v14725_v12  ;;  %4939 = vmatprep.subr.bf16.mxu0 %v17960_v9  ;;  %5132 = vmatprep.subr.bf16.mxu1 %v17960_v9  ;;  %v18246_v4 = vld [vmem:[#allocation38_spill] sm:$0xff] }
 0x348   :  { %v3605_v59 = vpop.f32.mrf.mxu0  ;;  %v3798_v43 = vpop.f32.mrf.mxu1  ;;  %4548 = vmatmul.mubr.bf16.gmra.mxu0 %v18242_v10  ;;  %4781 = vmatmul.mubr.bf16.gmra.mxu1 %v18243_v44 }
 0x349   :  { %v14737_v11 = vadd.f32 %v3798_v43, %v3605_v59  ;;  %4557 = vmatprep.mubr.bf16.mxu0 %v18245_v63  ;;  %4790 = vmatprep.mubr.bf16.mxu1 %v18246_v4  ;;  %v12136_v59 = vld [vmem:[%s17660_s3 + $0x6ac] ss:$12 sps:$4 sm:$0xff]  }
 0x34a   :  { %v3607_v7 = vpop.f32.mrf.mxu0  ;;  %v3800_v12 = vpop.f32.mrf.mxu1  ;;  %4940 = vmatpush2.bf16.msra.mxu0 %v12130_v6  ;;  %5133 = vmatpush2.bf16.msra.mxu1 %v12131_v42  ;;  %v12139_v43 = vld [vmem:[%s17660_s3 + $0x82c] ss:$12 sps:$4 sm:$0xff]  }
 0x34b   :  { %18244 = vst [vmem:[#allocation29_spill] sm:$0xff] %v14737_v11  ;;  %4941 = vmatprep.subr.bf16.mxu0 %v17960_v9  ;;  %5134 = vmatprep.subr.bf16.mxu1 %v17960_v9 }
 0x34c   :  { %v3608_v12 = vpop.f32.mrf.mxu0  ;;  %v3801_v6 = vpop.f32.mrf.mxu1 }
 0x34d   :  { %v14755_v42 = vadd.f32 %v3801_v6, %v3608_v12 }
 0x34e   :  { %v3610_v7 = vpop.f32.mrf.mxu0  ;;  %v3803_v11 = vpop.f32.mrf.mxu1  ;;  %4942 = vmatpush2.bf16.msra.mxu0 %v12132_v51  ;;  %5135 = vmatpush2.bf16.msra.mxu1 %v12133_v8 }
 0x34f   :  { %18247 = vst [vmem:[#allocation30_spill] sm:$0xff] %v14755_v42  ;;  %5937 = vmatprep.subr.bf16.mxu0 %v12136_v59  ;;  %6170 = vmatprep.subr.bf16.mxu1 %v12139_v43 }
 0x350   :  { %v3613_v49 = vpop.f32.mrf.mxu0  ;;  %v3806_v48 = vpop.f32.mrf.mxu1  ;;  %4558 = vmatmul.mubr.bf16.gmra.mxu0 %v18248_v57  ;;  %4791 = vmatmul.mubr.bf16.gmra.mxu1 %v18249_v54  ;;  %v18255_v57 = vld [vmem:[#allocation40_spill] sm:$0xff]  ;;  %v18260_v54 = vld [vmem:[#allocation43_spill] sm:$0xff] }
 0x351   :  { %v14759_v9 = vadd.f32 %v3806_v48, %v3613_v49  ;;  %4567 = vmatprep.mubr.bf16.mxu0 %v18251_v19  ;;  %4800 = vmatprep.mubr.bf16.mxu1 %v18252_v32  ;;  %v18257_v49 = vld [vmem:[#allocation45_spill] sm:$0xff] }
 0x352   :  { %v3615_v12 = vpop.f32.mrf.mxu0  ;;  %v3808_v6 = vpop.f32.mrf.mxu1 }
 0x353   :  { %18250 = vst [vmem:[#allocation27_spill] sm:$0xff] %v14759_v9  ;;  %v18258_v9 = vld [vmem:[#allocation46_spill] sm:$0xff] }
 0x354   :  { %v3616_v7 = vpop.f32.mrf.mxu0  ;;  %v3809_v11 = vpop.f32.mrf.mxu1 }
 0x355   :  { %v14763_v51 = vadd.f32 %v3809_v11, %v3616_v7 }
 0x356   :  { %v3618_v8 = vpop.f32.mrf.mxu0  ;;  %v3811_v59 = vpop.f32.mrf.mxu1 }
 0x357   :  { %18253 = vst [vmem:[#allocation28_spill] sm:$0xff] %v14763_v51 }
 0x358   :  { %v3621_v43 = vpop.f32.mrf.mxu0  ;;  %v3814_v42 = vpop.f32.mrf.mxu1  ;;  %4568 = vmatmul.mubr.bf16.gmra.mxu0 %v18254_v20  ;;  %4801 = vmatmul.mubr.bf16.gmra.mxu1 %v18255_v57  ;;  %v18261_v20 = vld [vmem:[#allocation44_spill] sm:$0xff]  ;;  %v18266_v57 = vld [vmem:[#allocation47_spill] sm:$0xff] }
 0x359   :  { %v14767_v48 = vadd.f32 %v3814_v42, %v3621_v43  ;;  %4577 = vmatprep.mubr.bf16.mxu0 %v18257_v49  ;;  %4810 = vmatprep.mubr.bf16.mxu1 %v18258_v9  ;;  %v18263_v43 = vld [vmem:[#allocation49_spill] sm:$0xff] }
 0x35a   :  { %v3623_v12 = vpop.f32.mrf.mxu0  ;;  %v3816_v6 = vpop.f32.mrf.mxu1 }
 0x35b   :  { %18256 = vst [vmem:[#allocation33_spill] sm:$0xff] %v14767_v48  ;;  %v18264_v48 = vld [vmem:[#allocation50_spill] sm:$0xff] }
 0x35c   :  { %v3624_v32 = vpop.f32.mrf.mxu0  ;;  %v3817_v19 = vpop.f32.mrf.mxu1 }
 0x35d   :  { %v14771_v7 = vadd.f32 %v3817_v19, %v3624_v32 }
 0x35e   :  { %v3626_v11 = vpop.f32.mrf.mxu0  ;;  %v3819_v8 = vpop.f32.mrf.mxu1 }
 0x35f   :  { %18259 = vst [vmem:[#allocation34_spill] sm:$0xff] %v14771_v7 }
 0x360   :  { %v3629_v59 = vpop.f32.mrf.mxu0  ;;  %v3822_v51 = vpop.f32.mrf.mxu1  ;;  %4578 = vmatmul.mubr.bf16.gmra.mxu0 %v18260_v54  ;;  %4811 = vmatmul.mubr.bf16.gmra.mxu1 %v18261_v20  ;;  %v18267_v54 = vld [vmem:[#allocation48_spill] sm:$0xff]  ;;  %v18272_v20 = vld [vmem:[#allocation51_spill] sm:$0xff] }
 0x361   :  { %v14775_v42 = vadd.f32 %v3822_v51, %v3629_v59  ;;  %4587 = vmatprep.mubr.bf16.mxu0 %v18263_v43  ;;  %4820 = vmatprep.mubr.bf16.mxu1 %v18264_v48  ;;  %v18269_v59 = vld [vmem:[#allocation53_spill] sm:$0xff] }
 0x362   :  { %v3631_v12 = vpop.f32.mrf.mxu0  ;;  %v3824_v6 = vpop.f32.mrf.mxu1 }
 0x363   :  { %18262 = vst [vmem:[#allocation31_spill] sm:$0xff] %v14775_v42  ;;  %v18270_v42 = vld [vmem:[#allocation54_spill] sm:$0xff] }
 0x364   :  { %v3632_v9 = vpop.f32.mrf.mxu0  ;;  %v3825_v49 = vpop.f32.mrf.mxu1 }
 0x365   :  { %v14779_v32 = vadd.f32 %v3825_v49, %v3632_v9 }
 0x366   :  { %v3634_v19 = vpop.f32.mrf.mxu0  ;;  %v3827_v11 = vpop.f32.mrf.mxu1 }
 0x367   :  { %18265 = vst [vmem:[#allocation32_spill] sm:$0xff] %v14779_v32 }
 0x368   :  { %v3637_v8 = vpop.f32.mrf.mxu0  ;;  %v3830_v7 = vpop.f32.mrf.mxu1  ;;  %4588 = vmatmul.mubr.bf16.gmra.mxu0 %v18266_v57  ;;  %4821 = vmatmul.mubr.bf16.gmra.mxu1 %v18267_v54  ;;  %v18273_v57 = vld [vmem:[#allocation52_spill] sm:$0xff]  ;;  %v18278_v54 = vld [vmem:[#allocation55_spill] sm:$0xff] }
 0x369   :  { %v14783_v51 = vadd.f32 %v3830_v7, %v3637_v8  ;;  %4597 = vmatprep.mubr.bf16.mxu0 %v18269_v59  ;;  %4830 = vmatprep.mubr.bf16.mxu1 %v18270_v42  ;;  %v18275_v8 = vld [vmem:[#allocation57_spill] sm:$0xff] }
 0x36a   :  { %v3639_v12 = vpop.f32.mrf.mxu0  ;;  %v3832_v6 = vpop.f32.mrf.mxu1 }
 0x36b   :  { %18268 = vst [vmem:[#allocation37_spill] sm:$0xff] %v14783_v51  ;;  %v18276_v51 = vld [vmem:[#allocation58_spill] sm:$0xff] }
 0x36c   :  { %v3640_v48 = vpop.f32.mrf.mxu0  ;;  %v3833_v43 = vpop.f32.mrf.mxu1 }
 0x36d   :  { %v14787_v9 = vadd.f32 %v3833_v43, %v3640_v48 }
 0x36e   :  { %v3642_v49 = vpop.f32.mrf.mxu0  ;;  %v3835_v19 = vpop.f32.mrf.mxu1 }
 0x36f   :  { %18271 = vst [vmem:[#allocation38_spill] sm:$0xff] %v14787_v9 }
 0x370   :  { %v3645_v11 = vpop.f32.mrf.mxu0  ;;  %v3838_v32 = vpop.f32.mrf.mxu1  ;;  %4598 = vmatmul.mubr.bf16.gmra.mxu0 %v18272_v20  ;;  %4831 = vmatmul.mubr.bf16.gmra.mxu1 %v18273_v57  ;;  %v18279_v20 = vld [vmem:[#allocation56_spill] sm:$0xff]  ;;  %v18284_v57 = vld [vmem:[#allocation59_spill] sm:$0xff] }
 0x371   :  { %v14791_v7 = vadd.f32 %v3838_v32, %v3645_v11  ;;  %4607 = vmatprep.mubr.bf16.mxu0 %v18275_v8  ;;  %4840 = vmatprep.mubr.bf16.mxu1 %v18276_v51  ;;  %v18281_v11 = vld [vmem:[#allocation61_spill] sm:$0xff] }
 0x372   :  { %v3647_v12 = vpop.f32.mrf.mxu0  ;;  %v3840_v6 = vpop.f32.mrf.mxu1 }
 0x373   :  { %18274 = vst [vmem:[#allocation228_spill] sm:$0xff] %v14791_v7  ;;  %v18282_v7 = vld [vmem:[#allocation62_spill] sm:$0xff] }
 0x374   :  { %v3648_v42 = vpop.f32.mrf.mxu0  ;;  %v3841_v59 = vpop.f32.mrf.mxu1 }
 0x375   :  { %v14795_v48 = vadd.f32 %v3841_v59, %v3648_v42 }
 0x376   :  { %v3650_v43 = vpop.f32.mrf.mxu0  ;;  %v3843_v49 = vpop.f32.mrf.mxu1 }
 0x377   :  { %18277 = vst [vmem:[#allocation229_spill] sm:$0xff] %v14795_v48 }
 0x378   :  { %v3653_v19 = vpop.f32.mrf.mxu0  ;;  %v3846_v9 = vpop.f32.mrf.mxu1  ;;  %4608 = vmatmul.mubr.bf16.gmra.mxu0 %v18278_v54  ;;  %4841 = vmatmul.mubr.bf16.gmra.mxu1 %v18279_v20  ;;  %v18285_v54 = vld [vmem:[#allocation60_spill] sm:$0xff]  ;;  %v18290_v20 = vld [vmem:[#allocation63_spill] sm:$0xff] }
 0x379   :  { %v14799_v32 = vadd.f32 %v3846_v9, %v3653_v19  ;;  %4617 = vmatprep.mubr.bf16.mxu0 %v18281_v11  ;;  %4850 = vmatprep.mubr.bf16.mxu1 %v18282_v7  ;;  %v18287_v19 = vld [vmem:[#allocation65_spill] sm:$0xff] }
 0x37a   :  { %v3655_v12 = vpop.f32.mrf.mxu0  ;;  %v3848_v6 = vpop.f32.mrf.mxu1 }
 0x37b   :  { %18280 = vst [vmem:[#allocation230_spill] sm:$0xff] %v14799_v32  ;;  %v18288_v32 = vld [vmem:[#allocation66_spill] sm:$0xff] }
 0x37c   :  { %v3656_v51 = vpop.f32.mrf.mxu0  ;;  %v3849_v8 = vpop.f32.mrf.mxu1 }
 0x37d   :  { %v14803_v42 = vadd.f32 %v3849_v8, %v3656_v51 }
 0x37e   :  { %v3658_v59 = vpop.f32.mrf.mxu0  ;;  %v3851_v43 = vpop.f32.mrf.mxu1 }
 0x37f   :  { %18283 = vst [vmem:[#allocation231_spill] sm:$0xff] %v14803_v42 }
 0x380   :  { %v3661_v49 = vpop.f32.mrf.mxu0  ;;  %v3854_v48 = vpop.f32.mrf.mxu1  ;;  %4618 = vmatmul.mubr.bf16.gmra.mxu0 %v18284_v57  ;;  %4851 = vmatmul.mubr.bf16.gmra.mxu1 %v18285_v54  ;;  %v18291_v57 = vld [vmem:[#allocation64_spill] sm:$0xff]  ;;  %v18296_v54 = vld [vmem:[#allocation67_spill] sm:$0xff] }
 0x381   :  { %v14807_v9 = vadd.f32 %v3854_v48, %v3661_v49  ;;  %4627 = vmatprep.mubr.bf16.mxu0 %v18287_v19  ;;  %4860 = vmatprep.mubr.bf16.mxu1 %v18288_v32  ;;  %v18293_v49 = vld [vmem:[#allocation69_spill] sm:$0xff] }
 0x382   :  { %v3663_v12 = vpop.f32.mrf.mxu0  ;;  %v3856_v6 = vpop.f32.mrf.mxu1 }
 0x383   :  { %18286 = vst [vmem:[#allocation232_spill] sm:$0xff] %v14807_v9  ;;  %v18294_v9 = vld [vmem:[#allocation70_spill] sm:$0xff] }
 0x384   :  { %v3664_v7 = vpop.f32.mrf.mxu0  ;;  %v3857_v11 = vpop.f32.mrf.mxu1 }
 0x385   :  { %v14811_v51 = vadd.f32 %v3857_v11, %v3664_v7 }
 0x386   :  { %v3666_v8 = vpop.f32.mrf.mxu0  ;;  %v3859_v59 = vpop.f32.mrf.mxu1 }
 0x387   :  { %18289 = vst [vmem:[#allocation233_spill] sm:$0xff] %v14811_v51 }
 0x388   :  { %v3669_v43 = vpop.f32.mrf.mxu0  ;;  %v3862_v42 = vpop.f32.mrf.mxu1  ;;  %4628 = vmatmul.mubr.bf16.gmra.mxu0 %v18290_v20  ;;  %4861 = vmatmul.mubr.bf16.gmra.mxu1 %v18291_v57  ;;  %v18297_v20 = vld [vmem:[#allocation68_spill] sm:$0xff]  ;;  %v18302_v57 = vld [vmem:[#allocation71_spill] sm:$0xff] }
 0x389   :  { %v14815_v48 = vadd.f32 %v3862_v42, %v3669_v43  ;;  %4637 = vmatprep.mubr.bf16.mxu0 %v18293_v49  ;;  %4870 = vmatprep.mubr.bf16.mxu1 %v18294_v9  ;;  %v18299_v43 = vld [vmem:[#allocation73_spill] sm:$0xff] }
 0x38a   :  { %v3671_v12 = vpop.f32.mrf.mxu0  ;;  %v3864_v6 = vpop.f32.mrf.mxu1 }
 0x38b   :  { %18292 = vst [vmem:[#allocation234_spill] sm:$0xff] %v14815_v48  ;;  %v18300_v48 = vld [vmem:[#allocation74_spill] sm:$0xff] }
 0x38c   :  { %v3672_v32 = vpop.f32.mrf.mxu0  ;;  %v3865_v19 = vpop.f32.mrf.mxu1 }
 0x38d   :  { %v14819_v7 = vadd.f32 %v3865_v19, %v3672_v32 }
 0x38e   :  { %v3674_v11 = vpop.f32.mrf.mxu0  ;;  %v3867_v8 = vpop.f32.mrf.mxu1 }
 0x38f   :  { %18295 = vst [vmem:[#allocation235_spill] sm:$0xff] %v14819_v7 }
 0x390   :  { %v3677_v59 = vpop.f32.mrf.mxu0  ;;  %v3870_v51 = vpop.f32.mrf.mxu1  ;;  %4638 = vmatmul.mubr.bf16.gmra.mxu0 %v18296_v54  ;;  %4871 = vmatmul.mubr.bf16.gmra.mxu1 %v18297_v20  ;;  %v18303_v54 = vld [vmem:[#allocation72_spill] sm:$0xff]  ;;  %v18308_v20 = vld [vmem:[#allocation75_spill] sm:$0xff] }
 0x391   :  { %v14823_v42 = vadd.f32 %v3870_v51, %v3677_v59  ;;  %4647 = vmatprep.mubr.bf16.mxu0 %v18299_v43  ;;  %4880 = vmatprep.mubr.bf16.mxu1 %v18300_v48  ;;  %v18305_v59 = vld [vmem:[#allocation77_spill] sm:$0xff] }
 0x392   :  { %v3679_v12 = vpop.f32.mrf.mxu0  ;;  %v3872_v6 = vpop.f32.mrf.mxu1 }
 0x393   :  { %18298 = vst [vmem:[#allocation236_spill] sm:$0xff] %v14823_v42  ;;  %v18306_v42 = vld [vmem:[#allocation78_spill] sm:$0xff] }
 0x394   :  { %v3680_v9 = vpop.f32.mrf.mxu0  ;;  %v3873_v49 = vpop.f32.mrf.mxu1 }
 0x395   :  { %v14827_v32 = vadd.f32 %v3873_v49, %v3680_v9 }
 0x396   :  { %v3682_v19 = vpop.f32.mrf.mxu0  ;;  %v3875_v11 = vpop.f32.mrf.mxu1 }
 0x397   :  { %18301 = vst [vmem:[#allocation237_spill] sm:$0xff] %v14827_v32 }
 0x398   :  { %v3685_v8 = vpop.f32.mrf.mxu0  ;;  %v3878_v7 = vpop.f32.mrf.mxu1  ;;  %4648 = vmatmul.mubr.bf16.gmra.mxu0 %v18302_v57  ;;  %4881 = vmatmul.mubr.bf16.gmra.mxu1 %v18303_v54  ;;  %v18309_v57 = vld [vmem:[#allocation76_spill] sm:$0xff]  ;;  %v18314_v54 = vld [vmem:[#allocation79_spill] sm:$0xff] }
 0x399   :  { %v14831_v51 = vadd.f32 %v3878_v7, %v3685_v8  ;;  %4657 = vmatprep.mubr.bf16.mxu0 %v18305_v59  ;;  %4890 = vmatprep.mubr.bf16.mxu1 %v18306_v42  ;;  %v18311_v8 = vld [vmem:[#allocation81_spill] sm:$0xff] }
 0x39a   :  { %v3687_v12 = vpop.f32.mrf.mxu0  ;;  %v3880_v6 = vpop.f32.mrf.mxu1 }
 0x39b   :  { %18304 = vst [vmem:[#allocation238_spill] sm:$0xff] %v14831_v51  ;;  %v18312_v51 = vld [vmem:[#allocation82_spill] sm:$0xff] }
 0x39c   :  { %v3688_v48 = vpop.f32.mrf.mxu0  ;;  %v3881_v43 = vpop.f32.mrf.mxu1 }
 0x39d   :  { %v14835_v9 = vadd.f32 %v3881_v43, %v3688_v48 }
 0x39e   :  { %v3690_v49 = vpop.f32.mrf.mxu0  ;;  %v3883_v19 = vpop.f32.mrf.mxu1 }
 0x39f   :  { %18307 = vst [vmem:[#allocation239_spill] sm:$0xff] %v14835_v9 }
 0x3a0   :  { %v3693_v11 = vpop.f32.mrf.mxu0  ;;  %v3886_v32 = vpop.f32.mrf.mxu1  ;;  %4658 = vmatmul.mubr.bf16.gmra.mxu0 %v18308_v20  ;;  %4891 = vmatmul.mubr.bf16.gmra.mxu1 %v18309_v57  ;;  %v18315_v20 = vld [vmem:[#allocation80_spill] sm:$0xff] }
 0x3a1   :  { %v14839_v7 = vadd.f32 %v3886_v32, %v3693_v11  ;;  %4667 = vmatprep.mubr.bf16.mxu0 %v18311_v8  ;;  %4900 = vmatprep.mubr.bf16.mxu1 %v18312_v51 }
 0x3a2   :  { %v3695_v12 = vpop.f32.mrf.mxu0  ;;  %v3888_v6 = vpop.f32.mrf.mxu1 }
 0x3a3   :  { %18310 = vst [vmem:[#allocation76_spill] sm:$0xff] %v14839_v7 }
 0x3a4   :  { %v3696_v42 = vpop.f32.mrf.mxu0  ;;  %v3889_v59 = vpop.f32.mrf.mxu1 }
 0x3a5   :  { %v14843_v48 = vadd.f32 %v3889_v59, %v3696_v42  ;;  %v12134_v59 = vld [vmem:[%s17660_s3 + $0x6a8] ss:$12 sps:$4 sm:$0xff]  }
 0x3a6   :  { %v3698_v43 = vpop.f32.mrf.mxu0  ;;  %v3891_v49 = vpop.f32.mrf.mxu1 }
 0x3a7   :  { %18313 = vst [vmem:[#allocation81_spill] sm:$0xff] %v14843_v48  ;;  %v12137_v43 = vld [vmem:[%s17660_s3 + $0x828] ss:$12 sps:$4 sm:$0xff]  }
 0x3a8   :  { %v3701_v19 = vpop.f32.mrf.mxu0  ;;  %v3894_v9 = vpop.f32.mrf.mxu1  ;;  %4668 = vmatmul.mubr.bf16.gmra.mxu0 %v18314_v54  ;;  %4901 = vmatmul.mubr.bf16.gmra.mxu1 %v18315_v20  ;;  %v18405_v48 = vld [vmem:[#allocation55_spill] sm:$0xff] }
 0x3a9   :  { %v14847_v32 = vadd.f32 %v3894_v9, %v3701_v19  ;;  %4943 = vmatprep.mubr.bf16.mxu0 %v18187_v37  ;;  %5136 = vmatprep.mubr.bf16.mxu1 %v18188_v46  ;;  %v12142_v37 = vld [vmem:[%s17660_s3 + $0x694] ss:$12 sps:$4 sm:$0xff]  }
 0x3aa   :  { %v3703_v11 = vpop.f32.mrf.mxu0  ;;  %v3896_v12 = vpop.f32.mrf.mxu1  ;;  %v12145_v46 = vld [vmem:[%s17660_s3 + $0x814] ss:$12 sps:$4 sm:$0xff]  }
 0x3ab   :  { %18316 = vst [vmem:[#allocation240_spill] sm:$0xff] %v14847_v32  ;;  %v12140_v12 = vld [vmem:[%s17660_s3 + $0x690] ss:$12 sps:$4 sm:$0xff]  }
 0x3ac   :  { %v3704_v6 = vpop.f32.mrf.mxu0  ;;  %v3897_v7 = vpop.f32.mrf.mxu1 }
 0x3ad   :  { %v14851_v42 = vadd.f32 %v3897_v7, %v3704_v6  ;;  %v12143_v6 = vld [vmem:[%s17660_s3 + $0x810] ss:$12 sps:$4 sm:$0xff]  }
 0x3ae   :  { %v3706_v9 = vpop.f32.mrf.mxu0  ;;  %v3899_v49 = vpop.f32.mrf.mxu1 }
 0x3af   :  { %18317 = vst [vmem:[#allocation241_spill] sm:$0xff] %v14851_v42 }
 0x3b0   :  { %v3709_v7 = vpop.f32.mrf.mxu0  ;;  %v3902_v19 = vpop.f32.mrf.mxu1  ;;  %4944 = vmatmul.mubr.bf16.vlgmr.msra.gmra.mxu0 %v18192_v28  ;;  %5137 = vmatmul.mubr.bf16.vlgmr.msra.gmra.mxu1 %v18193_v62  ;;  %v12148_v62 = vld [vmem:[%s17660_s3 + $0x67c] ss:$12 sps:$4 sm:$0xff]  }
 0x3b1   :  { %v14867_v11 = vadd.f32 %v3902_v19, %v3709_v7  ;;  %5938 = vmatpush1.bf16.msra.mxu0 %v12134_v59  ;;  %6171 = vmatpush1.bf16.msra.mxu1 %v12137_v43  ;;  %v12151_v59 = vld [vmem:[%s17660_s3 + $0x7fc] ss:$12 sps:$4 sm:$0xff]   ;;  %v12146_v19 = vld [vmem:[%s17660_s3 + $0x678] ss:$12 sps:$4 sm:$0xff]  }
 0x3b2   :  { %4951 = vmatprep.mubr.bf16.mxu0 %v18195_v34  ;;  %5144 = vmatprep.mubr.bf16.mxu1 %v18196_v61  ;;  %v3711_v9 = vpop.f32.mrf.mxu0  ;;  %v3904_v28 = vpop.f32.mrf.mxu1 }
 0x3b3   :  { %18318 = vst [vmem:[#allocation242_spill] sm:$0xff] %v14867_v11  ;;  %5939 = vmatprep.subr.bf16.mxu0 %v12142_v37  ;;  %6172 = vmatprep.subr.bf16.mxu1 %v12145_v46  ;;  %v12149_v9 = vld [vmem:[%s17660_s3 + $0x7f8] ss:$12 sps:$4 sm:$0xff]  }
 0x3b4   :  { %v3712_v43 = vpop.f32.mrf.mxu0  ;;  %v3905_v49 = vpop.f32.mrf.mxu1  ;;  %v12154_v37 = vld [vmem:[%s17660_s3 + $0x664] ss:$12 sps:$4 sm:$0xff]  }
 0x3b5   :  { %v14883_v7 = vadd.f32 %v3905_v49, %v3712_v43  ;;  %5940 = vmatpush1.bf16.msra.mxu0 %v12140_v12  ;;  %6173 = vmatpush1.bf16.msra.mxu1 %v12143_v6  ;;  %v12157_v46 = vld [vmem:[%s17660_s3 + $0x7e4] ss:$12 sps:$4 sm:$0xff]   ;;  %v12152_v43 = vld [vmem:[%s17660_s3 + $0x660] ss:$12 sps:$4 sm:$0xff]  }
 0x3b6   :  { %v3714_v34 = vpop.f32.mrf.mxu0  ;;  %v3907_v61 = vpop.f32.mrf.mxu1  ;;  %5941 = vmatprep.subr.bf16.mxu0 %v12148_v62  ;;  %6174 = vmatprep.subr.bf16.mxu1 %v12151_v59 }
 0x3b7   :  { %18319 = vst [vmem:[#allocation243_spill] sm:$0xff] %v14883_v7  ;;  %v18393_v7 = vld [vmem:[#allocation51_spill] sm:$0xff] }
 0x3b8   :  { %v3717_v12 = vpop.f32.mrf.mxu0  ;;  %v3910_v6 = vpop.f32.mrf.mxu1  ;;  %4952 = vmatmul.mubr.bf16.gmra.mxu0 %v18200_v55  ;;  %5145 = vmatmul.mubr.bf16.gmra.mxu1 %v18201_v26  ;;  %v12155_v55 = vld [vmem:[%s17660_s3 + $0x7e0] ss:$12 sps:$4 sm:$0xff]  }
 0x3b9   :  { %v14899_v28 = vadd.f32 %v3910_v6, %v3717_v12  ;;  %4959 = vmatprep.mubr.bf16.mxu0 %v18203_v13  ;;  %5152 = vmatprep.mubr.bf16.mxu1 %v18204_v53  ;;  %v12160_v13 = vld [vmem:[%s17660_s3 + $0x64c] ss:$12 sps:$4 sm:$0xff]   ;;  %v12169_v12 = vld [vmem:[%s17660_s3 + $0x7b4] ss:$12 sps:$4 sm:$0xff]  }
 0x3ba   :  { %v3719_v62 = vpop.f32.mrf.mxu0  ;;  %v3912_v59 = vpop.f32.mrf.mxu1  ;;  %5942 = vmatpush1.bf16.msra.mxu0 %v12146_v19  ;;  %6175 = vmatpush1.bf16.msra.mxu1 %v12149_v9  ;;  %v12163_v53 = vld [vmem:[%s17660_s3 + $0x7cc] ss:$12 sps:$4 sm:$0xff]   ;;  %v12158_v9 = vld [vmem:[%s17660_s3 + $0x648] ss:$12 sps:$4 sm:$0xff]  }
 0x3bb   :  { %18320 = vst [vmem:[#allocation244_spill] sm:$0xff] %v14899_v28  ;;  %5943 = vmatprep.subr.bf16.mxu0 %v12154_v37  ;;  %6176 = vmatprep.subr.bf16.mxu1 %v12157_v46  ;;  %v12161_v37 = vld [vmem:[%s17660_s3 + $0x7c8] ss:$12 sps:$4 sm:$0xff]  }
 0x3bc   :  { %v3720_v26 = vpop.f32.mrf.mxu0  ;;  %v3913_v49 = vpop.f32.mrf.mxu1  ;;  %v12166_v46 = vld [vmem:[%s17660_s3 + $0x634] ss:$12 sps:$4 sm:$0xff]  }
 0x3bd   :  { %v14915_v34 = vadd.f32 %v3913_v49, %v3720_v26 }
 0x3be   :  { %v3722_v61 = vpop.f32.mrf.mxu0  ;;  %v3915_v19 = vpop.f32.mrf.mxu1  ;;  %5944 = vmatpush1.bf16.msra.mxu0 %v12152_v43  ;;  %6177 = vmatpush1.bf16.msra.mxu1 %v12155_v55 }
 0x3bf   :  { %18321 = vst [vmem:[#allocation245_spill] sm:$0xff] %v14915_v34  ;;  %5945 = vmatprep.subr.bf16.mxu0 %v12160_v13  ;;  %6178 = vmatprep.subr.bf16.mxu1 %v12163_v53  ;;  %v12164_v13 = vld [vmem:[%s17660_s3 + $0x630] ss:$12 sps:$4 sm:$0xff]   ;;  %v12170_v19 = vld [vmem:[%s17660_s3 + $0x618] ss:$12 sps:$4 sm:$0xff]  }
 0x3c0   :  { %v3725_v6 = vpop.f32.mrf.mxu0  ;;  %v3918_v62 = vpop.f32.mrf.mxu1  ;;  %4960 = vmatmul.mubr.bf16.gmra.mxu0 %v18208_v52  ;;  %5153 = vmatmul.mubr.bf16.gmra.mxu1 %v18209_v16  ;;  %v12167_v52 = vld [vmem:[%s17660_s3 + $0x7b0] ss:$12 sps:$4 sm:$0xff]  }
 0x3c1   :  { %v14931_v59 = vadd.f32 %v3918_v62, %v3725_v6  ;;  %4967 = vmatprep.mubr.bf16.mxu0 %v18211_v58  ;;  %5160 = vmatprep.mubr.bf16.mxu1 %v18212_v18  ;;  %v12172_v58 = vld [vmem:[%s17660_s3 + $0x61c] ss:$12 sps:$4 sm:$0xff]  }
 0x3c2   :  { %v3727_v43 = vpop.f32.mrf.mxu0  ;;  %v3920_v55 = vpop.f32.mrf.mxu1  ;;  %5946 = vmatpush1.bf16.msra.mxu0 %v12158_v9  ;;  %6179 = vmatpush1.bf16.msra.mxu1 %v12161_v37  ;;  %v12175_v18 = vld [vmem:[%s17660_s3 + $0x79c] ss:$12 sps:$4 sm:$0xff]   ;;  %v12173_v9 = vld [vmem:[%s17660_s3 + $0x798] ss:$12 sps:$4 sm:$0xff]  }
 0x3c3   :  { %18322 = vst [vmem:[#allocation246_spill] sm:$0xff] %v14931_v59  ;;  %5947 = vmatprep.subr.bf16.mxu0 %v12166_v46  ;;  %6180 = vmatprep.subr.bf16.mxu1 %v12169_v12  ;;  %v12178_v37 = vld [vmem:[%s17660_s3 + $0x604] ss:$12 sps:$4 sm:$0xff]  }
 0x3c4   :  { %v3728_v16 = vpop.f32.mrf.mxu0  ;;  %v3921_v53 = vpop.f32.mrf.mxu1  ;;  %v12181_v46 = vld [vmem:[%s17660_s3 + $0x784] ss:$12 sps:$4 sm:$0xff]  }
 0x3c5   :  { %v14947_v26 = vadd.f32 %v3921_v53, %v3728_v16 }
 0x3c6   :  { %v3730_v49 = vpop.f32.mrf.mxu0  ;;  %v3923_v61 = vpop.f32.mrf.mxu1  ;;  %5948 = vmatpush1.bf16.msra.mxu0 %v12164_v13  ;;  %6181 = vmatpush1.bf16.msra.mxu1 %v12167_v52  ;;  %v12176_v13 = vld [vmem:[%s17660_s3 + $0x600] ss:$12 sps:$4 sm:$0xff]  }
 0x3c7   :  { %18323 = vst [vmem:[#allocation247_spill] sm:$0xff] %v14947_v26  ;;  %5949 = vmatprep.subr.bf16.mxu0 %v12172_v58  ;;  %6182 = vmatprep.subr.bf16.mxu1 %v12175_v18  ;;  %v12187_v52 = vld [vmem:[%s17660_s3 + $0x8ec] ss:$12 sps:$4 sm:$0xff]   ;;  %v12182_v61 = vld [vmem:[%s17660_s3 + $0x768] ss:$12 sps:$4 sm:$0xff]  }
 0x3c8   :  { %v3733_v12 = vpop.f32.mrf.mxu0  ;;  %v3926_v6 = vpop.f32.mrf.mxu1  ;;  %4968 = vmatmul.mubr.bf16.gmra.mxu0 %v18216_v47  ;;  %5161 = vmatmul.mubr.bf16.gmra.mxu1 %v18217_v17  ;;  %v12179_v47 = vld [vmem:[%s17660_s3 + $0x780] ss:$12 sps:$4 sm:$0xff]  }
 0x3c9   :  { %v14963_v62 = vadd.f32 %v3926_v6, %v3733_v12  ;;  %4975 = vmatprep.mubr.bf16.mxu0 %v18219_v36  ;;  %5168 = vmatprep.mubr.bf16.mxu1 %v18220_v38  ;;  %v12184_v17 = vld [vmem:[%s17660_s3 + $0x76c] ss:$12 sps:$4 sm:$0xff]  }
 0x3ca   :  { %v3735_v43 = vpop.f32.mrf.mxu0  ;;  %v3928_v55 = vpop.f32.mrf.mxu1  ;;  %5950 = vmatpush1.bf16.msra.mxu0 %v12170_v19  ;;  %6183 = vmatpush1.bf16.msra.mxu1 %v12173_v9  ;;  %v12185_v19 = vld [vmem:[%s17660_s3 + $0x8e8] ss:$12 sps:$4 sm:$0xff]  }
 0x3cb   :  { %18324 = vst [vmem:[#allocation248_spill] sm:$0xff] %v14963_v62  ;;  %5951 = vmatprep.subr.bf16.mxu0 %v12178_v37  ;;  %6184 = vmatprep.subr.bf16.mxu1 %v12181_v46  ;;  %v12190_v9 = vld [vmem:[%s17660_s3 + $0x754] ss:$12 sps:$4 sm:$0xff]   ;;  %v18381_v26 = vld [vmem:[#allocation47_spill] sm:$0xff] }
 0x3cc   :  { %v3736_v58 = vpop.f32.mrf.mxu0  ;;  %v3929_v18 = vpop.f32.mrf.mxu1  ;;  %v12193_v37 = vld [vmem:[%s17660_s3 + $0x8d4] ss:$12 sps:$4 sm:$0xff]  }
 0x3cd   :  { %v14979_v16 = vadd.f32 %v3929_v18, %v3736_v58  ;;  %v12199_v58 = vld [vmem:[%s17660_s3 + $0x8bc] ss:$12 sps:$4 sm:$0xff]  }
 0x3ce   :  { %v3738_v53 = vpop.f32.mrf.mxu0  ;;  %v3931_v49 = vpop.f32.mrf.mxu1  ;;  %5952 = vmatpush1.bf16.msra.mxu0 %v12176_v13  ;;  %6185 = vmatpush1.bf16.msra.mxu1 %v12179_v47  ;;  %v12188_v13 = vld [vmem:[%s17660_s3 + $0x750] ss:$12 sps:$4 sm:$0xff]  }
 0x3cf   :  { %18325 = vst [vmem:[#allocation249_spill] sm:$0xff] %v14979_v16  ;;  %5953 = vmatprep.subr.bf16.mxu0 %v12184_v17  ;;  %6186 = vmatprep.subr.bf16.mxu1 %v12187_v52  ;;  %v12191_v47 = vld [vmem:[%s17660_s3 + $0x8d0] ss:$12 sps:$4 sm:$0xff]  }
 0x3d0   :  { %v4479_v46 = vpop.f32.mrf.mxu0  ;;  %v4712_v12 = vpop.f32.mrf.mxu1  ;;  %4976 = vmatmul.mubr.bf16.gmra.mxu0 %v18224_v0  ;;  %5169 = vmatmul.mubr.bf16.gmra.mxu1 %v18225_v45  ;;  %v12196_v52 = vld [vmem:[%s17660_s3 + $0x73c] ss:$12 sps:$4 sm:$0xff]  }
 0x3d1   :  { %v4480_v6 = vadd.f32 %v4479_v46, %v14275_v30  ;;  %4983 = vmatprep.mubr.bf16.mxu0 %v18227_v1  ;;  %5176 = vmatprep.mubr.bf16.mxu1 %v18228_v5 }
 0x3d2   :  { %v4481_v43 = vpop.f32.mrf.mxu0  ;;  %v4714_v55 = vpop.f32.mrf.mxu1  ;;  %5954 = vmatpush2.bf16.msra.mxu0 %v12182_v61  ;;  %6187 = vmatpush2.bf16.msra.mxu1 %v12185_v19 }
 0x3d3   :  { %v15004_v17 = vadd.f32 %v4712_v12, %v4480_v6  ;;  %v4482_v30 = vadd.f32 %v4481_v43, %v14285_v14  ;;  %5955 = vmatprep.subr.bf16.mxu0 %v12190_v9  ;;  %6188 = vmatprep.subr.bf16.mxu1 %v12193_v37  ;;  %v12194_v14 = vld [vmem:[%s17660_s3 + $0x738] ss:$12 sps:$4 sm:$0xff]  }
 0x3d4   :  { %v4483_v18 = vpop.f32.mrf.mxu0  ;;  %v4716_v53 = vpop.f32.mrf.mxu1  ;;  %v12197_v9 = vld [vmem:[%s17660_s3 + $0x8b8] ss:$12 sps:$4 sm:$0xff]  }
 0x3d5   :  { %18326 = vst [vmem:[#allocation250_spill] sm:$0xff] %v15004_v17  ;;  %v15013_v49 = vadd.f32 %v4714_v55, %v4482_v30  ;;  %v4484_v61 = vadd.f32 %v4483_v18, %v14293_v40  ;;  %v12202_v40 = vld [vmem:[%s17660_s3 + $0x724] ss:$12 sps:$4 sm:$0xff]  }
 0x3d6   :  { %v4485_v19 = vpop.f32.mrf.mxu0  ;;  %v4718_v46 = vpop.f32.mrf.mxu1  ;;  %5956 = vmatpush2.bf16.msra.mxu0 %v12188_v13  ;;  %6189 = vmatpush2.bf16.msra.mxu1 %v12191_v47  ;;  %v12205_v6 = vld [vmem:[%s17660_s3 + $0x8a4] ss:$12 sps:$4 sm:$0xff]  }
 0x3d7   :  { %18327 = vst [vmem:[#allocation251_spill] sm:$0xff] %v15013_v49  ;;  %v15022_v37 = vadd.f32 %v4716_v53, %v4484_v61  ;;  %v4486_v12 = vadd.f32 %v4485_v19, %v14301_v25  ;;  %5957 = vmatprep.subr.bf16.mxu0 %v12196_v52  ;;  %6190 = vmatprep.subr.bf16.mxu1 %v12199_v58  ;;  %v12200_v52 = vld [vmem:[%s17660_s3 + $0x720] ss:$12 sps:$4 sm:$0xff]  }
 0x3d8   :  { %v4489_v43 = vpop.f32.mrf.mxu0  ;;  %v4722_v55 = vpop.f32.mrf.mxu1  ;;  %4984 = vmatmul.mubr.bf16.gmra.mxu0 %v18230_v29  ;;  %5177 = vmatmul.mubr.bf16.gmra.mxu1 %v18231_v41  ;;  %v12203_v58 = vld [vmem:[%s17660_s3 + $0x8a0] ss:$12 sps:$4 sm:$0xff]  }
 0x3d9   :  { %18328 = vst [vmem:[#allocation252_spill] sm:$0xff] %v15022_v37  ;;  %v15033_v13 = vadd.f32 %v4718_v46, %v4486_v12  ;;  %v4490_v25 = vadd.f32 %v4489_v43, %v14311_v35  ;;  %4991 = vmatprep.mubr.bf16.mxu0 %v18233_v56  ;;  %5184 = vmatprep.mubr.bf16.mxu1 %v18234_v31  ;;  %v12208_v53 = vld [vmem:[%s17660_s3 + $0x70c] ss:$12 sps:$4 sm:$0xff]  }
 0x3da   :  { %v4491_v47 = vpop.f32.mrf.mxu0  ;;  %v4724_v30 = vpop.f32.mrf.mxu1  ;;  %5958 = vmatpush2.bf16.msra.mxu0 %v12194_v14  ;;  %6191 = vmatpush2.bf16.msra.mxu1 %v12197_v9  ;;  %v12211_v61 = vld [vmem:[%s17660_s3 + $0x88c] ss:$12 sps:$4 sm:$0xff]  }
 0x3db   :  { %18329 = vst [vmem:[#allocation253_spill] sm:$0xff] %v15033_v13  ;;  %v15044_v18 = vadd.f32 %v4722_v55, %v4490_v25  ;;  %v4492_v35 = vadd.f32 %v4491_v47, %v14321_v21  ;;  %5959 = vmatprep.subr.bf16.mxu0 %v12202_v40  ;;  %6192 = vmatprep.subr.bf16.mxu1 %v12205_v6  ;;  %v12206_v21 = vld [vmem:[%s17660_s3 + $0x708] ss:$12 sps:$4 sm:$0xff]  }
 0x3dc   :  { %v4493_v19 = vpop.f32.mrf.mxu0  ;;  %v4726_v46 = vpop.f32.mrf.mxu1  ;;  %v12209_v40 = vld [vmem:[%s17660_s3 + $0x888] ss:$12 sps:$4 sm:$0xff]  }
 0x3dd   :  { %18330 = vst [vmem:[#allocation254_spill] sm:$0xff] %v15044_v18  ;;  %v15053_v14 = vadd.f32 %v4724_v30, %v4492_v35  ;;  %v4494_v9 = vadd.f32 %v4493_v19, %v14329_v50  ;;  %v12214_v50 = vld [vmem:[%s17660_s3 + $0x6f4] ss:$12 sps:$4 sm:$0xff]   ;;  %v18369_v49 = vld [vmem:[#allocation43_spill] sm:$0xff] }
 0x3de   :  { %v4495_v12 = vpop.f32.mrf.mxu0  ;;  %v4728_v43 = vpop.f32.mrf.mxu1  ;;  %5960 = vmatpush2.bf16.msra.mxu0 %v12200_v52  ;;  %6193 = vmatpush2.bf16.msra.mxu1 %v12203_v58  ;;  %v12217_v25 = vld [vmem:[%s17660_s3 + $0x874] ss:$12 sps:$4 sm:$0xff]  }
 0x3df   :  { %18331 = vst [vmem:[#allocation255_spill] sm:$0xff] %v15053_v14  ;;  %v15062_v6 = vadd.f32 %v4726_v46, %v4494_v9  ;;  %v4496_v55 = vadd.f32 %v4495_v12, %v14337_v22  ;;  %5961 = vmatprep.subr.bf16.mxu0 %v12208_v53  ;;  %6194 = vmatprep.subr.bf16.mxu1 %v12211_v61  ;;  %v12212_v53 = vld [vmem:[%s17660_s3 + $0x6f0] ss:$12 sps:$4 sm:$0xff]   ;;  %v18357_v14 = vld [vmem:[#allocation39_spill] sm:$0xff] }
 0x3e0   :  { %v4499_v47 = vpop.f32.mrf.mxu0  ;;  %v4732_v30 = vpop.f32.mrf.mxu1  ;;  %4992 = vmatmul.mubr.bf16.gmra.mxu0 %v18236_v24  ;;  %5185 = vmatmul.mubr.bf16.gmra.mxu1 %v18237_v15  ;;  %v12215_v61 = vld [vmem:[%s17660_s3 + $0x870] ss:$12 sps:$4 sm:$0xff]  }
 0x3e1   :  { %18332 = vst [vmem:[#allocation256_spill] sm:$0xff] %v15062_v6  ;;  %v15073_v52 = vadd.f32 %v4728_v43, %v4496_v55  ;;  %v4500_v22 = vadd.f32 %v4499_v47, %v14347_v3  ;;  %4999 = vmatprep.mubr.bf16.mxu0 %v18239_v23  ;;  %5192 = vmatprep.mubr.bf16.mxu1 %v18240_v60  ;;  %v12220_v46 = vld [vmem:[%s17660_s3 + $0x6dc] ss:$12 sps:$4 sm:$0xff]  }
 0x3e2   :  { %v4501_v58 = vpop.f32.mrf.mxu0  ;;  %v4734_v35 = vpop.f32.mrf.mxu1  ;;  %5962 = vmatpush2.bf16.msra.mxu0 %v12206_v21  ;;  %6195 = vmatpush2.bf16.msra.mxu1 %v12209_v40  ;;  %v12223_v9 = vld [vmem:[%s17660_s3 + $0x85c] ss:$12 sps:$4 sm:$0xff]  }
 0x3e3   :  { %18333 = vst [vmem:[#allocation257_spill] sm:$0xff] %v15073_v52  ;;  %v15084_v19 = vadd.f32 %v4732_v30, %v4500_v22  ;;  %v4502_v3 = vadd.f32 %v4501_v58, %v14357_v39  ;;  %5963 = vmatprep.subr.bf16.mxu0 %v12214_v50  ;;  %6196 = vmatprep.subr.bf16.mxu1 %v12217_v25  ;;  %v12218_v39 = vld [vmem:[%s17660_s3 + $0x6d8] ss:$12 sps:$4 sm:$0xff]  }
 0x3e4   :  { %v4503_v12 = vpop.f32.mrf.mxu0  ;;  %v4736_v43 = vpop.f32.mrf.mxu1  ;;  %v12221_v50 = vld [vmem:[%s17660_s3 + $0x858] ss:$12 sps:$4 sm:$0xff]  }
 0x3e5   :  { %18334 = vst [vmem:[#allocation258_spill] sm:$0xff] %v15084_v19  ;;  %v15093_v21 = vadd.f32 %v4734_v35, %v4502_v3  ;;  %v4504_v40 = vadd.f32 %v4503_v12, %v14365_v33  ;;  %v12226_v33 = vld [vmem:[%s17660_s3 + $0x6c4] ss:$12 sps:$4 sm:$0xff]  }
 0x3e6   :  { %v4505_v55 = vpop.f32.mrf.mxu0  ;;  %v4738_v47 = vpop.f32.mrf.mxu1  ;;  %5964 = vmatpush2.bf16.msra.mxu0 %v12212_v53  ;;  %6197 = vmatpush2.bf16.msra.mxu1 %v12215_v61  ;;  %v12229_v22 = vld [vmem:[%s17660_s3 + $0x844] ss:$12 sps:$4 sm:$0xff]  }
 0x3e7   :  { %18335 = vst [vmem:[#allocation259_spill] sm:$0xff] %v15093_v21  ;;  %v15102_v25 = vadd.f32 %v4736_v43, %v4504_v40  ;;  %v4506_v30 = vadd.f32 %v4505_v55, %v14373_v27  ;;  %5965 = vmatprep.subr.bf16.mxu0 %v12220_v46  ;;  %6198 = vmatprep.subr.bf16.mxu1 %v12223_v9  ;;  %v12224_v46 = vld [vmem:[%s17660_s3 + $0x6c0] ss:$12 sps:$4 sm:$0xff]  }
 0x3e8   :  { %v4509_v58 = vpop.f32.mrf.mxu0  ;;  %v4742_v35 = vpop.f32.mrf.mxu1  ;;  %5000 = vmatmul.mubr.bf16.gmra.mxu0 %v18242_v10  ;;  %5193 = vmatmul.mubr.bf16.gmra.mxu1 %v18243_v44  ;;  %v12227_v9 = vld [vmem:[%s17660_s3 + $0x840] ss:$12 sps:$4 sm:$0xff]  }
 0x3e9   :  { %18336 = vst [vmem:[#allocation260_spill] sm:$0xff] %v15102_v25  ;;  %v15113_v53 = vadd.f32 %v4738_v47, %v4506_v30  ;;  %v4510_v27 = vadd.f32 %v4509_v58, %v14383_v2  ;;  %5007 = vmatprep.mubr.bf16.mxu0 %v18245_v63  ;;  %5200 = vmatprep.mubr.bf16.mxu1 %v18246_v4  ;;  %v18339_v43 = vld [vmem:[#allocation179_spill] sm:$0xff]  ;;  %v18343_v25 = vld [vmem:[#allocation181_spill] sm:$0xff] }
 0x3ea   :  { %v4511_v61 = vpop.f32.mrf.mxu0  ;;  %v4744_v3 = vpop.f32.mrf.mxu1  ;;  %5966 = vmatpush2.bf16.msra.mxu0 %v12218_v39  ;;  %6199 = vmatpush2.bf16.msra.mxu1 %v12221_v50  ;;  %v18341_v39 = vld [vmem:[#allocation180_spill] sm:$0xff] }
 0x3eb   :  { %18337 = vst [vmem:[#allocation261_spill] sm:$0xff] %v15113_v53  ;;  %v15124_v12 = vadd.f32 %v4742_v35, %v4510_v27  ;;  %v4512_v2 = vadd.f32 %v4511_v61, %v18339_v43  ;;  %5967 = vmatprep.subr.bf16.mxu0 %v12226_v33  ;;  %6200 = vmatprep.subr.bf16.mxu1 %v12229_v22  ;;  %v18344_v35 = vmov 0   ;;  %v18345_v27 = vld [vmem:[#allocation35_spill] sm:$0xff]  ;;  %v18346_v61 = vld [vmem:[#allocation36_spill] sm:$0xff]  ;;  %v18348_v43 = vld [vmem:[#allocation182_spill] sm:$0xff] }
 0x3ec   :  { %v4513_v40 = vpop.f32.mrf.mxu0  ;;  %v4746_v55 = vpop.f32.mrf.mxu1 }
 0x3ed   :  { %18338 = vst [vmem:[#allocation262_spill] sm:$0xff] %v15124_v12  ;;  %v15127_v47 = vadd.f32 %v4744_v3, %v4512_v2  ;;  %v4514_v50 = vadd.f32 %v4513_v40, %v18341_v39  ;;  %v18352_v39 = vld [vmem:[#allocation183_spill] sm:$0xff]  ;;  %v18354_v12 = vld [vmem:[#allocation184_spill] sm:$0xff] }
 0x3ee   :  { %v4515_v30 = vpop.f32.mrf.mxu0  ;;  %v4748_v58 = vpop.f32.mrf.mxu1  ;;  %5968 = vmatpush2.bf16.msra.mxu0 %v12224_v46  ;;  %6201 = vmatpush2.bf16.msra.mxu1 %v12227_v9  ;;  %v18349_v46 = vld [vmem:[#allocation41_spill] sm:$0xff]  ;;  %v18350_v9 = vld [vmem:[#allocation42_spill] sm:$0xff] }
 0x3ef   :  { %18340 = vst [vmem:[#allocation179_spill] sm:$0xff] %v15127_v47  ;;  %v15130_v53 = vadd.f32 %v4746_v55, %v4514_v50  ;;  %v4516_v21 = vadd.f32 %v4515_v30, %v18343_v25  ;;  %6403 = vmatprep.subr.bf16.mxu0 %v18344_v35  ;;  %6596 = vmatprep.subr.bf16.mxu1 %v18344_v35 }
 0x3f0   :  { %v4519_v33 = vpop.f32.mrf.mxu0  ;;  %v4752_v22 = vpop.f32.mrf.mxu1  ;;  %5008 = vmatmul.mubr.bf16.gmra.mxu0 %v18345_v27  ;;  %5201 = vmatmul.mubr.bf16.gmra.mxu1 %v18346_v61 }
 0x3f1   :  { %18342 = vst [vmem:[#allocation180_spill] sm:$0xff] %v15130_v53  ;;  %v15137_v3 = vadd.f32 %v4748_v58, %v4516_v21  ;;  %v4520_v2 = vadd.f32 %v4519_v33, %v18348_v43  ;;  %5015 = vmatprep.mubr.bf16.mxu0 %v18349_v46  ;;  %5208 = vmatprep.mubr.bf16.mxu1 %v18350_v9  ;;  %v18356_v33 = vld [vmem:[#allocation185_spill] sm:$0xff] }
 0x3f2   :  { %v4521_v40 = vpop.f32.mrf.mxu0  ;;  %v4754_v25 = vpop.f32.mrf.mxu1 }
 0x3f3   :  { %18347 = vst [vmem:[#allocation181_spill] sm:$0xff] %v15137_v3  ;;  %v15142_v55 = vadd.f32 %v4752_v22, %v4520_v2  ;;  %v4522_v50 = vadd.f32 %v4521_v40, %v18352_v39  ;;  %v18358_v22 = vld [vmem:[#allocation40_spill] sm:$0xff]  ;;  %v18360_v40 = vld [vmem:[#allocation186_spill] sm:$0xff] }
 0x3f4   :  { %v4523_v30 = vpop.f32.mrf.mxu0  ;;  %v4756_v53 = vpop.f32.mrf.mxu1 }
 0x3f5   :  { %18351 = vst [vmem:[#allocation35_spill] sm:$0xff] %v15142_v55  ;;  %v15145_v47 = vadd.f32 %v4754_v25, %v4522_v50  ;;  %v4524_v19 = vadd.f32 %v4523_v30, %v18354_v12  ;;  %v18361_v25 = vld [vmem:[#allocation45_spill] sm:$0xff]  ;;  %v18362_v50 = vld [vmem:[#allocation46_spill] sm:$0xff]  ;;  %v18366_v55 = vld [vmem:[#allocation188_spill] sm:$0xff] }
 0x3f6   :  { %v4525_v21 = vpop.f32.mrf.mxu0  ;;  %v4758_v58 = vpop.f32.mrf.mxu1 }
 0x3f7   :  { %18353 = vst [vmem:[#allocation36_spill] sm:$0xff] %v15145_v47  ;;  %v15148_v3 = vadd.f32 %v4756_v53, %v4524_v19  ;;  %v4526_v43 = vadd.f32 %v4525_v21, %v18356_v33  ;;  %v18364_v53 = vld [vmem:[#allocation187_spill] sm:$0xff] }
 0x3f8   :  { %v4529_v52 = vpop.f32.mrf.mxu0  ;;  %v4762_v6 = vpop.f32.mrf.mxu1  ;;  %5016 = vmatmul.mubr.bf16.gmra.mxu0 %v18357_v14  ;;  %5209 = vmatmul.mubr.bf16.gmra.mxu1 %v18358_v22 }
 0x3f9   :  { %18355 = vst [vmem:[#allocation182_spill] sm:$0xff] %v15148_v3  ;;  %v15153_v2 = vadd.f32 %v4758_v58, %v4526_v43  ;;  %v4530_v39 = vadd.f32 %v4529_v52, %v18360_v40  ;;  %5023 = vmatprep.mubr.bf16.mxu0 %v18361_v25  ;;  %5216 = vmatprep.mubr.bf16.mxu1 %v18362_v50  ;;  %v18368_v52 = vld [vmem:[#allocation189_spill] sm:$0xff] }
 0x3fa   :  { %v4531_v12 = vpop.f32.mrf.mxu0  ;;  %v4764_v30 = vpop.f32.mrf.mxu1 }
 0x3fb   :  { %18359 = vst [vmem:[#allocation41_spill] sm:$0xff] %v15153_v2  ;;  %v15158_v19 = vadd.f32 %v4762_v6, %v4530_v39  ;;  %v4532_v21 = vadd.f32 %v4531_v12, %v18364_v53  ;;  %v18370_v6 = vld [vmem:[#allocation44_spill] sm:$0xff]  ;;  %v18372_v12 = vld [vmem:[#allocation190_spill] sm:$0xff] }
 0x3fc   :  { %v4533_v33 = vpop.f32.mrf.mxu0  ;;  %v4766_v3 = vpop.f32.mrf.mxu1 }
 0x3fd   :  { %18363 = vst [vmem:[#allocation42_spill] sm:$0xff] %v15158_v19  ;;  %v15161_v47 = vadd.f32 %v4764_v30, %v4532_v21  ;;  %v4534_v18 = vadd.f32 %v4533_v33, %v18366_v55  ;;  %v18373_v30 = vld [vmem:[#allocation49_spill] sm:$0xff]  ;;  %v18374_v21 = vld [vmem:[#allocation50_spill] sm:$0xff]  ;;  %v18378_v19 = vld [vmem:[#allocation192_spill] sm:$0xff] }
 0x3fe   :  { %v4535_v58 = vpop.f32.mrf.mxu0  ;;  %v4768_v43 = vpop.f32.mrf.mxu1 }
 0x3ff   :  { %18365 = vst [vmem:[#allocation183_spill] sm:$0xff] %v15161_v47  ;;  %v15164_v2 = vadd.f32 %v4766_v3, %v4534_v18  ;;  %v4536_v40 = vadd.f32 %v4535_v58, %v18368_v52  ;;  %v18376_v3 = vld [vmem:[#allocation191_spill] sm:$0xff] }
 0x400   :  { %v4539_v13 = vpop.f32.mrf.mxu0  ;;  %v4772_v37 = vpop.f32.mrf.mxu1  ;;  %5024 = vmatmul.mubr.bf16.gmra.mxu0 %v18369_v49  ;;  %5217 = vmatmul.mubr.bf16.gmra.mxu1 %v18370_v6 }
 0x401   :  { %18367 = vst [vmem:[#allocation184_spill] sm:$0xff] %v15164_v2  ;;  %v15169_v39 = vadd.f32 %v4768_v43, %v4536_v40  ;;  %v4540_v53 = vadd.f32 %v4539_v13, %v18372_v12  ;;  %5031 = vmatprep.mubr.bf16.mxu0 %v18373_v30  ;;  %5224 = vmatprep.mubr.bf16.mxu1 %v18374_v21  ;;  %v18380_v13 = vld [vmem:[#allocation193_spill] sm:$0xff] }
 0x402   :  { %v4541_v55 = vpop.f32.mrf.mxu0  ;;  %v4774_v33 = vpop.f32.mrf.mxu1 }
 0x403   :  { %18371 = vst [vmem:[#allocation185_spill] sm:$0xff] %v15169_v39  ;;  %v15174_v18 = vadd.f32 %v4772_v37, %v4540_v53  ;;  %v4542_v58 = vadd.f32 %v4541_v55, %v18376_v3  ;;  %v18382_v37 = vld [vmem:[#allocation48_spill] sm:$0xff]  ;;  %v18384_v55 = vld [vmem:[#allocation194_spill] sm:$0xff] }
 0x404   :  { %v4543_v52 = vpop.f32.mrf.mxu0  ;;  %v4776_v2 = vpop.f32.mrf.mxu1 }
 0x405   :  { %18375 = vst [vmem:[#allocation39_spill] sm:$0xff] %v15174_v18  ;;  %v15177_v47 = vadd.f32 %v4774_v33, %v4542_v58  ;;  %v4544_v17 = vadd.f32 %v4543_v52, %v18378_v19  ;;  %v18385_v33 = vld [vmem:[#allocation53_spill] sm:$0xff]  ;;  %v18386_v58 = vld [vmem:[#allocation54_spill] sm:$0xff]  ;;  %v18390_v18 = vld [vmem:[#allocation196_spill] sm:$0xff] }
 0x406   :  { %v4545_v43 = vpop.f32.mrf.mxu0  ;;  %v4778_v40 = vpop.f32.mrf.mxu1 }
 0x407   :  { %18377 = vst [vmem:[#allocation40_spill] sm:$0xff] %v15177_v47  ;;  %v15180_v39 = vadd.f32 %v4776_v2, %v4544_v17  ;;  %v4546_v12 = vadd.f32 %v4545_v43, %v18380_v13  ;;  %v18388_v2 = vld [vmem:[#allocation195_spill] sm:$0xff] }
 0x408   :  { %v4549_v16 = vpop.f32.mrf.mxu0  ;;  %v4782_v62 = vpop.f32.mrf.mxu1  ;;  %5032 = vmatmul.mubr.bf16.gmra.mxu0 %v18381_v26  ;;  %5225 = vmatmul.mubr.bf16.gmra.mxu1 %v18382_v37 }
 0x409   :  { %18379 = vst [vmem:[#allocation186_spill] sm:$0xff] %v15180_v39  ;;  %v15185_v53 = vadd.f32 %v4778_v40, %v4546_v12  ;;  %v4550_v3 = vadd.f32 %v4549_v16, %v18384_v55  ;;  %5039 = vmatprep.mubr.bf16.mxu0 %v18385_v33  ;;  %5232 = vmatprep.mubr.bf16.mxu1 %v18386_v58  ;;  %v18392_v16 = vld [vmem:[#allocation197_spill] sm:$0xff] }
 0x40a   :  { %v4551_v19 = vpop.f32.mrf.mxu0  ;;  %v4784_v52 = vpop.f32.mrf.mxu1 }
 0x40b   :  { %18383 = vst [vmem:[#allocation45_spill] sm:$0xff] %v15185_v53  ;;  %v15190_v17 = vadd.f32 %v4782_v62, %v4550_v3  ;;  %v4552_v43 = vadd.f32 %v4551_v19, %v18388_v2  ;;  %v18394_v62 = vld [vmem:[#allocation52_spill] sm:$0xff]  ;;  %v18396_v19 = vld [vmem:[#allocation198_spill] sm:$0xff] }
 0x40c   :  { %v4553_v13 = vpop.f32.mrf.mxu0  ;;  %v4786_v39 = vpop.f32.mrf.mxu1 }
 0x40d   :  { %18387 = vst [vmem:[#allocation46_spill] sm:$0xff] %v15190_v17  ;;  %v15193_v47 = vadd.f32 %v4784_v52, %v4552_v43  ;;  %v4554_v59 = vadd.f32 %v4553_v13, %v18390_v18  ;;  %v18397_v52 = vld [vmem:[#allocation57_spill] sm:$0xff]  ;;  %v18398_v43 = vld [vmem:[#allocation58_spill] sm:$0xff]  ;;  %v18402_v17 = vld [vmem:[#allocation200_spill] sm:$0xff] }
 0x40e   :  { %v4555_v40 = vpop.f32.mrf.mxu0  ;;  %v4788_v12 = vpop.f32.mrf.mxu1 }
 0x40f   :  { %18389 = vst [vmem:[#allocation187_spill] sm:$0xff] %v15193_v47  ;;  %v15196_v53 = vadd.f32 %v4786_v39, %v4554_v59  ;;  %v4556_v55 = vadd.f32 %v4555_v40, %v18392_v16  ;;  %v18400_v39 = vld [vmem:[#allocation199_spill] sm:$0xff] }
 0x410   :  { %v4559_v34 = vpop.f32.mrf.mxu0  ;;  %v4792_v28 = vpop.f32.mrf.mxu1  ;;  %5040 = vmatmul.mubr.bf16.gmra.mxu0 %v18393_v7  ;;  %5233 = vmatmul.mubr.bf16.gmra.mxu1 %v18394_v62 }
 0x411   :  { %18391 = vst [vmem:[#allocation188_spill] sm:$0xff] %v15196_v53  ;;  %v15201_v3 = vadd.f32 %v4788_v12, %v4556_v55  ;;  %v4560_v2 = vadd.f32 %v4559_v34, %v18396_v19  ;;  %5047 = vmatprep.mubr.bf16.mxu0 %v18397_v52  ;;  %5240 = vmatprep.mubr.bf16.mxu1 %v18398_v43  ;;  %v18404_v34 = vld [vmem:[#allocation201_spill] sm:$0xff] }
 0x412   :  { %v4561_v18 = vpop.f32.mrf.mxu0  ;;  %v4794_v13 = vpop.f32.mrf.mxu1 }
 0x413   :  { %18395 = vst [vmem:[#allocation189_spill] sm:$0xff] %v15201_v3  ;;  %v15206_v59 = vadd.f32 %v4792_v28, %v4560_v2  ;;  %v4562_v40 = vadd.f32 %v4561_v18, %v18400_v39  ;;  %v18406_v28 = vld [vmem:[#allocation56_spill] sm:$0xff]  ;;  %v18408_v18 = vld [vmem:[#allocation202_spill] sm:$0xff] }
 0x414   :  { %v4563_v16 = vpop.f32.mrf.mxu0  ;;  %v4796_v53 = vpop.f32.mrf.mxu1 }
 0x415   :  { %18399 = vst [vmem:[#allocation43_spill] sm:$0xff] %v15206_v59  ;;  %v15209_v47 = vadd.f32 %v4794_v13, %v4562_v40  ;;  %v4564_v11 = vadd.f32 %v4563_v16, %v18402_v17  ;;  %v18409_v13 = vld [vmem:[#allocation61_spill] sm:$0xff]  ;;  %v18410_v40 = vld [vmem:[#allocation62_spill] sm:$0xff]  ;;  %v18414_v59 = vld [vmem:[#allocation204_spill] sm:$0xff] }
 0x416   :  { %v4565_v12 = vpop.f32.mrf.mxu0  ;;  %v4798_v55 = vpop.f32.mrf.mxu1 }
 0x417   :  { %18401 = vst [vmem:[#allocation44_spill] sm:$0xff] %v15209_v47  ;;  %v15212_v3 = vadd.f32 %v4796_v53, %v4564_v11  ;;  %v4566_v19 = vadd.f32 %v4565_v12, %v18404_v34  ;;  %v18412_v53 = vld [vmem:[#allocation203_spill] sm:$0xff] }
 0x418   :  { %v4569_v42 = vpop.f32.mrf.mxu0  ;;  %v4802_v32 = vpop.f32.mrf.mxu1  ;;  %5048 = vmatmul.mubr.bf16.gmra.mxu0 %v18405_v48  ;;  %5241 = vmatmul.mubr.bf16.gmra.mxu1 %v18406_v28  ;;  %v18417_v48 = vld [vmem:[#allocation59_spill] sm:$0xff] }
 0x419   :  { %18403 = vst [vmem:[#allocation190_spill] sm:$0xff] %v15212_v3  ;;  %v15217_v2 = vadd.f32 %v4798_v55, %v4566_v19  ;;  %v4570_v39 = vadd.f32 %v4569_v42, %v18408_v18  ;;  %5055 = vmatprep.mubr.bf16.mxu0 %v18409_v13  ;;  %5248 = vmatprep.mubr.bf16.mxu1 %v18410_v40  ;;  %v18416_v42 = vld [vmem:[#allocation205_spill] sm:$0xff] }
 0x41a   :  { %v4571_v17 = vpop.f32.mrf.mxu0  ;;  %v4804_v16 = vpop.f32.mrf.mxu1 }
 0x41b   :  { %18407 = vst [vmem:[#allocation49_spill] sm:$0xff] %v15217_v2  ;;  %v15222_v11 = vadd.f32 %v4802_v32, %v4570_v39  ;;  %v4572_v12 = vadd.f32 %v4571_v17, %v18412_v53  ;;  %v18418_v32 = vld [vmem:[#allocation60_spill] sm:$0xff]  ;;  %v18420_v17 = vld [vmem:[#allocation206_spill] sm:$0xff] }
 0x41c   :  { %v4573_v34 = vpop.f32.mrf.mxu0  ;;  %v4806_v3 = vpop.f32.mrf.mxu1 }
 0x41d   :  { %18411 = vst [vmem:[#allocation50_spill] sm:$0xff] %v15222_v11  ;;  %v15225_v47 = vadd.f32 %v4804_v16, %v4572_v12  ;;  %v4574_v28 = vadd.f32 %v4573_v34, %v18414_v59  ;;  %v18421_v16 = vld [vmem:[#allocation65_spill] sm:$0xff]  ;;  %v18422_v12 = vld [vmem:[#allocation66_spill] sm:$0xff]  ;;  %v18426_v11 = vld [vmem:[#allocation208_spill] sm:$0xff] }
 0x41e   :  { %v4575_v55 = vpop.f32.mrf.mxu0  ;;  %v4808_v19 = vpop.f32.mrf.mxu1 }
 0x41f   :  { %18413 = vst [vmem:[#allocation191_spill] sm:$0xff] %v15225_v47  ;;  %v15228_v2 = vadd.f32 %v4806_v3, %v4574_v28  ;;  %v4576_v18 = vadd.f32 %v4575_v55, %v18416_v42  ;;  %v18424_v28 = vld [vmem:[#allocation207_spill] sm:$0xff] }
 0x420   :  { %v4579_v13 = vpop.f32.mrf.mxu0  ;;  %v4812_v40 = vpop.f32.mrf.mxu1  ;;  %5056 = vmatmul.mubr.bf16.gmra.mxu0 %v18417_v48  ;;  %5249 = vmatmul.mubr.bf16.gmra.mxu1 %v18418_v32  ;;  %v18429_v48 = vld [vmem:[#allocation63_spill] sm:$0xff] }
 0x421   :  { %18415 = vst [vmem:[#allocation192_spill] sm:$0xff] %v15228_v2  ;;  %v15233_v39 = vadd.f32 %v4808_v19, %v4576_v18  ;;  %v4580_v53 = vadd.f32 %v4579_v13, %v18420_v17  ;;  %5063 = vmatprep.mubr.bf16.mxu0 %v18421_v16  ;;  %5256 = vmatprep.mubr.bf16.mxu1 %v18422_v12  ;;  %v18428_v13 = vld [vmem:[#allocation209_spill] sm:$0xff] }
 0x422   :  { %v4581_v59 = vpop.f32.mrf.mxu0  ;;  %v4814_v34 = vpop.f32.mrf.mxu1 }
 0x423   :  { %18419 = vst [vmem:[#allocation193_spill] sm:$0xff] %v15233_v39  ;;  %v15238_v3 = vadd.f32 %v4812_v40, %v4580_v53  ;;  %v4582_v55 = vadd.f32 %v4581_v59, %v18424_v28  ;;  %v18430_v40 = vld [vmem:[#allocation64_spill] sm:$0xff]  ;;  %v18432_v59 = vld [vmem:[#allocation210_spill] sm:$0xff] }
 0x424   :  { %v4583_v42 = vpop.f32.mrf.mxu0  ;;  %v4816_v2 = vpop.f32.mrf.mxu1 }
 0x425   :  { %18423 = vst [vmem:[#allocation47_spill] sm:$0xff] %v15238_v3  ;;  %v15241_v47 = vadd.f32 %v4814_v34, %v4582_v55  ;;  %v4584_v32 = vadd.f32 %v4583_v42, %v18426_v11  ;;  %v18433_v34 = vld [vmem:[#allocation69_spill] sm:$0xff]  ;;  %v18434_v55 = vld [vmem:[#allocation70_spill] sm:$0xff]  ;;  %v18438_v3 = vld [vmem:[#allocation212_spill] sm:$0xff] }
 0x426   :  { %v4585_v19 = vpop.f32.mrf.mxu0  ;;  %v4818_v18 = vpop.f32.mrf.mxu1 }
 0x427   :  { %18425 = vst [vmem:[#allocation48_spill] sm:$0xff] %v15241_v47  ;;  %v15244_v39 = vadd.f32 %v4816_v2, %v4584_v32  ;;  %v4586_v17 = vadd.f32 %v4585_v19, %v18428_v13  ;;  %v18436_v32 = vld [vmem:[#allocation211_spill] sm:$0xff] }
 0x428   :  { %v4589_v16 = vpop.f32.mrf.mxu0  ;;  %v4822_v12 = vpop.f32.mrf.mxu1  ;;  %5064 = vmatmul.mubr.bf16.gmra.mxu0 %v18429_v48  ;;  %5257 = vmatmul.mubr.bf16.gmra.mxu1 %v18430_v40  ;;  %v18441_v48 = vld [vmem:[#allocation67_spill] sm:$0xff] }
 0x429   :  { %18427 = vst [vmem:[#allocation194_spill] sm:$0xff] %v15244_v39  ;;  %v15249_v53 = vadd.f32 %v4818_v18, %v4586_v17  ;;  %v4590_v28 = vadd.f32 %v4589_v16, %v18432_v59  ;;  %5071 = vmatprep.mubr.bf16.mxu0 %v18433_v34  ;;  %5264 = vmatprep.mubr.bf16.mxu1 %v18434_v55  ;;  %v18440_v16 = vld [vmem:[#allocation213_spill] sm:$0xff] }
 0x42a   :  { %v4591_v11 = vpop.f32.mrf.mxu0  ;;  %v4824_v42 = vpop.f32.mrf.mxu1 }
 0x42b   :  { %18431 = vst [vmem:[#allocation53_spill] sm:$0xff] %v15249_v53  ;;  %v15254_v2 = vadd.f32 %v4822_v12, %v4590_v28  ;;  %v4592_v19 = vadd.f32 %v4591_v11, %v18436_v32  ;;  %v18442_v12 = vld [vmem:[#allocation68_spill] sm:$0xff]  ;;  %v18444_v11 = vld [vmem:[#allocation214_spill] sm:$0xff] }
 0x42c   :  { %v4593_v13 = vpop.f32.mrf.mxu0  ;;  %v4826_v39 = vpop.f32.mrf.mxu1 }
 0x42d   :  { %18435 = vst [vmem:[#allocation54_spill] sm:$0xff] %v15254_v2  ;;  %v15257_v47 = vadd.f32 %v4824_v42, %v4592_v19  ;;  %v4594_v40 = vadd.f32 %v4593_v13, %v18438_v3  ;;  %v18445_v42 = vld [vmem:[#allocation73_spill] sm:$0xff]  ;;  %v18446_v19 = vld [vmem:[#allocation74_spill] sm:$0xff]  ;;  %v18450_v2 = vld [vmem:[#allocation216_spill] sm:$0xff] }
 0x42e   :  { %v4595_v18 = vpop.f32.mrf.mxu0  ;;  %v4828_v17 = vpop.f32.mrf.mxu1 }
 0x42f   :  { %18437 = vst [vmem:[#allocation195_spill] sm:$0xff] %v15257_v47  ;;  %v15260_v53 = vadd.f32 %v4826_v39, %v4594_v40  ;;  %v4596_v59 = vadd.f32 %v4595_v18, %v18440_v16  ;;  %v18448_v40 = vld [vmem:[#allocation215_spill] sm:$0xff] }
 0x430   :  { %v4599_v34 = vpop.f32.mrf.mxu0  ;;  %v4832_v55 = vpop.f32.mrf.mxu1  ;;  %5072 = vmatmul.mubr.bf16.gmra.mxu0 %v18441_v48  ;;  %5265 = vmatmul.mubr.bf16.gmra.mxu1 %v18442_v12  ;;  %v18453_v48 = vld [vmem:[#allocation71_spill] sm:$0xff] }
 0x431   :  { %18439 = vst [vmem:[#allocation196_spill] sm:$0xff] %v15260_v53  ;;  %v15265_v28 = vadd.f32 %v4828_v17, %v4596_v59  ;;  %v4600_v32 = vadd.f32 %v4599_v34, %v18444_v11  ;;  %5079 = vmatprep.mubr.bf16.mxu0 %v18445_v42  ;;  %5272 = vmatprep.mubr.bf16.mxu1 %v18446_v19  ;;  %v18452_v34 = vld [vmem:[#allocation217_spill] sm:$0xff] }
 0x432   :  { %v4601_v3 = vpop.f32.mrf.mxu0  ;;  %v4834_v13 = vpop.f32.mrf.mxu1 }
 0x433   :  { %18443 = vst [vmem:[#allocation197_spill] sm:$0xff] %v15265_v28  ;;  %v15270_v39 = vadd.f32 %v4832_v55, %v4600_v32  ;;  %v4602_v18 = vadd.f32 %v4601_v3, %v18448_v40  ;;  %v18454_v55 = vld [vmem:[#allocation72_spill] sm:$0xff]  ;;  %v18456_v3 = vld [vmem:[#allocation218_spill] sm:$0xff] }
 0x434   :  { %v4603_v16 = vpop.f32.mrf.mxu0  ;;  %v4836_v53 = vpop.f32.mrf.mxu1 }
 0x435   :  { %18447 = vst [vmem:[#allocation51_spill] sm:$0xff] %v15270_v39  ;;  %v15273_v47 = vadd.f32 %v4834_v13, %v4602_v18  ;;  %v4604_v12 = vadd.f32 %v4603_v16, %v18450_v2  ;;  %v18457_v13 = vld [vmem:[#allocation77_spill] sm:$0xff]  ;;  %v18458_v18 = vld [vmem:[#allocation78_spill] sm:$0xff]  ;;  %v18462_v39 = vld [vmem:[#allocation220_spill] sm:$0xff] }
 0x436   :  { %v4605_v17 = vpop.f32.mrf.mxu0  ;;  %v4838_v59 = vpop.f32.mrf.mxu1 }
 0x437   :  { %18449 = vst [vmem:[#allocation52_spill] sm:$0xff] %v15273_v47  ;;  %v15276_v28 = vadd.f32 %v4836_v53, %v4604_v12  ;;  %v4606_v11 = vadd.f32 %v4605_v17, %v18452_v34  ;;  %v18460_v12 = vld [vmem:[#allocation219_spill] sm:$0xff] }
 0x438   :  { %v4609_v42 = vpop.f32.mrf.mxu0  ;;  %v4842_v19 = vpop.f32.mrf.mxu1  ;;  %5080 = vmatmul.mubr.bf16.gmra.mxu0 %v18453_v48  ;;  %5273 = vmatmul.mubr.bf16.gmra.mxu1 %v18454_v55  ;;  %v18465_v48 = vld [vmem:[#allocation75_spill] sm:$0xff] }
 0x439   :  { %18451 = vst [vmem:[#allocation198_spill] sm:$0xff] %v15276_v28  ;;  %v15281_v32 = vadd.f32 %v4838_v59, %v4606_v11  ;;  %v4610_v40 = vadd.f32 %v4609_v42, %v18456_v3  ;;  %5087 = vmatprep.mubr.bf16.mxu0 %v18457_v13  ;;  %5280 = vmatprep.mubr.bf16.mxu1 %v18458_v18  ;;  %v18464_v42 = vld [vmem:[#allocation221_spill] sm:$0xff] }
 0x43a   :  { %v4611_v2 = vpop.f32.mrf.mxu0  ;;  %v4844_v16 = vpop.f32.mrf.mxu1 }
 0x43b   :  { %18455 = vst [vmem:[#allocation57_spill] sm:$0xff] %v15281_v32  ;;  %v15286_v53 = vadd.f32 %v4842_v19, %v4610_v40  ;;  %v4612_v17 = vadd.f32 %v4611_v2, %v18460_v12  ;;  %v18467_v40 = vld [vmem:[#allocation222_spill] sm:$0xff] }
 0x43c   :  { %v4613_v34 = vpop.f32.mrf.mxu0  ;;  %v4846_v28 = vpop.f32.mrf.mxu1 }
 0x43d   :  { %18459 = vst [vmem:[#allocation58_spill] sm:$0xff] %v15286_v53  ;;  %v15289_v47 = vadd.f32 %v4844_v16, %v4612_v17  ;;  %v4614_v55 = vadd.f32 %v4613_v34, %v18462_v39 }
 0x43e   :  { %v4615_v59 = vpop.f32.mrf.mxu0  ;;  %v4848_v11 = vpop.f32.mrf.mxu1 }
 0x43f   :  { %18461 = vst [vmem:[#allocation199_spill] sm:$0xff] %v15289_v47  ;;  %v15292_v32 = vadd.f32 %v4846_v28, %v4614_v55  ;;  %v4616_v3 = vadd.f32 %v4615_v59, %v18464_v42  ;;  %v18469_v55 = vld [vmem:[#allocation223_spill] sm:$0xff]  ;;  %v18471_v42 = vld [vmem:[#allocation224_spill] sm:$0xff] }
 0x440   :  { %v4619_v13 = vpop.f32.mrf.mxu0  ;;  %v4852_v18 = vpop.f32.mrf.mxu1  ;;  %5088 = vmatmul.mubr.bf16.gmra.mxu0 %v18465_v48  ;;  %5281 = vmatmul.mubr.bf16.gmra.mxu1 %v18309_v57 }
 0x441   :  { %18463 = vst [vmem:[#allocation200_spill] sm:$0xff] %v15292_v32  ;;  %v15297_v19 = vadd.f32 %v4848_v11, %v4616_v3  ;;  %v4620_v2 = vadd.f32 %v4619_v13, %v18467_v40  ;;  %5095 = vmatprep.mubr.bf16.mxu0 %v18311_v8  ;;  %5288 = vmatprep.mubr.bf16.mxu1 %v18312_v51  ;;  %v18473_v13 = vld [vmem:[#allocation225_spill] sm:$0xff] }
 0x442   :  { %v4621_v39 = vpop.f32.mrf.mxu0  ;;  %v4854_v16 = vpop.f32.mrf.mxu1 }
 0x443   :  { %18466 = vst [vmem:[#allocation201_spill] sm:$0xff] %v15297_v19  ;;  %v15302_v28 = vadd.f32 %v4852_v18, %v4620_v2  ;;  %v4622_v12 = vadd.f32 %v4621_v39, %v18469_v55  ;;  %v18475_v2 = vld [vmem:[#allocation226_spill] sm:$0xff] }
 0x444   :  { %v4623_v17 = vpop.f32.mrf.mxu0  ;;  %v4856_v34 = vpop.f32.mrf.mxu1 }
 0x445   :  { %18468 = vst [vmem:[#allocation202_spill] sm:$0xff] %v15302_v28  ;;  %v15305_v59 = vadd.f32 %v4854_v16, %v4622_v12  ;;  %v4624_v32 = vadd.f32 %v4623_v17, %v18471_v42  ;;  %v18477_v12 = vld [vmem:[#allocation5_spill] sm:$0xff] }
 0x446   :  { %v4625_v11 = vpop.f32.mrf.mxu0  ;;  %v4858_v3 = vpop.f32.mrf.mxu1 }
 0x447   :  { %18470 = vst [vmem:[#allocation203_spill] sm:$0xff] %v15305_v59  ;;  %v15308_v19 = vadd.f32 %v4856_v34, %v4624_v32  ;;  %v4626_v40 = vadd.f32 %v4625_v11, %v18473_v13  ;;  %v18479_v13 = vld [vmem:[#allocation6_spill] sm:$0xff] }
 0x448   :  { %v4629_v47 = vpop.f32.mrf.mxu0  ;;  %v4862_v53 = vpop.f32.mrf.mxu1  ;;  %5096 = vmatmul.mubr.bf16.gmra.mxu0 %v18314_v54  ;;  %5289 = vmatmul.mubr.bf16.gmra.mxu1 %v18315_v20 }
 0x449   :  { %18472 = vst [vmem:[#allocation204_spill] sm:$0xff] %v15308_v19  ;;  %v15313_v18 = vadd.f32 %v4858_v3, %v4626_v40  ;;  %v4630_v39 = vadd.f32 %v4629_v47, %v18475_v2  ;;  %5969 = vmatprep.mubr.bf16.mxu0 %v18219_v36  ;;  %6202 = vmatprep.mubr.bf16.mxu1 %v18220_v38  ;;  %v12230_v47 = vld [vmem:[%s17660_s3 + $0x6b0] ss:$12 sps:$4 sm:$0xff]  }
 0x44a   :  { %v4631_v16 = vpop.f32.mrf.mxu0  ;;  %v4864_v55 = vpop.f32.mrf.mxu1  ;;  %v12231_v3 = vld [vmem:[%s17660_s3 + $0x830] ss:$12 sps:$4 sm:$0xff]  }
 0x44b   :  { %18474 = vst [vmem:[#allocation205_spill] sm:$0xff] %v15313_v18  ;;  %v15318_v32 = vadd.f32 %v4862_v53, %v4630_v39  ;;  %v4632_v17 = vadd.f32 %v4631_v16, %v18477_v12  ;;  %v18481_v39 = vld [vmem:[#allocation227_spill] sm:$0xff] }
 0x44c   :  { %v4633_v34 = vpop.f32.mrf.mxu0  ;;  %v4866_v42 = vpop.f32.mrf.mxu1  ;;  %v18535_v18 = vld [vmem:[#allocation55_spill] sm:$0xff] }
 0x44d   :  { %18476 = vst [vmem:[#allocation206_spill] sm:$0xff] %v15318_v32  ;;  %v15321_v11 = vadd.f32 %v4864_v55, %v4632_v17  ;;  %v4634_v19 = vadd.f32 %v4633_v34, %v18479_v13  ;;  %v18483_v17 = vld [vmem:[#allocation3_spill] sm:$0xff]  ;;  %v12232_v13 = vld [vmem:[%s17660_s3 + $0x698] ss:$12 sps:$4 sm:$0xff]  }
 0x44e   :  { %v4635_v40 = vpop.f32.mrf.mxu0  ;;  %v4868_v2 = vpop.f32.mrf.mxu1 }
 0x44f   :  { %18478 = vst [vmem:[#allocation207_spill] sm:$0xff] %v15321_v11  ;;  %v15330_v53 = vadd.f32 %v4866_v42, %v4634_v19  ;;  %v4636_v16 = vadd.f32 %v4635_v40, %v18481_v39  ;;  %v12233_v19 = vld [vmem:[%s17660_s3 + $0x818] ss:$12 sps:$4 sm:$0xff]   ;;  %v18485_v39 = vld [vmem:[#allocation4_spill] sm:$0xff] }
 0x450   :  { %v4639_v12 = vpop.f32.mrf.mxu0  ;;  %v4872_v32 = vpop.f32.mrf.mxu1  ;;  %5970 = vmatmul.mubr.bf16.vlgmr.msra.gmra.mxu0 %v18224_v0  ;;  %6203 = vmatmul.mubr.bf16.vlgmr.msra.gmra.mxu1 %v18225_v45 }
 0x451   :  { %18480 = vst [vmem:[#allocation208_spill] sm:$0xff] %v15330_v53  ;;  %v15335_v55 = vadd.f32 %v4868_v2, %v4636_v16  ;;  %v4640_v34 = vadd.f32 %v4639_v12, %v18483_v17  ;;  %6404 = vmatpush1.bf16.msra.mxu0 %v12230_v47  ;;  %6597 = vmatpush1.bf16.msra.mxu1 %v12231_v3  ;;  %v18487_v17 = vld [vmem:[#allocation9_spill] sm:$0xff] }
 0x452   :  { %5979 = vmatprep.mubr.bf16.mxu0 %v18227_v1  ;;  %6212 = vmatprep.mubr.bf16.mxu1 %v18228_v5  ;;  %v4641_v42 = vpop.f32.mrf.mxu0  ;;  %v4874_v40 = vpop.f32.mrf.mxu1 }
 0x453   :  { %18482 = vst [vmem:[#allocation209_spill] sm:$0xff] %v15335_v55  ;;  %v15346_v2 = vadd.f32 %v4872_v32, %v4640_v34  ;;  %v4642_v16 = vadd.f32 %v4641_v42, %v18485_v39  ;;  %6405 = vmatprep.subr.bf16.mxu0 %v18344_v35  ;;  %6598 = vmatprep.subr.bf16.mxu1 %v18344_v35  ;;  %v12234_v32 = vld [vmem:[%s17660_s3 + $0x680] ss:$12 sps:$4 sm:$0xff]  }
 0x454   :  { %v4643_v47 = vpop.f32.mrf.mxu0  ;;  %v4876_v3 = vpop.f32.mrf.mxu1  ;;  %v12235_v34 = vld [vmem:[%s17660_s3 + $0x800] ss:$12 sps:$4 sm:$0xff]  }
 0x455   :  { %18484 = vst [vmem:[#allocation210_spill] sm:$0xff] %v15346_v2  ;;  %v15351_v12 = vadd.f32 %v4874_v40, %v4642_v16  ;;  %v4644_v55 = vadd.f32 %v4643_v47, %v18487_v17  ;;  %6406 = vmatpush1.bf16.msra.mxu0 %v12232_v13  ;;  %6599 = vmatpush1.bf16.msra.mxu1 %v12233_v19  ;;  %v18489_v40 = vld [vmem:[#allocation10_spill] sm:$0xff]  ;;  %v18491_v47 = vld [vmem:[#allocation7_spill] sm:$0xff] }
 0x456   :  { %v4645_v53 = vpop.f32.mrf.mxu0  ;;  %v4878_v11 = vpop.f32.mrf.mxu1  ;;  %6407 = vmatprep.subr.bf16.mxu0 %v18344_v35  ;;  %6600 = vmatprep.subr.bf16.mxu1 %v18344_v35 }
 0x457   :  { %18486 = vst [vmem:[#allocation211_spill] sm:$0xff] %v15351_v12  ;;  %v15362_v42 = vadd.f32 %v4876_v3, %v4644_v55  ;;  %v4646_v39 = vadd.f32 %v4645_v53, %v18489_v40  ;;  %v12236_v53 = vld [vmem:[%s17660_s3 + $0x668] ss:$12 sps:$4 sm:$0xff]  }
 0x458   :  { %v4649_v13 = vpop.f32.mrf.mxu0  ;;  %v4882_v19 = vpop.f32.mrf.mxu1  ;;  %5980 = vmatmul.mubr.bf16.gmra.mxu0 %v18230_v29  ;;  %6213 = vmatmul.mubr.bf16.gmra.mxu1 %v18231_v41  ;;  %v12237_v55 = vld [vmem:[%s17660_s3 + $0x7e8] ss:$12 sps:$4 sm:$0xff]  }
 0x459   :  { %18488 = vst [vmem:[#allocation212_spill] sm:$0xff] %v15362_v42  ;;  %v15367_v16 = vadd.f32 %v4878_v11, %v4646_v39  ;;  %v4650_v17 = vadd.f32 %v4649_v13, %v18491_v47  ;;  %5989 = vmatprep.mubr.bf16.mxu0 %v18233_v56  ;;  %6222 = vmatprep.mubr.bf16.mxu1 %v18234_v31  ;;  %v18493_v3 = vld [vmem:[#allocation8_spill] sm:$0xff] }
 0x45a   :  { %v4651_v12 = vpop.f32.mrf.mxu0  ;;  %v4884_v2 = vpop.f32.mrf.mxu1  ;;  %6408 = vmatpush1.bf16.msra.mxu0 %v12234_v32  ;;  %6601 = vmatpush1.bf16.msra.mxu1 %v12235_v34  ;;  %v18495_v34 = vld [vmem:[#allocation13_spill] sm:$0xff] }
 0x45b   :  { %18490 = vst [vmem:[#allocation213_spill] sm:$0xff] %v15367_v16  ;;  %v15378_v11 = vadd.f32 %v4882_v19, %v4650_v17  ;;  %v4652_v40 = vadd.f32 %v4651_v12, %v18493_v3  ;;  %6409 = vmatprep.subr.bf16.mxu0 %v18344_v35  ;;  %6602 = vmatprep.subr.bf16.mxu1 %v18344_v35  ;;  %v12238_v19 = vld [vmem:[%s17660_s3 + $0x650] ss:$12 sps:$4 sm:$0xff]   ;;  %v18497_v3 = vld [vmem:[#allocation14_spill] sm:$0xff] }
 0x45c   :  { %v4653_v39 = vpop.f32.mrf.mxu0  ;;  %v4886_v13 = vpop.f32.mrf.mxu1  ;;  %v12239_v12 = vld [vmem:[%s17660_s3 + $0x7d0] ss:$12 sps:$4 sm:$0xff]  }
 0x45d   :  { %18492 = vst [vmem:[#allocation214_spill] sm:$0xff] %v15378_v11  ;;  %v15383_v32 = vadd.f32 %v4884_v2, %v4652_v40  ;;  %v4654_v47 = vadd.f32 %v4653_v39, %v18495_v34  ;;  %v12240_v34 = vld [vmem:[%s17660_s3 + $0x638] ss:$12 sps:$4 sm:$0xff]  }
 0x45e   :  { %v4655_v16 = vpop.f32.mrf.mxu0  ;;  %v4888_v42 = vpop.f32.mrf.mxu1  ;;  %6410 = vmatpush1.bf16.msra.mxu0 %v12236_v53  ;;  %6603 = vmatpush1.bf16.msra.mxu1 %v12237_v55  ;;  %v18499_v55 = vld [vmem:[#allocation11_spill] sm:$0xff] }
 0x45f   :  { %18494 = vst [vmem:[#allocation215_spill] sm:$0xff] %v15383_v32  ;;  %v15392_v17 = vadd.f32 %v4886_v13, %v4654_v47  ;;  %v4656_v11 = vadd.f32 %v4655_v16, %v18497_v3  ;;  %6411 = vmatprep.subr.bf16.mxu0 %v18344_v35  ;;  %6604 = vmatprep.subr.bf16.mxu1 %v18344_v35  ;;  %v12241_v47 = vld [vmem:[%s17660_s3 + $0x7b8] ss:$12 sps:$4 sm:$0xff]  }
 0x460   :  { %v4659_v2 = vpop.f32.mrf.mxu0  ;;  %v4892_v40 = vpop.f32.mrf.mxu1  ;;  %5990 = vmatmul.mubr.bf16.gmra.mxu0 %v18236_v24  ;;  %6223 = vmatmul.mubr.bf16.gmra.mxu1 %v18237_v15 }
 0x461   :  { %18496 = vst [vmem:[#allocation216_spill] sm:$0xff] %v15392_v17  ;;  %v15399_v53 = vadd.f32 %v4888_v42, %v4656_v11  ;;  %v4660_v39 = vadd.f32 %v4659_v2, %v18499_v55  ;;  %5999 = vmatprep.mubr.bf16.mxu0 %v18239_v23  ;;  %6232 = vmatprep.mubr.bf16.mxu1 %v18240_v60  ;;  %v18501_v11 = vld [vmem:[#allocation12_spill] sm:$0xff] }
 0x462   :  { %v4661_v13 = vpop.f32.mrf.mxu0  ;;  %v4894_v16 = vpop.f32.mrf.mxu1  ;;  %6412 = vmatpush1.bf16.msra.mxu0 %v12238_v19  ;;  %6605 = vmatpush1.bf16.msra.mxu1 %v12239_v12  ;;  %v18503_v12 = vld [vmem:[#allocation17_spill] sm:$0xff] }
 0x463   :  { %18498 = vst [vmem:[#allocation217_spill] sm:$0xff] %v15399_v53  ;;  %v15410_v42 = vadd.f32 %v4892_v40, %v4660_v39  ;;  %v4662_v3 = vadd.f32 %v4661_v13, %v18501_v11  ;;  %6413 = vmatprep.subr.bf16.mxu0 %v18344_v35  ;;  %6606 = vmatprep.subr.bf16.mxu1 %v18344_v35  ;;  %v12242_v40 = vld [vmem:[%s17660_s3 + $0x620] ss:$12 sps:$4 sm:$0xff]  }
 0x464   :  { %v4663_v2 = vpop.f32.mrf.mxu0  ;;  %v4896_v55 = vpop.f32.mrf.mxu1  ;;  %v12243_v39 = vld [vmem:[%s17660_s3 + $0x7a0] ss:$12 sps:$4 sm:$0xff]  }
 0x465   :  { %18500 = vst [vmem:[#allocation218_spill] sm:$0xff] %v15410_v42  ;;  %v15415_v19 = vadd.f32 %v4894_v16, %v4662_v3  ;;  %v4664_v53 = vadd.f32 %v4663_v2, %v18503_v12  ;;  %v18505_v11 = vld [vmem:[#allocation18_spill] sm:$0xff]  ;;  %v12245_v12 = vld [vmem:[%s17660_s3 + $0x788] ss:$12 sps:$4 sm:$0xff]  }
 0x466   :  { %v4665_v17 = vpop.f32.mrf.mxu0  ;;  %v4898_v32 = vpop.f32.mrf.mxu1  ;;  %6414 = vmatpush1.bf16.msra.mxu0 %v12240_v34  ;;  %6607 = vmatpush1.bf16.msra.mxu1 %v12241_v47  ;;  %v18507_v47 = vld [vmem:[#allocation15_spill] sm:$0xff] }
 0x467   :  { %18502 = vst [vmem:[#allocation219_spill] sm:$0xff] %v15415_v19  ;;  %v15424_v13 = vadd.f32 %v4896_v55, %v4664_v53  ;;  %v4666_v42 = vadd.f32 %v4665_v17, %v18505_v11  ;;  %6415 = vmatprep.subr.bf16.mxu0 %v18344_v35  ;;  %6608 = vmatprep.subr.bf16.mxu1 %v18344_v35  ;;  %v12244_v55 = vld [vmem:[%s17660_s3 + $0x608] ss:$12 sps:$4 sm:$0xff]  }
 0x468   :  { %v4669_v16 = vpop.f32.mrf.mxu0  ;;  %v4902_v3 = vpop.f32.mrf.mxu1  ;;  %6000 = vmatmul.mubr.bf16.gmra.mxu0 %v18242_v10  ;;  %6233 = vmatmul.mubr.bf16.gmra.mxu1 %v18243_v44 }
 0x469   :  { %18504 = vst [vmem:[#allocation220_spill] sm:$0xff] %v15424_v13  ;;  %v15431_v34 = vadd.f32 %v4898_v32, %v4666_v42  ;;  %v4670_v2 = vadd.f32 %v4669_v16, %v18507_v47  ;;  %6009 = vmatprep.mubr.bf16.mxu0 %v18245_v63  ;;  %6242 = vmatprep.mubr.bf16.mxu1 %v18246_v4  ;;  %v18509_v42 = vld [vmem:[#allocation16_spill] sm:$0xff] }
 0x46a   :  { %v4671_v53 = vpop.f32.mrf.mxu0  ;;  %v4904_v17 = vpop.f32.mrf.mxu1  ;;  %6416 = vmatpush1.bf16.msra.mxu0 %v12242_v40  ;;  %6609 = vmatpush1.bf16.msra.mxu1 %v12243_v39  ;;  %v18511_v39 = vld [vmem:[#allocation21_spill] sm:$0xff] }
 0x46b   :  { %18506 = vst [vmem:[#allocation221_spill] sm:$0xff] %v15431_v34  ;;  %v15442_v32 = vadd.f32 %v4902_v3, %v4670_v2  ;;  %v4672_v11 = vadd.f32 %v4671_v53, %v18509_v42  ;;  %6417 = vmatprep.subr.bf16.mxu0 %v18344_v35  ;;  %6610 = vmatprep.subr.bf16.mxu1 %v18344_v35  ;;  %v12246_v3 = vld [vmem:[%s17660_s3 + $0x770] ss:$12 sps:$4 sm:$0xff]   ;;  %v18513_v42 = vld [vmem:[#allocation22_spill] sm:$0xff] }
 0x46c   :  { %v4673_v16 = vpop.f32.mrf.mxu0  ;;  %v4906_v47 = vpop.f32.mrf.mxu1  ;;  %v12247_v2 = vld [vmem:[%s17660_s3 + $0x8f0] ss:$12 sps:$4 sm:$0xff]  }
 0x46d   :  { %18508 = vst [vmem:[#allocation75_spill] sm:$0xff] %v15442_v32  ;;  %v15447_v40 = vadd.f32 %v4904_v17, %v4672_v11  ;;  %v4674_v34 = vadd.f32 %v4673_v16, %v18511_v39  ;;  %v12249_v39 = vld [vmem:[%s17660_s3 + $0x8d8] ss:$12 sps:$4 sm:$0xff]  }
 0x46e   :  { %v4675_v13 = vpop.f32.mrf.mxu0  ;;  %v4908_v19 = vpop.f32.mrf.mxu1  ;;  %6418 = vmatpush1.bf16.msra.mxu0 %v12244_v55  ;;  %6611 = vmatpush1.bf16.msra.mxu1 %v12245_v12  ;;  %v18515_v12 = vld [vmem:[#allocation19_spill] sm:$0xff] }
 0x46f   :  { %18510 = vst [vmem:[#allocation222_spill] sm:$0xff] %v15447_v40  ;;  %v15456_v53 = vadd.f32 %v4906_v47, %v4674_v34  ;;  %v4676_v32 = vadd.f32 %v4675_v13, %v18513_v42  ;;  %6419 = vmatprep.subr.bf16.mxu0 %v18344_v35  ;;  %6612 = vmatprep.subr.bf16.mxu1 %v18344_v35  ;;  %v12248_v47 = vld [vmem:[%s17660_s3 + $0x758] ss:$12 sps:$4 sm:$0xff]  }
 0x470   :  { %v4945_v17 = vpop.f32.mrf.mxu0  ;;  %v5138_v11 = vpop.f32.mrf.mxu1  ;;  %6010 = vmatmul.mubr.bf16.gmra.mxu0 %v18345_v27  ;;  %6243 = vmatmul.mubr.bf16.gmra.mxu1 %v18346_v61 }
 0x471   :  { %18512 = vst [vmem:[#allocation223_spill] sm:$0xff] %v15456_v53  ;;  %v15463_v55 = vadd.f32 %v4908_v19, %v4676_v32  ;;  %v4946_v16 = vadd.f32 %v4945_v17, %v18515_v12  ;;  %6019 = vmatprep.mubr.bf16.mxu0 %v18349_v46  ;;  %6252 = vmatprep.mubr.bf16.mxu1 %v18350_v9  ;;  %v18517_v17 = vld [vmem:[#allocation20_spill] sm:$0xff] }
 0x472   :  { %v4947_v34 = vpop.f32.mrf.mxu0  ;;  %v5140_v13 = vpop.f32.mrf.mxu1  ;;  %6420 = vmatpush2.bf16.msra.mxu0 %v12246_v3  ;;  %6613 = vmatpush2.bf16.msra.mxu1 %v12247_v2 }
 0x473   :  { %18514 = vst [vmem:[#allocation224_spill] sm:$0xff] %v15463_v55  ;;  %v15474_v19 = vadd.f32 %v5138_v11, %v4946_v16  ;;  %6421 = vmatprep.subr.bf16.mxu0 %v18344_v35  ;;  %6614 = vmatprep.subr.bf16.mxu1 %v18344_v35  ;;  %v12250_v34 = vld [vmem:[%s17660_s3 + $0x740] ss:$12 sps:$4 sm:$0xff]  }
 0x474   :  { %v4948_v32 = vpop.f32.mrf.mxu0  ;;  %v5141_v42 = vpop.f32.mrf.mxu1  ;;  %v12251_v11 = vld [vmem:[%s17660_s3 + $0x8c0] ss:$12 sps:$4 sm:$0xff]  }
 0x475   :  { %18516 = vst [vmem:[#allocation225_spill] sm:$0xff] %v15474_v19  ;;  %v4949_v12 = vadd.f32 %v4948_v32, %v18517_v17  ;;  %v18531_v55 = vld [vmem:[#allocation27_spill] sm:$0xff] }
 0x476   :  { %v4950_v3 = vpop.f32.mrf.mxu0  ;;  %v5143_v2 = vpop.f32.mrf.mxu1  ;;  %6422 = vmatpush2.bf16.msra.mxu0 %v12248_v47  ;;  %6615 = vmatpush2.bf16.msra.mxu1 %v12249_v39  ;;  %v18519_v47 = vld [vmem:[#allocation25_spill] sm:$0xff] }
 0x477   :  { %v15485_v16 = vadd.f32 %v5141_v42, %v4949_v12  ;;  %6423 = vmatprep.subr.bf16.mxu0 %v18344_v35  ;;  %6616 = vmatprep.subr.bf16.mxu1 %v18344_v35  ;;  %v12252_v42 = vld [vmem:[%s17660_s3 + $0x728] ss:$12 sps:$4 sm:$0xff]  }
 0x478   :  { %v4953_v13 = vpop.f32.mrf.mxu0  ;;  %v5146_v32 = vpop.f32.mrf.mxu1  ;;  %6020 = vmatmul.mubr.bf16.gmra.mxu0 %v18357_v14  ;;  %6253 = vmatmul.mubr.bf16.gmra.mxu1 %v18358_v22  ;;  %v12253_v12 = vld [vmem:[%s17660_s3 + $0x8a8] ss:$12 sps:$4 sm:$0xff]  }
 0x479   :  { %18518 = vst [vmem:[#allocation226_spill] sm:$0xff] %v15485_v16  ;;  %v4954_v39 = vadd.f32 %v4953_v13, %v18519_v47  ;;  %6029 = vmatprep.mubr.bf16.mxu0 %v18361_v25  ;;  %6262 = vmatprep.mubr.bf16.mxu1 %v18362_v50  ;;  %v12254_v16 = vld [vmem:[%s17660_s3 + $0x710] ss:$12 sps:$4 sm:$0xff]  }
 0x47a   :  { %v4955_v17 = vpop.f32.mrf.mxu0  ;;  %v5148_v3 = vpop.f32.mrf.mxu1  ;;  %6424 = vmatpush2.bf16.msra.mxu0 %v12250_v34  ;;  %6617 = vmatpush2.bf16.msra.mxu1 %v12251_v11 }
 0x47b   :  { %v15500_v2 = vadd.f32 %v5146_v32, %v4954_v39  ;;  %6425 = vmatprep.subr.bf16.mxu0 %v18344_v35  ;;  %6618 = vmatprep.subr.bf16.mxu1 %v18344_v35  ;;  %v18521_v17 = vld [vmem:[#allocation26_spill] sm:$0xff]  ;;  %v12255_v32 = vld [vmem:[%s17660_s3 + $0x890] ss:$12 sps:$4 sm:$0xff]  }
 0x47c   :  { %v4956_v13 = vpop.f32.mrf.mxu0  ;;  %v5149_v47 = vpop.f32.mrf.mxu1 }
 0x47d   :  { %18520 = vst [vmem:[#allocation5_spill] sm:$0xff] %v15500_v2  ;;  %v4957_v3 = vadd.f32 %v4956_v13, %v18521_v17 }
 0x47e   :  { %v4958_v34 = vpop.f32.mrf.mxu0  ;;  %v5151_v11 = vpop.f32.mrf.mxu1  ;;  %6426 = vmatpush2.bf16.msra.mxu0 %v12252_v42  ;;  %6619 = vmatpush2.bf16.msra.mxu1 %v12253_v12  ;;  %v18523_v42 = vld [vmem:[#allocation23_spill] sm:$0xff] }
 0x47f   :  { %v15511_v39 = vadd.f32 %v5149_v47, %v4957_v3  ;;  %6427 = vmatprep.subr.bf16.mxu0 %v18344_v35  ;;  %6620 = vmatprep.subr.bf16.mxu1 %v18344_v35  ;;  %v12256_v47 = vld [vmem:[%s17660_s3 + $0x6f8] ss:$12 sps:$4 sm:$0xff]  }
 0x480   :  { %v4961_v2 = vpop.f32.mrf.mxu0  ;;  %v5154_v13 = vpop.f32.mrf.mxu1  ;;  %6030 = vmatmul.mubr.bf16.gmra.mxu0 %v18369_v49  ;;  %6263 = vmatmul.mubr.bf16.gmra.mxu1 %v18370_v6  ;;  %v12257_v3 = vld [vmem:[%s17660_s3 + $0x878] ss:$12 sps:$4 sm:$0xff]  }
 0x481   :  { %18522 = vst [vmem:[#allocation6_spill] sm:$0xff] %v15511_v39  ;;  %v4962_v12 = vadd.f32 %v4961_v2, %v18523_v42  ;;  %6039 = vmatprep.mubr.bf16.mxu0 %v18373_v30  ;;  %6272 = vmatprep.mubr.bf16.mxu1 %v18374_v21  ;;  %v12258_v39 = vld [vmem:[%s17660_s3 + $0x6e0] ss:$12 sps:$4 sm:$0xff]  }
 0x482   :  { %v4963_v17 = vpop.f32.mrf.mxu0  ;;  %v5156_v34 = vpop.f32.mrf.mxu1  ;;  %6428 = vmatpush2.bf16.msra.mxu0 %v12254_v16  ;;  %6621 = vmatpush2.bf16.msra.mxu1 %v12255_v32 }
 0x483   :  { %v15526_v11 = vadd.f32 %v5154_v13, %v4962_v12  ;;  %6429 = vmatprep.subr.bf16.mxu0 %v18344_v35  ;;  %6622 = vmatprep.subr.bf16.mxu1 %v18344_v35  ;;  %v18525_v17 = vld [vmem:[#allocation24_spill] sm:$0xff]  ;;  %v12259_v13 = vld [vmem:[%s17660_s3 + $0x860] ss:$12 sps:$4 sm:$0xff]  }
 0x484   :  { %v4964_v2 = vpop.f32.mrf.mxu0  ;;  %v5157_v42 = vpop.f32.mrf.mxu1 }
 0x485   :  { %18524 = vst [vmem:[#allocation227_spill] sm:$0xff] %v15526_v11  ;;  %v4965_v34 = vadd.f32 %v4964_v2, %v18525_v17 }
 0x486   :  { %v4966_v16 = vpop.f32.mrf.mxu0  ;;  %v5159_v32 = vpop.f32.mrf.mxu1  ;;  %6430 = vmatpush2.bf16.msra.mxu0 %v12256_v47  ;;  %6623 = vmatpush2.bf16.msra.mxu1 %v12257_v3  ;;  %v18527_v47 = vld [vmem:[#allocation29_spill] sm:$0xff] }
 0x487   :  { %v15537_v12 = vadd.f32 %v5157_v42, %v4965_v34  ;;  %6431 = vmatprep.subr.bf16.mxu0 %v18344_v35  ;;  %6624 = vmatprep.subr.bf16.mxu1 %v18344_v35  ;;  %v12260_v42 = vld [vmem:[%s17660_s3 + $0x6c8] ss:$12 sps:$4 sm:$0xff]  }
 0x488   :  { %v4969_v11 = vpop.f32.mrf.mxu0  ;;  %v5162_v2 = vpop.f32.mrf.mxu1  ;;  %6040 = vmatmul.mubr.bf16.gmra.mxu0 %v18381_v26  ;;  %6273 = vmatmul.mubr.bf16.gmra.mxu1 %v18382_v37  ;;  %v12261_v34 = vld [vmem:[%s17660_s3 + $0x848] ss:$12 sps:$4 sm:$0xff]  }
 0x489   :  { %18526 = vst [vmem:[#allocation3_spill] sm:$0xff] %v15537_v12  ;;  %v4970_v3 = vadd.f32 %v4969_v11, %v18527_v47  ;;  %6049 = vmatprep.mubr.bf16.mxu0 %v18385_v33  ;;  %6282 = vmatprep.mubr.bf16.mxu1 %v18386_v58  ;;  %v12264_v11 = vld [vmem:[%s17660_s3 + $0x9ac] ss:$12 sps:$4 sm:$0xff]  }
 0x48a   :  { %v4971_v17 = vpop.f32.mrf.mxu0  ;;  %v5164_v16 = vpop.f32.mrf.mxu1  ;;  %6432 = vmatpush2.bf16.msra.mxu0 %v12258_v39  ;;  %6625 = vmatpush2.bf16.msra.mxu1 %v12259_v13  ;;  %v12267_v39 = vld [vmem:[%s17660_s3 + $0xb2c] ss:$12 sps:$4 sm:$0xff]  }
 0x48b   :  { %v15552_v32 = vadd.f32 %v5162_v2, %v4970_v3  ;;  %6433 = vmatprep.subr.bf16.mxu0 %v18344_v35  ;;  %6626 = vmatprep.subr.bf16.mxu1 %v18344_v35  ;;  %v18529_v17 = vld [vmem:[#allocation30_spill] sm:$0xff] }
 0x48c   :  { %v4972_v13 = vpop.f32.mrf.mxu0  ;;  %v5165_v47 = vpop.f32.mrf.mxu1 }
 0x48d   :  { %18528 = vst [vmem:[#allocation4_spill] sm:$0xff] %v15552_v32  ;;  %v4973_v16 = vadd.f32 %v4972_v13, %v18529_v17 }
 0x48e   :  { %v4974_v12 = vpop.f32.mrf.mxu0  ;;  %v5167_v19 = vpop.f32.mrf.mxu1  ;;  %6434 = vmatpush2.bf16.msra.mxu0 %v12260_v42  ;;  %6627 = vmatpush2.bf16.msra.mxu1 %v12261_v34 }
 0x48f   :  { %v15563_v2 = vadd.f32 %v5165_v47, %v4973_v16  ;;  %7549 = vmatprep.subr.bf16.mxu0 %v12264_v11  ;;  %7782 = vmatprep.subr.bf16.mxu1 %v12267_v39  ;;  %v18533_v11 = vld [vmem:[#allocation28_spill] sm:$0xff] }
 0x490   :  { %v4977_v3 = vpop.f32.mrf.mxu0  ;;  %v5170_v32 = vpop.f32.mrf.mxu1  ;;  %6050 = vmatmul.mubr.bf16.gmra.mxu0 %v18393_v7  ;;  %6283 = vmatmul.mubr.bf16.gmra.mxu1 %v18394_v62 }
 0x491   :  { %18530 = vst [vmem:[#allocation9_spill] sm:$0xff] %v15563_v2  ;;  %v4978_v53 = vadd.f32 %v4977_v3, %v18531_v55  ;;  %6059 = vmatprep.mubr.bf16.mxu0 %v18397_v52  ;;  %6292 = vmatprep.mubr.bf16.mxu1 %v18398_v43  ;;  %v18536_v55 = vld [vmem:[#allocation56_spill] sm:$0xff]  ;;  %v18537_v3 = vld [vmem:[#allocation33_spill] sm:$0xff] }
 0x492   :  { %v4979_v12 = vpop.f32.mrf.mxu0  ;;  %v5172_v19 = vpop.f32.mrf.mxu1 }
 0x493   :  { %v15570_v42 = vadd.f32 %v5170_v32, %v4978_v53  ;;  %v18538_v12 = vld [vmem:[#allocation61_spill] sm:$0xff]  ;;  %v18539_v53 = vld [vmem:[#allocation62_spill] sm:$0xff] }
 0x494   :  { %v4980_v34 = vpop.f32.mrf.mxu0  ;;  %v5173_v13 = vpop.f32.mrf.mxu1 }
 0x495   :  { %18532 = vst [vmem:[#allocation10_spill] sm:$0xff] %v15570_v42  ;;  %v4981_v39 = vadd.f32 %v4980_v34, %v18533_v11 }
 0x496   :  { %v4982_v47 = vpop.f32.mrf.mxu0  ;;  %v5175_v17 = vpop.f32.mrf.mxu1 }
 0x497   :  { %v15573_v16 = vadd.f32 %v5173_v13, %v4981_v39  ;;  %v18541_v13 = vld [vmem:[#allocation34_spill] sm:$0xff] }
 0x498   :  { %v4985_v2 = vpop.f32.mrf.mxu0  ;;  %v5178_v40 = vpop.f32.mrf.mxu1  ;;  %6060 = vmatmul.mubr.bf16.gmra.mxu0 %v18535_v18  ;;  %6293 = vmatmul.mubr.bf16.gmra.mxu1 %v18536_v55  ;;  %v18543_v18 = vld [vmem:[#allocation59_spill] sm:$0xff] }
 0x499   :  { %18534 = vst [vmem:[#allocation7_spill] sm:$0xff] %v15573_v16  ;;  %v4986_v59 = vadd.f32 %v4985_v2, %v18537_v3  ;;  %6069 = vmatprep.mubr.bf16.mxu0 %v18538_v12  ;;  %6302 = vmatprep.mubr.bf16.mxu1 %v18539_v53  ;;  %v18544_v2 = vld [vmem:[#allocation60_spill] sm:$0xff]  ;;  %v18545_v3 = vld [vmem:[#allocation31_spill] sm:$0xff] }
 0x49a   :  { %v4987_v32 = vpop.f32.mrf.mxu0  ;;  %v5180_v19 = vpop.f32.mrf.mxu1  ;;  %v18551_v12 = vld [vmem:[#allocation63_spill] sm:$0xff] }
 0x49b   :  { %v15580_v42 = vadd.f32 %v5178_v40, %v4986_v59  ;;  %v18546_v32 = vld [vmem:[#allocation65_spill] sm:$0xff]  ;;  %v18547_v59 = vld [vmem:[#allocation66_spill] sm:$0xff] }
 0x49c   :  { %v4988_v34 = vpop.f32.mrf.mxu0  ;;  %v5181_v11 = vpop.f32.mrf.mxu1 }
 0x49d   :  { %18540 = vst [vmem:[#allocation8_spill] sm:$0xff] %v15580_v42  ;;  %v4989_v39 = vadd.f32 %v4988_v34, %v18541_v13 }
 0x49e   :  { %v4990_v47 = vpop.f32.mrf.mxu0  ;;  %v5183_v17 = vpop.f32.mrf.mxu1 }
 0x49f   :  { %v15583_v16 = vadd.f32 %v5181_v11, %v4989_v39  ;;  %v18549_v11 = vld [vmem:[#allocation32_spill] sm:$0xff] }
 0x4a0   :  { %v4993_v28 = vpop.f32.mrf.mxu0  ;;  %v5186_v55 = vpop.f32.mrf.mxu1  ;;  %6070 = vmatmul.mubr.bf16.gmra.mxu0 %v18543_v18  ;;  %6303 = vmatmul.mubr.bf16.gmra.mxu1 %v18544_v2 }
 0x4a1   :  { %18542 = vst [vmem:[#allocation13_spill] sm:$0xff] %v15583_v16  ;;  %v4994_v53 = vadd.f32 %v4993_v28, %v18545_v3  ;;  %6079 = vmatprep.mubr.bf16.mxu0 %v18546_v32  ;;  %6312 = vmatprep.mubr.bf16.mxu1 %v18547_v59  ;;  %v18552_v28 = vld [vmem:[#allocation64_spill] sm:$0xff]  ;;  %v18553_v3 = vld [vmem:[#allocation37_spill] sm:$0xff]  ;;  %v18559_v32 = vld [vmem:[#allocation67_spill] sm:$0xff] }
 0x4a2   :  { %v4995_v40 = vpop.f32.mrf.mxu0  ;;  %v5188_v19 = vpop.f32.mrf.mxu1 }
 0x4a3   :  { %v15590_v42 = vadd.f32 %v5186_v55, %v4994_v53  ;;  %v18554_v40 = vld [vmem:[#allocation69_spill] sm:$0xff]  ;;  %v18555_v55 = vld [vmem:[#allocation70_spill] sm:$0xff] }
 0x4a4   :  { %v4996_v34 = vpop.f32.mrf.mxu0  ;;  %v5189_v13 = vpop.f32.mrf.mxu1 }
 0x4a5   :  { %18548 = vst [vmem:[#allocation14_spill] sm:$0xff] %v15590_v42  ;;  %v4997_v39 = vadd.f32 %v4996_v34, %v18549_v11 }
 0x4a6   :  { %v4998_v47 = vpop.f32.mrf.mxu0  ;;  %v5191_v17 = vpop.f32.mrf.mxu1 }
 0x4a7   :  { %v15593_v16 = vadd.f32 %v5189_v13, %v4997_v39  ;;  %v18557_v13 = vld [vmem:[#allocation38_spill] sm:$0xff] }
 0x4a8   :  { %v5001_v18 = vpop.f32.mrf.mxu0  ;;  %v5194_v2 = vpop.f32.mrf.mxu1  ;;  %6080 = vmatmul.mubr.bf16.gmra.mxu0 %v18551_v12  ;;  %6313 = vmatmul.mubr.bf16.gmra.mxu1 %v18552_v28 }
 0x4a9   :  { %18550 = vst [vmem:[#allocation11_spill] sm:$0xff] %v15593_v16  ;;  %v5002_v59 = vadd.f32 %v5001_v18, %v18553_v3  ;;  %6089 = vmatprep.mubr.bf16.mxu0 %v18554_v40  ;;  %6322 = vmatprep.mubr.bf16.mxu1 %v18555_v55  ;;  %v18560_v18 = vld [vmem:[#allocation68_spill] sm:$0xff]  ;;  %v18567_v40 = vld [vmem:[#allocation71_spill] sm:$0xff] }
 0x4aa   :  { %v5003_v53 = vpop.f32.mrf.mxu0  ;;  %v5196_v19 = vpop.f32.mrf.mxu1  ;;  %v18561_v3 = vld [vmem:[#allocation228_spill] sm:$0xff] }
 0x4ab   :  { %v15600_v42 = vadd.f32 %v5194_v2, %v5002_v59  ;;  %v18562_v53 = vld [vmem:[#allocation73_spill] sm:$0xff]  ;;  %v18563_v2 = vld [vmem:[#allocation74_spill] sm:$0xff] }
 0x4ac   :  { %v5004_v34 = vpop.f32.mrf.mxu0  ;;  %v5197_v11 = vpop.f32.mrf.mxu1 }
 0x4ad   :  { %18556 = vst [vmem:[#allocation12_spill] sm:$0xff] %v15600_v42  ;;  %v5005_v39 = vadd.f32 %v5004_v34, %v18557_v13 }
 0x4ae   :  { %v5006_v47 = vpop.f32.mrf.mxu0  ;;  %v5199_v17 = vpop.f32.mrf.mxu1 }
 0x4af   :  { %v15603_v16 = vadd.f32 %v5197_v11, %v5005_v39  ;;  %v18565_v11 = vld [vmem:[#allocation229_spill] sm:$0xff] }
 0x4b0   :  { %v5009_v12 = vpop.f32.mrf.mxu0  ;;  %v5202_v28 = vpop.f32.mrf.mxu1  ;;  %6090 = vmatmul.mubr.bf16.gmra.mxu0 %v18559_v32  ;;  %6323 = vmatmul.mubr.bf16.gmra.mxu1 %v18560_v18 }
 0x4b1   :  { %18558 = vst [vmem:[#allocation17_spill] sm:$0xff] %v15603_v16  ;;  %v5010_v55 = vadd.f32 %v5009_v12, %v18561_v3  ;;  %6099 = vmatprep.mubr.bf16.mxu0 %v18562_v53  ;;  %6332 = vmatprep.mubr.bf16.mxu1 %v18563_v2  ;;  %v18568_v12 = vld [vmem:[#allocation72_spill] sm:$0xff]  ;;  %v18569_v3 = vld [vmem:[#allocation230_spill] sm:$0xff] }
 0x4b2   :  { %v5011_v59 = vpop.f32.mrf.mxu0  ;;  %v5204_v19 = vpop.f32.mrf.mxu1 }
 0x4b3   :  { %v15610_v42 = vadd.f32 %v5202_v28, %v5010_v55  ;;  %v18570_v59 = vld [vmem:[#allocation77_spill] sm:$0xff]  ;;  %v18571_v28 = vld [vmem:[#allocation78_spill] sm:$0xff] }
 0x4b4   :  { %v5012_v34 = vpop.f32.mrf.mxu0  ;;  %v5205_v13 = vpop.f32.mrf.mxu1 }
 0x4b5   :  { %18564 = vst [vmem:[#allocation18_spill] sm:$0xff] %v15610_v42  ;;  %v5013_v39 = vadd.f32 %v5012_v34, %v18565_v11 }
 0x4b6   :  { %v5014_v47 = vpop.f32.mrf.mxu0  ;;  %v5207_v17 = vpop.f32.mrf.mxu1 }
 0x4b7   :  { %v15613_v16 = vadd.f32 %v5205_v13, %v5013_v39  ;;  %v18573_v13 = vld [vmem:[#allocation231_spill] sm:$0xff] }
 0x4b8   :  { %v5017_v32 = vpop.f32.mrf.mxu0  ;;  %v5210_v18 = vpop.f32.mrf.mxu1  ;;  %6100 = vmatmul.mubr.bf16.gmra.mxu0 %v18567_v40  ;;  %6333 = vmatmul.mubr.bf16.gmra.mxu1 %v18568_v12 }
 0x4b9   :  { %18566 = vst [vmem:[#allocation15_spill] sm:$0xff] %v15613_v16  ;;  %v5018_v2 = vadd.f32 %v5017_v32, %v18569_v3  ;;  %6109 = vmatprep.mubr.bf16.mxu0 %v18570_v59  ;;  %6342 = vmatprep.mubr.bf16.mxu1 %v18571_v28  ;;  %v18575_v32 = vld [vmem:[#allocation232_spill] sm:$0xff] }
 0x4ba   :  { %v5019_v55 = vpop.f32.mrf.mxu0  ;;  %v5212_v19 = vpop.f32.mrf.mxu1 }
 0x4bb   :  { %v15620_v42 = vadd.f32 %v5210_v18, %v5018_v2 }
 0x4bc   :  { %v5020_v34 = vpop.f32.mrf.mxu0  ;;  %v5213_v11 = vpop.f32.mrf.mxu1 }
 0x4bd   :  { %18572 = vst [vmem:[#allocation16_spill] sm:$0xff] %v15620_v42  ;;  %v5021_v39 = vadd.f32 %v5020_v34, %v18573_v13 }
 0x4be   :  { %v5022_v47 = vpop.f32.mrf.mxu0  ;;  %v5215_v17 = vpop.f32.mrf.mxu1 }
 0x4bf   :  { %v15623_v16 = vadd.f32 %v5213_v11, %v5021_v39  ;;  %v18577_v11 = vld [vmem:[#allocation233_spill] sm:$0xff] }
 0x4c0   :  { %v5025_v40 = vpop.f32.mrf.mxu0  ;;  %v5218_v12 = vpop.f32.mrf.mxu1  ;;  %6110 = vmatmul.mubr.bf16.gmra.mxu0 %v18465_v48  ;;  %6343 = vmatmul.mubr.bf16.gmra.mxu1 %v18309_v57 }
 0x4c1   :  { %18574 = vst [vmem:[#allocation21_spill] sm:$0xff] %v15623_v16  ;;  %v5026_v3 = vadd.f32 %v5025_v40, %v18575_v32  ;;  %6119 = vmatprep.mubr.bf16.mxu0 %v18311_v8  ;;  %6352 = vmatprep.mubr.bf16.mxu1 %v18312_v51  ;;  %v18579_v40 = vld [vmem:[#allocation234_spill] sm:$0xff]  ;;  %v18585_v51 = vld [vmem:[#allocation83_spill] sm:$0xff] }
 0x4c2   :  { %v5027_v18 = vpop.f32.mrf.mxu0  ;;  %v5220_v2 = vpop.f32.mrf.mxu1 }
 0x4c3   :  { %v15630_v55 = vadd.f32 %v5218_v12, %v5026_v3  ;;  %v18580_v18 = vld [vmem:[#allocation85_spill] sm:$0xff]  ;;  %v18581_v12 = vld [vmem:[#allocation86_spill] sm:$0xff] }
 0x4c4   :  { %v5028_v19 = vpop.f32.mrf.mxu0  ;;  %v5221_v34 = vpop.f32.mrf.mxu1 }
 0x4c5   :  { %18576 = vst [vmem:[#allocation22_spill] sm:$0xff] %v15630_v55  ;;  %v5029_v13 = vadd.f32 %v5028_v19, %v18577_v11 }
 0x4c6   :  { %v5030_v39 = vpop.f32.mrf.mxu0  ;;  %v5223_v47 = vpop.f32.mrf.mxu1 }
 0x4c7   :  { %v15633_v17 = vadd.f32 %v5221_v34, %v5029_v13  ;;  %v18583_v34 = vld [vmem:[#allocation235_spill] sm:$0xff] }
 0x4c8   :  { %v5033_v16 = vpop.f32.mrf.mxu0  ;;  %v5226_v42 = vpop.f32.mrf.mxu1  ;;  %6120 = vmatmul.mubr.bf16.gmra.mxu0 %v18314_v54  ;;  %6353 = vmatmul.mubr.bf16.gmra.mxu1 %v18315_v20 }
 0x4c9   :  { %18578 = vst [vmem:[#allocation19_spill] sm:$0xff] %v15633_v17  ;;  %v5034_v32 = vadd.f32 %v5033_v16, %v18579_v40  ;;  %6129 = vmatprep.mubr.bf16.mxu0 %v18580_v18  ;;  %6362 = vmatprep.mubr.bf16.mxu1 %v18581_v12  ;;  %v18586_v16 = vld [vmem:[#allocation84_spill] sm:$0xff]  ;;  %v18593_v18 = vld [vmem:[#allocation87_spill] sm:$0xff] }
 0x4ca   :  { %v5035_v3 = vpop.f32.mrf.mxu0  ;;  %v5228_v2 = vpop.f32.mrf.mxu1  ;;  %v18587_v40 = vld [vmem:[#allocation236_spill] sm:$0xff] }
 0x4cb   :  { %v15640_v55 = vadd.f32 %v5226_v42, %v5034_v32  ;;  %v18588_v3 = vld [vmem:[#allocation89_spill] sm:$0xff]  ;;  %v18589_v42 = vld [vmem:[#allocation90_spill] sm:$0xff] }
 0x4cc   :  { %v5036_v19 = vpop.f32.mrf.mxu0  ;;  %v5229_v11 = vpop.f32.mrf.mxu1 }
 0x4cd   :  { %18582 = vst [vmem:[#allocation20_spill] sm:$0xff] %v15640_v55  ;;  %v5037_v13 = vadd.f32 %v5036_v19, %v18583_v34 }
 0x4ce   :  { %v5038_v39 = vpop.f32.mrf.mxu0  ;;  %v5231_v47 = vpop.f32.mrf.mxu1 }
 0x4cf   :  { %v15643_v17 = vadd.f32 %v5229_v11, %v5037_v13  ;;  %v18591_v11 = vld [vmem:[#allocation237_spill] sm:$0xff] }
 0x4d0   :  { %v5041_v54 = vpop.f32.mrf.mxu0  ;;  %v5234_v20 = vpop.f32.mrf.mxu1  ;;  %6130 = vmatmul.mubr.bf16.gmra.mxu0 %v18585_v51  ;;  %6363 = vmatmul.mubr.bf16.gmra.mxu1 %v18586_v16 }
 0x4d1   :  { %18584 = vst [vmem:[#allocation25_spill] sm:$0xff] %v15643_v17  ;;  %v5042_v12 = vadd.f32 %v5041_v54, %v18587_v40  ;;  %6139 = vmatprep.mubr.bf16.mxu0 %v18588_v3  ;;  %6372 = vmatprep.mubr.bf16.mxu1 %v18589_v42  ;;  %v18594_v54 = vld [vmem:[#allocation88_spill] sm:$0xff]  ;;  %v18595_v40 = vld [vmem:[#allocation238_spill] sm:$0xff]  ;;  %v18601_v3 = vld [vmem:[#allocation91_spill] sm:$0xff] }
 0x4d2   :  { %v5043_v32 = vpop.f32.mrf.mxu0  ;;  %v5236_v2 = vpop.f32.mrf.mxu1 }
 0x4d3   :  { %v15650_v55 = vadd.f32 %v5234_v20, %v5042_v12  ;;  %v18596_v32 = vld [vmem:[#allocation93_spill] sm:$0xff]  ;;  %v18597_v20 = vld [vmem:[#allocation94_spill] sm:$0xff] }
 0x4d4   :  { %v5044_v19 = vpop.f32.mrf.mxu0  ;;  %v5237_v34 = vpop.f32.mrf.mxu1 }
 0x4d5   :  { %18590 = vst [vmem:[#allocation26_spill] sm:$0xff] %v15650_v55  ;;  %v5045_v13 = vadd.f32 %v5044_v19, %v18591_v11 }
 0x4d6   :  { %v5046_v39 = vpop.f32.mrf.mxu0  ;;  %v5239_v47 = vpop.f32.mrf.mxu1 }
 0x4d7   :  { %v15653_v17 = vadd.f32 %v5237_v34, %v5045_v13  ;;  %v18599_v34 = vld [vmem:[#allocation239_spill] sm:$0xff] }
 0x4d8   :  { %v5049_v51 = vpop.f32.mrf.mxu0  ;;  %v5242_v16 = vpop.f32.mrf.mxu1  ;;  %6140 = vmatmul.mubr.bf16.gmra.mxu0 %v18593_v18  ;;  %6373 = vmatmul.mubr.bf16.gmra.mxu1 %v18594_v54 }
 0x4d9   :  { %18592 = vst [vmem:[#allocation23_spill] sm:$0xff] %v15653_v17  ;;  %v5050_v42 = vadd.f32 %v5049_v51, %v18595_v40  ;;  %6149 = vmatprep.mubr.bf16.mxu0 %v18596_v32  ;;  %6382 = vmatprep.mubr.bf16.mxu1 %v18597_v20  ;;  %v18602_v51 = vld [vmem:[#allocation92_spill] sm:$0xff]  ;;  %v18607_v32 = vld [vmem:[#allocation95_spill] sm:$0xff] }
 0x4da   :  { %v5051_v12 = vpop.f32.mrf.mxu0  ;;  %v5244_v2 = vpop.f32.mrf.mxu1  ;;  %v18603_v40 = vld [vmem:[#allocation76_spill] sm:$0xff] }
 0x4db   :  { %v15660_v55 = vadd.f32 %v5242_v16, %v5050_v42  ;;  %v18604_v12 = vld [vmem:[#allocation97_spill] sm:$0xff]  ;;  %v18605_v16 = vld [vmem:[#allocation98_spill] sm:$0xff] }
 0x4dc   :  { %v5052_v19 = vpop.f32.mrf.mxu0  ;;  %v5245_v11 = vpop.f32.mrf.mxu1 }
 0x4dd   :  { %18598 = vst [vmem:[#allocation24_spill] sm:$0xff] %v15660_v55  ;;  %v5053_v13 = vadd.f32 %v5052_v19, %v18599_v34 }
 0x4de   :  { %v5054_v39 = vpop.f32.mrf.mxu0  ;;  %v5247_v47 = vpop.f32.mrf.mxu1 }
 0x4df   :  { %v15663_v17 = vadd.f32 %v5245_v11, %v5053_v13  ;;  %v18606_v11 = vld [vmem:[#allocation81_spill] sm:$0xff] }
 0x4e0   :  { %v5057_v18 = vpop.f32.mrf.mxu0  ;;  %v5250_v54 = vpop.f32.mrf.mxu1  ;;  %6150 = vmatmul.mubr.bf16.gmra.mxu0 %v18601_v3  ;;  %6383 = vmatmul.mubr.bf16.gmra.mxu1 %v18602_v51 }
 0x4e1   :  { %18600 = vst [vmem:[#allocation29_spill] sm:$0xff] %v15663_v17  ;;  %v5058_v20 = vadd.f32 %v5057_v18, %v18603_v40  ;;  %6159 = vmatprep.mubr.bf16.mxu0 %v18604_v12  ;;  %6392 = vmatprep.mubr.bf16.mxu1 %v18605_v16  ;;  %v18608_v18 = vld [vmem:[#allocation96_spill] sm:$0xff] }
 0x4e2   :  { %v5059_v42 = vpop.f32.mrf.mxu0  ;;  %v5252_v2 = vpop.f32.mrf.mxu1  ;;  %v18609_v40 = vld [vmem:[#allocation240_spill] sm:$0xff] }
 0x4e3   :  { %v15670_v55 = vadd.f32 %v5250_v54, %v5058_v20 }
 0x4e4   :  { %v5060_v19 = vpop.f32.mrf.mxu0  ;;  %v5253_v34 = vpop.f32.mrf.mxu1 }
 0x4e5   :  { %v5061_v13 = vadd.f32 %v5060_v19, %v18606_v11 }
 0x4e6   :  { %v5062_v39 = vpop.f32.mrf.mxu0  ;;  %v5255_v47 = vpop.f32.mrf.mxu1 }
 0x4e7   :  { %v15673_v17 = vadd.f32 %v5253_v34, %v5061_v13  ;;  %v18610_v34 = vld [vmem:[#allocation241_spill] sm:$0xff]  ;;  %v12262_v13 = vld [vmem:[%s17660_s3 + $0x9a8] ss:$12 sps:$4 sm:$0xff]  }
 0x4e8   :  { %v5065_v3 = vpop.f32.mrf.mxu0  ;;  %v5258_v51 = vpop.f32.mrf.mxu1  ;;  %6160 = vmatmul.mubr.bf16.gmra.mxu0 %v18607_v32  ;;  %6393 = vmatmul.mubr.bf16.gmra.mxu1 %v18608_v18 }
 0x4e9   :  { %v5066_v16 = vadd.f32 %v5065_v3, %v18609_v40  ;;  %6435 = vmatprep.mubr.bf16.mxu0 %v18219_v36  ;;  %6628 = vmatprep.mubr.bf16.mxu1 %v18220_v38  ;;  %v12265_v3 = vld [vmem:[%s17660_s3 + $0xb28] ss:$12 sps:$4 sm:$0xff]  }
 0x4ea   :  { %v5067_v54 = vpop.f32.mrf.mxu0  ;;  %v5260_v20 = vpop.f32.mrf.mxu1  ;;  %v12270_v38 = vld [vmem:[%s17660_s3 + $0x994] ss:$12 sps:$4 sm:$0xff]  }
 0x4eb   :  { %v15680_v42 = vadd.f32 %v5258_v51, %v5066_v16  ;;  %v12273_v51 = vld [vmem:[%s17660_s3 + $0xb14] ss:$12 sps:$4 sm:$0xff]  }
 0x4ec   :  { %v5068_v2 = vpop.f32.mrf.mxu0  ;;  %v5261_v19 = vpop.f32.mrf.mxu1  ;;  %v18611_v54 = vld [vmem:[#allocation242_spill] sm:$0xff] }
 0x4ed   :  { %v5069_v11 = vadd.f32 %v5068_v2, %v18610_v34  ;;  %v12268_v2 = vld [vmem:[%s17660_s3 + $0x990] ss:$12 sps:$4 sm:$0xff]  }
 0x4ee   :  { %v5070_v39 = vpop.f32.mrf.mxu0  ;;  %v5263_v36 = vpop.f32.mrf.mxu1 }
 0x4ef   :  { %v15689_v47 = vadd.f32 %v5261_v19, %v5069_v11  ;;  %v12271_v19 = vld [vmem:[%s17660_s3 + $0xb10] ss:$12 sps:$4 sm:$0xff]   ;;  %v18612_v36 = vld [vmem:[#allocation243_spill] sm:$0xff] }
 0x4f0   :  { %v5073_v16 = vpop.f32.mrf.mxu0  ;;  %v5266_v40 = vpop.f32.mrf.mxu1  ;;  %6436 = vmatmul.mubr.bf16.vlgmr.msra.gmra.mxu0 %v18224_v0  ;;  %6629 = vmatmul.mubr.bf16.vlgmr.msra.gmra.mxu1 %v18225_v45  ;;  %v12276_v45 = vld [vmem:[%s17660_s3 + $0x97c] ss:$12 sps:$4 sm:$0xff]  }
 0x4f1   :  { %v5074_v20 = vadd.f32 %v5073_v16, %v18611_v54  ;;  %7550 = vmatpush1.bf16.msra.mxu0 %v12262_v13  ;;  %7783 = vmatpush1.bf16.msra.mxu1 %v12265_v3  ;;  %v12279_v11 = vld [vmem:[%s17660_s3 + $0xafc] ss:$12 sps:$4 sm:$0xff]   ;;  %v12274_v54 = vld [vmem:[%s17660_s3 + $0x978] ss:$12 sps:$4 sm:$0xff]  }
 0x4f2   :  { %6443 = vmatprep.mubr.bf16.mxu0 %v18227_v1  ;;  %6636 = vmatprep.mubr.bf16.mxu1 %v18228_v5  ;;  %v5075_v34 = vpop.f32.mrf.mxu0  ;;  %v5268_v0 = vpop.f32.mrf.mxu1 }
 0x4f3   :  { %v15714_v13 = vadd.f32 %v5266_v40, %v5074_v20  ;;  %7551 = vmatprep.subr.bf16.mxu0 %v12270_v38  ;;  %7784 = vmatprep.subr.bf16.mxu1 %v12273_v51  ;;  %v12277_v40 = vld [vmem:[%s17660_s3 + $0xaf8] ss:$12 sps:$4 sm:$0xff]   ;;  %v18613_v34 = vld [vmem:[#allocation244_spill] sm:$0xff] }
 0x4f4   :  { %v5076_v3 = vpop.f32.mrf.mxu0  ;;  %v5269_v39 = vpop.f32.mrf.mxu1  ;;  %v12282_v51 = vld [vmem:[%s17660_s3 + $0x964] ss:$12 sps:$4 sm:$0xff]  }
 0x4f5   :  { %v5077_v1 = vadd.f32 %v5076_v3, %v18612_v36  ;;  %7552 = vmatpush1.bf16.msra.mxu0 %v12268_v2  ;;  %7785 = vmatpush1.bf16.msra.mxu1 %v12271_v19  ;;  %v12285_v20 = vld [vmem:[%s17660_s3 + $0xae4] ss:$12 sps:$4 sm:$0xff]   ;;  %v12280_v3 = vld [vmem:[%s17660_s3 + $0x960] ss:$12 sps:$4 sm:$0xff]  }
 0x4f6   :  { %v5078_v5 = vpop.f32.mrf.mxu0  ;;  %v5271_v16 = vpop.f32.mrf.mxu1  ;;  %7553 = vmatprep.subr.bf16.mxu0 %v12276_v45  ;;  %7786 = vmatprep.subr.bf16.mxu1 %v12279_v11 }
 0x4f7   :  { %v15723_v38 = vadd.f32 %v5269_v39, %v5077_v1  ;;  %v18614_v1 = vld [vmem:[#allocation245_spill] sm:$0xff] }
 0x4f8   :  { %v5081_v2 = vpop.f32.mrf.mxu0  ;;  %v5274_v19 = vpop.f32.mrf.mxu1  ;;  %6444 = vmatmul.mubr.bf16.gmra.mxu0 %v18230_v29  ;;  %6637 = vmatmul.mubr.bf16.gmra.mxu1 %v18231_v41  ;;  %v12283_v29 = vld [vmem:[%s17660_s3 + $0xae0] ss:$12 sps:$4 sm:$0xff]  }
 0x4f9   :  { %v5082_v0 = vadd.f32 %v5081_v2, %v18613_v34  ;;  %6451 = vmatprep.mubr.bf16.mxu0 %v18233_v56  ;;  %6644 = vmatprep.mubr.bf16.mxu1 %v18234_v31  ;;  %v12288_v41 = vld [vmem:[%s17660_s3 + $0x94c] ss:$12 sps:$4 sm:$0xff]   ;;  %v12294_v2 = vld [vmem:[%s17660_s3 + $0x934] ss:$12 sps:$4 sm:$0xff]  }
 0x4fa   :  { %v5083_v45 = vpop.f32.mrf.mxu0  ;;  %v5276_v11 = vpop.f32.mrf.mxu1  ;;  %7554 = vmatpush1.bf16.msra.mxu0 %v12274_v54  ;;  %7787 = vmatpush1.bf16.msra.mxu1 %v12277_v40  ;;  %v12291_v56 = vld [vmem:[%s17660_s3 + $0xacc] ss:$12 sps:$4 sm:$0xff]   ;;  %v12286_v40 = vld [vmem:[%s17660_s3 + $0x948] ss:$12 sps:$4 sm:$0xff]  }
 0x4fb   :  { %v15742_v39 = vadd.f32 %v5274_v19, %v5082_v0  ;;  %7555 = vmatprep.subr.bf16.mxu0 %v12282_v51  ;;  %7788 = vmatprep.subr.bf16.mxu1 %v12285_v20  ;;  %v12289_v51 = vld [vmem:[%s17660_s3 + $0xac8] ss:$12 sps:$4 sm:$0xff]   ;;  %v18615_v45 = vld [vmem:[#allocation246_spill] sm:$0xff] }
 0x4fc   :  { %v5084_v31 = vpop.f32.mrf.mxu0  ;;  %v5277_v36 = vpop.f32.mrf.mxu1  ;;  %v12297_v19 = vld [vmem:[%s17660_s3 + $0xab4] ss:$12 sps:$4 sm:$0xff]  }
 0x4fd   :  { %v5085_v5 = vadd.f32 %v5084_v31, %v18614_v1 }
 0x4fe   :  { %v5086_v16 = vpop.f32.mrf.mxu0  ;;  %v5279_v54 = vpop.f32.mrf.mxu1  ;;  %7556 = vmatpush1.bf16.msra.mxu0 %v12280_v3  ;;  %7789 = vmatpush1.bf16.msra.mxu1 %v12283_v29 }
 0x4ff   :  { %v15757_v20 = vadd.f32 %v5277_v36, %v5085_v5  ;;  %7557 = vmatprep.subr.bf16.mxu0 %v12288_v41  ;;  %7790 = vmatprep.subr.bf16.mxu1 %v12291_v56  ;;  %v12292_v41 = vld [vmem:[%s17660_s3 + $0x930] ss:$12 sps:$4 sm:$0xff]   ;;  %v18616_v36 = vld [vmem:[#allocation247_spill] sm:$0xff]  ;;  %v12298_v54 = vld [vmem:[%s17660_s3 + $0x918] ss:$12 sps:$4 sm:$0xff]  }
 0x500   :  { %v5089_v34 = vpop.f32.mrf.mxu0  ;;  %v5282_v0 = vpop.f32.mrf.mxu1  ;;  %6452 = vmatmul.mubr.bf16.gmra.mxu0 %v18236_v24  ;;  %6645 = vmatmul.mubr.bf16.gmra.mxu1 %v18237_v15  ;;  %v12295_v24 = vld [vmem:[%s17660_s3 + $0xab0] ss:$12 sps:$4 sm:$0xff]  }
 0x501   :  { %v5090_v11 = vadd.f32 %v5089_v34, %v18615_v45  ;;  %6459 = vmatprep.mubr.bf16.mxu0 %v18239_v23  ;;  %6652 = vmatprep.mubr.bf16.mxu1 %v18240_v60  ;;  %v12300_v15 = vld [vmem:[%s17660_s3 + $0x91c] ss:$12 sps:$4 sm:$0xff]   ;;  %v18617_v45 = vld [vmem:[#allocation248_spill] sm:$0xff] }
 0x502   :  { %v5091_v3 = vpop.f32.mrf.mxu0  ;;  %v5284_v29 = vpop.f32.mrf.mxu1  ;;  %7558 = vmatpush1.bf16.msra.mxu0 %v12286_v40  ;;  %7791 = vmatpush1.bf16.msra.mxu1 %v12289_v51  ;;  %v12303_v23 = vld [vmem:[%s17660_s3 + $0xa9c] ss:$12 sps:$4 sm:$0xff]   ;;  %v12301_v40 = vld [vmem:[%s17660_s3 + $0xa98] ss:$12 sps:$4 sm:$0xff]  }
 0x503   :  { %v15776_v56 = vadd.f32 %v5282_v0, %v5090_v11  ;;  %7559 = vmatprep.subr.bf16.mxu0 %v12294_v2  ;;  %7792 = vmatprep.subr.bf16.mxu1 %v12297_v19  ;;  %v12306_v2 = vld [vmem:[%s17660_s3 + $0x904] ss:$12 sps:$4 sm:$0xff]  }
 0x504   :  { %v5092_v60 = vpop.f32.mrf.mxu0  ;;  %v5285_v31 = vpop.f32.mrf.mxu1  ;;  %v12309_v19 = vld [vmem:[%s17660_s3 + $0xa84] ss:$12 sps:$4 sm:$0xff]  }
 0x505   :  { %v5093_v1 = vadd.f32 %v5092_v60, %v18616_v36 }
 0x506   :  { %v5094_v5 = vpop.f32.mrf.mxu0  ;;  %v5287_v16 = vpop.f32.mrf.mxu1  ;;  %7560 = vmatpush1.bf16.msra.mxu0 %v12292_v41  ;;  %7793 = vmatpush1.bf16.msra.mxu1 %v12295_v24  ;;  %v12304_v41 = vld [vmem:[%s17660_s3 + $0x900] ss:$12 sps:$4 sm:$0xff]  }
 0x507   :  { %v15791_v51 = vadd.f32 %v5285_v31, %v5093_v1  ;;  %7561 = vmatprep.subr.bf16.mxu0 %v12300_v15  ;;  %7794 = vmatprep.subr.bf16.mxu1 %v12303_v23  ;;  %v18618_v23 = vld [vmem:[#allocation249_spill] sm:$0xff]  ;;  %v12310_v1 = vld [vmem:[%s17660_s3 + $0xa68] ss:$12 sps:$4 sm:$0xff]  }
 0x508   :  { %v5097_v34 = vpop.f32.mrf.mxu0  ;;  %v5290_v0 = vpop.f32.mrf.mxu1  ;;  %6460 = vmatmul.mubr.bf16.gmra.mxu0 %v18242_v10  ;;  %6653 = vmatmul.mubr.bf16.gmra.mxu1 %v18243_v44  ;;  %v12307_v10 = vld [vmem:[%s17660_s3 + $0xa80] ss:$12 sps:$4 sm:$0xff]   ;;  %v12313_v5 = vld [vmem:[%s17660_s3 + $0xbe8] ss:$12 sps:$4 sm:$0xff]  }
 0x509   :  { %v5098_v11 = vadd.f32 %v5097_v34, %v18617_v45  ;;  %6467 = vmatprep.mubr.bf16.mxu0 %v18245_v63  ;;  %6660 = vmatprep.mubr.bf16.mxu1 %v18246_v4  ;;  %v12312_v44 = vld [vmem:[%s17660_s3 + $0xa6c] ss:$12 sps:$4 sm:$0xff]  }
 0x50a   :  { %v5099_v3 = vpop.f32.mrf.mxu0  ;;  %v5292_v29 = vpop.f32.mrf.mxu1  ;;  %7562 = vmatpush1.bf16.msra.mxu0 %v12298_v54  ;;  %7795 = vmatpush1.bf16.msra.mxu1 %v12301_v40  ;;  %v12315_v63 = vld [vmem:[%s17660_s3 + $0xbec] ss:$12 sps:$4 sm:$0xff]   ;;  %v12318_v54 = vld [vmem:[%s17660_s3 + $0xa54] ss:$12 sps:$4 sm:$0xff]  }
 0x50b   :  { %v15810_v24 = vadd.f32 %v5290_v0, %v5098_v11  ;;  %7563 = vmatprep.subr.bf16.mxu0 %v12306_v2  ;;  %7796 = vmatprep.subr.bf16.mxu1 %v12309_v19  ;;  %v12321_v40 = vld [vmem:[%s17660_s3 + $0xbd4] ss:$12 sps:$4 sm:$0xff]   ;;  %v12316_v11 = vld [vmem:[%s17660_s3 + $0xa50] ss:$12 sps:$4 sm:$0xff]  }
 0x50c   :  { %v5100_v4 = vpop.f32.mrf.mxu0  ;;  %v5293_v15 = vpop.f32.mrf.mxu1  ;;  %v12319_v3 = vld [vmem:[%s17660_s3 + $0xbd0] ss:$12 sps:$4 sm:$0xff]  }
 0x50d   :  { %v5101_v60 = vadd.f32 %v5100_v4, %v18618_v23 }
 0x50e   :  { %v5102_v31 = vpop.f32.mrf.mxu0  ;;  %v5295_v36 = vpop.f32.mrf.mxu1  ;;  %7564 = vmatpush1.bf16.msra.mxu0 %v12304_v41  ;;  %7797 = vmatpush1.bf16.msra.mxu1 %v12307_v10 }
 0x50f   :  { %v15825_v16 = vadd.f32 %v5293_v15, %v5101_v60  ;;  %7565 = vmatprep.subr.bf16.mxu0 %v12312_v44  ;;  %7798 = vmatprep.subr.bf16.mxu1 %v12315_v63  ;;  %v18620_v44 = vld [vmem:[#allocation251_spill] sm:$0xff]  ;;  %v12322_v60 = vld [vmem:[%s17660_s3 + $0xa38] ss:$12 sps:$4 sm:$0xff]   ;;  %v18621_v36 = vld [vmem:[#allocation252_spill] sm:$0xff] }
 0x510   :  { %v5971_v2 = vpop.f32.mrf.mxu0  ;;  %v6204_v19 = vpop.f32.mrf.mxu1  ;;  %6468 = vmatmul.mubr.bf16.gmra.mxu0 %v18345_v27  ;;  %6661 = vmatmul.mubr.bf16.gmra.mxu1 %v18346_v61  ;;  %v18619_v27 = vld [vmem:[#allocation250_spill] sm:$0xff] }
 0x511   :  { %v6205_v34 = vadd.f32 %v6204_v19, %v5971_v2  ;;  %6475 = vmatprep.mubr.bf16.mxu0 %v18349_v46  ;;  %6668 = vmatprep.mubr.bf16.mxu1 %v18350_v9  ;;  %v12324_v46 = vld [vmem:[%s17660_s3 + $0xa3c] ss:$12 sps:$4 sm:$0xff]   ;;  %v12325_v31 = vld [vmem:[%s17660_s3 + $0xbb8] ss:$12 sps:$4 sm:$0xff]  }
 0x512   :  { %v5973_v0 = vpop.f32.mrf.mxu0  ;;  %v6206_v45 = vpop.f32.mrf.mxu1  ;;  %7566 = vmatpush2.bf16.msra.mxu0 %v12310_v1  ;;  %7799 = vmatpush2.bf16.msra.mxu1 %v12313_v5  ;;  %v12327_v9 = vld [vmem:[%s17660_s3 + $0xbbc] ss:$12 sps:$4 sm:$0xff]  }
 0x513   :  { %v15844_v29 = vadd.f32 %v6205_v34, %v18619_v27  ;;  %v6207_v61 = vadd.f32 %v6206_v45, %v5973_v0  ;;  %7567 = vmatprep.subr.bf16.mxu0 %v12318_v54  ;;  %7800 = vmatprep.subr.bf16.mxu1 %v12321_v40  ;;  %v12330_v54 = vld [vmem:[%s17660_s3 + $0xa24] ss:$12 sps:$4 sm:$0xff]   ;;  %v18622_v34 = vld [vmem:[#allocation253_spill] sm:$0xff]  ;;  %v12328_v27 = vld [vmem:[%s17660_s3 + $0xa20] ss:$12 sps:$4 sm:$0xff]  }
 0x514   :  { %v5975_v41 = vpop.f32.mrf.mxu0  ;;  %v6208_v10 = vpop.f32.mrf.mxu1  ;;  %v12333_v40 = vld [vmem:[%s17660_s3 + $0xba4] ss:$12 sps:$4 sm:$0xff]  }
 0x515   :  { %v15853_v63 = vadd.f32 %v6207_v61, %v18620_v44  ;;  %v6209_v4 = vadd.f32 %v6208_v10, %v5975_v41  ;;  %v18624_v10 = vld [vmem:[#allocation255_spill] sm:$0xff] }
 0x516   :  { %v5977_v15 = vpop.f32.mrf.mxu0  ;;  %v6210_v23 = vpop.f32.mrf.mxu1  ;;  %7568 = vmatpush2.bf16.msra.mxu0 %v12316_v11  ;;  %7801 = vmatpush2.bf16.msra.mxu1 %v12319_v3 }
 0x517   :  { %v15862_v1 = vadd.f32 %v6209_v4, %v18621_v36  ;;  %v6211_v5 = vadd.f32 %v6210_v23, %v5977_v15  ;;  %7569 = vmatprep.subr.bf16.mxu0 %v12324_v46  ;;  %7802 = vmatprep.subr.bf16.mxu1 %v12327_v9  ;;  %v18625_v36 = vld [vmem:[#allocation256_spill] sm:$0xff] }
 0x518   :  { %v5981_v2 = vpop.f32.mrf.mxu0  ;;  %v6214_v19 = vpop.f32.mrf.mxu1  ;;  %6476 = vmatmul.mubr.bf16.gmra.mxu0 %v18357_v14  ;;  %6669 = vmatmul.mubr.bf16.gmra.mxu1 %v18358_v22  ;;  %v12331_v14 = vld [vmem:[%s17660_s3 + $0xba0] ss:$12 sps:$4 sm:$0xff]  }
 0x519   :  { %v15873_v0 = vadd.f32 %v6211_v5, %v18622_v34  ;;  %v6215_v45 = vadd.f32 %v6214_v19, %v5981_v2  ;;  %6483 = vmatprep.mubr.bf16.mxu0 %v18361_v25  ;;  %6676 = vmatprep.mubr.bf16.mxu1 %v18362_v50  ;;  %v18623_v22 = vld [vmem:[#allocation254_spill] sm:$0xff]  ;;  %v12336_v25 = vld [vmem:[%s17660_s3 + $0xa0c] ss:$12 sps:$4 sm:$0xff]  }
 0x51a   :  { %v5983_v11 = vpop.f32.mrf.mxu0  ;;  %v6216_v3 = vpop.f32.mrf.mxu1  ;;  %7570 = vmatpush2.bf16.msra.mxu0 %v12322_v60  ;;  %7803 = vmatpush2.bf16.msra.mxu1 %v12325_v31  ;;  %v12339_v50 = vld [vmem:[%s17660_s3 + $0xb8c] ss:$12 sps:$4 sm:$0xff]   ;;  %v12334_v60 = vld [vmem:[%s17660_s3 + $0xa08] ss:$12 sps:$4 sm:$0xff]  }
 0x51b   :  { %v15884_v61 = vadd.f32 %v6215_v45, %v18623_v22  ;;  %v6217_v46 = vadd.f32 %v6216_v3, %v5983_v11  ;;  %7571 = vmatprep.subr.bf16.mxu0 %v12330_v54  ;;  %7804 = vmatprep.subr.bf16.mxu1 %v12333_v40  ;;  %v12337_v31 = vld [vmem:[%s17660_s3 + $0xb88] ss:$12 sps:$4 sm:$0xff]   ;;  %v18626_v45 = vld [vmem:[#allocation257_spill] sm:$0xff] }
 0x51c   :  { %v5985_v9 = vpop.f32.mrf.mxu0  ;;  %v6218_v41 = vpop.f32.mrf.mxu1  ;;  %v12342_v40 = vld [vmem:[%s17660_s3 + $0x9f4] ss:$12 sps:$4 sm:$0xff]   ;;  %v12340_v22 = vld [vmem:[%s17660_s3 + $0x9f0] ss:$12 sps:$4 sm:$0xff]  }
 0x51d   :  { %v15893_v44 = vadd.f32 %v6217_v46, %v18624_v10  ;;  %v6219_v4 = vadd.f32 %v6218_v41, %v5985_v9  ;;  %v12345_v2 = vld [vmem:[%s17660_s3 + $0xb74] ss:$12 sps:$4 sm:$0xff]   ;;  %v18630_v41 = vld [vmem:[#allocation259_spill] sm:$0xff] }
 0x51e   :  { %v5987_v15 = vpop.f32.mrf.mxu0  ;;  %v6220_v23 = vpop.f32.mrf.mxu1  ;;  %7572 = vmatpush2.bf16.msra.mxu0 %v12328_v27  ;;  %7805 = vmatpush2.bf16.msra.mxu1 %v12331_v14 }
 0x51f   :  { %v15902_v5 = vadd.f32 %v6219_v4, %v18625_v36  ;;  %v6221_v54 = vadd.f32 %v6220_v23, %v5987_v15  ;;  %7573 = vmatprep.subr.bf16.mxu0 %v12336_v25  ;;  %7806 = vmatprep.subr.bf16.mxu1 %v12339_v50  ;;  %v18632_v36 = vld [vmem:[#allocation260_spill] sm:$0xff] }
 0x520   :  { %v5991_v19 = vpop.f32.mrf.mxu0  ;;  %v6224_v34 = vpop.f32.mrf.mxu1  ;;  %6484 = vmatmul.mubr.bf16.gmra.mxu0 %v18369_v49  ;;  %6677 = vmatmul.mubr.bf16.gmra.mxu1 %v18370_v6  ;;  %v12343_v49 = vld [vmem:[%s17660_s3 + $0xb70] ss:$12 sps:$4 sm:$0xff]   ;;  %v18628_v6 = vld [vmem:[#allocation258_spill] sm:$0xff] }
 0x521   :  { %v15913_v11 = vadd.f32 %v6221_v54, %v18626_v45  ;;  %v6225_v3 = vadd.f32 %v6224_v34, %v5991_v19  ;;  %6491 = vmatprep.mubr.bf16.mxu0 %v18373_v30  ;;  %6684 = vmatprep.mubr.bf16.mxu1 %v18374_v21  ;;  %v12348_v30 = vld [vmem:[%s17660_s3 + $0x9dc] ss:$12 sps:$4 sm:$0xff]   ;;  %v12357_v19 = vld [vmem:[%s17660_s3 + $0xb44] ss:$12 sps:$4 sm:$0xff]  }
 0x522   :  { %v5993_v27 = vpop.f32.mrf.mxu0  ;;  %v6226_v14 = vpop.f32.mrf.mxu1  ;;  %7574 = vmatpush2.bf16.msra.mxu0 %v12334_v60  ;;  %7807 = vmatpush2.bf16.msra.mxu1 %v12337_v31  ;;  %v12351_v21 = vld [vmem:[%s17660_s3 + $0xb5c] ss:$12 sps:$4 sm:$0xff]   ;;  %v12346_v60 = vld [vmem:[%s17660_s3 + $0x9d8] ss:$12 sps:$4 sm:$0xff]  }
 0x523   :  { %18627 = vst [vmem:[#allocation30_spill] sm:$0xff] %v15913_v11  ;;  %v15924_v46 = vadd.f32 %v6225_v3, %v18628_v6  ;;  %v6227_v25 = vadd.f32 %v6226_v14, %v5993_v27  ;;  %7575 = vmatprep.subr.bf16.mxu0 %v12342_v40  ;;  %7808 = vmatprep.subr.bf16.mxu1 %v12345_v2  ;;  %v12349_v31 = vld [vmem:[%s17660_s3 + $0xb58] ss:$12 sps:$4 sm:$0xff]   ;;  %v12352_v6 = vld [vmem:[%s17660_s3 + $0x9c0] ss:$12 sps:$4 sm:$0xff]  }
 0x524   :  { %v5995_v50 = vpop.f32.mrf.mxu0  ;;  %v6228_v9 = vpop.f32.mrf.mxu1  ;;  %v12354_v2 = vld [vmem:[%s17660_s3 + $0x9c4] ss:$12 sps:$4 sm:$0xff]   ;;  %v18634_v3 = vld [vmem:[#allocation261_spill] sm:$0xff] }
 0x525   :  { %18629 = vst [vmem:[#allocation27_spill] sm:$0xff] %v15924_v46  ;;  %v15933_v10 = vadd.f32 %v6227_v25, %v18630_v41  ;;  %v6229_v4 = vadd.f32 %v6228_v9, %v5995_v50 }
 0x526   :  { %v5997_v15 = vpop.f32.mrf.mxu0  ;;  %v6230_v23 = vpop.f32.mrf.mxu1  ;;  %7576 = vmatpush2.bf16.msra.mxu0 %v12340_v22  ;;  %7809 = vmatpush2.bf16.msra.mxu1 %v12343_v49 }
 0x527   :  { %18631 = vst [vmem:[#allocation28_spill] sm:$0xff] %v15933_v10  ;;  %v15942_v54 = vadd.f32 %v6229_v4, %v18632_v36  ;;  %v6231_v40 = vadd.f32 %v6230_v23, %v5997_v15  ;;  %7577 = vmatprep.subr.bf16.mxu0 %v12348_v30  ;;  %7810 = vmatprep.subr.bf16.mxu1 %v12351_v21  ;;  %v18638_v21 = vld [vmem:[#allocation179_spill] sm:$0xff]  ;;  %v18640_v15 = vld [vmem:[#allocation180_spill] sm:$0xff] }
 0x528   :  { %v6001_v34 = vpop.f32.mrf.mxu0  ;;  %v6234_v45 = vpop.f32.mrf.mxu1  ;;  %6492 = vmatmul.mubr.bf16.gmra.mxu0 %v18381_v26  ;;  %6685 = vmatmul.mubr.bf16.gmra.mxu1 %v18382_v37  ;;  %v12355_v26 = vld [vmem:[%s17660_s3 + $0xb40] ss:$12 sps:$4 sm:$0xff]   ;;  %v18850_v10 = vld [vmem:[#allocation132_spill] sm:$0xff] }
 0x529   :  { %18633 = vst [vmem:[#allocation33_spill] sm:$0xff] %v15942_v54  ;;  %v15953_v27 = vadd.f32 %v6231_v40, %v18634_v3  ;;  %v6235_v14 = vadd.f32 %v6234_v45, %v6001_v34  ;;  %6499 = vmatprep.mubr.bf16.mxu0 %v18385_v33  ;;  %6692 = vmatprep.mubr.bf16.mxu1 %v18386_v58  ;;  %v18636_v37 = vld [vmem:[#allocation262_spill] sm:$0xff]  ;;  %v18642_v40 = vld [vmem:[#allocation181_spill] sm:$0xff]  ;;  %v18644_v3 = vld [vmem:[#allocation35_spill] sm:$0xff] }
 0x52a   :  { %v6003_v22 = vpop.f32.mrf.mxu0  ;;  %v6236_v49 = vpop.f32.mrf.mxu1  ;;  %7578 = vmatpush2.bf16.msra.mxu0 %v12346_v60  ;;  %7811 = vmatpush2.bf16.msra.mxu1 %v12349_v31 }
 0x52b   :  { %18635 = vst [vmem:[#allocation34_spill] sm:$0xff] %v15953_v27  ;;  %v15964_v25 = vadd.f32 %v6235_v14, %v18636_v37  ;;  %v6237_v30 = vadd.f32 %v6236_v49, %v6003_v22  ;;  %7579 = vmatprep.subr.bf16.mxu0 %v12354_v2  ;;  %7812 = vmatprep.subr.bf16.mxu1 %v12357_v19 }
 0x52c   :  { %v6005_v33 = vpop.f32.mrf.mxu0  ;;  %v6238_v58 = vpop.f32.mrf.mxu1 }
 0x52d   :  { %18637 = vst [vmem:[#allocation31_spill] sm:$0xff] %v15964_v25  ;;  %v15967_v50 = vadd.f32 %v6237_v30, %v18638_v21  ;;  %v6239_v9 = vadd.f32 %v6238_v58, %v6005_v33  ;;  %v18648_v33 = vld [vmem:[#allocation182_spill] sm:$0xff] }
 0x52e   :  { %v6007_v41 = vpop.f32.mrf.mxu0  ;;  %v6240_v4 = vpop.f32.mrf.mxu1  ;;  %7580 = vmatpush2.bf16.msra.mxu0 %v12352_v6  ;;  %7813 = vmatpush2.bf16.msra.mxu1 %v12355_v26  ;;  %v18646_v26 = vld [vmem:[#allocation36_spill] sm:$0xff] }
 0x52f   :  { %18639 = vst [vmem:[#allocation32_spill] sm:$0xff] %v15967_v50  ;;  %v15970_v23 = vadd.f32 %v6239_v9, %v18640_v15  ;;  %v6241_v60 = vadd.f32 %v6240_v4, %v6007_v41  ;;  %8015 = vmatprep.subr.bf16.mxu0 %v18344_v35  ;;  %8208 = vmatprep.subr.bf16.mxu1 %v18344_v35  ;;  %v18650_v9 = vld [vmem:[#allocation55_spill] sm:$0xff]  ;;  %v18651_v41 = vld [vmem:[#allocation56_spill] sm:$0xff]  ;;  %v18652_v4 = vld [vmem:[#allocation41_spill] sm:$0xff] }
 0x530   :  { %v6011_v31 = vpop.f32.mrf.mxu0  ;;  %v6244_v36 = vpop.f32.mrf.mxu1  ;;  %6500 = vmatmul.mubr.bf16.gmra.mxu0 %v18393_v7  ;;  %6693 = vmatmul.mubr.bf16.gmra.mxu1 %v18394_v62  ;;  %v18842_v50 = vld [vmem:[#allocation128_spill] sm:$0xff] }
 0x531   :  { %18641 = vst [vmem:[#allocation37_spill] sm:$0xff] %v15970_v23  ;;  %v15977_v2 = vadd.f32 %v6241_v60, %v18642_v40  ;;  %v6245_v19 = vadd.f32 %v6244_v36, %v6011_v31  ;;  %6507 = vmatprep.mubr.bf16.mxu0 %v18397_v52  ;;  %6700 = vmatprep.mubr.bf16.mxu1 %v18398_v43  ;;  %v18654_v31 = vld [vmem:[#allocation61_spill] sm:$0xff]  ;;  %v18655_v36 = vld [vmem:[#allocation62_spill] sm:$0xff] }
 0x532   :  { %v6013_v34 = vpop.f32.mrf.mxu0  ;;  %v6246_v45 = vpop.f32.mrf.mxu1 }
 0x533   :  { %18643 = vst [vmem:[#allocation38_spill] sm:$0xff] %v15977_v2  ;;  %v15982_v14 = vadd.f32 %v6245_v19, %v18644_v3  ;;  %v6247_v22 = vadd.f32 %v6246_v45, %v6013_v34  ;;  %v18656_v34 = vld [vmem:[#allocation42_spill] sm:$0xff] }
 0x534   :  { %v6015_v49 = vpop.f32.mrf.mxu0  ;;  %v6248_v6 = vpop.f32.mrf.mxu1 }
 0x535   :  { %18645 = vst [vmem:[#allocation228_spill] sm:$0xff] %v15982_v14  ;;  %v15985_v7 = vadd.f32 %v6247_v22, %v18646_v26  ;;  %v6249_v62 = vadd.f32 %v6248_v6, %v6015_v49  ;;  %v18658_v6 = vld [vmem:[#allocation183_spill] sm:$0xff]  ;;  %v18826_v14 = vld [vmem:[#allocation120_spill] sm:$0xff] }
 0x536   :  { %v6017_v37 = vpop.f32.mrf.mxu0  ;;  %v6250_v30 = vpop.f32.mrf.mxu1 }
 0x537   :  { %18647 = vst [vmem:[#allocation73_spill] sm:$0xff] %v15985_v7  ;;  %v15988_v58 = vadd.f32 %v6249_v62, %v18648_v33  ;;  %v6251_v52 = vadd.f32 %v6250_v30, %v6017_v37  ;;  %v18660_v33 = vld [vmem:[#allocation184_spill] sm:$0xff]  ;;  %v18825_v7 = vld [vmem:[#allocation119_spill] sm:$0xff] }
 0x538   :  { %v6021_v21 = vpop.f32.mrf.mxu0  ;;  %v6254_v43 = vpop.f32.mrf.mxu1  ;;  %6508 = vmatmul.mubr.bf16.gmra.mxu0 %v18650_v9  ;;  %6701 = vmatmul.mubr.bf16.gmra.mxu1 %v18651_v41  ;;  %v18662_v41 = vld [vmem:[#allocation59_spill] sm:$0xff] }
 0x539   :  { %18649 = vst [vmem:[#allocation229_spill] sm:$0xff] %v15988_v58  ;;  %v15993_v15 = vadd.f32 %v6251_v52, %v18652_v4  ;;  %v6255_v60 = vadd.f32 %v6254_v43, %v6021_v21  ;;  %6515 = vmatprep.mubr.bf16.mxu0 %v18654_v31  ;;  %6708 = vmatprep.mubr.bf16.mxu1 %v18655_v36  ;;  %v18663_v4 = vld [vmem:[#allocation60_spill] sm:$0xff] }
 0x53a   :  { %v6023_v40 = vpop.f32.mrf.mxu0  ;;  %v6256_v19 = vpop.f32.mrf.mxu1 }
 0x53b   :  { %18653 = vst [vmem:[#allocation230_spill] sm:$0xff] %v15993_v15  ;;  %v15998_v45 = vadd.f32 %v6255_v60, %v18656_v34  ;;  %v6257_v3 = vadd.f32 %v6256_v19, %v6023_v40  ;;  %v18664_v60 = vld [vmem:[#allocation185_spill] sm:$0xff]  ;;  %v18667_v19 = vld [vmem:[#allocation66_spill] sm:$0xff] }
 0x53c   :  { %v6025_v22 = vpop.f32.mrf.mxu0  ;;  %v6258_v49 = vpop.f32.mrf.mxu1  ;;  %v18666_v40 = vld [vmem:[#allocation65_spill] sm:$0xff] }
 0x53d   :  { %18657 = vst [vmem:[#allocation77_spill] sm:$0xff] %v15998_v45  ;;  %v16001_v26 = vadd.f32 %v6257_v3, %v18658_v6  ;;  %v6259_v62 = vadd.f32 %v6258_v49, %v6025_v22  ;;  %v18668_v22 = vld [vmem:[#allocation39_spill] sm:$0xff]  ;;  %v18814_v45 = vld [vmem:[#allocation116_spill] sm:$0xff] }
 0x53e   :  { %v6027_v37 = vpop.f32.mrf.mxu0  ;;  %v6260_v30 = vpop.f32.mrf.mxu1 }
 0x53f   :  { %18659 = vst [vmem:[#allocation78_spill] sm:$0xff] %v16001_v26  ;;  %v16004_v52 = vadd.f32 %v6259_v62, %v18660_v33  ;;  %v6261_v21 = vadd.f32 %v6260_v30, %v6027_v37  ;;  %v18670_v30 = vld [vmem:[#allocation40_spill] sm:$0xff]  ;;  %v18813_v26 = vld [vmem:[#allocation115_spill] sm:$0xff] }
 0x540   :  { %v6031_v43 = vpop.f32.mrf.mxu0  ;;  %v6264_v9 = vpop.f32.mrf.mxu1  ;;  %6516 = vmatmul.mubr.bf16.gmra.mxu0 %v18662_v41  ;;  %6709 = vmatmul.mubr.bf16.gmra.mxu1 %v18663_v4 }
 0x541   :  { %18661 = vst [vmem:[#allocation231_spill] sm:$0xff] %v16004_v52  ;;  %v16009_v31 = vadd.f32 %v6261_v21, %v18664_v60  ;;  %v6265_v36 = vadd.f32 %v6264_v9, %v6031_v43  ;;  %6523 = vmatprep.mubr.bf16.mxu0 %v18666_v40  ;;  %6716 = vmatprep.mubr.bf16.mxu1 %v18667_v19  ;;  %v18672_v60 = vld [vmem:[#allocation186_spill] sm:$0xff]  ;;  %v18675_v52 = vld [vmem:[#allocation64_spill] sm:$0xff] }
 0x542   :  { %v6033_v34 = vpop.f32.mrf.mxu0  ;;  %v6266_v3 = vpop.f32.mrf.mxu1 }
 0x543   :  { %18665 = vst [vmem:[#allocation232_spill] sm:$0xff] %v16009_v31  ;;  %v16014_v49 = vadd.f32 %v6265_v36, %v18668_v22  ;;  %v6267_v6 = vadd.f32 %v6266_v3, %v6033_v34  ;;  %v18674_v31 = vld [vmem:[#allocation63_spill] sm:$0xff]  ;;  %v18676_v36 = vld [vmem:[#allocation45_spill] sm:$0xff] }
 0x544   :  { %v6035_v62 = vpop.f32.mrf.mxu0  ;;  %v6268_v37 = vpop.f32.mrf.mxu1  ;;  %v18678_v22 = vld [vmem:[#allocation69_spill] sm:$0xff] }
 0x545   :  { %18669 = vst [vmem:[#allocation233_spill] sm:$0xff] %v16014_v49  ;;  %v16017_v33 = vadd.f32 %v6267_v6, %v18670_v30  ;;  %v6269_v41 = vadd.f32 %v6268_v37, %v6035_v62  ;;  %v18679_v6 = vld [vmem:[#allocation70_spill] sm:$0xff]  ;;  %v18687_v49 = vld [vmem:[#allocation68_spill] sm:$0xff] }
 0x546   :  { %v6037_v4 = vpop.f32.mrf.mxu0  ;;  %v6270_v21 = vpop.f32.mrf.mxu1  ;;  %v18680_v30 = vld [vmem:[#allocation46_spill] sm:$0xff] }
 0x547   :  { %18671 = vst [vmem:[#allocation234_spill] sm:$0xff] %v16017_v33  ;;  %v16020_v43 = vadd.f32 %v6269_v41, %v18672_v60  ;;  %v6271_v9 = vadd.f32 %v6270_v21, %v6037_v4 }
 0x548   :  { %v6041_v40 = vpop.f32.mrf.mxu0  ;;  %v6274_v19 = vpop.f32.mrf.mxu1  ;;  %6524 = vmatmul.mubr.bf16.gmra.mxu0 %v18674_v31  ;;  %6717 = vmatmul.mubr.bf16.gmra.mxu1 %v18675_v52 }
 0x549   :  { %18673 = vst [vmem:[#allocation235_spill] sm:$0xff] %v16020_v43  ;;  %v16025_v34 = vadd.f32 %v6271_v9, %v18676_v36  ;;  %v6275_v3 = vadd.f32 %v6274_v19, %v6041_v40  ;;  %6531 = vmatprep.mubr.bf16.mxu0 %v18678_v22  ;;  %6724 = vmatprep.mubr.bf16.mxu1 %v18679_v6  ;;  %v18682_v43 = vld [vmem:[#allocation187_spill] sm:$0xff]  ;;  %v18684_v36 = vld [vmem:[#allocation188_spill] sm:$0xff] }
 0x54a   :  { %v6043_v62 = vpop.f32.mrf.mxu0  ;;  %v6276_v37 = vpop.f32.mrf.mxu1 }
 0x54b   :  { %18677 = vst [vmem:[#allocation236_spill] sm:$0xff] %v16025_v34  ;;  %v16030_v41 = vadd.f32 %v6275_v3, %v18680_v30  ;;  %v6277_v4 = vadd.f32 %v6276_v37, %v6043_v62  ;;  %v18686_v34 = vld [vmem:[#allocation67_spill] sm:$0xff]  ;;  %v18688_v3 = vld [vmem:[#allocation189_spill] sm:$0xff] }
 0x54c   :  { %v6045_v21 = vpop.f32.mrf.mxu0  ;;  %v6278_v60 = vpop.f32.mrf.mxu1 }
 0x54d   :  { %18681 = vst [vmem:[#allocation237_spill] sm:$0xff] %v16030_v41  ;;  %v16033_v31 = vadd.f32 %v6277_v4, %v18682_v43  ;;  %v6279_v52 = vadd.f32 %v6278_v60, %v6045_v21  ;;  %v18690_v43 = vld [vmem:[#allocation74_spill] sm:$0xff]  ;;  %v18691_v21 = vld [vmem:[#allocation43_spill] sm:$0xff] }
 0x54e   :  { %v6047_v33 = vpop.f32.mrf.mxu0  ;;  %v6280_v9 = vpop.f32.mrf.mxu1 }
 0x54f   :  { %18683 = vst [vmem:[#allocation238_spill] sm:$0xff] %v16033_v31  ;;  %v16036_v40 = vadd.f32 %v6279_v52, %v18684_v36  ;;  %v6281_v19 = vadd.f32 %v6280_v9, %v6047_v33  ;;  %v18693_v36 = vld [vmem:[#allocation44_spill] sm:$0xff] }
 0x550   :  { %v6051_v22 = vpop.f32.mrf.mxu0  ;;  %v6284_v6 = vpop.f32.mrf.mxu1  ;;  %6532 = vmatmul.mubr.bf16.gmra.mxu0 %v18686_v34  ;;  %6725 = vmatmul.mubr.bf16.gmra.mxu1 %v18687_v49  ;;  %v18698_v31 = vld [vmem:[#allocation72_spill] sm:$0xff] }
 0x551   :  { %18685 = vst [vmem:[#allocation239_spill] sm:$0xff] %v16036_v40  ;;  %v16041_v62 = vadd.f32 %v6281_v19, %v18688_v3  ;;  %v6285_v37 = vadd.f32 %v6284_v6, %v6051_v22  ;;  %6539 = vmatprep.mubr.bf16.mxu0 %v18562_v53  ;;  %6732 = vmatprep.mubr.bf16.mxu1 %v18690_v43  ;;  %v18695_v3 = vld [vmem:[#allocation190_spill] sm:$0xff] }
 0x552   :  { %v6053_v30 = vpop.f32.mrf.mxu0  ;;  %v6286_v4 = vpop.f32.mrf.mxu1 }
 0x553   :  { %18689 = vst [vmem:[#allocation76_spill] sm:$0xff] %v16041_v62  ;;  %v16046_v60 = vadd.f32 %v6285_v37, %v18691_v21  ;;  %v6287_v33 = vadd.f32 %v6286_v4, %v6053_v30  ;;  %v18697_v62 = vld [vmem:[#allocation71_spill] sm:$0xff]  ;;  %v18699_v37 = vld [vmem:[#allocation49_spill] sm:$0xff] }
 0x554   :  { %v6055_v52 = vpop.f32.mrf.mxu0  ;;  %v6288_v9 = vpop.f32.mrf.mxu1 }
 0x555   :  { %18692 = vst [vmem:[#allocation97_spill] sm:$0xff] %v16046_v60  ;;  %v16049_v34 = vadd.f32 %v6287_v33, %v18693_v36  ;;  %v6289_v49 = vadd.f32 %v6288_v9, %v6055_v52  ;;  %v18701_v52 = vld [vmem:[#allocation50_spill] sm:$0xff] }
 0x556   :  { %v6057_v40 = vpop.f32.mrf.mxu0  ;;  %v6290_v19 = vpop.f32.mrf.mxu1 }
 0x557   :  { %18694 = vst [vmem:[#allocation81_spill] sm:$0xff] %v16049_v34  ;;  %v16052_v22 = vadd.f32 %v6289_v49, %v18695_v3  ;;  %v6291_v53 = vadd.f32 %v6290_v19, %v6057_v40  ;;  %v18703_v19 = vld [vmem:[#allocation191_spill] sm:$0xff]  ;;  %v18802_v34 = vld [vmem:[#allocation112_spill] sm:$0xff] }
 0x558   :  { %v6061_v6 = vpop.f32.mrf.mxu0  ;;  %v6294_v43 = vpop.f32.mrf.mxu1  ;;  %6540 = vmatmul.mubr.bf16.gmra.mxu0 %v18697_v62  ;;  %6733 = vmatmul.mubr.bf16.gmra.mxu1 %v18698_v31 }
 0x559   :  { %18696 = vst [vmem:[#allocation95_spill] sm:$0xff] %v16052_v22  ;;  %v16057_v30 = vadd.f32 %v6291_v53, %v18699_v37  ;;  %v6295_v4 = vadd.f32 %v6294_v43, %v6061_v6  ;;  %6547 = vmatprep.mubr.bf16.mxu0 %v18570_v59  ;;  %6740 = vmatprep.mubr.bf16.mxu1 %v18571_v28  ;;  %v18705_v37 = vld [vmem:[#allocation192_spill] sm:$0xff]  ;;  %v18801_v22 = vld [vmem:[#allocation111_spill] sm:$0xff] }
 0x55a   :  { %v6063_v21 = vpop.f32.mrf.mxu0  ;;  %v6296_v33 = vpop.f32.mrf.mxu1 }
 0x55b   :  { %18700 = vst [vmem:[#allocation96_spill] sm:$0xff] %v16057_v30  ;;  %v16062_v9 = vadd.f32 %v6295_v4, %v18701_v52  ;;  %v6297_v40 = vadd.f32 %v6296_v33, %v6063_v21  ;;  %v18707_v4 = vld [vmem:[#allocation193_spill] sm:$0xff]  ;;  %v18709_v52 = vld [vmem:[#allocation82_spill] sm:$0xff] }
 0x55c   :  { %v6065_v36 = vpop.f32.mrf.mxu0  ;;  %v6298_v49 = vpop.f32.mrf.mxu1 }
 0x55d   :  { %18702 = vst [vmem:[#allocation240_spill] sm:$0xff] %v16062_v9  ;;  %v16065_v62 = vadd.f32 %v6297_v40, %v18703_v19  ;;  %v6299_v31 = vadd.f32 %v6298_v49, %v6065_v36  ;;  %v18710_v49 = vld [vmem:[#allocation47_spill] sm:$0xff] }
 0x55e   :  { %v6067_v3 = vpop.f32.mrf.mxu0  ;;  %v6300_v53 = vpop.f32.mrf.mxu1 }
 0x55f   :  { %18704 = vst [vmem:[#allocation241_spill] sm:$0xff] %v16065_v62  ;;  %v16068_v6 = vadd.f32 %v6299_v31, %v18705_v37  ;;  %v6301_v59 = vadd.f32 %v6300_v53, %v6067_v3  ;;  %v18712_v37 = vld [vmem:[#allocation48_spill] sm:$0xff] }
 0x560   :  { %v6071_v43 = vpop.f32.mrf.mxu0  ;;  %v6304_v28 = vpop.f32.mrf.mxu1  ;;  %6548 = vmatmul.mubr.bf16.gmra.mxu0 %v18465_v48  ;;  %6741 = vmatmul.mubr.bf16.gmra.mxu1 %v18309_v57  ;;  %v18717_v62 = vld [vmem:[#allocation80_spill] sm:$0xff] }
 0x561   :  { %18706 = vst [vmem:[#allocation242_spill] sm:$0xff] %v16068_v6  ;;  %v16073_v21 = vadd.f32 %v6301_v59, %v18707_v4  ;;  %v6305_v33 = vadd.f32 %v6304_v28, %v6071_v43  ;;  %6555 = vmatprep.mubr.bf16.mxu0 %v18311_v8  ;;  %6748 = vmatprep.mubr.bf16.mxu1 %v18709_v52  ;;  %v18714_v4 = vld [vmem:[#allocation194_spill] sm:$0xff] }
 0x562   :  { %v6073_v40 = vpop.f32.mrf.mxu0  ;;  %v6306_v36 = vpop.f32.mrf.mxu1 }
 0x563   :  { %18708 = vst [vmem:[#allocation243_spill] sm:$0xff] %v16073_v21  ;;  %v16078_v19 = vadd.f32 %v6305_v33, %v18710_v49  ;;  %v6307_v31 = vadd.f32 %v6306_v36, %v6073_v40  ;;  %v18716_v21 = vld [vmem:[#allocation79_spill] sm:$0xff]  ;;  %v18718_v33 = vld [vmem:[#allocation53_spill] sm:$0xff] }
 0x564   :  { %v6075_v3 = vpop.f32.mrf.mxu0  ;;  %v6308_v53 = vpop.f32.mrf.mxu1  ;;  %v18720_v49 = vld [vmem:[#allocation85_spill] sm:$0xff] }
 0x565   :  { %18711 = vst [vmem:[#allocation244_spill] sm:$0xff] %v16078_v19  ;;  %v16081_v48 = vadd.f32 %v6307_v31, %v18712_v37  ;;  %v6309_v57 = vadd.f32 %v6308_v53, %v6075_v3  ;;  %v18721_v31 = vld [vmem:[#allocation86_spill] sm:$0xff]  ;;  %v18729_v19 = vld [vmem:[#allocation84_spill] sm:$0xff] }
 0x566   :  { %v6077_v6 = vpop.f32.mrf.mxu0  ;;  %v6310_v59 = vpop.f32.mrf.mxu1  ;;  %v18722_v37 = vld [vmem:[#allocation54_spill] sm:$0xff] }
 0x567   :  { %18713 = vst [vmem:[#allocation245_spill] sm:$0xff] %v16081_v48  ;;  %v16084_v43 = vadd.f32 %v6309_v57, %v18714_v4  ;;  %v6311_v8 = vadd.f32 %v6310_v59, %v6077_v6 }
 0x568   :  { %v6081_v28 = vpop.f32.mrf.mxu0  ;;  %v6314_v52 = vpop.f32.mrf.mxu1  ;;  %6556 = vmatmul.mubr.bf16.gmra.mxu0 %v18716_v21  ;;  %6749 = vmatmul.mubr.bf16.gmra.mxu1 %v18717_v62 }
 0x569   :  { %18715 = vst [vmem:[#allocation246_spill] sm:$0xff] %v16084_v43  ;;  %v16089_v40 = vadd.f32 %v6311_v8, %v18718_v33  ;;  %v6315_v36 = vadd.f32 %v6314_v52, %v6081_v28  ;;  %6563 = vmatprep.mubr.bf16.mxu0 %v18720_v49  ;;  %6756 = vmatprep.mubr.bf16.mxu1 %v18721_v31  ;;  %v18724_v43 = vld [vmem:[#allocation195_spill] sm:$0xff]  ;;  %v18726_v33 = vld [vmem:[#allocation196_spill] sm:$0xff] }
 0x56a   :  { %v6083_v3 = vpop.f32.mrf.mxu0  ;;  %v6316_v53 = vpop.f32.mrf.mxu1 }
 0x56b   :  { %18719 = vst [vmem:[#allocation247_spill] sm:$0xff] %v16089_v40  ;;  %v16094_v57 = vadd.f32 %v6315_v36, %v18722_v37  ;;  %v6317_v6 = vadd.f32 %v6316_v53, %v6083_v3  ;;  %v18728_v40 = vld [vmem:[#allocation83_spill] sm:$0xff]  ;;  %v18730_v36 = vld [vmem:[#allocation197_spill] sm:$0xff] }
 0x56c   :  { %v6085_v59 = vpop.f32.mrf.mxu0  ;;  %v6318_v4 = vpop.f32.mrf.mxu1  ;;  %v18732_v37 = vld [vmem:[#allocation89_spill] sm:$0xff] }
 0x56d   :  { %18723 = vst [vmem:[#allocation248_spill] sm:$0xff] %v16094_v57  ;;  %v16097_v21 = vadd.f32 %v6317_v6, %v18724_v43  ;;  %v6319_v62 = vadd.f32 %v6318_v4, %v6085_v59  ;;  %v18733_v43 = vld [vmem:[#allocation90_spill] sm:$0xff]  ;;  %v18734_v4 = vld [vmem:[#allocation51_spill] sm:$0xff]  ;;  %v18741_v57 = vld [vmem:[#allocation88_spill] sm:$0xff] }
 0x56e   :  { %v6087_v48 = vpop.f32.mrf.mxu0  ;;  %v6320_v8 = vpop.f32.mrf.mxu1 }
 0x56f   :  { %18725 = vst [vmem:[#allocation249_spill] sm:$0xff] %v16097_v21  ;;  %v16100_v28 = vadd.f32 %v6319_v62, %v18726_v33  ;;  %v6321_v52 = vadd.f32 %v6320_v8, %v6087_v48 }
 0x570   :  { %v6091_v49 = vpop.f32.mrf.mxu0  ;;  %v6324_v31 = vpop.f32.mrf.mxu1  ;;  %6564 = vmatmul.mubr.bf16.gmra.mxu0 %v18728_v40  ;;  %6757 = vmatmul.mubr.bf16.gmra.mxu1 %v18729_v19 }
 0x571   :  { %18727 = vst [vmem:[#allocation250_spill] sm:$0xff] %v16100_v28  ;;  %v16105_v3 = vadd.f32 %v6321_v52, %v18730_v36  ;;  %v6325_v53 = vadd.f32 %v6324_v31, %v6091_v49  ;;  %6571 = vmatprep.mubr.bf16.mxu0 %v18732_v37  ;;  %6764 = vmatprep.mubr.bf16.mxu1 %v18733_v43  ;;  %v18736_v28 = vld [vmem:[#allocation52_spill] sm:$0xff]  ;;  %v18738_v36 = vld [vmem:[#allocation198_spill] sm:$0xff] }
 0x572   :  { %v6093_v6 = vpop.f32.mrf.mxu0  ;;  %v6326_v59 = vpop.f32.mrf.mxu1 }
 0x573   :  { %18731 = vst [vmem:[#allocation251_spill] sm:$0xff] %v16105_v3  ;;  %v16110_v62 = vadd.f32 %v6325_v53, %v18734_v4  ;;  %v6327_v48 = vadd.f32 %v6326_v59, %v6093_v6  ;;  %v18740_v3 = vld [vmem:[#allocation87_spill] sm:$0xff]  ;;  %v18742_v53 = vld [vmem:[#allocation57_spill] sm:$0xff] }
 0x574   :  { %v6095_v8 = vpop.f32.mrf.mxu0  ;;  %v6328_v33 = vpop.f32.mrf.mxu1  ;;  %v18744_v4 = vld [vmem:[#allocation93_spill] sm:$0xff] }
 0x575   :  { %18735 = vst [vmem:[#allocation252_spill] sm:$0xff] %v16110_v62  ;;  %v16113_v40 = vadd.f32 %v6327_v48, %v18736_v28  ;;  %v6329_v19 = vadd.f32 %v6328_v33, %v6095_v8  ;;  %v18745_v28 = vld [vmem:[#allocation94_spill] sm:$0xff]  ;;  %v18753_v62 = vld [vmem:[#allocation92_spill] sm:$0xff] }
 0x576   :  { %v6097_v21 = vpop.f32.mrf.mxu0  ;;  %v6330_v52 = vpop.f32.mrf.mxu1  ;;  %v18746_v33 = vld [vmem:[#allocation58_spill] sm:$0xff] }
 0x577   :  { %18737 = vst [vmem:[#allocation253_spill] sm:$0xff] %v16113_v40  ;;  %v16116_v49 = vadd.f32 %v6329_v19, %v18738_v36  ;;  %v6331_v31 = vadd.f32 %v6330_v52, %v6097_v21 }
 0x578   :  { %v6101_v37 = vpop.f32.mrf.mxu0  ;;  %v6334_v43 = vpop.f32.mrf.mxu1  ;;  %6572 = vmatmul.mubr.bf16.gmra.mxu0 %v18740_v3  ;;  %6765 = vmatmul.mubr.bf16.gmra.mxu1 %v18741_v57 }
 0x579   :  { %18739 = vst [vmem:[#allocation254_spill] sm:$0xff] %v16116_v49  ;;  %v16121_v6 = vadd.f32 %v6331_v31, %v18742_v53  ;;  %v6335_v59 = vadd.f32 %v6334_v43, %v6101_v37  ;;  %6579 = vmatprep.mubr.bf16.mxu0 %v18744_v4  ;;  %6772 = vmatprep.mubr.bf16.mxu1 %v18745_v28  ;;  %v18748_v49 = vld [vmem:[#allocation199_spill] sm:$0xff]  ;;  %v18750_v53 = vld [vmem:[#allocation200_spill] sm:$0xff] }
 0x57a   :  { %v6103_v48 = vpop.f32.mrf.mxu0  ;;  %v6336_v8 = vpop.f32.mrf.mxu1 }
 0x57b   :  { %18743 = vst [vmem:[#allocation255_spill] sm:$0xff] %v16121_v6  ;;  %v16126_v19 = vadd.f32 %v6335_v59, %v18746_v33  ;;  %v6337_v21 = vadd.f32 %v6336_v8, %v6103_v48  ;;  %v18752_v6 = vld [vmem:[#allocation91_spill] sm:$0xff]  ;;  %v18754_v59 = vld [vmem:[#allocation201_spill] sm:$0xff] }
 0x57c   :  { %v6105_v52 = vpop.f32.mrf.mxu0  ;;  %v6338_v36 = vpop.f32.mrf.mxu1 }
 0x57d   :  { %18747 = vst [vmem:[#allocation256_spill] sm:$0xff] %v16126_v19  ;;  %v16129_v3 = vadd.f32 %v6337_v21, %v18748_v49  ;;  %v6339_v57 = vadd.f32 %v6338_v36, %v6105_v52  ;;  %v18756_v49 = vld [vmem:[#allocation98_spill] sm:$0xff]  ;;  %v18790_v19 = vld [vmem:[#allocation108_spill] sm:$0xff] }
 0x57e   :  { %v6107_v40 = vpop.f32.mrf.mxu0  ;;  %v6340_v31 = vpop.f32.mrf.mxu1  ;;  %v18757_v52 = vld [vmem:[#allocation202_spill] sm:$0xff] }
 0x57f   :  { %18749 = vst [vmem:[#allocation257_spill] sm:$0xff] %v16129_v3  ;;  %v16132_v37 = vadd.f32 %v6339_v57, %v18750_v53  ;;  %v6341_v43 = vadd.f32 %v6340_v31, %v6107_v40  ;;  %v18759_v53 = vld [vmem:[#allocation203_spill] sm:$0xff] }
 0x580   :  { %v6111_v4 = vpop.f32.mrf.mxu0  ;;  %v6344_v28 = vpop.f32.mrf.mxu1  ;;  %6580 = vmatmul.mubr.bf16.gmra.mxu0 %v18752_v6  ;;  %6773 = vmatmul.mubr.bf16.gmra.mxu1 %v18753_v62  ;;  %v18789_v3 = vld [vmem:[#allocation107_spill] sm:$0xff] }
 0x581   :  { %18751 = vst [vmem:[#allocation258_spill] sm:$0xff] %v16132_v37  ;;  %v16137_v48 = vadd.f32 %v6341_v43, %v18754_v59  ;;  %v6345_v8 = vadd.f32 %v6344_v28, %v6111_v4  ;;  %6587 = vmatprep.mubr.bf16.mxu0 %v18604_v12  ;;  %6780 = vmatprep.mubr.bf16.mxu1 %v18756_v49  ;;  %v18761_v59 = vld [vmem:[#allocation204_spill] sm:$0xff] }
 0x582   :  { %v6113_v33 = vpop.f32.mrf.mxu0  ;;  %v6346_v21 = vpop.f32.mrf.mxu1 }
 0x583   :  { %18755 = vst [vmem:[#allocation259_spill] sm:$0xff] %v16137_v48  ;;  %v16142_v36 = vadd.f32 %v6345_v8, %v18757_v52  ;;  %v6347_v40 = vadd.f32 %v6346_v21, %v6113_v33  ;;  %v18763_v8 = vld [vmem:[#allocation205_spill] sm:$0xff]  ;;  %v18765_v52 = vld [vmem:[#allocation99_spill] sm:$0xff] }
 0x584   :  { %v6115_v57 = vpop.f32.mrf.mxu0  ;;  %v6348_v31 = vpop.f32.mrf.mxu1 }
 0x585   :  { %18758 = vst [vmem:[#allocation260_spill] sm:$0xff] %v16142_v36  ;;  %v16145_v6 = vadd.f32 %v6347_v40, %v18759_v53  ;;  %v6349_v62 = vadd.f32 %v6348_v31, %v6115_v57  ;;  %v18766_v40 = vld [vmem:[#allocation100_spill] sm:$0xff]  ;;  %v18767_v53 = vld [vmem:[#allocation206_spill] sm:$0xff] }
 0x586   :  { %v6117_v37 = vpop.f32.mrf.mxu0  ;;  %v6350_v43 = vpop.f32.mrf.mxu1 }
 0x587   :  { %18760 = vst [vmem:[#allocation261_spill] sm:$0xff] %v16145_v6  ;;  %v16148_v4 = vadd.f32 %v6349_v62, %v18761_v59  ;;  %v6351_v12 = vadd.f32 %v6350_v43, %v6117_v37  ;;  %v18779_v6 = vld [vmem:[#allocation210_spill] sm:$0xff] }
 0x588   :  { %v6121_v28 = vpop.f32.mrf.mxu0  ;;  %v6354_v49 = vpop.f32.mrf.mxu1  ;;  %6588 = vmatmul.mubr.bf16.gmra.mxu0 %v18607_v32  ;;  %6781 = vmatmul.mubr.bf16.gmra.mxu1 %v18608_v18 }
 0x589   :  { %18762 = vst [vmem:[#allocation262_spill] sm:$0xff] %v16148_v4  ;;  %v16153_v33 = vadd.f32 %v6351_v12, %v18763_v8  ;;  %v6355_v21 = vadd.f32 %v6354_v49, %v6121_v28  ;;  %7581 = vmatprep.mubr.bf16.mxu0 %v18765_v52  ;;  %7814 = vmatprep.mubr.bf16.mxu1 %v18766_v40  ;;  %v18769_v4 = vld [vmem:[#allocation207_spill] sm:$0xff]  ;;  %v12358_v12 = vld [vmem:[%s17660_s3 + $0x9b0] ss:$12 sps:$4 sm:$0xff]  }
 0x58a   :  { %v6123_v57 = vpop.f32.mrf.mxu0  ;;  %v6356_v31 = vpop.f32.mrf.mxu1  ;;  %v12359_v28 = vld [vmem:[%s17660_s3 + $0xb30] ss:$12 sps:$4 sm:$0xff]  }
 0x58b   :  { %18764 = vst [vmem:[#allocation179_spill] sm:$0xff] %v16153_v33  ;;  %v16158_v62 = vadd.f32 %v6355_v21, %v18767_v53  ;;  %v6357_v37 = vadd.f32 %v6356_v31, %v6123_v57  ;;  %v18771_v33 = vld [vmem:[#allocation208_spill] sm:$0xff] }
 0x58c   :  { %v6125_v43 = vpop.f32.mrf.mxu0  ;;  %v6358_v59 = vpop.f32.mrf.mxu1 }
 0x58d   :  { %18768 = vst [vmem:[#allocation180_spill] sm:$0xff] %v16158_v62  ;;  %v16161_v32 = vadd.f32 %v6357_v37, %v18769_v4  ;;  %v6359_v18 = vadd.f32 %v6358_v59, %v6125_v43  ;;  %v18773_v62 = vld [vmem:[#allocation101_spill] sm:$0xff]  ;;  %v18774_v4 = vld [vmem:[#allocation102_spill] sm:$0xff] }
 0x58e   :  { %v6127_v49 = vpop.f32.mrf.mxu0  ;;  %v6360_v8 = vpop.f32.mrf.mxu1  ;;  %v18775_v37 = vld [vmem:[#allocation209_spill] sm:$0xff] }
 0x58f   :  { %18770 = vst [vmem:[#allocation181_spill] sm:$0xff] %v16161_v32  ;;  %v16170_v21 = vadd.f32 %v6359_v18, %v18771_v33  ;;  %v6361_v57 = vadd.f32 %v6360_v8, %v6127_v49  ;;  %v12360_v32 = vld [vmem:[%s17660_s3 + $0x998] ss:$12 sps:$4 sm:$0xff]   ;;  %v18777_v18 = vld [vmem:[#allocation103_spill] sm:$0xff]  ;;  %v18778_v49 = vld [vmem:[#allocation104_spill] sm:$0xff] }
 0x590   :  { %v6131_v31 = vpop.f32.mrf.mxu0  ;;  %v6364_v53 = vpop.f32.mrf.mxu1  ;;  %7582 = vmatmul.mubr.bf16.vlgmr.msra.gmra.mxu0 %v18773_v62  ;;  %7815 = vmatmul.mubr.bf16.vlgmr.msra.gmra.mxu1 %v18774_v4  ;;  %v12361_v33 = vld [vmem:[%s17660_s3 + $0xb18] ss:$12 sps:$4 sm:$0xff]  }
 0x591   :  { %18772 = vst [vmem:[#allocation35_spill] sm:$0xff] %v16170_v21  ;;  %v16175_v43 = vadd.f32 %v6361_v57, %v18775_v37  ;;  %v6365_v59 = vadd.f32 %v6364_v53, %v6131_v31  ;;  %8016 = vmatpush1.bf16.msra.mxu0 %v12358_v12  ;;  %8209 = vmatpush1.bf16.msra.mxu1 %v12359_v28  ;;  %v18781_v53 = vld [vmem:[#allocation211_spill] sm:$0xff] }
 0x592   :  { %7591 = vmatprep.mubr.bf16.mxu0 %v18777_v18  ;;  %7824 = vmatprep.mubr.bf16.mxu1 %v18778_v49  ;;  %v6133_v8 = vpop.f32.mrf.mxu0  ;;  %v6366_v21 = vpop.f32.mrf.mxu1 }
 0x593   :  { %18776 = vst [vmem:[#allocation36_spill] sm:$0xff] %v16175_v43  ;;  %v16186_v57 = vadd.f32 %v6365_v59, %v18779_v6  ;;  %v6367_v31 = vadd.f32 %v6366_v21, %v6133_v8  ;;  %8017 = vmatprep.subr.bf16.mxu0 %v18344_v35  ;;  %8210 = vmatprep.subr.bf16.mxu1 %v18344_v35  ;;  %v12362_v6 = vld [vmem:[%s17660_s3 + $0x980] ss:$12 sps:$4 sm:$0xff]   ;;  %v18783_v59 = vld [vmem:[#allocation212_spill] sm:$0xff] }
 0x594   :  { %v6135_v12 = vpop.f32.mrf.mxu0  ;;  %v6368_v28 = vpop.f32.mrf.mxu1  ;;  %v12363_v21 = vld [vmem:[%s17660_s3 + $0xb00] ss:$12 sps:$4 sm:$0xff]  }
 0x595   :  { %18780 = vst [vmem:[#allocation182_spill] sm:$0xff] %v16186_v57  ;;  %v16191_v37 = vadd.f32 %v6367_v31, %v18781_v53  ;;  %v6369_v43 = vadd.f32 %v6368_v28, %v6135_v12  ;;  %8018 = vmatpush1.bf16.msra.mxu0 %v12360_v32  ;;  %8211 = vmatpush1.bf16.msra.mxu1 %v12361_v33  ;;  %v18785_v12 = vld [vmem:[#allocation105_spill] sm:$0xff]  ;;  %v18786_v28 = vld [vmem:[#allocation106_spill] sm:$0xff] }
 0x596   :  { %v6137_v36 = vpop.f32.mrf.mxu0  ;;  %v6370_v48 = vpop.f32.mrf.mxu1  ;;  %8019 = vmatprep.subr.bf16.mxu0 %v18344_v35  ;;  %8212 = vmatprep.subr.bf16.mxu1 %v18344_v35  ;;  %v18787_v53 = vld [vmem:[#allocation213_spill] sm:$0xff] }
 0x597   :  { %18782 = vst [vmem:[#allocation55_spill] sm:$0xff] %v16191_v37  ;;  %v16202_v8 = vadd.f32 %v6369_v43, %v18783_v59  ;;  %v6371_v31 = vadd.f32 %v6370_v48, %v6137_v36  ;;  %v12364_v48 = vld [vmem:[%s17660_s3 + $0x968] ss:$12 sps:$4 sm:$0xff]   ;;  %v18791_v43 = vld [vmem:[#allocation214_spill] sm:$0xff] }
 0x598   :  { %v6141_v32 = vpop.f32.mrf.mxu0  ;;  %v6374_v33 = vpop.f32.mrf.mxu1  ;;  %7592 = vmatmul.mubr.bf16.gmra.mxu0 %v18785_v12  ;;  %7825 = vmatmul.mubr.bf16.gmra.mxu1 %v18786_v28  ;;  %v12365_v36 = vld [vmem:[%s17660_s3 + $0xae8] ss:$12 sps:$4 sm:$0xff]  }
 0x599   :  { %18784 = vst [vmem:[#allocation56_spill] sm:$0xff] %v16202_v8  ;;  %v16207_v37 = vadd.f32 %v6371_v31, %v18787_v53  ;;  %v6375_v57 = vadd.f32 %v6374_v33, %v6141_v32  ;;  %7601 = vmatprep.mubr.bf16.mxu0 %v18789_v3  ;;  %7834 = vmatprep.mubr.bf16.mxu1 %v18790_v19 }
 0x59a   :  { %v6143_v9 = vpop.f32.mrf.mxu0  ;;  %v6376_v30 = vpop.f32.mrf.mxu1  ;;  %8020 = vmatpush1.bf16.msra.mxu0 %v12362_v6  ;;  %8213 = vmatpush1.bf16.msra.mxu1 %v12363_v21  ;;  %v18793_v6 = vld [vmem:[#allocation215_spill] sm:$0xff] }
 0x59b   :  { %18788 = vst [vmem:[#allocation41_spill] sm:$0xff] %v16207_v37  ;;  %v16218_v59 = vadd.f32 %v6375_v57, %v18791_v43  ;;  %v6377_v31 = vadd.f32 %v6376_v30, %v6143_v9  ;;  %8021 = vmatprep.subr.bf16.mxu0 %v18344_v35  ;;  %8214 = vmatprep.subr.bf16.mxu1 %v18344_v35  ;;  %v12366_v57 = vld [vmem:[%s17660_s3 + $0x950] ss:$12 sps:$4 sm:$0xff]  }
 0x59c   :  { %v6145_v32 = vpop.f32.mrf.mxu0  ;;  %v6378_v33 = vpop.f32.mrf.mxu1  ;;  %v12367_v30 = vld [vmem:[%s17660_s3 + $0xad0] ss:$12 sps:$4 sm:$0xff]  }
 0x59d   :  { %18792 = vst [vmem:[#allocation61_spill] sm:$0xff] %v16218_v59  ;;  %v16223_v21 = vadd.f32 %v6377_v31, %v18793_v6  ;;  %v6379_v53 = vadd.f32 %v6378_v33, %v6145_v32  ;;  %v18795_v9 = vld [vmem:[#allocation216_spill] sm:$0xff]  ;;  %v18799_v33 = vld [vmem:[#allocation217_spill] sm:$0xff] }
 0x59e   :  { %v6147_v37 = vpop.f32.mrf.mxu0  ;;  %v6380_v8 = vpop.f32.mrf.mxu1  ;;  %8022 = vmatpush1.bf16.msra.mxu0 %v12364_v48  ;;  %8215 = vmatpush1.bf16.msra.mxu1 %v12365_v36  ;;  %v18797_v48 = vld [vmem:[#allocation109_spill] sm:$0xff]  ;;  %v18798_v36 = vld [vmem:[#allocation110_spill] sm:$0xff] }
 0x59f   :  { %18794 = vst [vmem:[#allocation62_spill] sm:$0xff] %v16223_v21  ;;  %v16232_v43 = vadd.f32 %v6379_v53, %v18795_v9  ;;  %v6381_v59 = vadd.f32 %v6380_v8, %v6147_v37  ;;  %8023 = vmatprep.subr.bf16.mxu0 %v18344_v35  ;;  %8216 = vmatprep.subr.bf16.mxu1 %v18344_v35  ;;  %v12368_v8 = vld [vmem:[%s17660_s3 + $0x938] ss:$12 sps:$4 sm:$0xff]  }
 0x5a0   :  { %v6151_v31 = vpop.f32.mrf.mxu0  ;;  %v6384_v32 = vpop.f32.mrf.mxu1  ;;  %7602 = vmatmul.mubr.bf16.gmra.mxu0 %v18797_v48  ;;  %7835 = vmatmul.mubr.bf16.gmra.mxu1 %v18798_v36  ;;  %v12369_v9 = vld [vmem:[%s17660_s3 + $0xab8] ss:$12 sps:$4 sm:$0xff]  }
 0x5a1   :  { %18796 = vst [vmem:[#allocation42_spill] sm:$0xff] %v16232_v43  ;;  %v16239_v6 = vadd.f32 %v6381_v59, %v18799_v33  ;;  %v6385_v21 = vadd.f32 %v6384_v32, %v6151_v31  ;;  %7611 = vmatprep.mubr.bf16.mxu0 %v18801_v22  ;;  %7844 = vmatprep.mubr.bf16.mxu1 %v18802_v34  ;;  %v18803_v43 = vld [vmem:[#allocation218_spill] sm:$0xff] }
 0x5a2   :  { %v6153_v53 = vpop.f32.mrf.mxu0  ;;  %v6386_v37 = vpop.f32.mrf.mxu1  ;;  %8024 = vmatpush1.bf16.msra.mxu0 %v12366_v57  ;;  %8217 = vmatpush1.bf16.msra.mxu1 %v12367_v30  ;;  %v18805_v57 = vld [vmem:[#allocation219_spill] sm:$0xff] }
 0x5a3   :  { %18800 = vst [vmem:[#allocation183_spill] sm:$0xff] %v16239_v6  ;;  %v16250_v59 = vadd.f32 %v6385_v21, %v18803_v43  ;;  %v6387_v31 = vadd.f32 %v6386_v37, %v6153_v53  ;;  %8025 = vmatprep.subr.bf16.mxu0 %v18344_v35  ;;  %8218 = vmatprep.subr.bf16.mxu1 %v18344_v35  ;;  %v12370_v21 = vld [vmem:[%s17660_s3 + $0x920] ss:$12 sps:$4 sm:$0xff]   ;;  %v18807_v53 = vld [vmem:[#allocation220_spill] sm:$0xff] }
 0x5a4   :  { %v6155_v32 = vpop.f32.mrf.mxu0  ;;  %v6388_v33 = vpop.f32.mrf.mxu1  ;;  %v12371_v43 = vld [vmem:[%s17660_s3 + $0xaa0] ss:$12 sps:$4 sm:$0xff]  }
 0x5a5   :  { %18804 = vst [vmem:[#allocation184_spill] sm:$0xff] %v16250_v59  ;;  %v16255_v30 = vadd.f32 %v6387_v31, %v18805_v57  ;;  %v6389_v6 = vadd.f32 %v6388_v33, %v6155_v32  ;;  %v18811_v33 = vld [vmem:[#allocation221_spill] sm:$0xff] }
 0x5a6   :  { %v6157_v60 = vpop.f32.mrf.mxu0  ;;  %v6390_v41 = vpop.f32.mrf.mxu1  ;;  %8026 = vmatpush1.bf16.msra.mxu0 %v12368_v8  ;;  %8219 = vmatpush1.bf16.msra.mxu1 %v12369_v9  ;;  %v18809_v8 = vld [vmem:[#allocation113_spill] sm:$0xff]  ;;  %v18810_v9 = vld [vmem:[#allocation114_spill] sm:$0xff] }
 0x5a7   :  { %18806 = vst [vmem:[#allocation59_spill] sm:$0xff] %v16255_v30  ;;  %v16264_v37 = vadd.f32 %v6389_v6, %v18807_v53  ;;  %v6391_v59 = vadd.f32 %v6390_v41, %v6157_v60  ;;  %8027 = vmatprep.subr.bf16.mxu0 %v18344_v35  ;;  %8220 = vmatprep.subr.bf16.mxu1 %v18344_v35  ;;  %v12372_v60 = vld [vmem:[%s17660_s3 + $0x908] ss:$12 sps:$4 sm:$0xff]  }
 0x5a8   :  { %v6161_v31 = vpop.f32.mrf.mxu0  ;;  %v6394_v32 = vpop.f32.mrf.mxu1  ;;  %7612 = vmatmul.mubr.bf16.gmra.mxu0 %v18809_v8  ;;  %7845 = vmatmul.mubr.bf16.gmra.mxu1 %v18810_v9  ;;  %v12373_v53 = vld [vmem:[%s17660_s3 + $0xa88] ss:$12 sps:$4 sm:$0xff]  }
 0x5a9   :  { %18808 = vst [vmem:[#allocation60_spill] sm:$0xff] %v16264_v37  ;;  %v16271_v57 = vadd.f32 %v6391_v59, %v18811_v33  ;;  %v6395_v30 = vadd.f32 %v6394_v32, %v6161_v31  ;;  %7621 = vmatprep.mubr.bf16.mxu0 %v18813_v26  ;;  %7854 = vmatprep.mubr.bf16.mxu1 %v18814_v45  ;;  %v18815_v37 = vld [vmem:[#allocation75_spill] sm:$0xff] }
 0x5aa   :  { %v6163_v6 = vpop.f32.mrf.mxu0  ;;  %v6396_v41 = vpop.f32.mrf.mxu1  ;;  %8028 = vmatpush1.bf16.msra.mxu0 %v12370_v21  ;;  %8221 = vmatpush1.bf16.msra.mxu1 %v12371_v43  ;;  %v18817_v21 = vld [vmem:[#allocation222_spill] sm:$0xff] }
 0x5ab   :  { %18812 = vst [vmem:[#allocation185_spill] sm:$0xff] %v16271_v57  ;;  %v16282_v59 = vadd.f32 %v6395_v30, %v18815_v37  ;;  %v6397_v31 = vadd.f32 %v6396_v41, %v6163_v6  ;;  %8029 = vmatprep.subr.bf16.mxu0 %v18344_v35  ;;  %8222 = vmatprep.subr.bf16.mxu1 %v18344_v35  ;;  %v12374_v30 = vld [vmem:[%s17660_s3 + $0xa70] ss:$12 sps:$4 sm:$0xff]   ;;  %v18819_v6 = vld [vmem:[#allocation223_spill] sm:$0xff] }
 0x5ac   :  { %v6165_v32 = vpop.f32.mrf.mxu0  ;;  %v6398_v33 = vpop.f32.mrf.mxu1  ;;  %v12375_v37 = vld [vmem:[%s17660_s3 + $0xbf0] ss:$12 sps:$4 sm:$0xff]  }
 0x5ad   :  { %18816 = vst [vmem:[#allocation65_spill] sm:$0xff] %v16282_v59  ;;  %v16287_v43 = vadd.f32 %v6397_v31, %v18817_v21  ;;  %v6399_v57 = vadd.f32 %v6398_v33, %v6165_v32  ;;  %v18823_v33 = vld [vmem:[#allocation224_spill] sm:$0xff] }
 0x5ae   :  { %v6167_v15 = vpop.f32.mrf.mxu0  ;;  %v6400_v58 = vpop.f32.mrf.mxu1  ;;  %8030 = vmatpush1.bf16.msra.mxu0 %v12372_v60  ;;  %8223 = vmatpush1.bf16.msra.mxu1 %v12373_v53  ;;  %v18821_v60 = vld [vmem:[#allocation117_spill] sm:$0xff]  ;;  %v18822_v53 = vld [vmem:[#allocation118_spill] sm:$0xff] }
 0x5af   :  { %18818 = vst [vmem:[#allocation66_spill] sm:$0xff] %v16287_v43  ;;  %v16296_v41 = vadd.f32 %v6399_v57, %v18819_v6  ;;  %v6401_v59 = vadd.f32 %v6400_v58, %v6167_v15  ;;  %8031 = vmatprep.subr.bf16.mxu0 %v18344_v35  ;;  %8224 = vmatprep.subr.bf16.mxu1 %v18344_v35  ;;  %v12376_v15 = vld [vmem:[%s17660_s3 + $0xa58] ss:$12 sps:$4 sm:$0xff]  }
 0x5b0   :  { %v6437_v31 = vpop.f32.mrf.mxu0  ;;  %v6630_v32 = vpop.f32.mrf.mxu1  ;;  %7622 = vmatmul.mubr.bf16.gmra.mxu0 %v18821_v60  ;;  %7855 = vmatmul.mubr.bf16.gmra.mxu1 %v18822_v53  ;;  %v12377_v6 = vld [vmem:[%s17660_s3 + $0xbd8] ss:$12 sps:$4 sm:$0xff]  }
 0x5b1   :  { %18820 = vst [vmem:[#allocation39_spill] sm:$0xff] %v16296_v41  ;;  %v16303_v21 = vadd.f32 %v6401_v59, %v18823_v33  ;;  %v6631_v43 = vadd.f32 %v6630_v32, %v6437_v31  ;;  %7631 = vmatprep.mubr.bf16.mxu0 %v18825_v7  ;;  %7864 = vmatprep.mubr.bf16.mxu1 %v18826_v14  ;;  %v18827_v41 = vld [vmem:[#allocation225_spill] sm:$0xff] }
 0x5b2   :  { %v6439_v57 = vpop.f32.mrf.mxu0  ;;  %v6632_v58 = vpop.f32.mrf.mxu1  ;;  %8032 = vmatpush2.bf16.msra.mxu0 %v12374_v30  ;;  %8225 = vmatpush2.bf16.msra.mxu1 %v12375_v37 }
 0x5b3   :  { %18824 = vst [vmem:[#allocation40_spill] sm:$0xff] %v16303_v21  ;;  %v16314_v59 = vadd.f32 %v6631_v43, %v18827_v41  ;;  %8033 = vmatprep.subr.bf16.mxu0 %v18344_v35  ;;  %8226 = vmatprep.subr.bf16.mxu1 %v18344_v35  ;;  %v12378_v57 = vld [vmem:[%s17660_s3 + $0xa40] ss:$12 sps:$4 sm:$0xff]  }
 0x5b4   :  { %v6440_v31 = vpop.f32.mrf.mxu0  ;;  %v6633_v32 = vpop.f32.mrf.mxu1  ;;  %v12379_v43 = vld [vmem:[%s17660_s3 + $0xbc0] ss:$12 sps:$4 sm:$0xff]  }
 0x5b5   :  { %18828 = vst [vmem:[#allocation186_spill] sm:$0xff] %v16314_v59  ;;  %v6634_v33 = vadd.f32 %v6633_v32, %v6440_v31  ;;  %v18829_v41 = vld [vmem:[#allocation226_spill] sm:$0xff]  ;;  %v18834_v59 = vld [vmem:[#allocation124_spill] sm:$0xff] }
 0x5b6   :  { %v6442_v30 = vpop.f32.mrf.mxu0  ;;  %v6635_v37 = vpop.f32.mrf.mxu1  ;;  %8034 = vmatpush2.bf16.msra.mxu0 %v12376_v15  ;;  %8227 = vmatpush2.bf16.msra.mxu1 %v12377_v6  ;;  %v18832_v15 = vld [vmem:[#allocation122_spill] sm:$0xff] }
 0x5b7   :  { %v16325_v58 = vadd.f32 %v6634_v33, %v18829_v41  ;;  %8035 = vmatprep.subr.bf16.mxu0 %v18344_v35  ;;  %8228 = vmatprep.subr.bf16.mxu1 %v18344_v35  ;;  %v18831_v30 = vld [vmem:[#allocation121_spill] sm:$0xff]  ;;  %v18833_v37 = vld [vmem:[#allocation123_spill] sm:$0xff] }
 0x5b8   :  { %v6445_v31 = vpop.f32.mrf.mxu0  ;;  %v6638_v32 = vpop.f32.mrf.mxu1  ;;  %7632 = vmatmul.mubr.bf16.gmra.mxu0 %v18831_v30  ;;  %7865 = vmatmul.mubr.bf16.gmra.mxu1 %v18832_v15  ;;  %v12380_v33 = vld [vmem:[%s17660_s3 + $0xa28] ss:$12 sps:$4 sm:$0xff]  }
 0x5b9   :  { %18830 = vst [vmem:[#allocation63_spill] sm:$0xff] %v16325_v58  ;;  %v6639_v6 = vadd.f32 %v6638_v32, %v6445_v31  ;;  %7641 = vmatprep.mubr.bf16.mxu0 %v18833_v37  ;;  %7874 = vmatprep.mubr.bf16.mxu1 %v18834_v59  ;;  %v12381_v41 = vld [vmem:[%s17660_s3 + $0xba8] ss:$12 sps:$4 sm:$0xff]   ;;  %v18835_v58 = vld [vmem:[#allocation5_spill] sm:$0xff] }
 0x5ba   :  { %v6447_v21 = vpop.f32.mrf.mxu0  ;;  %v6640_v2 = vpop.f32.mrf.mxu1  ;;  %8036 = vmatpush2.bf16.msra.mxu0 %v12378_v57  ;;  %8229 = vmatpush2.bf16.msra.mxu1 %v12379_v43  ;;  %v12382_v32 = vld [vmem:[%s17660_s3 + $0xa10] ss:$12 sps:$4 sm:$0xff]  }
 0x5bb   :  { %v16340_v23 = vadd.f32 %v6639_v6, %v18835_v58  ;;  %8037 = vmatprep.subr.bf16.mxu0 %v18344_v35  ;;  %8230 = vmatprep.subr.bf16.mxu1 %v18344_v35  ;;  %v12383_v58 = vld [vmem:[%s17660_s3 + $0xb90] ss:$12 sps:$4 sm:$0xff]   ;;  %v18837_v6 = vld [vmem:[#allocation6_spill] sm:$0xff] }
 0x5bc   :  { %v6448_v31 = vpop.f32.mrf.mxu0  ;;  %v6641_v21 = vpop.f32.mrf.mxu1 }
 0x5bd   :  { %18836 = vst [vmem:[#allocation64_spill] sm:$0xff] %v16340_v23  ;;  %v6642_v2 = vadd.f32 %v6641_v21, %v6448_v31 }
 0x5be   :  { %v6450_v57 = vpop.f32.mrf.mxu0  ;;  %v6643_v43 = vpop.f32.mrf.mxu1  ;;  %8038 = vmatpush2.bf16.msra.mxu0 %v12380_v33  ;;  %8231 = vmatpush2.bf16.msra.mxu1 %v12381_v41  ;;  %v18840_v33 = vld [vmem:[#allocation126_spill] sm:$0xff] }
 0x5bf   :  { %v16351_v23 = vadd.f32 %v6642_v2, %v18837_v6  ;;  %8039 = vmatprep.subr.bf16.mxu0 %v18344_v35  ;;  %8232 = vmatprep.subr.bf16.mxu1 %v18344_v35  ;;  %v18839_v57 = vld [vmem:[#allocation125_spill] sm:$0xff]  ;;  %v18841_v43 = vld [vmem:[#allocation127_spill] sm:$0xff] }
 0x5c0   :  { %v6453_v31 = vpop.f32.mrf.mxu0  ;;  %v6646_v21 = vpop.f32.mrf.mxu1  ;;  %7642 = vmatmul.mubr.bf16.gmra.mxu0 %v18839_v57  ;;  %7875 = vmatmul.mubr.bf16.gmra.mxu1 %v18840_v33  ;;  %v12384_v2 = vld [vmem:[%s17660_s3 + $0x9f8] ss:$12 sps:$4 sm:$0xff]  }
 0x5c1   :  { %18838 = vst [vmem:[#allocation45_spill] sm:$0xff] %v16351_v23  ;;  %v6647_v41 = vadd.f32 %v6646_v21, %v6453_v31  ;;  %7651 = vmatprep.mubr.bf16.mxu0 %v18841_v43  ;;  %7884 = vmatprep.mubr.bf16.mxu1 %v18842_v50  ;;  %v12385_v6 = vld [vmem:[%s17660_s3 + $0xb78] ss:$12 sps:$4 sm:$0xff]   ;;  %v18843_v23 = vld [vmem:[#allocation227_spill] sm:$0xff] }
 0x5c2   :  { %v6455_v25 = vpop.f32.mrf.mxu0  ;;  %v6648_v27 = vpop.f32.mrf.mxu1  ;;  %8040 = vmatpush2.bf16.msra.mxu0 %v12382_v32  ;;  %8233 = vmatpush2.bf16.msra.mxu1 %v12383_v58  ;;  %v12386_v21 = vld [vmem:[%s17660_s3 + $0x9e0] ss:$12 sps:$4 sm:$0xff]   ;;  %v18855_v43 = vld [vmem:[#allocation133_spill] sm:$0xff] }
 0x5c3   :  { %v16366_v54 = vadd.f32 %v6647_v41, %v18843_v23  ;;  %8041 = vmatprep.subr.bf16.mxu0 %v18344_v35  ;;  %8234 = vmatprep.subr.bf16.mxu1 %v18344_v35  ;;  %v12387_v23 = vld [vmem:[%s17660_s3 + $0xb60] ss:$12 sps:$4 sm:$0xff]  }
 0x5c4   :  { %v6456_v31 = vpop.f32.mrf.mxu0  ;;  %v6649_v25 = vpop.f32.mrf.mxu1  ;;  %v18845_v41 = vld [vmem:[#allocation3_spill] sm:$0xff] }
 0x5c5   :  { %18844 = vst [vmem:[#allocation69_spill] sm:$0xff] %v16366_v54  ;;  %v6650_v27 = vadd.f32 %v6649_v25, %v6456_v31 }
 0x5c6   :  { %v6458_v32 = vpop.f32.mrf.mxu0  ;;  %v6651_v58 = vpop.f32.mrf.mxu1  ;;  %8042 = vmatpush2.bf16.msra.mxu0 %v12384_v2  ;;  %8235 = vmatpush2.bf16.msra.mxu1 %v12385_v6  ;;  %v18848_v2 = vld [vmem:[#allocation130_spill] sm:$0xff] }
 0x5c7   :  { %v16377_v54 = vadd.f32 %v6650_v27, %v18845_v41  ;;  %8043 = vmatprep.subr.bf16.mxu0 %v18344_v35  ;;  %8236 = vmatprep.subr.bf16.mxu1 %v18344_v35  ;;  %v18847_v32 = vld [vmem:[#allocation129_spill] sm:$0xff]  ;;  %v18849_v58 = vld [vmem:[#allocation131_spill] sm:$0xff] }
 0x5c8   :  { %v6461_v31 = vpop.f32.mrf.mxu0  ;;  %v6654_v25 = vpop.f32.mrf.mxu1  ;;  %7652 = vmatmul.mubr.bf16.gmra.mxu0 %v18847_v32  ;;  %7885 = vmatmul.mubr.bf16.gmra.mxu1 %v18848_v2  ;;  %v12388_v27 = vld [vmem:[%s17660_s3 + $0x9c8] ss:$12 sps:$4 sm:$0xff]  }
 0x5c9   :  { %18846 = vst [vmem:[#allocation70_spill] sm:$0xff] %v16377_v54  ;;  %v6655_v6 = vadd.f32 %v6654_v25, %v6461_v31  ;;  %7661 = vmatprep.mubr.bf16.mxu0 %v18849_v58  ;;  %7894 = vmatprep.mubr.bf16.mxu1 %v18850_v10  ;;  %v12389_v41 = vld [vmem:[%s17660_s3 + $0xb48] ss:$12 sps:$4 sm:$0xff]   ;;  %v18853_v25 = vld [vmem:[#allocation9_spill] sm:$0xff] }
 0x5ca   :  { %v6463_v46 = vpop.f32.mrf.mxu0  ;;  %v6656_v50 = vpop.f32.mrf.mxu1  ;;  %8044 = vmatpush2.bf16.msra.mxu0 %v12386_v21  ;;  %8237 = vmatpush2.bf16.msra.mxu1 %v12387_v23  ;;  %v18851_v54 = vld [vmem:[#allocation4_spill] sm:$0xff] }
 0x5cb   :  { %v16392_v32 = vadd.f32 %v6655_v6, %v18851_v54  ;;  %8045 = vmatprep.subr.bf16.mxu0 %v18344_v35  ;;  %8238 = vmatprep.subr.bf16.mxu1 %v18344_v35  ;;  %v18856_v54 = vld [vmem:[#allocation134_spill] sm:$0xff]  ;;  %v18858_v35 = vld [vmem:[#allocation136_spill] sm:$0xff] }
 0x5cc   :  { %v6464_v31 = vpop.f32.mrf.mxu0  ;;  %v6657_v46 = vpop.f32.mrf.mxu1 }
 0x5cd   :  { %18852 = vst [vmem:[#allocation46_spill] sm:$0xff] %v16392_v32  ;;  %v6658_v50 = vadd.f32 %v6657_v46, %v6464_v31  ;;  %v18857_v32 = vld [vmem:[#allocation135_spill] sm:$0xff]  ;;  %v18859_v46 = vld [vmem:[#allocation10_spill] sm:$0xff] }
 0x5ce   :  { %v6466_v21 = vpop.f32.mrf.mxu0  ;;  %v6659_v23 = vpop.f32.mrf.mxu1  ;;  %8046 = vmatpush2.bf16.msra.mxu0 %v12388_v27  ;;  %8239 = vmatpush2.bf16.msra.mxu1 %v12389_v41 }
 0x5cf   :  { %v16397_v10 = vadd.f32 %v6658_v50, %v18853_v25 }
 0x5d0   :  { %v6469_v58 = vpop.f32.mrf.mxu0  ;;  %v6662_v2 = vpop.f32.mrf.mxu1  ;;  %7662 = vmatmul.mubr.bf16.gmra.mxu0 %v18855_v43  ;;  %7895 = vmatmul.mubr.bf16.gmra.mxu1 %v18856_v54 }
 0x5d1   :  { %18854 = vst [vmem:[#allocation187_spill] sm:$0xff] %v16397_v10  ;;  %v6663_v6 = vadd.f32 %v6662_v2, %v6469_v58  ;;  %7671 = vmatprep.mubr.bf16.mxu0 %v18857_v32  ;;  %7904 = vmatprep.mubr.bf16.mxu1 %v18858_v35  ;;  %v18861_v10 = vld [vmem:[#allocation7_spill] sm:$0xff]  ;;  %v18863_v2 = vld [vmem:[#allocation137_spill] sm:$0xff]  ;;  %v18864_v58 = vld [vmem:[#allocation138_spill] sm:$0xff] }
 0x5d2   :  { %v6471_v11 = vpop.f32.mrf.mxu0  ;;  %v6664_v31 = vpop.f32.mrf.mxu1 }
 0x5d3   :  { %v16404_v21 = vadd.f32 %v6663_v6, %v18859_v46  ;;  %v18865_v11 = vld [vmem:[#allocation139_spill] sm:$0xff]  ;;  %v18866_v31 = vld [vmem:[#allocation140_spill] sm:$0xff] }
 0x5d4   :  { %v6472_v27 = vpop.f32.mrf.mxu0  ;;  %v6665_v41 = vpop.f32.mrf.mxu1 }
 0x5d5   :  { %18860 = vst [vmem:[#allocation188_spill] sm:$0xff] %v16404_v21  ;;  %v6666_v50 = vadd.f32 %v6665_v41, %v6472_v27  ;;  %v18867_v21 = vld [vmem:[#allocation8_spill] sm:$0xff] }
 0x5d6   :  { %v6474_v23 = vpop.f32.mrf.mxu0  ;;  %v6667_v25 = vpop.f32.mrf.mxu1 }
 0x5d7   :  { %v16407_v33 = vadd.f32 %v6666_v50, %v18861_v10 }
 0x5d8   :  { %v6477_v43 = vpop.f32.mrf.mxu0  ;;  %v6670_v54 = vpop.f32.mrf.mxu1  ;;  %7672 = vmatmul.mubr.bf16.gmra.mxu0 %v18863_v2  ;;  %7905 = vmatmul.mubr.bf16.gmra.mxu1 %v18864_v58 }
 0x5d9   :  { %18862 = vst [vmem:[#allocation67_spill] sm:$0xff] %v16407_v33  ;;  %v6671_v35 = vadd.f32 %v6670_v54, %v6477_v43  ;;  %7681 = vmatprep.mubr.bf16.mxu0 %v18865_v11  ;;  %7914 = vmatprep.mubr.bf16.mxu1 %v18866_v31  ;;  %v18869_v33 = vld [vmem:[#allocation13_spill] sm:$0xff]  ;;  %v18872_v54 = vld [vmem:[#allocation142_spill] sm:$0xff] }
 0x5da   :  { %v6479_v6 = vpop.f32.mrf.mxu0  ;;  %v6672_v46 = vpop.f32.mrf.mxu1  ;;  %v18871_v43 = vld [vmem:[#allocation141_spill] sm:$0xff] }
 0x5db   :  { %v16414_v27 = vadd.f32 %v6671_v35, %v18867_v21  ;;  %v18873_v6 = vld [vmem:[#allocation143_spill] sm:$0xff]  ;;  %v18874_v46 = vld [vmem:[#allocation144_spill] sm:$0xff] }
 0x5dc   :  { %v6480_v41 = vpop.f32.mrf.mxu0  ;;  %v6673_v23 = vpop.f32.mrf.mxu1 }
 0x5dd   :  { %18868 = vst [vmem:[#allocation68_spill] sm:$0xff] %v16414_v27  ;;  %v6674_v10 = vadd.f32 %v6673_v23, %v6480_v41  ;;  %v18875_v27 = vld [vmem:[#allocation14_spill] sm:$0xff] }
 0x5de   :  { %v6482_v50 = vpop.f32.mrf.mxu0  ;;  %v6675_v25 = vpop.f32.mrf.mxu1 }
 0x5df   :  { %v16417_v32 = vadd.f32 %v6674_v10, %v18869_v33 }
 0x5e0   :  { %v6485_v2 = vpop.f32.mrf.mxu0  ;;  %v6678_v58 = vpop.f32.mrf.mxu1  ;;  %7682 = vmatmul.mubr.bf16.gmra.mxu0 %v18871_v43  ;;  %7915 = vmatmul.mubr.bf16.gmra.mxu1 %v18872_v54 }
 0x5e1   :  { %18870 = vst [vmem:[#allocation189_spill] sm:$0xff] %v16417_v32  ;;  %v6679_v31 = vadd.f32 %v6678_v58, %v6485_v2  ;;  %7691 = vmatprep.mubr.bf16.mxu0 %v18873_v6  ;;  %7924 = vmatprep.mubr.bf16.mxu1 %v18874_v46  ;;  %v18877_v32 = vld [vmem:[#allocation11_spill] sm:$0xff]  ;;  %v18879_v2 = vld [vmem:[#allocation145_spill] sm:$0xff]  ;;  %v18880_v58 = vld [vmem:[#allocation146_spill] sm:$0xff] }
 0x5e2   :  { %v6487_v35 = vpop.f32.mrf.mxu0  ;;  %v6680_v21 = vpop.f32.mrf.mxu1 }
 0x5e3   :  { %v16424_v41 = vadd.f32 %v6679_v31, %v18875_v27  ;;  %v18881_v35 = vld [vmem:[#allocation147_spill] sm:$0xff]  ;;  %v18882_v21 = vld [vmem:[#allocation148_spill] sm:$0xff] }
 0x5e4   :  { %v6488_v23 = vpop.f32.mrf.mxu0  ;;  %v6681_v50 = vpop.f32.mrf.mxu1 }
 0x5e5   :  { %18876 = vst [vmem:[#allocation74_spill] sm:$0xff] %v16424_v41  ;;  %v6682_v33 = vadd.f32 %v6681_v50, %v6488_v23  ;;  %v18883_v41 = vld [vmem:[#allocation12_spill] sm:$0xff] }
 0x5e6   :  { %v6490_v10 = vpop.f32.mrf.mxu0  ;;  %v6683_v25 = vpop.f32.mrf.mxu1 }
 0x5e7   :  { %v16427_v11 = vadd.f32 %v6682_v33, %v18877_v32 }
 0x5e8   :  { %v6493_v43 = vpop.f32.mrf.mxu0  ;;  %v6686_v54 = vpop.f32.mrf.mxu1  ;;  %7692 = vmatmul.mubr.bf16.gmra.mxu0 %v18879_v2  ;;  %7925 = vmatmul.mubr.bf16.gmra.mxu1 %v18880_v58 }
 0x5e9   :  { %18878 = vst [vmem:[#allocation43_spill] sm:$0xff] %v16427_v11  ;;  %v6687_v46 = vadd.f32 %v6686_v54, %v6493_v43  ;;  %7701 = vmatprep.mubr.bf16.mxu0 %v18881_v35  ;;  %7934 = vmatprep.mubr.bf16.mxu1 %v18882_v21  ;;  %v18885_v11 = vld [vmem:[#allocation17_spill] sm:$0xff]  ;;  %v18888_v54 = vld [vmem:[#allocation150_spill] sm:$0xff] }
 0x5ea   :  { %v6495_v31 = vpop.f32.mrf.mxu0  ;;  %v6688_v27 = vpop.f32.mrf.mxu1  ;;  %v18887_v43 = vld [vmem:[#allocation149_spill] sm:$0xff] }
 0x5eb   :  { %v16434_v23 = vadd.f32 %v6687_v46, %v18883_v41  ;;  %v18889_v31 = vld [vmem:[#allocation151_spill] sm:$0xff]  ;;  %v18890_v27 = vld [vmem:[#allocation152_spill] sm:$0xff] }
 0x5ec   :  { %v6496_v50 = vpop.f32.mrf.mxu0  ;;  %v6689_v10 = vpop.f32.mrf.mxu1 }
 0x5ed   :  { %18884 = vst [vmem:[#allocation44_spill] sm:$0xff] %v16434_v23  ;;  %v6690_v32 = vadd.f32 %v6689_v10, %v6496_v50  ;;  %v18891_v23 = vld [vmem:[#allocation18_spill] sm:$0xff] }
 0x5ee   :  { %v6498_v33 = vpop.f32.mrf.mxu0  ;;  %v6691_v25 = vpop.f32.mrf.mxu1 }
 0x5ef   :  { %v16437_v6 = vadd.f32 %v6690_v32, %v18885_v11 }
 0x5f0   :  { %v6501_v2 = vpop.f32.mrf.mxu0  ;;  %v6694_v58 = vpop.f32.mrf.mxu1  ;;  %7702 = vmatmul.mubr.bf16.gmra.mxu0 %v18887_v43  ;;  %7935 = vmatmul.mubr.bf16.gmra.mxu1 %v18888_v54 }
 0x5f1   :  { %18886 = vst [vmem:[#allocation190_spill] sm:$0xff] %v16437_v6  ;;  %v6695_v21 = vadd.f32 %v6694_v58, %v6501_v2  ;;  %7711 = vmatprep.mubr.bf16.mxu0 %v18889_v31  ;;  %7944 = vmatprep.mubr.bf16.mxu1 %v18890_v27  ;;  %v18893_v6 = vld [vmem:[#allocation15_spill] sm:$0xff]  ;;  %v18895_v2 = vld [vmem:[#allocation153_spill] sm:$0xff]  ;;  %v18896_v58 = vld [vmem:[#allocation154_spill] sm:$0xff] }
 0x5f2   :  { %v6503_v46 = vpop.f32.mrf.mxu0  ;;  %v6696_v41 = vpop.f32.mrf.mxu1 }
 0x5f3   :  { %v16444_v50 = vadd.f32 %v6695_v21, %v18891_v23  ;;  %v18897_v46 = vld [vmem:[#allocation155_spill] sm:$0xff]  ;;  %v18898_v41 = vld [vmem:[#allocation156_spill] sm:$0xff] }
 0x5f4   :  { %v6504_v10 = vpop.f32.mrf.mxu0  ;;  %v6697_v33 = vpop.f32.mrf.mxu1 }
 0x5f5   :  { %18892 = vst [vmem:[#allocation71_spill] sm:$0xff] %v16444_v50  ;;  %v6698_v11 = vadd.f32 %v6697_v33, %v6504_v10  ;;  %v18899_v50 = vld [vmem:[#allocation16_spill] sm:$0xff] }
 0x5f6   :  { %v6506_v32 = vpop.f32.mrf.mxu0  ;;  %v6699_v25 = vpop.f32.mrf.mxu1 }
 0x5f7   :  { %v16447_v35 = vadd.f32 %v6698_v11, %v18893_v6 }
 0x5f8   :  { %v6509_v43 = vpop.f32.mrf.mxu0  ;;  %v6702_v54 = vpop.f32.mrf.mxu1  ;;  %7712 = vmatmul.mubr.bf16.gmra.mxu0 %v18895_v2  ;;  %7945 = vmatmul.mubr.bf16.gmra.mxu1 %v18896_v58 }
 0x5f9   :  { %18894 = vst [vmem:[#allocation72_spill] sm:$0xff] %v16447_v35  ;;  %v6703_v27 = vadd.f32 %v6702_v54, %v6509_v43  ;;  %7721 = vmatprep.mubr.bf16.mxu0 %v18897_v46  ;;  %7954 = vmatprep.mubr.bf16.mxu1 %v18898_v41  ;;  %v18901_v35 = vld [vmem:[#allocation21_spill] sm:$0xff]  ;;  %v18904_v54 = vld [vmem:[#allocation158_spill] sm:$0xff] }
 0x5fa   :  { %v6511_v21 = vpop.f32.mrf.mxu0  ;;  %v6704_v23 = vpop.f32.mrf.mxu1  ;;  %v18903_v43 = vld [vmem:[#allocation157_spill] sm:$0xff] }
 0x5fb   :  { %v16454_v10 = vadd.f32 %v6703_v27, %v18899_v50  ;;  %v12390_v21 = vld [vmem:[%s17662_s5 + $0x138] sm:$0xff]   ;;  %v18905_v50 = vld [vmem:[#allocation159_spill] sm:$0xff]  ;;  %v18906_v23 = vld [vmem:[#allocation160_spill] sm:$0xff] }
 0x5fc   :  { %v6512_v33 = vpop.f32.mrf.mxu0  ;;  %v6705_v32 = vpop.f32.mrf.mxu1  ;;  %11297 = vmatprep.subr.bf16.mxu0 %v12390_v21  ;;  %v18914_v21 = vld [vmem:[#allocation166_spill] sm:$0xff] }
 0x5fd   :  { %18900 = vst [vmem:[#allocation49_spill] sm:$0xff] %v16454_v10  ;;  %v6706_v6 = vadd.f32 %v6705_v32, %v6512_v33 }
 0x5fe   :  { %v6514_v11 = vpop.f32.mrf.mxu0  ;;  %v6707_v25 = vpop.f32.mrf.mxu1 }
 0x5ff   :  { %v16457_v31 = vadd.f32 %v6706_v6, %v18901_v35  ;;  %v18907_v35 = vld [vmem:[#allocation22_spill] sm:$0xff] }
 0x600   :  { %v6517_v2 = vpop.f32.mrf.mxu0  ;;  %v6710_v58 = vpop.f32.mrf.mxu1  ;;  %7722 = vmatmul.mubr.bf16.gmra.mxu0 %v18903_v43  ;;  %7955 = vmatmul.mubr.bf16.gmra.mxu1 %v18904_v54  ;;  %v18909_v43 = vld [vmem:[#allocation19_spill] sm:$0xff] }
 0x601   :  { %18902 = vst [vmem:[#allocation50_spill] sm:$0xff] %v16457_v31  ;;  %v6711_v27 = vadd.f32 %v6710_v58, %v6517_v2  ;;  %7731 = vmatprep.mubr.bf16.mxu0 %v18905_v50  ;;  %7964 = vmatprep.mubr.bf16.mxu1 %v18906_v23  ;;  %v18911_v58 = vld [vmem:[#allocation161_spill] sm:$0xff]  ;;  %v18912_v50 = vld [vmem:[#allocation162_spill] sm:$0xff]  ;;  %v18925_v23 = vld [vmem:[#allocation23_spill] sm:$0xff] }
 0x602   :  { %v6519_v33 = vpop.f32.mrf.mxu0  ;;  %v6712_v32 = vpop.f32.mrf.mxu1 }
 0x603   :  { %v16467_v6 = vadd.f32 %v6711_v27, %v18907_v35  ;;  %v18913_v32 = vld [vmem:[#allocation165_spill] sm:$0xff] }
 0x604   :  { %v6520_v11 = vpop.f32.mrf.mxu0  ;;  %v6713_v25 = vpop.f32.mrf.mxu1 }
 0x605   :  { %18908 = vst [vmem:[#allocation191_spill] sm:$0xff] %v16467_v6  ;;  %v6714_v31 = vadd.f32 %v6713_v25, %v6520_v11  ;;  %v18915_v6 = vld [vmem:[#allocation20_spill] sm:$0xff] }
 0x606   :  { %v6522_v10 = vpop.f32.mrf.mxu0  ;;  %v6715_v54 = vpop.f32.mrf.mxu1 }
 0x607   :  { %v16470_v41 = vadd.f32 %v6714_v31, %v18909_v43  ;;  %v16482_v43 = vld [vmem:[%s17662_s5 + $0x178] sm:$0xff]  }
 0x608   :  { %v6525_v46 = vpop.f32.mrf.mxu0  ;;  %v6718_v2 = vpop.f32.mrf.mxu1  ;;  %7732 = vmatmul.mubr.bf16.gmra.mxu0 %v18911_v58  ;;  %7965 = vmatmul.mubr.bf16.gmra.mxu1 %v18912_v50 }
 0x609   :  { %18910 = vst [vmem:[#allocation192_spill] sm:$0xff] %v16470_v41  ;;  %v6719_v33 = vadd.f32 %v6718_v2, %v6525_v46  ;;  %7741 = vmatprep.mubr.bf16.mxu0 %v18913_v32  ;;  %7974 = vmatprep.mubr.bf16.mxu1 %v18914_v21  ;;  %v18917_v46 = vld [vmem:[#allocation25_spill] sm:$0xff]  ;;  %v18919_v21 = vld [vmem:[#allocation163_spill] sm:$0xff] }
 0x60a   :  { %v6527_v27 = vpop.f32.mrf.mxu0  ;;  %v6720_v35 = vpop.f32.mrf.mxu1  ;;  %11581 = vmatprep.subr.bf16.mxu1 %v16482_v43 }
 0x60b   :  { %v16477_v11 = vadd.f32 %v6719_v33, %v18915_v6  ;;  %v18920_v6 = vld [vmem:[#allocation164_spill] sm:$0xff] }
 0x60c   :  { %v6528_v10 = vpop.f32.mrf.mxu0  ;;  %v6721_v54 = vpop.f32.mrf.mxu1 }
 0x60d   :  { %18916 = vst [vmem:[#allocation193_spill] sm:$0xff] %v16477_v11  ;;  %v6722_v31 = vadd.f32 %v6721_v54, %v6528_v10  ;;  %v18921_v10 = vld [vmem:[#allocation169_spill] sm:$0xff]  ;;  %v18922_v54 = vld [vmem:[#allocation170_spill] sm:$0xff] }
 0x60e   :  { %v6530_v25 = vpop.f32.mrf.mxu0  ;;  %v6723_v41 = vpop.f32.mrf.mxu1 }
 0x60f   :  { %v16485_v2 = vadd.f32 %v6722_v31, %v18917_v46  ;;  %v18923_v25 = vld [vmem:[#allocation26_spill] sm:$0xff] }
 0x610   :  { %v6533_v27 = vpop.f32.mrf.mxu0  ;;  %v6726_v35 = vpop.f32.mrf.mxu1  ;;  %7742 = vmatmul.mubr.bf16.gmra.mxu0 %v18919_v21  ;;  %7975 = vmatmul.mubr.bf16.gmra.mxu1 %v18920_v6 }
 0x611   :  { %18918 = vst [vmem:[#allocation82_spill] sm:$0xff] %v16485_v2  ;;  %v6727_v33 = vadd.f32 %v6726_v35, %v6533_v27  ;;  %7751 = vmatprep.mubr.bf16.mxu0 %v18921_v10  ;;  %7984 = vmatprep.mubr.bf16.mxu1 %v18922_v54  ;;  %v18927_v27 = vld [vmem:[#allocation167_spill] sm:$0xff]  ;;  %v18928_v35 = vld [vmem:[#allocation168_spill] sm:$0xff] }
 0x612   :  { %v6535_v11 = vpop.f32.mrf.mxu0  ;;  %v6728_v32 = vpop.f32.mrf.mxu1 }
 0x613   :  { %v16493_v41 = vadd.f32 %v6727_v33, %v18923_v25  ;;  %v18929_v11 = vld [vmem:[#allocation173_spill] sm:$0xff]  ;;  %v18930_v32 = vld [vmem:[#allocation174_spill] sm:$0xff] }
 0x614   :  { %v6536_v31 = vpop.f32.mrf.mxu0  ;;  %v6729_v46 = vpop.f32.mrf.mxu1 }
 0x615   :  { %18924 = vst [vmem:[#allocation47_spill] sm:$0xff] %v16493_v41  ;;  %v6730_v2 = vadd.f32 %v6729_v46, %v6536_v31  ;;  %v18931_v41 = vld [vmem:[#allocation24_spill] sm:$0xff] }
 0x616   :  { %v6538_v50 = vpop.f32.mrf.mxu0  ;;  %v6731_v58 = vpop.f32.mrf.mxu1 }
 0x617   :  { %v16496_v57 = vadd.f32 %v6730_v2, %v18925_v23 }
 0x618   :  { %v6541_v21 = vpop.f32.mrf.mxu0  ;;  %v6734_v6 = vpop.f32.mrf.mxu1  ;;  %7752 = vmatmul.mubr.bf16.gmra.mxu0 %v18927_v27  ;;  %7985 = vmatmul.mubr.bf16.gmra.mxu1 %v18928_v35 }
 0x619   :  { %18926 = vst [vmem:[#allocation48_spill] sm:$0xff] %v16496_v57  ;;  %v6735_v54 = vadd.f32 %v6734_v6, %v6541_v21  ;;  %7761 = vmatprep.mubr.bf16.mxu0 %v18929_v11  ;;  %7994 = vmatprep.mubr.bf16.mxu1 %v18930_v32  ;;  %v18933_v57 = vld [vmem:[#allocation29_spill] sm:$0xff]  ;;  %v18935_v21 = vld [vmem:[#allocation171_spill] sm:$0xff]  ;;  %v18936_v6 = vld [vmem:[#allocation172_spill] sm:$0xff] }
 0x61a   :  { %v6543_v33 = vpop.f32.mrf.mxu0  ;;  %v6736_v25 = vpop.f32.mrf.mxu1 }
 0x61b   :  { %v16503_v31 = vadd.f32 %v6735_v54, %v18931_v41  ;;  %v18937_v33 = vld [vmem:[#allocation177_spill] sm:$0xff]  ;;  %v18938_v25 = vld [vmem:[#allocation178_spill] sm:$0xff] }
 0x61c   :  { %v6544_v50 = vpop.f32.mrf.mxu0  ;;  %v6737_v58 = vpop.f32.mrf.mxu1 }
 0x61d   :  { %18932 = vst [vmem:[#allocation194_spill] sm:$0xff] %v16503_v31  ;;  %v6738_v23 = vadd.f32 %v6737_v58, %v6544_v50 }
 0x61e   :  { %v6546_v2 = vpop.f32.mrf.mxu0  ;;  %v6739_v46 = vpop.f32.mrf.mxu1 }
 0x61f   :  { %v16506_v10 = vadd.f32 %v6738_v23, %v18933_v57 }
 0x620   :  { %v6549_v27 = vpop.f32.mrf.mxu0  ;;  %v6742_v35 = vpop.f32.mrf.mxu1  ;;  %7762 = vmatmul.mubr.bf16.gmra.mxu0 %v18935_v21  ;;  %7995 = vmatmul.mubr.bf16.gmra.mxu1 %v18936_v6 }
 0x621   :  { %18934 = vst [vmem:[#allocation79_spill] sm:$0xff] %v16506_v10  ;;  %v6743_v32 = vadd.f32 %v6742_v35, %v6549_v27  ;;  %7771 = vmatprep.mubr.bf16.mxu0 %v18937_v33  ;;  %8004 = vmatprep.mubr.bf16.mxu1 %v18938_v25  ;;  %v18939_v27 = vld [vmem:[#allocation175_spill] sm:$0xff]  ;;  %v18940_v35 = vld [vmem:[#allocation176_spill] sm:$0xff] }
 0x622   :  { %v6551_v54 = vpop.f32.mrf.mxu0  ;;  %v6744_v41 = vpop.f32.mrf.mxu1 }
 0x623   :  { %v16513_v50 = vadd.f32 %v6743_v32, %v15670_v55 }
 0x624   :  { %v6552_v58 = vpop.f32.mrf.mxu0  ;;  %v6745_v2 = vpop.f32.mrf.mxu1 }
 0x625   :  { %v6746_v57 = vadd.f32 %v6745_v2, %v6552_v58 }
 0x626   :  { %v6554_v23 = vpop.f32.mrf.mxu0  ;;  %v6747_v46 = vpop.f32.mrf.mxu1 }
 0x627   :  { %v16516_v10 = vadd.f32 %v6746_v57, %v15673_v17  ;;  %v12391_v17 = vld [vmem:[%s17662_s5 + $0xf8] sm:$0xff]   ;;  %v12394_v23 = vld [vmem:[%s17662_s5 + $0xf0] sm:$0xff]  }
 0x628   :  { %v6557_v31 = vpop.f32.mrf.mxu0  ;;  %v6750_v6 = vpop.f32.mrf.mxu1  ;;  %7772 = vmatmul.mubr.bf16.gmra.mxu0 %v18939_v27  ;;  %8005 = vmatmul.mubr.bf16.gmra.mxu1 %v18940_v35 }
 0x629   :  { %v6751_v25 = vadd.f32 %v6750_v6, %v6557_v31  ;;  %8047 = vmatprep.mubr.bf16.mxu0 %v18765_v52  ;;  %8240 = vmatprep.mubr.bf16.mxu1 %v18766_v40  ;;  %v12393_v31 = vld [vmem:[%s17662_s5 + $0x130] sm:$0xff]  }
 0x62a   :  { %v6559_v55 = vpop.f32.mrf.mxu0  ;;  %v6752_v32 = vpop.f32.mrf.mxu1  ;;  %v12395_v52 = vld [vmem:[%s17662_s5 + $0x170] sm:$0xff]  }
 0x62b   :  { %v16523_v54 = vadd.f32 %v6751_v25, %v15680_v42 }
 0x62c   :  { %v6560_v41 = vpop.f32.mrf.mxu0  ;;  %v6753_v58 = vpop.f32.mrf.mxu1 }
 0x62d   :  { %v6754_v2 = vadd.f32 %v6753_v58, %v6560_v41  ;;  %v12398_v58 = vld [vmem:[%s17662_s5 + $0x168] sm:$0xff]  }
 0x62e   :  { %v6562_v40 = vpop.f32.mrf.mxu0  ;;  %v6755_v6 = vpop.f32.mrf.mxu1 }
 0x62f   :  { %v16535_v42 = vadd.f32 %v6754_v2, %v15689_v47  ;;  %v12396_v47 = vld [vmem:[%s17662_s5 + $0x128] sm:$0xff]  }
 0x630   :  { %v6565_v25 = vpop.f32.mrf.mxu0  ;;  %v6758_v57 = vpop.f32.mrf.mxu1  ;;  %8048 = vmatmul.mubr.bf16.vlgmr.msra.gmra.mxu0 %v18773_v62  ;;  %8241 = vmatmul.mubr.bf16.vlgmr.msra.gmra.mxu1 %v18774_v4 }
 0x631   :  { %v6759_v46 = vadd.f32 %v6758_v57, %v6565_v25  ;;  %8055 = vmatprep.mubr.bf16.mxu0 %v18777_v18  ;;  %8248 = vmatprep.mubr.bf16.mxu1 %v18778_v49  ;;  %v12397_v18 = vld [vmem:[%s17662_s5 + $0xe8] sm:$0xff]  }
 0x632   :  { %v6567_v55 = vpop.f32.mrf.mxu0  ;;  %v6760_v32 = vpop.f32.mrf.mxu1  ;;  %11298 = vmatpush3.bf16.msra.mxu0 %v12391_v17  ;;  %11582 = vmatpush3.bf16.msra.mxu1 %v16482_v43 }
 0x633   :  { %v16549_v62 = vadd.f32 %v6759_v46, %v15714_v13  ;;  %11299 = vmatprep.subr.bf16.mxu0 %v12393_v31  ;;  %11583 = vmatprep.subr.bf16.mxu1 %v12395_v52  ;;  %v12402_v32 = vld [vmem:[%s17662_s5 + $0xd8] sm:$0xff]  }
 0x634   :  { %v6568_v4 = vpop.f32.mrf.mxu0  ;;  %v6761_v41 = vpop.f32.mrf.mxu1 }
 0x635   :  { %v6762_v49 = vadd.f32 %v6761_v41, %v6568_v4 }
 0x636   :  { %v6570_v2 = vpop.f32.mrf.mxu0  ;;  %v6763_v17 = vpop.f32.mrf.mxu1  ;;  %11300 = vmatpush3.bf16.msra.mxu0 %v12394_v23  ;;  %11584 = vmatpush3.bf16.msra.mxu1 %v12395_v52  ;;  %v12399_v52 = vld [vmem:[%s17662_s5 + $0x120] sm:$0xff]  }
 0x637   :  { %v16558_v13 = vadd.f32 %v6762_v49, %v15723_v38  ;;  %11301 = vmatprep.subr.bf16.mxu0 %v12396_v47  ;;  %11585 = vmatprep.subr.bf16.mxu1 %v12398_v58 }
 0x638   :  { %v6573_v43 = vpop.f32.mrf.mxu0  ;;  %v6766_v31 = vpop.f32.mrf.mxu1  ;;  %8056 = vmatmul.mubr.bf16.gmra.mxu0 %v18785_v12  ;;  %8249 = vmatmul.mubr.bf16.gmra.mxu1 %v18786_v28  ;;  %v12400_v28 = vld [vmem:[%s17662_s5 + $0xe0] sm:$0xff]  }
 0x639   :  { %v6767_v40 = vadd.f32 %v6766_v31, %v6573_v43  ;;  %8063 = vmatprep.mubr.bf16.mxu0 %v18789_v3  ;;  %8256 = vmatprep.mubr.bf16.mxu1 %v18790_v19 }
 0x63a   :  { %v6575_v6 = vpop.f32.mrf.mxu0  ;;  %v6768_v25 = vpop.f32.mrf.mxu1  ;;  %11302 = vmatpush3.bf16.msra.mxu0 %v12397_v18  ;;  %11586 = vmatpush3.bf16.msra.mxu1 %v12398_v58  ;;  %v12405_v58 = vld [vmem:[%s17662_s5 + $0xd0] sm:$0xff]  }
 0x63b   :  { %v16565_v38 = vadd.f32 %v6767_v40, %v15742_v39  ;;  %11303 = vmatprep.subr.bf16.mxu0 %v12399_v52  ;;  %v12401_v39 = vld [vmem:[%s17662_s5 + $0x118] sm:$0xff]   ;;  %v12407_v40 = vld [vmem:[%s17662_s5 + $0xc8] sm:$0xff]  }
 0x63c   :  { %v6576_v57 = vpop.f32.mrf.mxu0  ;;  %v6769_v12 = vpop.f32.mrf.mxu1 }
 0x63d   :  { %18941 = vst [vmem:[#allocation80_spill] sm:$0xff] %v16565_v38  ;;  %v6770_v3 = vadd.f32 %v6769_v12, %v6576_v57 }
 0x63e   :  { %v6578_v19 = vpop.f32.mrf.mxu0  ;;  %v6771_v23 = vpop.f32.mrf.mxu1  ;;  %11304 = vmatpush3.bf16.msra.mxu0 %v12400_v28  ;;  %v8521_v28 = vld [vmem:[%s17663_s4] sm:$0x7] }
 0x63f   :  { %v16574_v46 = vadd.f32 %v6770_v3, %v15757_v20  ;;  %11305 = vmatprep.subr.bf16.mxu0 %v12401_v39  ;;  %v12410_v23 = vld [vmem:[%s17662_s5 + $0x78] sm:$0xff]  }
 0x640   :  { %v6581_v47 = vpop.f32.mrf.mxu0  ;;  %v6774_v55 = vpop.f32.mrf.mxu1  ;;  %8064 = vmatmul.mubr.bf16.gmra.mxu0 %v18797_v48  ;;  %8257 = vmatmul.mubr.bf16.gmra.mxu1 %v18798_v36  ;;  %v12404_v48 = vld [vmem:[%s17662_s5 + $0x110] sm:$0xff]  }
 0x641   :  { %18942 = vst [vmem:[#allocation53_spill] sm:$0xff] %v16574_v46  ;;  %v6775_v4 = vadd.f32 %v6774_v55, %v6581_v47  ;;  %8071 = vmatprep.mubr.bf16.mxu0 %v18801_v22  ;;  %8264 = vmatprep.mubr.bf16.mxu1 %v18802_v34 }
 0x642   :  { %v6583_v20 = vpop.f32.mrf.mxu0  ;;  %v6776_v41 = vpop.f32.mrf.mxu1  ;;  %11306 = vmatpush3.bf16.msra.mxu0 %v12402_v32  ;;  %v18947_v32 = vld [vmem:[#allocation2_spill] sm:$0xff] }
 0x643   :  { %v16587_v18 = vadd.f32 %v6775_v4, %v15776_v56  ;;  %11307 = vmatprep.subr.bf16.mxu0 %v12404_v48  ;;  %v12406_v56 = vld [vmem:[%s17662_s5 + $0x108] sm:$0xff]   ;;  %v18948_v4 = vsub.s32 0, %v18947_v32 }
 0x644   :  { %v6584_v36 = vpop.f32.mrf.mxu0  ;;  %v6777_v49 = vpop.f32.mrf.mxu1 }
 0x645   :  { %18943 = vst [vmem:[#allocation85_spill] sm:$0xff] %v16587_v18  ;;  %v6778_v22 = vadd.f32 %v6777_v49, %v6584_v36 }
 0x646   :  { %v6586_v34 = vpop.f32.mrf.mxu0  ;;  %v6779_v2 = vpop.f32.mrf.mxu1  ;;  %11308 = vmatpush3.bf16.msra.mxu0 %v12405_v58 }
 0x647   :  { %v16596_v17 = vadd.f32 %v6778_v22, %v15791_v51  ;;  %v12403_v51 = vld [vmem:[%s17662_s5 + $0x160] sm:$0xff]   ;;  %11309 = vmatprep.subr.bf16.mxu0 %v12406_v56 }
 0x648   :  { %v6589_v43 = vpop.f32.mrf.mxu0  ;;  %v6782_v31 = vpop.f32.mrf.mxu1  ;;  %8072 = vmatmul.mubr.bf16.gmra.mxu0 %v18809_v8  ;;  %8265 = vmatmul.mubr.bf16.gmra.mxu1 %v18810_v9  ;;  %v12408_v9 = vld [vmem:[%s17662_s5 + $0x100] sm:$0xff]  }
 0x649   :  { %18944 = vst [vmem:[#allocation86_spill] sm:$0xff] %v16596_v17  ;;  %v6783_v6 = vadd.f32 %v6782_v31, %v6589_v43  ;;  %8079 = vmatprep.mubr.bf16.mxu0 %v18813_v26  ;;  %8272 = vmatprep.mubr.bf16.mxu1 %v18814_v45  ;;  %v12409_v45 = vld [vmem:[%s17662_s5 + $0xc0] sm:$0xff]  }
 0x64a   :  { %v6591_v25 = vpop.f32.mrf.mxu0  ;;  %v6784_v52 = vpop.f32.mrf.mxu1  ;;  %11587 = vmatprep.subr.bf16.mxu1 %v12403_v51  ;;  %11310 = vmatpush3.bf16.msra.mxu0 %v12407_v40 }
 0x64b   :  { %v16612_v8 = vadd.f32 %v6783_v6, %v15810_v24  ;;  %11588 = vmatpush3.bf16.msra.mxu1 %v12403_v51  ;;  %11311 = vmatprep.subr.bf16.mxu0 %v12408_v9 }
 0x64c   :  { %v6592_v57 = vpop.f32.mrf.mxu0  ;;  %v6785_v26 = vpop.f32.mrf.mxu1 }
 0x64d   :  { %18945 = vst [vmem:[#allocation54_spill] sm:$0xff] %v16612_v8  ;;  %v6786_v12 = vadd.f32 %v6785_v26, %v6592_v57 }
 0x64e   :  { %v6594_v24 = vpop.f32.mrf.mxu0  ;;  %v6787_v3 = vpop.f32.mrf.mxu1  ;;  %11312 = vmatpush3.bf16.msra.mxu0 %v12409_v45 }
 0x64f   :  { %v16624_v19 = vadd.f32 %v6786_v12, %v15825_v16  ;;  %v16635_v16 = vrot.slane %v8521_v28, %v18948_v4  ;;  %11349 = vmatprep.subr.bf16.mxu0 %v12410_v23 }
 0x650   :  { %v7583_v39 = vpop.f32.mrf.mxu0  ;;  %v7816_v47 = vpop.f32.mrf.mxu1  ;;  %8080 = vmatmul.mubr.bf16.gmra.mxu0 %v18821_v60  ;;  %8273 = vmatmul.mubr.bf16.gmra.mxu1 %v18822_v53 }
 0x651   :  { %18946 = vst [vmem:[#allocation195_spill] sm:$0xff] %v16624_v19  ;;  %v7817_v55 = vadd.f32 %v7816_v47, %v7583_v39  ;;  %8087 = vmatprep.mubr.bf16.mxu0 %v18825_v7  ;;  %8280 = vmatprep.mubr.bf16.mxu1 %v18826_v14  ;;  %v18949_v7 = vsub.s32 1, %v18947_v32  ;;  %v19029_v19 = vld [vmem:[#allocation250_spill] sm:$0xff] }
 0x652   :  { %v7585_v20 = vpop.f32.mrf.mxu0  ;;  %v7818_v41 = vpop.f32.mrf.mxu1 }
 0x653   :  { %v8401_v48 = vadd.f32 %v7817_v55, %v15844_v29  ;;  %v7819_v36 = vadd.f32 %v7818_v41, %v7585_v20  ;;  %v16642_v14 = vrot.slane %v8521_v28, %v18949_v7  ;;  %v18950_v20 = vld [vmem:[#allocation125_spill] sm:$0xff] }
 0x654   :  { %v7587_v49 = vpop.f32.mrf.mxu0  ;;  %v7820_v58 = vpop.f32.mrf.mxu1 }
 0x655   :  { %v8402_v60 = vadd.f32 %v7819_v36, %v15853_v63  ;;  %v7821_v53 = vadd.f32 %v7820_v58, %v7587_v49  ;;  %v8538_v22 = vadd.f32 %v16635_v16, %v8401_v48  ;;  %v18952_v36 = vld [vmem:[#allocation30_spill] sm:$0xff] }
 0x656   :  { %v7589_v34 = vpop.f32.mrf.mxu0  ;;  %v7822_v2 = vpop.f32.mrf.mxu1 }
 0x657   :  { %v8404_v56 = vadd.f32 %v7821_v53, %v15862_v1  ;;  %v7823_v43 = vadd.f32 %v7822_v2, %v7589_v34  ;;  %v8658_v51 = vmax.f32 %v8538_v22, 0.0  ;;  %v8539_v25 = vadd.f32 %v16642_v14, %v8402_v60  ;;  %v18953_v60 = vld [vmem:[#allocation127_spill] sm:$0xff]  ;;  %v18954_v53 = vld [vmem:[#allocation128_spill] sm:$0xff] }
 0x658   :  { %v7593_v31 = vpop.f32.mrf.mxu0  ;;  %v7826_v40 = vpop.f32.mrf.mxu1  ;;  %8088 = vmatmul.mubr.bf16.gmra.mxu0 %v18831_v30  ;;  %8281 = vmatmul.mubr.bf16.gmra.mxu1 %v18832_v15 }
 0x659   :  { %v8541_v29 = vadd.f32 %v16635_v16, %v8404_v56  ;;  %v8405_v63 = vadd.f32 %v7823_v43, %v15873_v0  ;;  %v7827_v6 = vadd.f32 %v7826_v40, %v7593_v31  ;;  %8095 = vmatprep.mubr.bf16.mxu0 %v18833_v37  ;;  %8288 = vmatprep.mubr.bf16.mxu1 %v18834_v59  ;;  %v12414_v59 = vld [vmem:[%s17662_s5 + $0x158] sm:$0xff]   ;;  %v8659_v28 = vmax.f32 %v8539_v25, 0.0  ;;  %v18955_v43 = vld [vmem:[#allocation27_spill] sm:$0xff] }
 0x65a   :  { %v7595_v1 = vpop.f32.mrf.mxu0  ;;  %v7828_v52 = vpop.f32.mrf.mxu1  ;;  %11589 = vmatprep.subr.bf16.mxu1 %v12414_v59 }
 0x65b   :  { %v8661_v9 = vmax.f32 %v8541_v29, 0.0  ;;  %v8542_v57 = vadd.f32 %v16642_v14, %v8405_v63  ;;  %v8407_v30 = vadd.f32 %v7827_v6, %v15884_v61  ;;  %v7829_v15 = vadd.f32 %v7828_v52, %v7595_v1  ;;  %11590 = vmatpush3.bf16.msra.mxu1 %v12414_v59 }
 0x65c   :  { %v7597_v26 = vpop.f32.mrf.mxu0  ;;  %v7830_v45 = vpop.f32.mrf.mxu1 }
 0x65d   :  { %v16654_v12 = vpack.c.bf16 %v8661_v9, %v8658_v51  ;;  %v8408_v0 = vadd.f32 %v7829_v15, %v15893_v44  ;;  %v7831_v37 = vadd.f32 %v7830_v45, %v7597_v26  ;;  %v8544_v24 = vadd.f32 %v16635_v16, %v8407_v30  ;;  %v18951_v44 = vld [vmem:[#allocation126_spill] sm:$0xff]  ;;  %v18956_v51 = vld [vmem:[#allocation28_spill] sm:$0xff]  ;;  %v18957_v26 = vld [vmem:[#allocation33_spill] sm:$0xff] }
 0x65e   :  { %v7599_v3 = vpop.f32.mrf.mxu0  ;;  %v7832_v23 = vpop.f32.mrf.mxu1  ;;  %v8662_v39 = vmax.f32 %v8542_v57, 0.0 }
 0x65f   :  { %v8410_v61 = vadd.f32 %v7831_v37, %v15902_v5  ;;  %v7833_v47 = vadd.f32 %v7832_v23, %v7599_v3  ;;  %v8664_v5 = vmax.f32 %v8544_v24, 0.0  ;;  %v8545_v22 = vadd.f32 %v16642_v14, %v8408_v0  ;;  %v18959_v24 = vld [vmem:[#allocation130_spill] sm:$0xff] }
 0x660   :  { %v7603_v55 = vpop.f32.mrf.mxu0  ;;  %v7836_v4 = vpop.f32.mrf.mxu1  ;;  %8096 = vmatmul.mubr.bf16.gmra.mxu0 %v18950_v20  ;;  %8289 = vmatmul.mubr.bf16.gmra.mxu1 %v18951_v44  ;;  %v16664_v41 = vpack.c.bf16 %v8662_v39, %v8659_v28  ;;  %v18958_v28 = vld [vmem:[#allocation129_spill] sm:$0xff]  ;;  %v18960_v39 = vld [vmem:[#allocation34_spill] sm:$0xff] }
 0x661   :  { %v8547_v48 = vadd.f32 %v16635_v16, %v8410_v61  ;;  %v8411_v49 = vadd.f32 %v7833_v47, %v18952_v36  ;;  %v7837_v58 = vadd.f32 %v7836_v4, %v7603_v55  ;;  %8103 = vmatprep.mubr.bf16.mxu0 %v18953_v60  ;;  %8296 = vmatprep.mubr.bf16.mxu1 %v18954_v53  ;;  %v8665_v52 = vmax.f32 %v8545_v22, 0.0  ;;  %v18961_v55 = vld [vmem:[#allocation131_spill] sm:$0xff]  ;;  %v18962_v4 = vld [vmem:[#allocation132_spill] sm:$0xff] }
 0x662   :  { %v7605_v7 = vpop.f32.mrf.mxu0  ;;  %v7838_v34 = vpop.f32.mrf.mxu1  ;;  %v18963_v60 = vld [vmem:[#allocation31_spill] sm:$0xff] }
 0x663   :  { %v8667_v2 = vmax.f32 %v8547_v48, 0.0  ;;  %v8548_v56 = vadd.f32 %v16642_v14, %v8411_v49  ;;  %v8413_v31 = vadd.f32 %v7837_v58, %v18955_v43  ;;  %v7839_v40 = vadd.f32 %v7838_v34, %v7605_v7 }
 0x664   :  { %v7607_v29 = vpop.f32.mrf.mxu0  ;;  %v7840_v63 = vpop.f32.mrf.mxu1 }
 0x665   :  { %v16673_v6 = vpack.c.bf16 %v8667_v2, %v8664_v5  ;;  %v8414_v25 = vadd.f32 %v7839_v40, %v18956_v51  ;;  %v7841_v1 = vadd.f32 %v7840_v63, %v7607_v29  ;;  %v8550_v9 = vadd.f32 %v16635_v16, %v8413_v31  ;;  %v18964_v2 = vld [vmem:[#allocation32_spill] sm:$0xff] }
 0x666   :  { %v7609_v57 = vpop.f32.mrf.mxu0  ;;  %v7842_v30 = vpop.f32.mrf.mxu1  ;;  %v8668_v15 = vmax.f32 %v8548_v56, 0.0 }
 0x667   :  { %v8416_v45 = vadd.f32 %v7841_v1, %v18957_v26  ;;  %v7843_v0 = vadd.f32 %v7842_v30, %v7609_v57  ;;  %v8670_v20 = vmax.f32 %v8550_v9, 0.0  ;;  %v8551_v44 = vadd.f32 %v16642_v14, %v8414_v25  ;;  %v18965_v25 = vld [vmem:[#allocation37_spill] sm:$0xff] }
 0x668   :  { %v7613_v37 = vpop.f32.mrf.mxu0  ;;  %v7846_v59 = vpop.f32.mrf.mxu1  ;;  %8104 = vmatmul.mubr.bf16.gmra.mxu0 %v18958_v28  ;;  %8297 = vmatmul.mubr.bf16.gmra.mxu1 %v18959_v24  ;;  %v16680_v3 = vpack.c.bf16 %v8668_v15, %v8665_v52  ;;  %v18966_v30 = vld [vmem:[#allocation133_spill] sm:$0xff]  ;;  %v18967_v15 = vld [vmem:[#allocation134_spill] sm:$0xff]  ;;  %v18969_v28 = vld [vmem:[#allocation135_spill] sm:$0xff] }
 0x669   :  { %v8553_v23 = vadd.f32 %v16635_v16, %v8416_v45  ;;  %v8417_v61 = vadd.f32 %v7843_v0, %v18960_v39  ;;  %v7847_v47 = vadd.f32 %v7846_v59, %v7613_v37  ;;  %8111 = vmatprep.mubr.bf16.mxu0 %v18961_v55  ;;  %8304 = vmatprep.mubr.bf16.mxu1 %v18962_v4  ;;  %v8671_v31 = vmax.f32 %v8551_v44, 0.0  ;;  %v18968_v0 = vld [vmem:[#allocation38_spill] sm:$0xff]  ;;  %v18970_v24 = vld [vmem:[#allocation136_spill] sm:$0xff] }
 0x66a   :  { %v7615_v48 = vpop.f32.mrf.mxu0  ;;  %v7848_v36 = vpop.f32.mrf.mxu1  ;;  %v18971_v44 = vld [vmem:[#allocation228_spill] sm:$0xff] }
 0x66b   :  { %v8673_v49 = vmax.f32 %v8553_v23, 0.0  ;;  %v8554_v58 = vadd.f32 %v16642_v14, %v8417_v61  ;;  %v8419_v53 = vadd.f32 %v7847_v47, %v18963_v60  ;;  %v7849_v5 = vadd.f32 %v7848_v36, %v7615_v48  ;;  %v12425_v23 = vld [vmem:[%s17662_s5 + $0x150] sm:$0xff]  }
 0x66c   :  { %v7617_v22 = vpop.f32.mrf.mxu0  ;;  %v7850_v7 = vpop.f32.mrf.mxu1  ;;  %11591 = vmatprep.subr.bf16.mxu1 %v12425_v23 }
 0x66d   :  { %v16689_v34 = vpack.c.bf16 %v8673_v49, %v8670_v20  ;;  %v8420_v56 = vadd.f32 %v7849_v5, %v18964_v2  ;;  %v7851_v43 = vadd.f32 %v7850_v7, %v7617_v22  ;;  %v8556_v40 = vadd.f32 %v16635_v16, %v8419_v53  ;;  %11592 = vmatpush3.bf16.msra.mxu1 %v12425_v23  ;;  %v18972_v53 = vld [vmem:[#allocation73_spill] sm:$0xff] }
 0x66e   :  { %v7619_v29 = vpop.f32.mrf.mxu0  ;;  %v7852_v63 = vpop.f32.mrf.mxu1  ;;  %v8674_v51 = vmax.f32 %v8554_v58, 0.0 }
 0x66f   :  { %v8422_v1 = vadd.f32 %v7851_v43, %v18965_v25  ;;  %v7853_v52 = vadd.f32 %v7852_v63, %v7619_v29  ;;  %v8676_v39 = vmax.f32 %v8556_v40, 0.0  ;;  %v8557_v61 = vadd.f32 %v16642_v14, %v8420_v56  ;;  %v18973_v40 = vld [vmem:[#allocation229_spill] sm:$0xff] }
 0x670   :  { %v7623_v9 = vpop.f32.mrf.mxu0  ;;  %v7856_v57 = vpop.f32.mrf.mxu1  ;;  %8112 = vmatmul.mubr.bf16.gmra.mxu0 %v18966_v30  ;;  %8305 = vmatmul.mubr.bf16.gmra.mxu1 %v18967_v15  ;;  %v16696_v26 = vpack.c.bf16 %v8674_v51, %v8671_v31  ;;  %v18976_v30 = vld [vmem:[#allocation230_spill] sm:$0xff] }
 0x671   :  { %v8559_v45 = vadd.f32 %v16635_v16, %v8422_v1  ;;  %v8423_v37 = vadd.f32 %v7853_v52, %v18968_v0  ;;  %v7857_v59 = vadd.f32 %v7856_v57, %v7623_v9  ;;  %8119 = vmatprep.mubr.bf16.mxu0 %v18969_v28  ;;  %8312 = vmatprep.mubr.bf16.mxu1 %v18970_v24  ;;  %v8677_v7 = vmax.f32 %v8557_v61, 0.0  ;;  %v18974_v1 = vld [vmem:[#allocation137_spill] sm:$0xff]  ;;  %v18975_v52 = vld [vmem:[#allocation138_spill] sm:$0xff]  ;;  %v18977_v0 = vld [vmem:[#allocation139_spill] sm:$0xff] }
 0x672   :  { %v7625_v47 = vpop.f32.mrf.mxu0  ;;  %v7858_v55 = vpop.f32.mrf.mxu1 }
 0x673   :  { %v8679_v4 = vmax.f32 %v8559_v45, 0.0  ;;  %v8560_v20 = vadd.f32 %v16642_v14, %v8423_v37  ;;  %v8425_v48 = vadd.f32 %v7857_v59, %v18971_v44  ;;  %v7859_v36 = vadd.f32 %v7858_v55, %v7625_v47  ;;  %v18978_v37 = vld [vmem:[#allocation140_spill] sm:$0xff]  ;;  %v18979_v47 = vld [vmem:[#allocation77_spill] sm:$0xff] }
 0x674   :  { %v7627_v49 = vpop.f32.mrf.mxu0  ;;  %v7860_v58 = vpop.f32.mrf.mxu1 }
 0x675   :  { %v16708_v60 = vpack.c.bf16 %v8679_v4, %v8676_v39  ;;  %v8426_v5 = vadd.f32 %v7859_v36, %v18972_v53  ;;  %v7861_v22 = vadd.f32 %v7860_v58, %v7627_v49  ;;  %v8562_v2 = vadd.f32 %v16635_v16, %v8425_v48  ;;  %v18980_v36 = vld [vmem:[#allocation78_spill] sm:$0xff] }
 0x676   :  { %v7629_v56 = vpop.f32.mrf.mxu0  ;;  %v7862_v43 = vpop.f32.mrf.mxu1  ;;  %v8680_v31 = vmax.f32 %v8560_v20, 0.0 }
 0x677   :  { %v8428_v29 = vadd.f32 %v7861_v22, %v18973_v40  ;;  %v7863_v63 = vadd.f32 %v7862_v43, %v7629_v56  ;;  %v8682_v59 = vmax.f32 %v8562_v2, 0.0  ;;  %v8563_v28 = vadd.f32 %v16642_v14, %v8426_v5  ;;  %v18981_v56 = vld [vmem:[#allocation231_spill] sm:$0xff] }
 0x678   :  { %v7633_v51 = vpop.f32.mrf.mxu0  ;;  %v7866_v25 = vpop.f32.mrf.mxu1  ;;  %8120 = vmatmul.mubr.bf16.gmra.mxu0 %v18974_v1  ;;  %8313 = vmatmul.mubr.bf16.gmra.mxu1 %v18975_v52  ;;  %v16715_v9 = vpack.c.bf16 %v8680_v31, %v8677_v7  ;;  %v18984_v52 = vld [vmem:[#allocation232_spill] sm:$0xff] }
 0x679   :  { %v8565_v57 = vadd.f32 %v16635_v16, %v8428_v29  ;;  %v8429_v15 = vadd.f32 %v7863_v63, %v18976_v30  ;;  %v7867_v45 = vadd.f32 %v7866_v25, %v7633_v51  ;;  %8127 = vmatprep.mubr.bf16.mxu0 %v18977_v0  ;;  %8320 = vmatprep.mubr.bf16.mxu1 %v18978_v37  ;;  %v8683_v53 = vmax.f32 %v8563_v28, 0.0  ;;  %v18982_v63 = vld [vmem:[#allocation141_spill] sm:$0xff]  ;;  %v18983_v51 = vld [vmem:[#allocation142_spill] sm:$0xff] }
 0x67a   :  { %v7635_v24 = vpop.f32.mrf.mxu0  ;;  %v7868_v23 = vpop.f32.mrf.mxu1 }
 0x67b   :  { %v8685_v39 = vmax.f32 %v8565_v57, 0.0  ;;  %v8566_v61 = vadd.f32 %v16642_v14, %v8429_v15  ;;  %v8431_v55 = vadd.f32 %v7867_v45, %v18979_v47  ;;  %v7869_v4 = vadd.f32 %v7868_v23, %v7635_v24  ;;  %v18985_v15 = vld [vmem:[#allocation143_spill] sm:$0xff]  ;;  %v18986_v45 = vld [vmem:[#allocation144_spill] sm:$0xff] }
 0x67c   :  { %v7637_v20 = vpop.f32.mrf.mxu0  ;;  %v7870_v44 = vpop.f32.mrf.mxu1 }
 0x67d   :  { %v16724_v48 = vpack.c.bf16 %v8685_v39, %v8682_v59  ;;  %v8432_v49 = vadd.f32 %v7869_v4, %v18980_v36  ;;  %v7871_v58 = vadd.f32 %v7870_v44, %v7637_v20  ;;  %v8568_v22 = vadd.f32 %v16635_v16, %v8431_v55  ;;  %v18987_v39 = vld [vmem:[#allocation233_spill] sm:$0xff]  ;;  %v18988_v44 = vld [vmem:[#allocation234_spill] sm:$0xff] }
 0x67e   :  { %v7639_v7 = vpop.f32.mrf.mxu0  ;;  %v7872_v5 = vpop.f32.mrf.mxu1  ;;  %v8686_v2 = vmax.f32 %v8566_v61, 0.0 }
 0x67f   :  { %v8434_v43 = vadd.f32 %v7871_v58, %v18981_v56  ;;  %v7873_v31 = vadd.f32 %v7872_v5, %v7639_v7  ;;  %v8688_v0 = vmax.f32 %v8568_v22, 0.0  ;;  %v8569_v37 = vadd.f32 %v16642_v14, %v8432_v49  ;;  %v18989_v56 = vld [vmem:[#allocation235_spill] sm:$0xff] }
 0x680   :  { %v7643_v40 = vpop.f32.mrf.mxu0  ;;  %v7876_v29 = vpop.f32.mrf.mxu1  ;;  %8128 = vmatmul.mubr.bf16.gmra.mxu0 %v18982_v63  ;;  %8321 = vmatmul.mubr.bf16.gmra.mxu1 %v18983_v51  ;;  %v16731_v25 = vpack.c.bf16 %v8686_v2, %v8683_v53  ;;  %v12436_v53 = vld [vmem:[%s17662_s5 + $0x148] sm:$0xff]   ;;  %v18990_v63 = vld [vmem:[#allocation145_spill] sm:$0xff]  ;;  %v18991_v51 = vld [vmem:[#allocation146_spill] sm:$0xff] }
 0x681   :  { %v8571_v1 = vadd.f32 %v16635_v16, %v8434_v43  ;;  %v8435_v57 = vadd.f32 %v7873_v31, %v18984_v52  ;;  %v7877_v30 = vadd.f32 %v7876_v29, %v7643_v40  ;;  %8135 = vmatprep.mubr.bf16.mxu0 %v18985_v15  ;;  %8328 = vmatprep.mubr.bf16.mxu1 %v18986_v45  ;;  %v8689_v49 = vmax.f32 %v8569_v37, 0.0  ;;  %v18993_v45 = vld [vmem:[#allocation147_spill] sm:$0xff] }
 0x682   :  { %v7645_v59 = vpop.f32.mrf.mxu0  ;;  %v7878_v28 = vpop.f32.mrf.mxu1  ;;  %11593 = vmatprep.subr.bf16.mxu1 %v12436_v53 }
 0x683   :  { %v8691_v24 = vmax.f32 %v8571_v1, 0.0  ;;  %v8572_v23 = vadd.f32 %v16642_v14, %v8435_v57  ;;  %v8437_v61 = vadd.f32 %v7877_v30, %v18987_v39  ;;  %v7879_v47 = vadd.f32 %v7878_v28, %v7645_v59  ;;  %v18992_v57 = vld [vmem:[#allocation236_spill] sm:$0xff]  ;;  %11594 = vmatpush3.bf16.msra.mxu1 %v12436_v53  ;;  %v18997_v53 = vld [vmem:[#allocation239_spill] sm:$0xff] }
 0x684   :  { %v7647_v55 = vpop.f32.mrf.mxu0  ;;  %v7880_v4 = vpop.f32.mrf.mxu1 }
 0x685   :  { %v16740_v20 = vpack.c.bf16 %v8691_v24, %v8688_v0  ;;  %v8438_v36 = vadd.f32 %v7879_v47, %v18988_v44  ;;  %v7881_v58 = vadd.f32 %v7880_v4, %v7647_v55  ;;  %v8574_v22 = vadd.f32 %v16635_v16, %v8437_v61  ;;  %v18994_v0 = vld [vmem:[#allocation148_spill] sm:$0xff]  ;;  %v18995_v61 = vld [vmem:[#allocation237_spill] sm:$0xff] }
 0x686   :  { %v7649_v7 = vpop.f32.mrf.mxu0  ;;  %v7882_v5 = vpop.f32.mrf.mxu1  ;;  %v8692_v2 = vmax.f32 %v8572_v23, 0.0 }
 0x687   :  { %v8440_v43 = vadd.f32 %v7881_v58, %v18989_v56  ;;  %v7883_v31 = vadd.f32 %v7882_v5, %v7649_v7  ;;  %v8694_v37 = vmax.f32 %v8574_v22, 0.0  ;;  %v8575_v59 = vadd.f32 %v16642_v14, %v8438_v36 }
 0x688   :  { %v7653_v40 = vpop.f32.mrf.mxu0  ;;  %v7886_v29 = vpop.f32.mrf.mxu1  ;;  %8136 = vmatmul.mubr.bf16.gmra.mxu0 %v18990_v63  ;;  %8329 = vmatmul.mubr.bf16.gmra.mxu1 %v18991_v51  ;;  %v16750_v1 = vpack.c.bf16 %v8692_v2, %v8689_v49  ;;  %v18996_v49 = vld [vmem:[#allocation238_spill] sm:$0xff]  ;;  %v18998_v51 = vld [vmem:[#allocation149_spill] sm:$0xff] }
 0x689   :  { %v8577_v52 = vadd.f32 %v16635_v16, %v8440_v43  ;;  %v8441_v30 = vadd.f32 %v7883_v31, %v18992_v57  ;;  %v7887_v15 = vadd.f32 %v7886_v29, %v7653_v40  ;;  %8143 = vmatprep.mubr.bf16.mxu0 %v18993_v45  ;;  %8336 = vmatprep.mubr.bf16.mxu1 %v18994_v0  ;;  %v8695_v2 = vmax.f32 %v8575_v59, 0.0  ;;  %v19002_v59 = vld [vmem:[#allocation152_spill] sm:$0xff] }
 0x68a   :  { %v7655_v28 = vpop.f32.mrf.mxu0  ;;  %v7888_v24 = vpop.f32.mrf.mxu1 }
 0x68b   :  { %v8697_v23 = vmax.f32 %v8577_v52, 0.0  ;;  %v8578_v39 = vadd.f32 %v16642_v14, %v8441_v30  ;;  %v8443_v47 = vadd.f32 %v7887_v15, %v18995_v61  ;;  %v7889_v55 = vadd.f32 %v7888_v24, %v7655_v28  ;;  %v18999_v52 = vld [vmem:[#allocation150_spill] sm:$0xff]  ;;  %v19000_v15 = vld [vmem:[#allocation76_spill] sm:$0xff] }
 0x68c   :  { %v7657_v4 = vpop.f32.mrf.mxu0  ;;  %v7890_v44 = vpop.f32.mrf.mxu1 }
 0x68d   :  { %v16759_v58 = vpack.c.bf16 %v8697_v23, %v8694_v37  ;;  %v8444_v7 = vadd.f32 %v7889_v55, %v18996_v49  ;;  %v7891_v5 = vadd.f32 %v7890_v44, %v7657_v4  ;;  %v8580_v22 = vadd.f32 %v16635_v16, %v8443_v47  ;;  %v19001_v37 = vld [vmem:[#allocation151_spill] sm:$0xff]  ;;  %v19003_v55 = vld [vmem:[#allocation97_spill] sm:$0xff] }
 0x68e   :  { %v7659_v36 = vpop.f32.mrf.mxu0  ;;  %v7892_v56 = vpop.f32.mrf.mxu1  ;;  %v8698_v43 = vmax.f32 %v8578_v39, 0.0 }
 0x68f   :  { %v8446_v31 = vadd.f32 %v7891_v5, %v18997_v53  ;;  %v7893_v40 = vadd.f32 %v7892_v56, %v7659_v36  ;;  %v8700_v28 = vmax.f32 %v8580_v22, 0.0  ;;  %v8581_v24 = vadd.f32 %v16642_v14, %v8444_v7  ;;  %v19004_v36 = vld [vmem:[#allocation81_spill] sm:$0xff] }
 0x690   :  { %v7663_v29 = vpop.f32.mrf.mxu0  ;;  %v7896_v63 = vpop.f32.mrf.mxu1  ;;  %8144 = vmatmul.mubr.bf16.gmra.mxu0 %v18998_v51  ;;  %8337 = vmatmul.mubr.bf16.gmra.mxu1 %v18999_v52  ;;  %v16766_v57 = vpack.c.bf16 %v8698_v43, %v8695_v2  ;;  %v12447_v52 = vld [vmem:[%s17662_s5 + $0x140] sm:$0xff]  }
 0x691   :  { %v8583_v30 = vadd.f32 %v16635_v16, %v8446_v31  ;;  %v8447_v45 = vadd.f32 %v7893_v40, %v19000_v15  ;;  %v7897_v0 = vadd.f32 %v7896_v63, %v7663_v29  ;;  %8151 = vmatprep.mubr.bf16.mxu0 %v19001_v37  ;;  %8344 = vmatprep.mubr.bf16.mxu1 %v19002_v59  ;;  %v8701_v53 = vmax.f32 %v8581_v24, 0.0  ;;  %v19005_v29 = vld [vmem:[#allocation95_spill] sm:$0xff] }
 0x692   :  { %v7665_v23 = vpop.f32.mrf.mxu0  ;;  %v7898_v39 = vpop.f32.mrf.mxu1  ;;  %11595 = vmatprep.subr.bf16.mxu1 %v12447_v52 }
 0x693   :  { %v8703_v61 = vmax.f32 %v8583_v30, 0.0  ;;  %v8584_v47 = vadd.f32 %v16642_v14, %v8447_v45  ;;  %v8449_v4 = vadd.f32 %v7897_v0, %v19003_v55  ;;  %v7899_v44 = vadd.f32 %v7898_v39, %v7665_v23  ;;  %v19006_v45 = vld [vmem:[#allocation153_spill] sm:$0xff]  ;;  %v19007_v0 = vld [vmem:[#allocation154_spill] sm:$0xff]  ;;  %v19009_v39 = vld [vmem:[#allocation155_spill] sm:$0xff]  ;;  %11596 = vmatpush3.bf16.msra.mxu1 %v12447_v52 }
 0x694   :  { %v7667_v49 = vpop.f32.mrf.mxu0  ;;  %v7900_v5 = vpop.f32.mrf.mxu1  ;;  %v19015_v52 = vld [vmem:[#allocation158_spill] sm:$0xff] }
 0x695   :  { %v16775_v2 = vpack.c.bf16 %v8703_v61, %v8700_v28  ;;  %v8450_v56 = vadd.f32 %v7899_v44, %v19004_v36  ;;  %v7901_v43 = vadd.f32 %v7900_v5, %v7667_v49  ;;  %v8586_v22 = vadd.f32 %v16635_v16, %v8449_v4  ;;  %v19008_v28 = vld [vmem:[#allocation96_spill] sm:$0xff] }
 0x696   :  { %v7669_v31 = vpop.f32.mrf.mxu0  ;;  %v7902_v7 = vpop.f32.mrf.mxu1  ;;  %v8704_v40 = vmax.f32 %v8584_v47, 0.0  ;;  %v19010_v61 = vld [vmem:[#allocation156_spill] sm:$0xff] }
 0x697   :  { %v8452_v63 = vadd.f32 %v7901_v43, %v19005_v29  ;;  %v7903_v51 = vadd.f32 %v7902_v7, %v7669_v31  ;;  %v8706_v47 = vmax.f32 %v8586_v22, 0.0  ;;  %v8587_v55 = vadd.f32 %v16642_v14, %v8450_v56  ;;  %v19011_v36 = vld [vmem:[#allocation240_spill] sm:$0xff]  ;;  %v19012_v29 = vld [vmem:[#allocation241_spill] sm:$0xff] }
 0x698   :  { %v7673_v30 = vpop.f32.mrf.mxu0  ;;  %v7906_v15 = vpop.f32.mrf.mxu1  ;;  %8152 = vmatmul.mubr.bf16.gmra.mxu0 %v19006_v45  ;;  %8345 = vmatmul.mubr.bf16.gmra.mxu1 %v19007_v0  ;;  %v16785_v37 = vpack.c.bf16 %v8704_v40, %v8701_v53  ;;  %v19013_v0 = vld [vmem:[#allocation242_spill] sm:$0xff] }
 0x699   :  { %v8589_v59 = vadd.f32 %v16635_v16, %v8452_v63  ;;  %v8453_v24 = vadd.f32 %v7903_v51, %v19008_v28  ;;  %v7907_v23 = vadd.f32 %v7906_v15, %v7673_v30  ;;  %8159 = vmatprep.mubr.bf16.mxu0 %v19009_v39  ;;  %8352 = vmatprep.mubr.bf16.mxu1 %v19010_v61  ;;  %v8707_v22 = vmax.f32 %v8587_v55, 0.0  ;;  %v19014_v39 = vld [vmem:[#allocation157_spill] sm:$0xff] }
 0x69a   :  { %v7675_v4 = vpop.f32.mrf.mxu0  ;;  %v7908_v44 = vpop.f32.mrf.mxu1 }
 0x69b   :  { %v8709_v49 = vmax.f32 %v8589_v59, 0.0  ;;  %v8590_v5 = vadd.f32 %v16642_v14, %v8453_v24  ;;  %v8455_v43 = vadd.f32 %v7907_v23, %v19011_v36  ;;  %v7909_v53 = vadd.f32 %v7908_v44, %v7675_v4  ;;  %v19016_v4 = vld [vmem:[#allocation243_spill] sm:$0xff]  ;;  %v19018_v36 = vld [vmem:[#allocation160_spill] sm:$0xff] }
 0x69c   :  { %v7677_v31 = vpop.f32.mrf.mxu0  ;;  %v7910_v7 = vpop.f32.mrf.mxu1 }
 0x69d   :  { %v16794_v40 = vpack.c.bf16 %v8709_v49, %v8706_v47  ;;  %v8456_v63 = vadd.f32 %v7909_v53, %v19012_v29  ;;  %v7911_v51 = vadd.f32 %v7910_v7, %v7677_v31  ;;  %v8592_v56 = vadd.f32 %v16635_v16, %v8455_v43  ;;  %v19017_v49 = vld [vmem:[#allocation159_spill] sm:$0xff] }
 0x69e   :  { %v7679_v30 = vpop.f32.mrf.mxu0  ;;  %v7912_v15 = vpop.f32.mrf.mxu1  ;;  %v8710_v45 = vmax.f32 %v8590_v5, 0.0 }
 0x69f   :  { %v8458_v59 = vadd.f32 %v7911_v51, %v19013_v0  ;;  %v7913_v28 = vadd.f32 %v7912_v15, %v7679_v30  ;;  %v8712_v5 = vmax.f32 %v8592_v56, 0.0  ;;  %v8593_v43 = vadd.f32 %v16642_v14, %v8456_v63  ;;  %v19019_v51 = vld [vmem:[#allocation244_spill] sm:$0xff]  ;;  %v16816_v56 = vld [vmem:[%s17662_s5 + $0xb8] sm:$0xff]  }
 0x6a0   :  { %v7683_v24 = vpop.f32.mrf.mxu0  ;;  %v7916_v23 = vpop.f32.mrf.mxu1  ;;  %8160 = vmatmul.mubr.bf16.gmra.mxu0 %v19014_v39  ;;  %8353 = vmatmul.mubr.bf16.gmra.mxu1 %v19015_v52  ;;  %v16801_v61 = vpack.c.bf16 %v8710_v45, %v8707_v22 }
 0x6a1   :  { %v8595_v47 = vadd.f32 %v16635_v16, %v8458_v59  ;;  %v8459_v55 = vadd.f32 %v7913_v28, %v19016_v4  ;;  %v7917_v44 = vadd.f32 %v7916_v23, %v7683_v24  ;;  %8167 = vmatprep.mubr.bf16.mxu0 %v19017_v49  ;;  %8360 = vmatprep.mubr.bf16.mxu1 %v19018_v36  ;;  %v19020_v59 = vld [vmem:[#allocation245_spill] sm:$0xff]  ;;  %v8713_v63 = vmax.f32 %v8593_v43, 0.0  ;;  %v19021_v4 = vld [vmem:[#allocation246_spill] sm:$0xff] }
 0x6a2   :  { %v7685_v53 = vpop.f32.mrf.mxu0  ;;  %v7918_v31 = vpop.f32.mrf.mxu1  ;;  %11605 = vmatprep.subr.bf16.mxu1 %v16816_v56 }
 0x6a3   :  { %v8715_v7 = vmax.f32 %v8595_v47, 0.0  ;;  %v8596_v29 = vadd.f32 %v16642_v14, %v8459_v55  ;;  %v8461_v22 = vadd.f32 %v7917_v44, %v19019_v51  ;;  %v7919_v30 = vadd.f32 %v7918_v31, %v7685_v53  ;;  %v19023_v53 = vld [vmem:[#allocation162_spill] sm:$0xff] }
 0x6a4   :  { %v7687_v15 = vpop.f32.mrf.mxu0  ;;  %v7920_v45 = vpop.f32.mrf.mxu1 }
 0x6a5   :  { %v16810_v0 = vpack.c.bf16 %v8715_v7, %v8712_v5  ;;  %v8462_v28 = vadd.f32 %v7919_v30, %v19020_v59  ;;  %v7921_v24 = vadd.f32 %v7920_v45, %v7687_v15  ;;  %v8598_v23 = vadd.f32 %v16635_v16, %v8461_v22  ;;  %v19022_v5 = vld [vmem:[#allocation161_spill] sm:$0xff]  ;;  %v19024_v7 = vld [vmem:[#allocation247_spill] sm:$0xff] }
 0x6a6   :  { %v7689_v39 = vpop.f32.mrf.mxu0  ;;  %v7922_v52 = vpop.f32.mrf.mxu1  ;;  %v8716_v47 = vmax.f32 %v8596_v29, 0.0  ;;  %v19025_v30 = vld [vmem:[#allocation165_spill] sm:$0xff]  ;;  %v19026_v29 = vld [vmem:[#allocation166_spill] sm:$0xff] }
 0x6a7   :  { %v8464_v55 = vadd.f32 %v7921_v24, %v19021_v4  ;;  %v7923_v44 = vadd.f32 %v7922_v52, %v7689_v39  ;;  %v8718_v15 = vmax.f32 %v8598_v23, 0.0  ;;  %v8599_v45 = vadd.f32 %v16642_v14, %v8462_v28  ;;  %v19027_v4 = vld [vmem:[#allocation248_spill] sm:$0xff] }
 0x6a8   :  { %v7693_v49 = vpop.f32.mrf.mxu0  ;;  %v7926_v36 = vpop.f32.mrf.mxu1  ;;  %8168 = vmatmul.mubr.bf16.gmra.mxu0 %v19022_v5  ;;  %8361 = vmatmul.mubr.bf16.gmra.mxu1 %v19023_v53  ;;  %v16823_v31 = vpack.c.bf16 %v8716_v47, %v8713_v63 }
 0x6a9   :  { %v8601_v43 = vadd.f32 %v16635_v16, %v8464_v55  ;;  %v8465_v51 = vadd.f32 %v7923_v44, %v19024_v7  ;;  %v7927_v22 = vadd.f32 %v7926_v36, %v7693_v49  ;;  %8175 = vmatprep.mubr.bf16.mxu0 %v19025_v30  ;;  %8368 = vmatprep.mubr.bf16.mxu1 %v19026_v29  ;;  %v19028_v44 = vld [vmem:[#allocation249_spill] sm:$0xff]  ;;  %v8719_v7 = vmax.f32 %v8599_v45, 0.0 }
 0x6aa   :  { %v7695_v59 = vpop.f32.mrf.mxu0  ;;  %v7928_v24 = vpop.f32.mrf.mxu1 }
 0x6ab   :  { %v8721_v39 = vmax.f32 %v8601_v43, 0.0  ;;  %v8602_v52 = vadd.f32 %v16642_v14, %v8465_v51  ;;  %v8467_v63 = vadd.f32 %v7927_v22, %v19027_v4  ;;  %v7929_v47 = vadd.f32 %v7928_v24, %v7695_v59  ;;  %v19030_v22 = vld [vmem:[#allocation163_spill] sm:$0xff]  ;;  %v19031_v59 = vld [vmem:[#allocation164_spill] sm:$0xff] }
 0x6ac   :  { %v7697_v5 = vpop.f32.mrf.mxu0  ;;  %v7930_v55 = vpop.f32.mrf.mxu1 }
 0x6ad   :  { %v16832_v53 = vpack.c.bf16 %v8721_v39, %v8718_v15  ;;  %v8468_v49 = vadd.f32 %v7929_v47, %v19028_v44  ;;  %v7931_v36 = vadd.f32 %v7930_v55, %v7697_v5  ;;  %v8604_v23 = vadd.f32 %v16635_v16, %v8467_v63  ;;  %v19032_v39 = vld [vmem:[#allocation251_spill] sm:$0xff]  ;;  %v19033_v63 = vld [vmem:[#allocation169_spill] sm:$0xff]  ;;  %v19034_v47 = vld [vmem:[#allocation170_spill] sm:$0xff] }
 0x6ae   :  { %v7699_v30 = vpop.f32.mrf.mxu0  ;;  %v7932_v28 = vpop.f32.mrf.mxu1  ;;  %v8722_v29 = vmax.f32 %v8602_v52, 0.0 }
 0x6af   :  { %v8470_v43 = vadd.f32 %v7931_v36, %v19029_v19  ;;  %v7933_v8 = vadd.f32 %v7932_v28, %v7699_v30  ;;  %v8724_v52 = vmax.f32 %v8604_v23, 0.0  ;;  %v8605_v19 = vadd.f32 %v16642_v14, %v8468_v49  ;;  %v19035_v30 = vld [vmem:[#allocation252_spill] sm:$0xff] }
 0x6b0   :  { %v7703_v51 = vpop.f32.mrf.mxu0  ;;  %v7936_v17 = vpop.f32.mrf.mxu1  ;;  %8176 = vmatmul.mubr.bf16.gmra.mxu0 %v19030_v22  ;;  %8369 = vmatmul.mubr.bf16.gmra.mxu1 %v19031_v59  ;;  %v16839_v15 = vpack.c.bf16 %v8722_v29, %v8719_v7 }
 0x6b1   :  { %v8607_v24 = vadd.f32 %v16635_v16, %v8470_v43  ;;  %v8471_v45 = vadd.f32 %v7933_v8, %v19032_v39  ;;  %v7937_v4 = vadd.f32 %v7936_v17, %v7703_v51  ;;  %8183 = vmatprep.mubr.bf16.mxu0 %v19033_v63  ;;  %8376 = vmatprep.mubr.bf16.mxu1 %v19034_v47  ;;  %v19036_v17 = vld [vmem:[#allocation253_spill] sm:$0xff]  ;;  %v8725_v59 = vmax.f32 %v8605_v19, 0.0  ;;  %v19037_v47 = vld [vmem:[#allocation254_spill] sm:$0xff] }
 0x6b2   :  { %v7705_v5 = vpop.f32.mrf.mxu0  ;;  %v7938_v55 = vpop.f32.mrf.mxu1 }
 0x6b3   :  { %v8727_v44 = vmax.f32 %v8607_v24, 0.0  ;;  %v8608_v36 = vadd.f32 %v16642_v14, %v8471_v45  ;;  %v8473_v7 = vadd.f32 %v7937_v4, %v19035_v30  ;;  %v7939_v28 = vadd.f32 %v7938_v55, %v7705_v5  ;;  %v19038_v4 = vld [vmem:[#allocation167_spill] sm:$0xff]  ;;  %v19039_v5 = vld [vmem:[#allocation168_spill] sm:$0xff] }
 0x6b4   :  { %v7707_v29 = vpop.f32.mrf.mxu0  ;;  %v7940_v43 = vpop.f32.mrf.mxu1 }
 0x6b5   :  { %v16848_v22 = vpack.c.bf16 %v8727_v44, %v8724_v52  ;;  %v8474_v8 = vadd.f32 %v7939_v28, %v19036_v17  ;;  %v7941_v51 = vadd.f32 %v7940_v43, %v7707_v29  ;;  %v8610_v23 = vadd.f32 %v16635_v16, %v8473_v7  ;;  %v19040_v44 = vld [vmem:[#allocation255_spill] sm:$0xff]  ;;  %v19041_v7 = vld [vmem:[#allocation174_spill] sm:$0xff] }
 0x6b6   :  { %v7709_v39 = vpop.f32.mrf.mxu0  ;;  %v7942_v49 = vpop.f32.mrf.mxu1  ;;  %v8728_v63 = vmax.f32 %v8608_v36, 0.0 }
 0x6b7   :  { %v8476_v24 = vadd.f32 %v7941_v51, %v19037_v47  ;;  %v7943_v18 = vadd.f32 %v7942_v49, %v7709_v39  ;;  %v8730_v36 = vmax.f32 %v8610_v23, 0.0  ;;  %v8611_v28 = vadd.f32 %v16642_v14, %v8474_v8  ;;  %v19042_v39 = vld [vmem:[#allocation256_spill] sm:$0xff] }
 0x6b8   :  { %v7713_v45 = vpop.f32.mrf.mxu0  ;;  %v7946_v46 = vpop.f32.mrf.mxu1  ;;  %8184 = vmatmul.mubr.bf16.gmra.mxu0 %v19038_v4  ;;  %8377 = vmatmul.mubr.bf16.gmra.mxu1 %v19039_v5  ;;  %v16855_v52 = vpack.c.bf16 %v8728_v63, %v8725_v59 }
 0x6b9   :  { %v8613_v55 = vadd.f32 %v16635_v16, %v8476_v24  ;;  %v8477_v19 = vadd.f32 %v7943_v18, %v19040_v44  ;;  %v7947_v30 = vadd.f32 %v7946_v46, %v7713_v45  ;;  %8191 = vmatprep.mubr.bf16.mxu0 %v18929_v11  ;;  %8384 = vmatprep.mubr.bf16.mxu1 %v19041_v7  ;;  %v19043_v46 = vld [vmem:[#allocation257_spill] sm:$0xff]  ;;  %v8731_v45 = vmax.f32 %v8611_v28, 0.0  ;;  %v19044_v44 = vld [vmem:[#allocation258_spill] sm:$0xff] }
 0x6ba   :  { %v7715_v29 = vpop.f32.mrf.mxu0  ;;  %v7948_v43 = vpop.f32.mrf.mxu1 }
 0x6bb   :  { %v8733_v17 = vmax.f32 %v8613_v55, 0.0  ;;  %v8614_v51 = vadd.f32 %v16642_v14, %v8477_v19  ;;  %v8479_v59 = vadd.f32 %v7947_v30, %v19042_v39  ;;  %v7949_v49 = vadd.f32 %v7948_v43, %v7715_v29  ;;  %v19045_v30 = vld [vmem:[#allocation172_spill] sm:$0xff]  ;;  %v19046_v43 = vld [vmem:[#allocation259_spill] sm:$0xff]  ;;  %v19047_v39 = vld [vmem:[#allocation178_spill] sm:$0xff] }
 0x6bc   :  { %v7717_v63 = vpop.f32.mrf.mxu0  ;;  %v7950_v47 = vpop.f32.mrf.mxu1 }
 0x6bd   :  { %v16864_v24 = vpack.c.bf16 %v8733_v17, %v8730_v36  ;;  %v8480_v18 = vadd.f32 %v7949_v49, %v19043_v46  ;;  %v7951_v11 = vadd.f32 %v7950_v47, %v7717_v63  ;;  %v8616_v23 = vadd.f32 %v16635_v16, %v8479_v59  ;;  %v19048_v46 = vld [vmem:[#allocation260_spill] sm:$0xff] }
 0x6be   :  { %v7719_v4 = vpop.f32.mrf.mxu0  ;;  %v7952_v8 = vpop.f32.mrf.mxu1  ;;  %v8734_v5 = vmax.f32 %v8614_v51, 0.0 }
 0x6bf   :  { %v8482_v55 = vadd.f32 %v7951_v11, %v19044_v44  ;;  %v7953_v7 = vadd.f32 %v7952_v8, %v7719_v4  ;;  %v8736_v51 = vmax.f32 %v8616_v23, 0.0  ;;  %v8617_v59 = vadd.f32 %v16642_v14, %v8480_v18 }
 0x6c0   :  { %v7723_v19 = vpop.f32.mrf.mxu0  ;;  %v7956_v38 = vpop.f32.mrf.mxu1  ;;  %8192 = vmatmul.mubr.bf16.gmra.mxu0 %v18935_v21  ;;  %8385 = vmatmul.mubr.bf16.gmra.mxu1 %v19045_v30  ;;  %v16871_v36 = vpack.c.bf16 %v8734_v5, %v8731_v45  ;;  %v19050_v30 = vld [vmem:[#allocation262_spill] sm:$0xff] }
 0x6c1   :  { %v8619_v29 = vadd.f32 %v16635_v16, %v8482_v55  ;;  %v8483_v28 = vadd.f32 %v7953_v7, %v19046_v43  ;;  %v7957_v17 = vadd.f32 %v7956_v38, %v7723_v19  ;;  %8199 = vmatprep.mubr.bf16.mxu0 %v18937_v33  ;;  %8392 = vmatprep.mubr.bf16.mxu1 %v19047_v39  ;;  %v19049_v38 = vld [vmem:[#allocation261_spill] sm:$0xff]  ;;  %v8737_v55 = vmax.f32 %v8617_v59, 0.0 }
 0x6c2   :  { %v7725_v49 = vpop.f32.mrf.mxu0  ;;  %v7958_v63 = vpop.f32.mrf.mxu1 }
 0x6c3   :  { %v8739_v47 = vmax.f32 %v8619_v29, 0.0  ;;  %v8620_v21 = vadd.f32 %v16642_v14, %v8483_v28  ;;  %v8485_v11 = vadd.f32 %v7957_v17, %v19048_v46  ;;  %v7959_v45 = vadd.f32 %v7958_v63, %v7725_v49  ;;  %v19051_v49 = vld [vmem:[#allocation179_spill] sm:$0xff] }
 0x6c4   :  { %v7727_v4 = vpop.f32.mrf.mxu0  ;;  %v7960_v8 = vpop.f32.mrf.mxu1 }
 0x6c5   :  { %v16880_v5 = vpack.c.bf16 %v8739_v47, %v8736_v51  ;;  %v8486_v44 = vadd.f32 %v7959_v45, %v19049_v38  ;;  %v7961_v33 = vadd.f32 %v7960_v8, %v7727_v4  ;;  %v8622_v23 = vadd.f32 %v16635_v16, %v8485_v11 }
 0x6c6   :  { %v7729_v7 = vpop.f32.mrf.mxu0  ;;  %v7962_v18 = vpop.f32.mrf.mxu1  ;;  %v8740_v19 = vmax.f32 %v8620_v21, 0.0 }
 0x6c7   :  { %v8488_v29 = vadd.f32 %v7961_v33, %v19050_v30  ;;  %v7963_v43 = vadd.f32 %v7962_v18, %v7729_v7  ;;  %v8742_v47 = vmax.f32 %v8622_v23, 0.0  ;;  %v8623_v21 = vadd.f32 %v16642_v14, %v8486_v44  ;;  %v19053_v7 = vld [vmem:[#allocation181_spill] sm:$0xff] }
 0x6c8   :  { %v7733_v28 = vpop.f32.mrf.mxu0  ;;  %v7966_v39 = vpop.f32.mrf.mxu1  ;;  %8200 = vmatmul.mubr.bf16.gmra.mxu0 %v18939_v27  ;;  %8393 = vmatmul.mubr.bf16.gmra.mxu1 %v18940_v35  ;;  %v16887_v17 = vpack.c.bf16 %v8740_v19, %v8737_v55  ;;  %v19052_v27 = vld [vmem:[#allocation180_spill] sm:$0xff] }
 0x6c9   :  { %v8625_v51 = vadd.f32 %v16635_v16, %v8488_v29  ;;  %v8489_v59 = vadd.f32 %v7963_v43, %v19051_v49  ;;  %v7967_v63 = vadd.f32 %v7966_v39, %v7733_v28  ;;  %9110 = vmatprep.mubr.bf16.mxu0 %v16731_v25  ;;  %v12411_v25 = vld [vmem:[%s17662_s5 + $0x38] sm:$0xff]   ;;  %v8743_v44 = vmax.f32 %v8623_v21, 0.0  ;;  %v12412_v43 = vld [vmem:[%s17662_s5 + $0x70] sm:$0xff]   ;;  %v19054_v39 = vld [vmem:[#allocation35_spill] sm:$0xff] }
 0x6ca   :  { %v7735_v46 = vpop.f32.mrf.mxu0  ;;  %v7968_v11 = vpop.f32.mrf.mxu1 }
 0x6cb   :  { %v8745_v45 = vmax.f32 %v8625_v51, 0.0  ;;  %v8626_v4 = vadd.f32 %v16642_v14, %v8489_v59  ;;  %v8491_v8 = vadd.f32 %v7967_v63, %v19052_v27  ;;  %v7969_v35 = vadd.f32 %v7968_v11, %v7735_v46  ;;  %v19055_v46 = vld [vmem:[#allocation36_spill] sm:$0xff] }
 0x6cc   :  { %v7737_v38 = vpop.f32.mrf.mxu0  ;;  %v7970_v33 = vpop.f32.mrf.mxu1 }
 0x6cd   :  { %v16895_v55 = vpack.c.bf16 %v8745_v45, %v8742_v47  ;;  %v8492_v18 = vadd.f32 %v7969_v35, %v19053_v7  ;;  %v7971_v19 = vadd.f32 %v7970_v33, %v7737_v38  ;;  %v8628_v23 = vadd.f32 %v16635_v16, %v8491_v8 }
 0x6ce   :  { %v7739_v30 = vpop.f32.mrf.mxu0  ;;  %v7972_v29 = vpop.f32.mrf.mxu1  ;;  %v8746_v28 = vmax.f32 %v8626_v4, 0.0  ;;  %v12413_v4 = vld [vmem:[%s17662_s5 + $0x30] sm:$0xff]  }
 0x6cf   :  { %v8494_v51 = vadd.f32 %v7971_v19, %v19054_v39  ;;  %v7973_v49 = vadd.f32 %v7972_v29, %v7739_v30  ;;  %v8748_v27 = vmax.f32 %v8628_v23, 0.0  ;;  %v8629_v8 = vadd.f32 %v16642_v14, %v8492_v18  ;;  %v19056_v19 = vld [vmem:[#allocation182_spill] sm:$0xff]  ;;  %v19057_v23 = vld [vmem:[#allocation55_spill] sm:$0xff] }
 0x6d0   :  { %v7743_v59 = vpop.f32.mrf.mxu0  ;;  %v7976_v63 = vpop.f32.mrf.mxu1  ;;  %9111 = vmatmul.mubr.bf16.vlgmr.msra.gmra.mxu0 %v16724_v48  ;;  %v16907_v47 = vpack.c.bf16 %v8746_v28, %v8743_v44  ;;  %v12415_v48 = vld [vmem:[%s17662_s5 + $0x68] sm:$0xff]  }
 0x6d1   :  { %v8631_v21 = vadd.f32 %v16635_v16, %v8494_v51  ;;  %v8495_v11 = vadd.f32 %v7973_v49, %v19055_v46  ;;  %v7977_v45 = vadd.f32 %v7976_v63, %v7743_v59  ;;  %9118 = vmatprep.mubr.bf16.mxu0 %v16750_v1  ;;  %11350 = vmatpush3.bf16.msra.mxu0 %v12411_v25  ;;  %v8749_v39 = vmax.f32 %v8629_v8, 0.0  ;;  %v12417_v63 = vld [vmem:[%s17662_s5 + $0x60] sm:$0xff]   ;;  %v19058_v46 = vld [vmem:[#allocation56_spill] sm:$0xff] }
 0x6d2   :  { %v7745_v35 = vpop.f32.mrf.mxu0  ;;  %v7978_v38 = vpop.f32.mrf.mxu1  ;;  %11351 = vmatprep.subr.bf16.mxu0 %v12412_v43  ;;  %v12416_v43 = vld [vmem:[%s17662_s5 + $0x28] sm:$0xff]  }
 0x6d3   :  { %v8751_v33 = vmax.f32 %v8631_v21, 0.0  ;;  %v8632_v7 = vadd.f32 %v16642_v14, %v8495_v11  ;;  %v8497_v1 = vadd.f32 %v7977_v45, %v19056_v19  ;;  %v7979_v25 = vadd.f32 %v7978_v38, %v7745_v35  ;;  %v19059_v38 = vld [vmem:[#allocation41_spill] sm:$0xff] }
 0x6d4   :  { %v7747_v44 = vpop.f32.mrf.mxu0  ;;  %v7980_v30 = vpop.f32.mrf.mxu1 }
 0x6d5   :  { %v16921_v29 = vpack.c.bf16 %v8751_v33, %v8748_v27  ;;  %v8498_v28 = vadd.f32 %v7979_v25, %v19057_v23  ;;  %v7981_v18 = vadd.f32 %v7980_v30, %v7747_v44  ;;  %11352 = vmatpush3.bf16.msra.mxu0 %v12413_v4  ;;  %v8634_v51 = vadd.f32 %v16635_v16, %v8497_v1 }
 0x6d6   :  { %v7749_v49 = vpop.f32.mrf.mxu0  ;;  %v7982_v59 = vpop.f32.mrf.mxu1  ;;  %11353 = vmatprep.subr.bf16.mxu0 %v12415_v48  ;;  %v8752_v21 = vmax.f32 %v8632_v7, 0.0  ;;  %v12418_v48 = vld [vmem:[%s17662_s5 + $0x20] sm:$0xff]  }
 0x6d7   :  { %v8500_v11 = vadd.f32 %v7981_v18, %v19058_v46  ;;  %v7983_v45 = vadd.f32 %v7982_v59, %v7749_v49  ;;  %v8754_v7 = vmax.f32 %v8634_v51, 0.0  ;;  %v8635_v1 = vadd.f32 %v16642_v14, %v8498_v28  ;;  %v19060_v18 = vld [vmem:[#allocation61_spill] sm:$0xff]  ;;  %v19061_v51 = vld [vmem:[#allocation62_spill] sm:$0xff] }
 0x6d8   :  { %v7753_v27 = vpop.f32.mrf.mxu0  ;;  %v7986_v4 = vpop.f32.mrf.mxu1  ;;  %9119 = vmatmul.mubr.bf16.gmra.mxu0 %v16740_v20  ;;  %v16933_v35 = vpack.c.bf16 %v8752_v21, %v8749_v39  ;;  %v12419_v20 = vld [vmem:[%s17662_s5 + $0x58] sm:$0xff]  }
 0x6d9   :  { %v8637_v8 = vadd.f32 %v16635_v16, %v8500_v11  ;;  %v8501_v33 = vadd.f32 %v7983_v45, %v19059_v38  ;;  %v7987_v19 = vadd.f32 %v7986_v4, %v7753_v27  ;;  %9126 = vmatprep.mubr.bf16.mxu0 %v16766_v57  ;;  %11354 = vmatpush3.bf16.msra.mxu0 %v12416_v43  ;;  %v8755_v46 = vmax.f32 %v8635_v1, 0.0  ;;  %v12421_v4 = vld [vmem:[%s17662_s5 + $0x50] sm:$0xff]   ;;  %v19062_v38 = vld [vmem:[#allocation42_spill] sm:$0xff] }
 0x6da   :  { %v7755_v25 = vpop.f32.mrf.mxu0  ;;  %v7988_v44 = vpop.f32.mrf.mxu1  ;;  %11355 = vmatprep.subr.bf16.mxu0 %v12417_v63  ;;  %v12420_v63 = vld [vmem:[%s17662_s5 + $0x18] sm:$0xff]  }
 0x6db   :  { %v8757_v30 = vmax.f32 %v8637_v8, 0.0  ;;  %v8638_v23 = vadd.f32 %v16642_v14, %v8501_v33  ;;  %v8503_v57 = vadd.f32 %v7987_v19, %v19060_v18  ;;  %v7989_v43 = vadd.f32 %v7988_v44, %v7755_v25  ;;  %v19063_v44 = vld [vmem:[#allocation183_spill] sm:$0xff] }
 0x6dc   :  { %v7757_v39 = vpop.f32.mrf.mxu0  ;;  %v7990_v49 = vpop.f32.mrf.mxu1 }
 0x6dd   :  { %v16947_v59 = vpack.c.bf16 %v8757_v30, %v8754_v7  ;;  %v8504_v21 = vadd.f32 %v7989_v43, %v19061_v51  ;;  %v7991_v28 = vadd.f32 %v7990_v49, %v7757_v39  ;;  %11356 = vmatpush3.bf16.msra.mxu0 %v12418_v48  ;;  %v8640_v11 = vadd.f32 %v16635_v16, %v8503_v57 }
 0x6de   :  { %v7759_v45 = vpop.f32.mrf.mxu0  ;;  %v7992_v27 = vpop.f32.mrf.mxu1  ;;  %11357 = vmatprep.subr.bf16.mxu0 %v12419_v20  ;;  %v8758_v8 = vmax.f32 %v8638_v23, 0.0  ;;  %v12422_v20 = vld [vmem:[%s17662_s5 + $0x10] sm:$0xff]  }
 0x6df   :  { %v8506_v33 = vadd.f32 %v7991_v28, %v19062_v38  ;;  %v7993_v19 = vadd.f32 %v7992_v27, %v7759_v45  ;;  %v8760_v23 = vmax.f32 %v8640_v11, 0.0  ;;  %v8641_v57 = vadd.f32 %v16642_v14, %v8504_v21  ;;  %v19064_v28 = vld [vmem:[#allocation184_spill] sm:$0xff]  ;;  %v19065_v11 = vld [vmem:[#allocation59_spill] sm:$0xff] }
 0x6e0   :  { %v7763_v7 = vpop.f32.mrf.mxu0  ;;  %v7996_v48 = vpop.f32.mrf.mxu1  ;;  %9127 = vmatmul.mubr.bf16.gmra.mxu0 %v16759_v58  ;;  %v16959_v25 = vpack.c.bf16 %v8758_v8, %v8755_v46  ;;  %v12423_v58 = vld [vmem:[%s17662_s5 + $0x48] sm:$0xff]  }
 0x6e1   :  { %v8643_v1 = vadd.f32 %v16635_v16, %v8506_v33  ;;  %v8507_v30 = vadd.f32 %v7993_v19, %v19063_v44  ;;  %v7997_v18 = vadd.f32 %v7996_v48, %v7763_v7  ;;  %9134 = vmatprep.mubr.bf16.mxu0 %v16785_v37  ;;  %11358 = vmatpush3.bf16.msra.mxu0 %v12420_v63  ;;  %v8761_v38 = vmax.f32 %v8641_v57, 0.0  ;;  %v12426_v48 = vld [vmem:[%s17662_s5 + $0x40] sm:$0xff]   ;;  %v19066_v44 = vld [vmem:[#allocation60_spill] sm:$0xff] }
 0x6e2   :  { %v7765_v43 = vpop.f32.mrf.mxu0  ;;  %v7998_v39 = vpop.f32.mrf.mxu1  ;;  %11359 = vmatprep.subr.bf16.mxu0 %v12421_v4  ;;  %v12424_v4 = vld [vmem:[%s17662_s5 + $0x8] sm:$0xff]  }
 0x6e3   :  { %v8763_v49 = vmax.f32 %v8643_v1, 0.0  ;;  %v8644_v51 = vadd.f32 %v16642_v14, %v8507_v30  ;;  %v8509_v37 = vadd.f32 %v7997_v18, %v19064_v28  ;;  %v7999_v63 = vadd.f32 %v7998_v39, %v7765_v43  ;;  %v19067_v39 = vld [vmem:[#allocation185_spill] sm:$0xff] }
 0x6e4   :  { %v7767_v46 = vpop.f32.mrf.mxu0  ;;  %v8000_v45 = vpop.f32.mrf.mxu1 }
 0x6e5   :  { %v16973_v27 = vpack.c.bf16 %v8763_v49, %v8760_v23  ;;  %v8510_v8 = vadd.f32 %v7999_v63, %v19065_v11  ;;  %v8001_v21 = vadd.f32 %v8000_v45, %v7767_v46  ;;  %11360 = vmatpush3.bf16.msra.mxu0 %v12422_v20  ;;  %v8646_v33 = vadd.f32 %v16635_v16, %v8509_v37 }
 0x6e6   :  { %v7769_v19 = vpop.f32.mrf.mxu0  ;;  %v8002_v7 = vpop.f32.mrf.mxu1  ;;  %11361 = vmatprep.subr.bf16.mxu0 %v12423_v58  ;;  %v8764_v1 = vmax.f32 %v8644_v51, 0.0  ;;  %v12427_v58 = vld [vmem:[%s17662_s5] sm:$0xff]  }
 0x6e7   :  { %v8512_v30 = vadd.f32 %v8001_v21, %v19066_v44  ;;  %v8003_v18 = vadd.f32 %v8002_v7, %v7769_v19  ;;  %v8766_v51 = vmax.f32 %v8646_v33, 0.0  ;;  %v8647_v37 = vadd.f32 %v16642_v14, %v8510_v8  ;;  %v19068_v21 = vld [vmem:[#allocation65_spill] sm:$0xff]  ;;  %v19069_v33 = vld [vmem:[#allocation66_spill] sm:$0xff] }
 0x6e8   :  { %v7773_v23 = vpop.f32.mrf.mxu0  ;;  %v8006_v20 = vpop.f32.mrf.mxu1  ;;  %9135 = vmatmul.mubr.bf16.gmra.mxu0 %v16775_v2  ;;  %v16985_v43 = vpack.c.bf16 %v8764_v1, %v8761_v38  ;;  %v12428_v2 = vld [vmem:[%s17662_s5 + $0x1f8] sm:$0xff]  }
 0x6e9   :  { %v8649_v57 = vadd.f32 %v16635_v16, %v8512_v30  ;;  %v8513_v49 = vadd.f32 %v8003_v18, %v19067_v39  ;;  %v8007_v28 = vadd.f32 %v8006_v20, %v7773_v23  ;;  %11362 = vmatpush3.bf16.msra.mxu0 %v12424_v4  ;;  %9384 = vmatprep.mubr.bf16.mxu0 %v16664_v41  ;;  %v8767_v44 = vmax.f32 %v8647_v37, 0.0  ;;  %v12430_v23 = vld [vmem:[%s17662_s5 + $0x1f0] sm:$0xff]   ;;  %v19070_v39 = vld [vmem:[#allocation39_spill] sm:$0xff] }
 0x6ea   :  { %v7775_v63 = vpop.f32.mrf.mxu0  ;;  %v8008_v46 = vpop.f32.mrf.mxu1  ;;  %11363 = vmatprep.subr.bf16.mxu0 %v12426_v48  ;;  %v12429_v48 = vld [vmem:[%s17662_s5 + $0x1b8] sm:$0xff]  }
 0x6eb   :  { %v8769_v45 = vmax.f32 %v8649_v57, 0.0  ;;  %v8650_v11 = vadd.f32 %v16642_v14, %v8513_v49  ;;  %v8515_v4 = vadd.f32 %v8007_v28, %v19068_v21  ;;  %v8009_v41 = vadd.f32 %v8008_v46, %v7775_v63 }
 0x6ec   :  { %v7777_v38 = vpop.f32.mrf.mxu0  ;;  %v8010_v19 = vpop.f32.mrf.mxu1 }
 0x6ed   :  { %v16999_v7 = vpack.c.bf16 %v8769_v45, %v8766_v51  ;;  %v8516_v1 = vadd.f32 %v8009_v41, %v19069_v33  ;;  %v8011_v8 = vadd.f32 %v8010_v19, %v7777_v38  ;;  %11364 = vmatpush3.bf16.msra.mxu0 %v12427_v58  ;;  %v8770_v20 = vmax.f32 %v8650_v11, 0.0  ;;  %v12431_v11 = vld [vmem:[%s17662_s5 + $0x1b0] sm:$0xff]  }
 0x6ee   :  { %v7779_v30 = vpop.f32.mrf.mxu0  ;;  %v8012_v18 = vpop.f32.mrf.mxu1  ;;  %11401 = vmatprep.subr.bf16.mxu0 %v12428_v2  ;;  %v8652_v57 = vadd.f32 %v16635_v16, %v8515_v4  ;;  %v19071_v2 = vld [vmem:[#allocation40_spill] sm:$0xff]  ;;  %v12542_v4 = vld [vmem:[%s17663_s4] sm:$0x7] }
 0x6ef   :  { %v8518_v49 = vadd.f32 %v8011_v8, %v19070_v39  ;;  %v8013_v28 = vadd.f32 %v8012_v18, %v7779_v30  ;;  %v8653_v58 = vadd.f32 %v16642_v14, %v8516_v1  ;;  %v17012_v37 = vpack.c.bf16 %v8770_v20, %v8767_v44  ;;  %v19073_v8 = vld [vmem:[#allocation186_spill] sm:$0xff] }
 0x6f0   :  { %v8049_v51 = vpop.f32.mrf.mxu0  ;;  %v8242_v63 = vpop.f32.mrf.mxu1  ;;  %9385 = vmatmul.mubr.bf16.vlgmr.msra.gmra.mxu0 %v16654_v12  ;;  %v19072_v12 = vsub.s32 2, %v18947_v32  ;;  %v8772_v19 = vmax.f32 %v8652_v57, 0.0 }
 0x6f1   :  { %v8655_v46 = vadd.f32 %v16635_v16, %v8518_v49  ;;  %v8519_v45 = vadd.f32 %v8013_v28, %v19071_v2  ;;  %v8243_v21 = vadd.f32 %v8242_v63, %v8049_v51  ;;  %9392 = vmatprep.mubr.bf16.mxu0 %v16680_v3  ;;  %11402 = vmatpush3.bf16.msra.mxu0 %v12429_v48  ;;  %v12432_v3 = vld [vmem:[%s17662_s5 + $0x1e8] sm:$0xff]   ;;  %v8773_v18 = vmax.f32 %v8653_v58, 0.0 }
 0x6f2   :  { %v17025_v41 = vrot.slane %v12542_v4, %v19072_v12  ;;  %v8051_v38 = vpop.f32.mrf.mxu0  ;;  %v8244_v16 = vpop.f32.mrf.mxu1  ;;  %11403 = vmatprep.subr.bf16.mxu0 %v12430_v23  ;;  %v12433_v23 = vld [vmem:[%s17662_s5 + $0x1a8] sm:$0xff]  }
 0x6f3   :  { %v8775_v33 = vmax.f32 %v8655_v46, 0.0  ;;  %v8656_v1 = vadd.f32 %v16642_v14, %v8519_v45  ;;  %v8403_v48 = vadd.f32 %v8243_v21, %v19073_v8  ;;  %v12434_v14 = vld [vmem:[%s17662_s5 + $0x1e0] sm:$0xff]   ;;  %v19074_v51 = vld [vmem:[#allocation63_spill] sm:$0xff]  ;;  %v12437_v38 = vld [vmem:[%s17662_s5 + $0x1d8] sm:$0xff]  }
 0x6f4   :  { %v8052_v44 = vpop.f32.mrf.mxu0  ;;  %v8245_v30 = vpop.f32.mrf.mxu1 }
 0x6f5   :  { %v17032_v20 = vpack.c.bf16 %v8775_v33, %v8772_v19  ;;  %v8246_v32 = vadd.f32 %v8245_v30, %v8052_v44  ;;  %11404 = vmatpush3.bf16.msra.mxu0 %v12431_v11  ;;  %v8776_v39 = vmax.f32 %v8656_v1, 0.0  ;;  %v8540_v57 = vadd.f32 %v17025_v41, %v8403_v48  ;;  %v12435_v11 = vld [vmem:[%s17662_s5 + $0x1a0] sm:$0xff]  }
 0x6f6   :  { %v8054_v49 = vpop.f32.mrf.mxu0  ;;  %v8247_v28 = vpop.f32.mrf.mxu1  ;;  %11405 = vmatprep.subr.bf16.mxu0 %v12432_v3 }
 0x6f7   :  { %v8406_v58 = vadd.f32 %v8246_v32, %v19074_v51  ;;  %v17042_v63 = vpack.c.bf16 %v8776_v39, %v8773_v18  ;;  %v8660_v16 = vmax.f32 %v8540_v57, 0.0  ;;  %v12439_v18 = vld [vmem:[%s17662_s5 + $0x1d0] sm:$0xff]  }
 0x6f8   :  { %v8057_v46 = vpop.f32.mrf.mxu0  ;;  %v8250_v2 = vpop.f32.mrf.mxu1  ;;  %9393 = vmatmul.mubr.bf16.gmra.mxu0 %v16673_v6  ;;  %v19075_v6 = vld [vmem:[#allocation64_spill] sm:$0xff] }
 0x6f9   :  { %v8543_v45 = vadd.f32 %v17025_v41, %v8406_v58  ;;  %v8251_v21 = vadd.f32 %v8250_v2, %v8057_v46  ;;  %9400 = vmatprep.mubr.bf16.mxu0 %v16696_v26  ;;  %11406 = vmatpush3.bf16.msra.mxu0 %v12433_v23  ;;  %v12438_v26 = vld [vmem:[%s17662_s5 + $0x198] sm:$0xff]   ;;  %v12440_v51 = vld [vmem:[%s17662_s5 + $0x190] sm:$0xff]   ;;  %v12441_v2 = vld [vmem:[%s17662_s5 + $0x1c8] sm:$0xff]  }
 0x6fa   :  { %v8059_v4 = vpop.f32.mrf.mxu0  ;;  %v8252_v12 = vpop.f32.mrf.mxu1  ;;  %11407 = vmatprep.subr.bf16.mxu0 %v12434_v14  ;;  %v19076_v23 = vld [vmem:[#allocation45_spill] sm:$0xff] }
 0x6fb   :  { %v8663_v3 = vmax.f32 %v8543_v45, 0.0  ;;  %v8409_v19 = vadd.f32 %v8251_v21, %v19075_v6 }
 0x6fc   :  { %v8060_v33 = vpop.f32.mrf.mxu0  ;;  %v8253_v1 = vpop.f32.mrf.mxu1 }
 0x6fd   :  { %v8254_v8 = vadd.f32 %v8253_v1, %v8060_v33  ;;  %11408 = vmatpush3.bf16.msra.mxu0 %v12435_v11  ;;  %v17057_v48 = vpack.c.bf16 %v8663_v3, %v8660_v16  ;;  %v8546_v32 = vadd.f32 %v17025_v41, %v8409_v19  ;;  %v12442_v16 = vld [vmem:[%s17662_s5 + $0x188] sm:$0xff]   ;;  %v12443_v19 = vld [vmem:[%s17662_s5 + $0x1c0] sm:$0xff]  }
 0x6fe   :  { %v8062_v44 = vpop.f32.mrf.mxu0  ;;  %v8255_v30 = vpop.f32.mrf.mxu1  ;;  %11409 = vmatprep.subr.bf16.mxu0 %v12437_v38  ;;  %v19078_v1 = vld [vmem:[#allocation70_spill] sm:$0xff] }
 0x6ff   :  { %v8412_v39 = vadd.f32 %v8254_v8, %v19076_v23  ;;  %v8666_v45 = vmax.f32 %v8546_v32, 0.0  ;;  %v12444_v32 = vld [vmem:[%s17662_s5 + $0x180] sm:$0xff]  }
 0x700   :  { %v8065_v49 = vpop.f32.mrf.mxu0  ;;  %v8258_v28 = vpop.f32.mrf.mxu1  ;;  %9401 = vmatmul.mubr.bf16.gmra.mxu0 %v16689_v34  ;;  %v19077_v34 = vld [vmem:[#allocation69_spill] sm:$0xff] }
 0x701   :  { %v8549_v14 = vadd.f32 %v17025_v41, %v8412_v39  ;;  %v8259_v57 = vadd.f32 %v8258_v28, %v8065_v49  ;;  %9408 = vmatprep.mubr.bf16.mxu0 %v16715_v9  ;;  %11410 = vmatpush3.bf16.msra.mxu0 %v12438_v26  ;;  %v12445_v49 = vld [vmem:[%s17662_s5 + $0x2b8] sm:$0xff]  }
 0x702   :  { %v8067_v58 = vpop.f32.mrf.mxu0  ;;  %v8260_v46 = vpop.f32.mrf.mxu1  ;;  %11411 = vmatprep.subr.bf16.mxu0 %v12439_v18 }
 0x703   :  { %v8669_v21 = vmax.f32 %v8549_v14, 0.0  ;;  %v8415_v11 = vadd.f32 %v8259_v57, %v19077_v34  ;;  %v12448_v34 = vld [vmem:[%s17662_s5 + $0x2b0] sm:$0xff]  }
 0x704   :  { %v8068_v4 = vpop.f32.mrf.mxu0  ;;  %v8261_v12 = vpop.f32.mrf.mxu1 }
 0x705   :  { %v17074_v38 = vpack.c.bf16 %v8669_v21, %v8666_v45  ;;  %v8262_v9 = vadd.f32 %v8261_v12, %v8068_v4  ;;  %11412 = vmatpush3.bf16.msra.mxu0 %v12440_v51  ;;  %v8552_v33 = vadd.f32 %v17025_v41, %v8415_v11  ;;  %v19080_v4 = vld [vmem:[#allocation187_spill] sm:$0xff] }
 0x706   :  { %v8070_v3 = vpop.f32.mrf.mxu0  ;;  %v8263_v6 = vpop.f32.mrf.mxu1  ;;  %11413 = vmatprep.subr.bf16.mxu0 %v12441_v2 }
 0x707   :  { %v8418_v8 = vadd.f32 %v8262_v9, %v19078_v1  ;;  %v8672_v28 = vmax.f32 %v8552_v33, 0.0 }
 0x708   :  { %v8073_v26 = vpop.f32.mrf.mxu0  ;;  %v8266_v44 = vpop.f32.mrf.mxu1  ;;  %9409 = vmatmul.mubr.bf16.gmra.mxu0 %v16708_v60  ;;  %v19079_v60 = vld [vmem:[#allocation46_spill] sm:$0xff] }
 0x709   :  { %v8555_v30 = vadd.f32 %v17025_v41, %v8418_v8  ;;  %v8267_v18 = vadd.f32 %v8266_v44, %v8073_v26  ;;  %11414 = vmatpush3.bf16.msra.mxu0 %v12442_v16  ;;  %9706 = vmatprep.mubr.bf16.mxu0 %v16801_v61  ;;  %v12446_v61 = vld [vmem:[%s17662_s5 + $0x278] sm:$0xff]   ;;  %v12450_v8 = vld [vmem:[%s17662_s5 + $0x2a8] sm:$0xff]  }
 0x70a   :  { %v8075_v23 = vpop.f32.mrf.mxu0  ;;  %v8268_v39 = vpop.f32.mrf.mxu1  ;;  %11415 = vmatprep.subr.bf16.mxu0 %v12443_v19  ;;  %v12449_v19 = vld [vmem:[%s17662_s5 + $0x270] sm:$0xff]  }
 0x70b   :  { %v8675_v14 = vmax.f32 %v8555_v30, 0.0  ;;  %v8421_v57 = vadd.f32 %v8267_v18, %v19079_v60  ;;  %v12451_v39 = vld [vmem:[%s17662_s5 + $0x268] sm:$0xff]  }
 0x70c   :  { %v8076_v51 = vpop.f32.mrf.mxu0  ;;  %v8269_v58 = vpop.f32.mrf.mxu1 }
 0x70d   :  { %v8270_v46 = vadd.f32 %v8269_v58, %v8076_v51  ;;  %11416 = vmatpush3.bf16.msra.mxu0 %v12444_v32  ;;  %v17097_v2 = vpack.c.bf16 %v8675_v14, %v8672_v28  ;;  %v8558_v11 = vadd.f32 %v17025_v41, %v8421_v57  ;;  %v12452_v14 = vld [vmem:[%s17662_s5 + $0x2a0] sm:$0xff]   ;;  %v19082_v57 = vld [vmem:[#allocation67_spill] sm:$0xff] }
 0x70e   :  { %v8078_v45 = vpop.f32.mrf.mxu0  ;;  %v8271_v21 = vpop.f32.mrf.mxu1  ;;  %11453 = vmatprep.subr.bf16.mxu0 %v12445_v49 }
 0x70f   :  { %v8424_v12 = vadd.f32 %v8270_v46, %v19080_v4  ;;  %v8678_v26 = vmax.f32 %v8558_v11, 0.0  ;;  %v12453_v21 = vld [vmem:[%s17662_s5 + $0x260] sm:$0xff]   ;;  %v12454_v4 = vld [vmem:[%s17662_s5 + $0x298] sm:$0xff]  }
 0x710   :  { %v8081_v9 = vpop.f32.mrf.mxu0  ;;  %v8274_v16 = vpop.f32.mrf.mxu1  ;;  %9707 = vmatmul.mubr.bf16.vlgmr.msra.gmra.mxu0 %v16794_v40  ;;  %v19081_v40 = vld [vmem:[#allocation188_spill] sm:$0xff] }
 0x711   :  { %v8561_v3 = vadd.f32 %v17025_v41, %v8424_v12  ;;  %v8275_v6 = vadd.f32 %v8274_v16, %v8081_v9  ;;  %9714 = vmatprep.mubr.bf16.mxu0 %v16823_v31  ;;  %11454 = vmatpush3.bf16.msra.mxu0 %v12446_v61 }
 0x712   :  { %v8083_v33 = vpop.f32.mrf.mxu0  ;;  %v8276_v1 = vpop.f32.mrf.mxu1  ;;  %11455 = vmatprep.subr.bf16.mxu0 %v12448_v34 }
 0x713   :  { %v8681_v44 = vmax.f32 %v8561_v3, 0.0  ;;  %v8427_v30 = vadd.f32 %v8275_v6, %v19081_v40  ;;  %v12455_v33 = vld [vmem:[%s17662_s5 + $0x258] sm:$0xff]  }
 0x714   :  { %v8084_v18 = vpop.f32.mrf.mxu0  ;;  %v8277_v32 = vpop.f32.mrf.mxu1  ;;  %v19084_v40 = vld [vmem:[#allocation189_spill] sm:$0xff] }
 0x715   :  { %v17114_v23 = vpack.c.bf16 %v8681_v44, %v8678_v26  ;;  %v8278_v31 = vadd.f32 %v8277_v32, %v8084_v18  ;;  %11456 = vmatpush3.bf16.msra.mxu0 %v12449_v19  ;;  %v8564_v60 = vadd.f32 %v17025_v41, %v8427_v30  ;;  %v12456_v26 = vld [vmem:[%s17662_s5 + $0x290] sm:$0xff]  }
 0x716   :  { %v8086_v49 = vpop.f32.mrf.mxu0  ;;  %v8279_v28 = vpop.f32.mrf.mxu1  ;;  %11457 = vmatprep.subr.bf16.mxu0 %v12450_v8 }
 0x717   :  { %v8430_v51 = vadd.f32 %v8278_v31, %v19082_v57  ;;  %v8684_v12 = vmax.f32 %v8564_v60, 0.0  ;;  %v12457_v49 = vld [vmem:[%s17662_s5 + $0x250] sm:$0xff]   ;;  %v12459_v60 = vld [vmem:[%s17662_s5 + $0x288] sm:$0xff]  }
 0x718   :  { %v8089_v58 = vpop.f32.mrf.mxu0  ;;  %v8282_v46 = vpop.f32.mrf.mxu1  ;;  %9715 = vmatmul.mubr.bf16.gmra.mxu0 %v16810_v0  ;;  %v19083_v0 = vld [vmem:[#allocation68_spill] sm:$0xff] }
 0x719   :  { %v8567_v61 = vadd.f32 %v17025_v41, %v8430_v51  ;;  %v8283_v45 = vadd.f32 %v8282_v46, %v8089_v58  ;;  %9722 = vmatprep.mubr.bf16.mxu0 %v16839_v15  ;;  %11458 = vmatpush3.bf16.msra.mxu0 %v12451_v39 }
 0x71a   :  { %v8091_v34 = vpop.f32.mrf.mxu0  ;;  %v8284_v11 = vpop.f32.mrf.mxu1  ;;  %11459 = vmatprep.subr.bf16.mxu0 %v12452_v14 }
 0x71b   :  { %v8687_v9 = vmax.f32 %v8567_v61, 0.0  ;;  %v8433_v16 = vadd.f32 %v8283_v45, %v19083_v0  ;;  %v19086_v0 = vld [vmem:[#allocation43_spill] sm:$0xff] }
 0x71c   :  { %v8092_v3 = vpop.f32.mrf.mxu0  ;;  %v8285_v6 = vpop.f32.mrf.mxu1 }
 0x71d   :  { %v8286_v19 = vadd.f32 %v8285_v6, %v8092_v3  ;;  %11460 = vmatpush3.bf16.msra.mxu0 %v12453_v21  ;;  %v8792_v15 = vpack.c.bf16 %v8687_v9, %v8684_v12  ;;  %v8570_v44 = vadd.f32 %v17025_v41, %v8433_v16  ;;  %v12460_v21 = vld [vmem:[%s17662_s5 + $0x248] sm:$0xff]   ;;  %v12462_v12 = vld [vmem:[%s17662_s5 + $0x280] sm:$0xff]  }
 0x71e   :  { %v8094_v1 = vpop.f32.mrf.mxu0  ;;  %v8287_v8 = vpop.f32.mrf.mxu1  ;;  %11461 = vmatprep.subr.bf16.mxu0 %v12454_v4  ;;  %v12461_v4 = vld [vmem:[%s17662_s5 + $0xb0] sm:$0xff]  }
 0x71f   :  { %v8436_v30 = vadd.f32 %v8286_v19, %v19084_v40  ;;  %11597 = vmatprep.mubr.bf16.mxu1 %v8792_v15  ;;  %v8690_v57 = vmax.f32 %v8570_v44, 0.0  ;;  %v12464_v1 = vld [vmem:[%s17662_s5 + $0xa8] sm:$0xff]   ;;  %v19087_v40 = vld [vmem:[#allocation44_spill] sm:$0xff] }
 0x720   :  { %v8097_v18 = vpop.f32.mrf.mxu0  ;;  %v8290_v32 = vpop.f32.mrf.mxu1  ;;  %9723 = vmatmul.mubr.bf16.gmra.mxu0 %v16832_v53  ;;  %v19085_v53 = vld [vmem:[#allocation74_spill] sm:$0xff] }
 0x721   :  { %v8573_v31 = vadd.f32 %v17025_v41, %v8436_v30  ;;  %v8291_v39 = vadd.f32 %v8290_v32, %v8097_v18  ;;  %9730 = vmatprep.mubr.bf16.mxu0 %v16855_v52  ;;  %11462 = vmatpush3.bf16.msra.mxu0 %v12455_v33  ;;  %v12463_v33 = vld [vmem:[%s17662_s5 + $0x240] sm:$0xff]  }
 0x722   :  { %v8099_v28 = vpop.f32.mrf.mxu0  ;;  %v8292_v14 = vpop.f32.mrf.mxu1  ;;  %11463 = vmatprep.subr.bf16.mxu0 %v12456_v26 }
 0x723   :  { %v8693_v51 = vmax.f32 %v8573_v31, 0.0  ;;  %v8439_v58 = vadd.f32 %v8291_v39, %v19085_v53  ;;  %v12466_v39 = vld [vmem:[%s17662_s5 + $0x338] sm:$0xff]   ;;  %v12467_v14 = vld [vmem:[%s17662_s5 + $0xa0] sm:$0xff]  }
 0x724   :  { %v8100_v46 = vpop.f32.mrf.mxu0  ;;  %v8293_v61 = vpop.f32.mrf.mxu1 }
 0x725   :  { %v8795_v45 = vpack.c.bf16 %v8693_v51, %v8690_v57  ;;  %v8294_v52 = vadd.f32 %v8293_v61, %v8100_v46  ;;  %11464 = vmatpush3.bf16.msra.mxu0 %v12457_v49  ;;  %v8576_v9 = vadd.f32 %v17025_v41, %v8439_v58  ;;  %v19088_v51 = vld [vmem:[#allocation190_spill] sm:$0xff] }
 0x726   :  { %v8102_v34 = vpop.f32.mrf.mxu0  ;;  %v8295_v11 = vpop.f32.mrf.mxu1  ;;  %11465 = vmatprep.subr.bf16.mxu0 %v12459_v60  ;;  %v12468_v60 = vld [vmem:[%s17662_s5 + $0x370] sm:$0xff]  }
 0x727   :  { %v8442_v16 = vadd.f32 %v8294_v52, %v19086_v0  ;;  %11598 = vmatmul.mubr.bf16.vlgmr.msra.gmra.mxu1 %v8795_v45  ;;  %v8696_v26 = vmax.f32 %v8576_v9, 0.0  ;;  %v12469_v52 = vld [vmem:[%s17662_s5 + $0x330] sm:$0xff]  }
 0x728   :  { %11606 = vmatpush3.bf16.msra.mxu1 %v16816_v56  ;;  %v8105_v3 = vpop.f32.mrf.mxu0  ;;  %v8298_v6 = vpop.f32.mrf.mxu1  ;;  %9731 = vmatmul.mubr.bf16.gmra.mxu0 %v16848_v22  ;;  %v12465_v22 = vld [vmem:[%s17662_s5 + $0x378] sm:$0xff]  }
 0x729   :  { %v8579_v19 = vadd.f32 %v17025_v41, %v8442_v16  ;;  %v8299_v15 = vadd.f32 %v8298_v6, %v8105_v3  ;;  %11466 = vmatpush3.bf16.msra.mxu0 %v12460_v21  ;;  %10036 = vmatprep.mubr.bf16.mxu0 %v16871_v36  ;;  %v12470_v21 = vld [vmem:[%s17662_s5 + $0x98] sm:$0xff]  }
 0x72a   :  { %v8107_v8 = vpop.f32.mrf.mxu0  ;;  %v8300_v56 = vpop.f32.mrf.mxu1  ;;  %11607 = vmatprep.subr.bf16.mxu1 %v12461_v4  ;;  %11467 = vmatprep.subr.bf16.mxu0 %v12462_v12 }
 0x72b   :  { %v8699_v44 = vmax.f32 %v8579_v19, 0.0  ;;  %v8445_v36 = vadd.f32 %v8299_v15, %v19087_v40  ;;  %v12473_v19 = vld [vmem:[%s17662_s5 + $0x90] sm:$0xff]  }
 0x72c   :  { %11608 = vmatpush3.bf16.msra.mxu1 %v12461_v4  ;;  %v8108_v30 = vpop.f32.mrf.mxu0  ;;  %v8301_v18 = vpop.f32.mrf.mxu1  ;;  %v19090_v56 = vld [vmem:[#allocation72_spill] sm:$0xff] }
 0x72d   :  { %v8302_v32 = vadd.f32 %v8301_v18, %v8108_v30  ;;  %11468 = vmatpush3.bf16.msra.mxu0 %v12463_v33  ;;  %11609 = vmatprep.subr.bf16.mxu1 %v12464_v1  ;;  %v8798_v31 = vpack.c.bf16 %v8699_v44, %v8696_v26  ;;  %v8582_v57 = vadd.f32 %v17025_v41, %v8445_v36  ;;  %v12474_v26 = vld [vmem:[%s17662_s5 + $0x360] sm:$0xff]   ;;  %v12476_v18 = vld [vmem:[%s17662_s5 + $0x88] sm:$0xff]  }
 0x72e   :  { %v8110_v49 = vpop.f32.mrf.mxu0  ;;  %v8303_v28 = vpop.f32.mrf.mxu1  ;;  %11505 = vmatprep.subr.bf16.mxu0 %v12465_v22 }
 0x72f   :  { %v8448_v53 = vadd.f32 %v8302_v32, %v19088_v51  ;;  %11601 = vmatprep.mubr.bf16.mxu1 %v8798_v31  ;;  %v8702_v4 = vmax.f32 %v8582_v57, 0.0  ;;  %v19091_v28 = vld [vmem:[#allocation49_spill] sm:$0xff]  ;;  %v12479_v51 = vld [vmem:[%s17662_s5 + $0x80] sm:$0xff]  }
 0x730   :  { %11610 = vmatpush3.bf16.msra.mxu1 %v12464_v1  ;;  %v8113_v58 = vpop.f32.mrf.mxu0  ;;  %v8306_v46 = vpop.f32.mrf.mxu1  ;;  %10037 = vmatmul.mubr.bf16.vlgmr.msra.gmra.mxu0 %v16864_v24  ;;  %v12471_v24 = vld [vmem:[%s17662_s5 + $0x368] sm:$0xff]  }
 0x731   :  { %v8585_v61 = vadd.f32 %v17025_v41, %v8448_v53  ;;  %v8307_v45 = vadd.f32 %v8306_v46, %v8113_v58  ;;  %10044 = vmatprep.mubr.bf16.mxu0 %v16887_v17  ;;  %11506 = vmatpush3.bf16.msra.mxu0 %v12466_v39  ;;  %v19089_v17 = vld [vmem:[#allocation71_spill] sm:$0xff]  ;;  %v12475_v39 = vld [vmem:[%s17662_s5 + $0x320] sm:$0xff]  }
 0x732   :  { %v8115_v34 = vpop.f32.mrf.mxu0  ;;  %v8308_v11 = vpop.f32.mrf.mxu1  ;;  %11611 = vmatprep.subr.bf16.mxu1 %v12467_v14  ;;  %11507 = vmatprep.subr.bf16.mxu0 %v12468_v60  ;;  %v12472_v1 = vld [vmem:[%s17662_s5 + $0x328] sm:$0xff]  }
 0x733   :  { %v8705_v12 = vmax.f32 %v8585_v61, 0.0  ;;  %v8451_v9 = vadd.f32 %v8307_v45, %v19089_v17  ;;  %v12478_v61 = vld [vmem:[%s17662_s5 + $0x318] sm:$0xff]   ;;  %v12480_v34 = vld [vmem:[%s17662_s5 + $0x350] sm:$0xff]  }
 0x734   :  { %11612 = vmatpush3.bf16.msra.mxu1 %v12467_v14  ;;  %v8116_v0 = vpop.f32.mrf.mxu0  ;;  %v8309_v16 = vpop.f32.mrf.mxu1  ;;  %v12482_v17 = vld [vmem:[%s17662_s5 + $0x238] sm:$0xff]  }
 0x735   :  { %v8801_v3 = vpack.c.bf16 %v8705_v12, %v8702_v4  ;;  %v8310_v6 = vadd.f32 %v8309_v16, %v8116_v0  ;;  %11508 = vmatpush3.bf16.msra.mxu0 %v12469_v52  ;;  %11613 = vmatprep.subr.bf16.mxu1 %v12470_v21  ;;  %v8588_v8 = vadd.f32 %v17025_v41, %v8451_v9  ;;  %v19092_v52 = vld [vmem:[#allocation50_spill] sm:$0xff]  ;;  %v12481_v16 = vld [vmem:[%s17662_s5 + $0x310] sm:$0xff]  }
 0x736   :  { %v8118_v15 = vpop.f32.mrf.mxu0  ;;  %v8311_v33 = vpop.f32.mrf.mxu1  ;;  %11509 = vmatprep.subr.bf16.mxu0 %v12471_v24 }
 0x737   :  { %v8454_v22 = vadd.f32 %v8310_v6, %v19090_v56  ;;  %11602 = vmatmul.mubr.bf16.gmra.mxu1 %v8801_v3  ;;  %v12485_v56 = vld [vmem:[%s17662_s5 + $0x230] sm:$0xff]  }
 0x738   :  { %11614 = vmatpush3.bf16.msra.mxu1 %v12470_v21  ;;  %v8121_v44 = vpop.f32.mrf.mxu0  ;;  %v8314_v40 = vpop.f32.mrf.mxu1  ;;  %11621 = vmatprep.mubr.bf16.mxu1 %v17057_v48  ;;  %v8708_v48 = vmax.f32 %v8588_v8, 0.0 }
 0x739   :  { %v8591_v36 = vadd.f32 %v17025_v41, %v8454_v22  ;;  %v8315_v30 = vadd.f32 %v8314_v40, %v8121_v44  ;;  %10045 = vmatmul.mubr.bf16.gmra.mxu0 %v16880_v5  ;;  %11615 = vmatprep.subr.bf16.mxu1 %v12473_v19  ;;  %v12477_v5 = vld [vmem:[%s17662_s5 + $0x358] sm:$0xff]   ;;  %v12484_v44 = vld [vmem:[%s17662_s5 + $0x308] sm:$0xff]  }
 0x73a   :  { %10052 = vmatprep.mubr.bf16.mxu0 %v16907_v47  ;;  %11510 = vmatpush3.bf16.msra.mxu0 %v12472_v1  ;;  %v8123_v32 = vpop.f32.mrf.mxu0  ;;  %v8316_v31 = vpop.f32.mrf.mxu1 }
 0x73b   :  { %v8711_v49 = vmax.f32 %v8591_v36, 0.0  ;;  %v8457_v14 = vadd.f32 %v8315_v30, %v19091_v28  ;;  %11511 = vmatprep.subr.bf16.mxu0 %v12474_v26  ;;  %v19094_v36 = vld [vmem:[#allocation192_spill] sm:$0xff] }
 0x73c   :  { %11616 = vmatpush3.bf16.msra.mxu1 %v12473_v19  ;;  %v8124_v60 = vpop.f32.mrf.mxu0  ;;  %v8317_v57 = vpop.f32.mrf.mxu1  ;;  %v19093_v19 = vld [vmem:[#allocation191_spill] sm:$0xff] }
 0x73d   :  { %v8318_v47 = vadd.f32 %v8317_v57, %v8124_v60  ;;  %11617 = vmatprep.subr.bf16.mxu1 %v12476_v18  ;;  %v17229_v53 = vpack.c.bf16 %v8711_v49, %v8708_v48  ;;  %v8594_v45 = vadd.f32 %v17025_v41, %v8457_v14  ;;  %v19095_v60 = vld [vmem:[#allocation193_spill] sm:$0xff] }
 0x73e   :  { %11512 = vmatpush3.bf16.msra.mxu0 %v12475_v39  ;;  %v8126_v58 = vpop.f32.mrf.mxu0  ;;  %v8319_v46 = vpop.f32.mrf.mxu1 }
 0x73f   :  { %v8460_v21 = vadd.f32 %v8318_v47, %v19092_v52  ;;  %11513 = vmatprep.subr.bf16.mxu0 %v12477_v5  ;;  %v8714_v3 = vmax.f32 %v8594_v45, 0.0  ;;  %v19096_v52 = vld [vmem:[#allocation82_spill] sm:$0xff] }
 0x740   :  { %11618 = vmatpush3.bf16.msra.mxu1 %v12476_v18  ;;  %v8129_v11 = vpop.f32.mrf.mxu0  ;;  %v8322_v24 = vpop.f32.mrf.mxu1  ;;  %v12486_v18 = vld [vmem:[%s17662_s5 + $0x340] sm:$0xff]  }
 0x741   :  { %v8597_v4 = vadd.f32 %v17025_v41, %v8460_v21  ;;  %v8323_v12 = vadd.f32 %v8322_v24, %v8129_v11  ;;  %10053 = vmatmul.mubr.bf16.gmra.mxu0 %v16895_v55  ;;  %11619 = vmatprep.subr.bf16.mxu1 %v12479_v51  ;;  %v12483_v55 = vld [vmem:[%s17662_s5 + $0x348] sm:$0xff]  }
 0x742   :  { %10060 = vmatprep.mubr.bf16.mxu0 %v16933_v35  ;;  %11514 = vmatpush3.bf16.msra.mxu0 %v12478_v61  ;;  %v8131_v9 = vpop.f32.mrf.mxu0  ;;  %v8324_v0 = vpop.f32.mrf.mxu1 }
 0x743   :  { %v8717_v6 = vmax.f32 %v8597_v4, 0.0  ;;  %v8463_v15 = vadd.f32 %v8323_v12, %v19093_v19  ;;  %11515 = vmatprep.subr.bf16.mxu0 %v12480_v34  ;;  %v12490_v12 = vld [vmem:[%s17662_s5 + $0x218] sm:$0xff]  }
 0x744   :  { %11620 = vmatpush3.bf16.msra.mxu1 %v12479_v51  ;;  %v8132_v33 = vpop.f32.mrf.mxu0  ;;  %v8325_v1 = vpop.f32.mrf.mxu1 }
 0x745   :  { %v17252_v35 = vpack.c.bf16 %v8717_v6, %v8714_v3  ;;  %v8326_v8 = vadd.f32 %v8325_v1, %v8132_v33  ;;  %11629 = vmatprep.subr.bf16.mxu1 %v12482_v17  ;;  %v8600_v40 = vadd.f32 %v17025_v41, %v8463_v15  ;;  %v19098_v1 = vld [vmem:[#allocation48_spill] sm:$0xff] }
 0x746   :  { %11516 = vmatpush3.bf16.msra.mxu0 %v12481_v16  ;;  %v8134_v22 = vpop.f32.mrf.mxu0  ;;  %v8327_v26 = vpop.f32.mrf.mxu1  ;;  %v19097_v16 = vld [vmem:[#allocation47_spill] sm:$0xff] }
 0x747   :  { %v8466_v30 = vadd.f32 %v8326_v8, %v19094_v36  ;;  %11622 = vmatmul.mubr.bf16.vlgmr.msra.gmra.mxu1 %v17074_v38  ;;  %11517 = vmatprep.subr.bf16.mxu0 %v12483_v55  ;;  %v12488_v38 = vld [vmem:[%s17662_s5 + $0x228] sm:$0xff]   ;;  %v8720_v14 = vmax.f32 %v8600_v40, 0.0 }
 0x748   :  { %11625 = vmatprep.mubr.bf16.mxu1 %v17097_v2  ;;  %11630 = vmatpush3.bf16.msra.mxu1 %v12482_v17  ;;  %v8137_v32 = vpop.f32.mrf.mxu0  ;;  %v8330_v31 = vpop.f32.mrf.mxu1  ;;  %v12487_v2 = vld [vmem:[%s17662_s5 + $0x300] sm:$0xff]   ;;  %v12492_v40 = vld [vmem:[%s17662_s5 + $0x208] sm:$0xff]  }
 0x749   :  { %v8603_v39 = vadd.f32 %v17025_v41, %v8466_v30  ;;  %v8331_v48 = vadd.f32 %v8330_v31, %v8137_v32  ;;  %10061 = vmatmul.mubr.bf16.gmra.mxu0 %v16921_v29  ;;  %11631 = vmatprep.subr.bf16.mxu1 %v12485_v56  ;;  %v19099_v31 = vld [vmem:[#allocation194_spill] sm:$0xff] }
 0x74a   :  { %11518 = vmatpush3.bf16.msra.mxu0 %v12484_v44  ;;  %10366 = vmatprep.mubr.bf16.mxu0 %v16959_v25  ;;  %v8139_v49 = vpop.f32.mrf.mxu0  ;;  %v8332_v28 = vpop.f32.mrf.mxu1  ;;  %v12489_v25 = vld [vmem:[%s17662_s5 + $0x220] sm:$0xff]  }
 0x74b   :  { %v8723_v5 = vmax.f32 %v8603_v39, 0.0  ;;  %v8469_v57 = vadd.f32 %v8331_v48, %v19095_v60  ;;  %11519 = vmatprep.subr.bf16.mxu0 %v12486_v18 }
 0x74c   :  { %11632 = vmatpush3.bf16.msra.mxu1 %v12485_v56  ;;  %v8140_v29 = vpop.f32.mrf.mxu0  ;;  %v8333_v47 = vpop.f32.mrf.mxu1 }
 0x74d   :  { %v8334_v51 = vadd.f32 %v8333_v47, %v8140_v29  ;;  %11633 = vmatprep.subr.bf16.mxu1 %v12488_v38  ;;  %v17280_v58 = vpack.c.bf16 %v8723_v5, %v8720_v14  ;;  %v8606_v45 = vadd.f32 %v17025_v41, %v8469_v57  ;;  %v19100_v5 = vld [vmem:[#allocation79_spill] sm:$0xff] }
 0x74e   :  { %11520 = vmatpush3.bf16.msra.mxu0 %v12487_v2  ;;  %v8142_v46 = vpop.f32.mrf.mxu0  ;;  %v8335_v61 = vpop.f32.mrf.mxu1 }
 0x74f   :  { %v8472_v21 = vadd.f32 %v8334_v51, %v19096_v52  ;;  %11626 = vmatmul.mubr.bf16.gmra.mxu1 %v17114_v23  ;;  %v8726_v23 = vmax.f32 %v8606_v45, 0.0 }
 0x750   :  { %11634 = vmatpush3.bf16.msra.mxu1 %v12488_v38  ;;  %11645 = vmatprep.mubr.bf16.mxu1 %v17229_v53  ;;  %v8145_v34 = vpop.f32.mrf.mxu0  ;;  %v8338_v11 = vpop.f32.mrf.mxu1 }
 0x751   :  { %v8609_v24 = vadd.f32 %v17025_v41, %v8472_v21  ;;  %v8339_v4 = vadd.f32 %v8338_v11, %v8145_v34  ;;  %10367 = vmatmul.mubr.bf16.vlgmr.msra.gmra.mxu0 %v16947_v59  ;;  %11635 = vmatprep.subr.bf16.mxu1 %v12489_v25  ;;  %v12491_v59 = vld [vmem:[%s17662_s5 + $0x210] sm:$0xff]  }
 0x752   :  { %10374 = vmatprep.mubr.bf16.mxu0 %v16985_v43  ;;  %v8147_v17 = vpop.f32.mrf.mxu0  ;;  %v8340_v9 = vpop.f32.mrf.mxu1 }
 0x753   :  { %v8729_v0 = vmax.f32 %v8609_v24, 0.0  ;;  %v8475_v53 = vadd.f32 %v8339_v4, %v19097_v16 }
 0x754   :  { %11636 = vmatpush3.bf16.msra.mxu1 %v12489_v25  ;;  %v8148_v3 = vpop.f32.mrf.mxu0  ;;  %v8341_v6 = vpop.f32.mrf.mxu1  ;;  %v12494_v25 = vld [vmem:[%s17662_s5 + $0x2f8] sm:$0xff]  }
 0x755   :  { %v17293_v19 = vpack.c.bf16 %v8729_v0, %v8726_v23  ;;  %v8342_v15 = vadd.f32 %v8341_v6, %v8148_v3  ;;  %11637 = vmatprep.subr.bf16.mxu1 %v12490_v12  ;;  %v8612_v43 = vadd.f32 %v17025_v41, %v8475_v53  ;;  %v12496_v53 = vld [vmem:[%s17662_s5 + $0x2e8] sm:$0xff]  }
 0x756   :  { %v8150_v55 = vpop.f32.mrf.mxu0  ;;  %v8343_v33 = vpop.f32.mrf.mxu1 }
 0x757   :  { %v8478_v8 = vadd.f32 %v8342_v15, %v19098_v1  ;;  %v8732_v18 = vmax.f32 %v8612_v43, 0.0 }
 0x758   :  { %11638 = vmatpush3.bf16.msra.mxu1 %v12490_v12  ;;  %v8153_v56 = vpop.f32.mrf.mxu0  ;;  %v8346_v22 = vpop.f32.mrf.mxu1 }
 0x759   :  { %v8615_v26 = vadd.f32 %v17025_v41, %v8478_v8  ;;  %v8347_v44 = vadd.f32 %v8346_v22, %v8153_v56  ;;  %10375 = vmatmul.mubr.bf16.gmra.mxu0 %v16973_v27  ;;  %11639 = vmatprep.subr.bf16.mxu1 %v12491_v59  ;;  %v12493_v27 = vld [vmem:[%s17662_s5 + $0x200] sm:$0xff]  }
 0x75a   :  { %10382 = vmatprep.mubr.bf16.mxu0 %v17012_v37  ;;  %v8155_v36 = vpop.f32.mrf.mxu0  ;;  %v8348_v30 = vpop.f32.mrf.mxu1 }
 0x75b   :  { %v8735_v32 = vmax.f32 %v8615_v26, 0.0  ;;  %v8481_v39 = vadd.f32 %v8347_v44, %v19099_v31 }
 0x75c   :  { %11640 = vmatpush3.bf16.msra.mxu1 %v12491_v59  ;;  %v8156_v48 = vpop.f32.mrf.mxu0  ;;  %v8349_v38 = vpop.f32.mrf.mxu1 }
 0x75d   :  { %v8350_v49 = vadd.f32 %v8349_v38, %v8156_v48  ;;  %11641 = vmatprep.subr.bf16.mxu1 %v12492_v40  ;;  %v8816_v28 = vpack.c.bf16 %v8735_v32, %v8732_v18  ;;  %v8618_v37 = vadd.f32 %v17025_v41, %v8481_v39  ;;  %v12499_v38 = vld [vmem:[%s17662_s5 + $0x2d0] sm:$0xff]  }
 0x75e   :  { %v8158_v2 = vpop.f32.mrf.mxu0  ;;  %v8351_v14 = vpop.f32.mrf.mxu1 }
 0x75f   :  { %v8484_v60 = vadd.f32 %v8350_v49, %v19100_v5  ;;  %v8738_v45 = vmax.f32 %v8618_v37, 0.0 }
 0x760   :  { %11642 = vmatpush3.bf16.msra.mxu1 %v12492_v40  ;;  %v8161_v57 = vpop.f32.mrf.mxu0  ;;  %v8354_v29 = vpop.f32.mrf.mxu1  ;;  %v12498_v40 = vld [vmem:[%s17662_s5 + $0x2d8] sm:$0xff]  }
 0x761   :  { %v8621_v47 = vadd.f32 %v17025_v41, %v8484_v60  ;;  %v8355_v51 = vadd.f32 %v8354_v29, %v8161_v57  ;;  %10383 = vmatmul.mubr.bf16.gmra.mxu0 %v16999_v7  ;;  %11643 = vmatprep.subr.bf16.mxu1 %v12493_v27  ;;  %v12495_v7 = vld [vmem:[%s17662_s5 + $0x2f0] sm:$0xff]   ;;  %v12500_v60 = vld [vmem:[%s17662_s5 + $0x2c8] sm:$0xff]  }
 0x762   :  { %10390 = vmatprep.mubr.bf16.mxu0 %v17042_v63  ;;  %v8163_v46 = vpop.f32.mrf.mxu0  ;;  %v8356_v61 = vpop.f32.mrf.mxu1 }
 0x763   :  { %v8741_v52 = vmax.f32 %v8621_v47, 0.0  ;;  %v8487_v21 = vadd.f32 %v8355_v51, %v16513_v50 }
 0x764   :  { %11644 = vmatpush3.bf16.msra.mxu1 %v12493_v27  ;;  %v8164_v34 = vpop.f32.mrf.mxu0  ;;  %v8357_v11 = vpop.f32.mrf.mxu1 }
 0x765   :  { %v17319_v24 = vpack.c.bf16 %v8741_v52, %v8738_v45  ;;  %v8358_v4 = vadd.f32 %v8357_v11, %v8164_v34  ;;  %11653 = vmatprep.subr.bf16.mxu1 %v12494_v25  ;;  %v8624_v63 = vadd.f32 %v17025_v41, %v8487_v21  ;;  %v12501_v52 = vld [vmem:[%s17662_s5 + $0x2c0] sm:$0xff]  }
 0x766   :  { %v8166_v12 = vpop.f32.mrf.mxu0  ;;  %v8359_v17 = vpop.f32.mrf.mxu1 }
 0x767   :  { %v8490_v9 = vadd.f32 %v8358_v4, %v16516_v10  ;;  %11646 = vmatmul.mubr.bf16.vlgmr.msra.gmra.mxu1 %v17252_v35  ;;  %v8744_v10 = vmax.f32 %v8624_v63, 0.0 }
 0x768   :  { %11649 = vmatprep.mubr.bf16.mxu1 %v17280_v58  ;;  %11654 = vmatpush3.bf16.msra.mxu1 %v12494_v25  ;;  %v8169_v50 = vpop.f32.mrf.mxu0  ;;  %v8362_v23 = vpop.f32.mrf.mxu1  ;;  %v19101_v25 = vld [vmem:[#allocation80_spill] sm:$0xff] }
 0x769   :  { %v8627_v0 = vadd.f32 %v17025_v41, %v8490_v9  ;;  %v8363_v16 = vadd.f32 %v8362_v23, %v8169_v50  ;;  %10391 = vmatmul.mubr.bf16.gmra.mxu0 %v17032_v20  ;;  %11655 = vmatprep.subr.bf16.mxu1 %v12495_v7  ;;  %v12497_v20 = vld [vmem:[%s17662_s5 + $0x2e0] sm:$0xff]   ;;  %v12502_v23 = vld [vmem:[%s17662_s5 + $0x3b8] sm:$0xff]  }
 0x76a   :  { %v8171_v3 = vpop.f32.mrf.mxu0  ;;  %v8364_v6 = vpop.f32.mrf.mxu1 }
 0x76b   :  { %v8747_v15 = vmax.f32 %v8627_v0, 0.0  ;;  %v8493_v35 = vadd.f32 %v8363_v16, %v16523_v54  ;;  %v19103_v6 = vld [vmem:[#allocation85_spill] sm:$0xff] }
 0x76c   :  { %11656 = vmatpush3.bf16.msra.mxu1 %v12495_v7  ;;  %v8172_v58 = vpop.f32.mrf.mxu0  ;;  %v8365_v59 = vpop.f32.mrf.mxu1  ;;  %v19102_v7 = vld [vmem:[#allocation53_spill] sm:$0xff] }
 0x76d   :  { %v8366_v55 = vadd.f32 %v8365_v59, %v8172_v58  ;;  %11657 = vmatprep.subr.bf16.mxu1 %v12496_v53  ;;  %v17337_v33 = vpack.c.bf16 %v8747_v15, %v8744_v10  ;;  %v8630_v8 = vadd.f32 %v17025_v41, %v8493_v35 }
 0x76e   :  { %v8174_v43 = vpop.f32.mrf.mxu0  ;;  %v8367_v1 = vpop.f32.mrf.mxu1 }
 0x76f   :  { %v8496_v56 = vadd.f32 %v8366_v55, %v16535_v42  ;;  %11650 = vmatmul.mubr.bf16.gmra.mxu1 %v17293_v19  ;;  %v8750_v18 = vmax.f32 %v8630_v8, 0.0  ;;  %v12503_v55 = vld [vmem:[%s17662_s5 + $0x3b0] sm:$0xff]   ;;  %v19104_v8 = vld [vmem:[#allocation86_spill] sm:$0xff] }
 0x770   :  { %11658 = vmatpush3.bf16.msra.mxu1 %v12496_v53  ;;  %11669 = vmatprep.mubr.bf16.mxu1 %v8816_v28  ;;  %v8177_v54 = vpop.f32.mrf.mxu0  ;;  %v8370_v22 = vpop.f32.mrf.mxu1 }
 0x771   :  { %v8633_v26 = vadd.f32 %v17025_v41, %v8496_v56  ;;  %v8371_v44 = vadd.f32 %v8370_v22, %v8177_v54  ;;  %11659 = vmatprep.subr.bf16.mxu1 %v12497_v20 }
 0x772   :  { %v8179_v36 = vpop.f32.mrf.mxu0  ;;  %v8372_v30 = vpop.f32.mrf.mxu1 }
 0x773   :  { %v8753_v32 = vmax.f32 %v8633_v26, 0.0  ;;  %v8499_v42 = vadd.f32 %v8371_v44, %v16549_v62 }
 0x774   :  { %11660 = vmatpush3.bf16.msra.mxu1 %v12497_v20  ;;  %v8180_v19 = vpop.f32.mrf.mxu0  ;;  %v8373_v31 = vpop.f32.mrf.mxu1 }
 0x775   :  { %v17347_v39 = vpack.c.bf16 %v8753_v32, %v8750_v18  ;;  %v8374_v48 = vadd.f32 %v8373_v31, %v8180_v19  ;;  %11661 = vmatprep.subr.bf16.mxu1 %v12498_v40  ;;  %v8636_v28 = vadd.f32 %v17025_v41, %v8499_v42  ;;  %v19105_v42 = vld [vmem:[#allocation54_spill] sm:$0xff] }
 0x776   :  { %v8182_v49 = vpop.f32.mrf.mxu0  ;;  %v8375_v27 = vpop.f32.mrf.mxu1 }
 0x777   :  { %v8502_v2 = vadd.f32 %v8374_v48, %v16558_v13  ;;  %v8756_v47 = vmax.f32 %v8636_v28, 0.0  ;;  %v12505_v48 = vld [vmem:[%s17662_s5 + $0x3a0] sm:$0xff]  }
 0x778   :  { %11662 = vmatpush3.bf16.msra.mxu1 %v12498_v40  ;;  %v8185_v14 = vpop.f32.mrf.mxu0  ;;  %v8378_v62 = vpop.f32.mrf.mxu1  ;;  %v12504_v40 = vld [vmem:[%s17662_s5 + $0x3a8] sm:$0xff]  }
 0x779   :  { %v8639_v37 = vadd.f32 %v17025_v41, %v8502_v2  ;;  %v8379_v5 = vadd.f32 %v8378_v62, %v8185_v14  ;;  %11663 = vmatprep.subr.bf16.mxu1 %v12499_v38  ;;  %v19106_v2 = vld [vmem:[#allocation195_spill] sm:$0xff] }
 0x77a   :  { %v8187_v57 = vpop.f32.mrf.mxu0  ;;  %v8380_v29 = vpop.f32.mrf.mxu1 }
 0x77b   :  { %v8759_v51 = vmax.f32 %v8639_v37, 0.0  ;;  %v8505_v46 = vadd.f32 %v8379_v5, %v19101_v25  ;;  %v12506_v5 = vld [vmem:[%s17662_s5 + $0x398] sm:$0xff]  }
 0x77c   :  { %11664 = vmatpush3.bf16.msra.mxu1 %v12499_v38  ;;  %v8188_v61 = vpop.f32.mrf.mxu0  ;;  %v8381_v13 = vpop.f32.mrf.mxu1 }
 0x77d   :  { %v8382_v45 = vadd.f32 %v8381_v13, %v8188_v61  ;;  %11665 = vmatprep.subr.bf16.mxu1 %v12500_v60  ;;  %v8828_v21 = vpack.c.bf16 %v8759_v51, %v8756_v47  ;;  %v8642_v4 = vadd.f32 %v17025_v41, %v8505_v46  ;;  %v12508_v13 = vld [vmem:[%s17662_s5 + $0x388] sm:$0xff]  }
 0x77e   :  { %v8190_v34 = vpop.f32.mrf.mxu0  ;;  %v8383_v11 = vpop.f32.mrf.mxu1 }
 0x77f   :  { %v8508_v12 = vadd.f32 %v8382_v45, %v19102_v7  ;;  %v8762_v53 = vmax.f32 %v8642_v4, 0.0  ;;  %v12509_v34 = vld [vmem:[%s17662_s5 + $0x380] sm:$0xff]  }
 0x780   :  { %11666 = vmatpush3.bf16.msra.mxu1 %v12500_v60  ;;  %v8193_v17 = vpop.f32.mrf.mxu0  ;;  %v8386_v63 = vpop.f32.mrf.mxu1 }
 0x781   :  { %v8645_v9 = vadd.f32 %v17025_v41, %v8508_v12  ;;  %v8387_v50 = vadd.f32 %v8386_v63, %v8193_v17  ;;  %11667 = vmatprep.subr.bf16.mxu1 %v12501_v52 }
 0x782   :  { %v8195_v0 = vpop.f32.mrf.mxu0  ;;  %v8388_v16 = vpop.f32.mrf.mxu1 }
 0x783   :  { %v8765_v3 = vmax.f32 %v8645_v9, 0.0  ;;  %v8511_v10 = vadd.f32 %v8387_v50, %v19103_v6 }
 0x784   :  { %11668 = vmatpush3.bf16.msra.mxu1 %v12501_v52  ;;  %v8196_v15 = vpop.f32.mrf.mxu0  ;;  %v8389_v35 = vpop.f32.mrf.mxu1 }
 0x785   :  { %v17369_v58 = vpack.c.bf16 %v8765_v3, %v8762_v53  ;;  %v8390_v59 = vadd.f32 %v8389_v35, %v8196_v15  ;;  %11677 = vmatprep.subr.bf16.mxu1 %v12502_v23  ;;  %v8648_v1 = vadd.f32 %v17025_v41, %v8511_v10 }
 0x786   :  { %v8198_v20 = vpop.f32.mrf.mxu0  ;;  %v8391_v43 = vpop.f32.mrf.mxu1 }
 0x787   :  { %v8514_v56 = vadd.f32 %v8390_v59, %v19104_v8  ;;  %11670 = vmatmul.mubr.bf16.vlgmr.msra.gmra.mxu1 %v17319_v24  ;;  %v8768_v18 = vmax.f32 %v8648_v1, 0.0 }
 0x788   :  { %11673 = vmatprep.mubr.bf16.mxu1 %v17337_v33  ;;  %11678 = vmatpush3.bf16.msra.mxu1 %v12502_v23  ;;  %v8201_v54 = vpop.f32.mrf.mxu0  ;;  %v8394_v22 = vpop.f32.mrf.mxu1 }
 0x789   :  { %v8651_v26 = vadd.f32 %v17025_v41, %v8514_v56  ;;  %v8395_v44 = vadd.f32 %v8394_v22, %v8201_v54  ;;  %11679 = vmatprep.subr.bf16.mxu1 %v12503_v55 }
 0x78a   :  { %v8203_v36 = vpop.f32.mrf.mxu0  ;;  %v8396_v30 = vpop.f32.mrf.mxu1 }
 0x78b   :  { %v8771_v32 = vmax.f32 %v8651_v26, 0.0  ;;  %v8517_v19 = vadd.f32 %v8395_v44, %v19105_v42 }
 0x78c   :  { %11680 = vmatpush3.bf16.msra.mxu1 %v12503_v55  ;;  %v8204_v24 = vpop.f32.mrf.mxu0  ;;  %v8397_v33 = vpop.f32.mrf.mxu1 }
 0x78d   :  { %v8398_v31 = vadd.f32 %v8397_v33, %v8204_v24  ;;  %11681 = vmatprep.subr.bf16.mxu1 %v12504_v40  ;;  %v8834_v38 = vpack.c.bf16 %v8771_v32, %v8768_v18  ;;  %v8654_v28 = vadd.f32 %v17025_v41, %v8517_v19 }
 0x78e   :  { %v8206_v49 = vpop.f32.mrf.mxu0  ;;  %v8399_v27 = vpop.f32.mrf.mxu1 }
 0x78f   :  { %v8520_v14 = vadd.f32 %v8398_v31, %v19106_v2  ;;  %11674 = vmatmul.mubr.bf16.gmra.mxu1 %v17347_v39  ;;  %v8774_v57 = vmax.f32 %v8654_v28, 0.0  ;;  %v12507_v39 = vld [vmem:[%s17662_s5 + $0x390] sm:$0xff]   ;;  %v10510_v27 = vld [vmem:[%s17664_s7 + $0x78] sm:$0xff] }
 0x790   :  { %11682 = vmatpush3.bf16.msra.mxu1 %v12504_v40  ;;  %11693 = vmatprep.mubr.bf16.mxu1 %v8828_v21  ;;  %v11313_v62 = vpop.f32.mrf.mxu0 }
 0x791   :  { %v8657_v37 = vadd.f32 %v17025_v41, %v8520_v14  ;;  %11683 = vmatprep.subr.bf16.mxu1 %v12505_v48  ;;  %11701 = vmatprep.subr.mxu0 %v10510_v27  ;;  %v10509_v14 = vld [vmem:[%s17664_s7 + $0x70] sm:$0xff] }
 0x792   :  { %v11314_v60 = vpop.f32.mrf.mxu0  ;;  %11702 = vmatpush3.msra.mxu0 %v10510_v27 }
 0x793   :  { %v8777_v29 = vmax.f32 %v8657_v37, 0.0  ;;  %v17393_v47 = vadd.f32 %v11314_v60, %v11313_v62  ;;  %11703 = vmatprep.subr.mxu0 %v10509_v14  ;;  %v10508_v37 = vld [vmem:[%s17664_s7 + $0x68] sm:$0xff] }
 0x794   :  { %11684 = vmatpush3.bf16.msra.mxu1 %v12505_v48  ;;  %v11316_v51 = vpop.f32.mrf.mxu0  ;;  %11704 = vmatpush3.msra.mxu0 %v10509_v14 }
 0x795   :  { %v8837_v25 = vpack.c.bf16 %v8777_v29, %v8774_v57  ;;  %11685 = vmatprep.subr.bf16.mxu1 %v12506_v5  ;;  %11705 = vmatprep.subr.mxu0 %v10508_v37  ;;  %v10506_v29 = vld [vmem:[%s17664_s7 + $0x58] sm:$0xff] }
 0x796   :  { %v11317_v46 = vpop.f32.mrf.mxu0  ;;  %11706 = vmatpush3.msra.mxu0 %v10508_v37 }
 0x797   :  { %v17398_v41 = vadd.f32 %v11317_v46, %v11316_v51 }
 0x798   :  { %11686 = vmatpush3.bf16.msra.mxu1 %v12506_v5  ;;  %v11319_v61 = vpop.f32.mrf.mxu0  ;;  %v10507_v5 = vld [vmem:[%s17664_s7 + $0x60] sm:$0xff] }
 0x799   :  { %11687 = vmatprep.subr.bf16.mxu1 %v12507_v39  ;;  %11707 = vmatprep.subr.mxu0 %v10507_v5 }
 0x79a   :  { %v11320_v45 = vpop.f32.mrf.mxu0  ;;  %11708 = vmatpush3.msra.mxu0 %v10507_v5 }
 0x79b   :  { %v17403_v52 = vadd.f32 %v11320_v45, %v11319_v61  ;;  %11709 = vmatprep.subr.mxu0 %v10506_v29  ;;  %v10504_v61 = vld [vmem:[%s17664_s7 + $0x48] sm:$0xff]  ;;  %v10503_v45 = vld [vmem:[%s17664_s7 + $0x40] sm:$0xff] }
 0x79c   :  { %11688 = vmatpush3.bf16.msra.mxu1 %v12507_v39  ;;  %v11322_v21 = vpop.f32.mrf.mxu0  ;;  %11710 = vmatpush3.msra.mxu0 %v10506_v29 }
 0x79d   :  { %11689 = vmatprep.subr.bf16.mxu1 %v12508_v13 }
 0x79e   :  { %v11323_v11 = vpop.f32.mrf.mxu0 }
 0x79f   :  { %v17408_v4 = vadd.f32 %v11323_v11, %v11322_v21  ;;  %v10502_v11 = vld [vmem:[%s17664_s7 + $0x38] sm:$0xff] }
 0x7a0   :  { %11690 = vmatpush3.bf16.msra.mxu1 %v12508_v13  ;;  %v11325_v7 = vpop.f32.mrf.mxu0 }
 0x7a1   :  { %11691 = vmatprep.subr.bf16.mxu1 %v12509_v34 }
 0x7a2   :  { %v11326_v12 = vpop.f32.mrf.mxu0 }
 0x7a3   :  { %v17410_v17 = vadd.f32 %v11326_v12, %v11325_v7 }
 0x7a4   :  { %11692 = vmatpush3.bf16.msra.mxu1 %v12509_v34  ;;  %v11328_v63 = vpop.f32.mrf.mxu0 }
 0x7a5   :  { %11745 = vmatprep.subr.mxu1 %v10510_v27 }
 0x7a6   :  { %v11329_v9 = vpop.f32.mrf.mxu0 }
 0x7a7   :  { %v17412_v50 = vadd.f32 %v11329_v9, %v11328_v63  ;;  %11694 = vmatmul.mubr.bf16.vlgmr.msra.gmra.mxu1 %v17369_v58 }
 0x7a8   :  { %11697 = vmatprep.mubr.bf16.mxu1 %v8834_v38  ;;  %v11331_v23 = vpop.f32.mrf.mxu0  ;;  %11761 = vmatpush3.msra.mxu1 %v10510_v27 }
 0x7a9   :  { %11746 = vmatprep.subr.mxu1 %v10509_v14 }
 0x7aa   :  { %v11332_v0 = vpop.f32.mrf.mxu0  ;;  %11762 = vmatpush3.msra.mxu1 %v10509_v14 }
 0x7ab   :  { %v17415_v16 = vadd.f32 %v11332_v0, %v11331_v23  ;;  %11747 = vmatprep.subr.mxu1 %v10508_v37  ;;  %v10501_v23 = vld [vmem:[%s17664_s7 + $0x30] sm:$0xff] }
 0x7ac   :  { %v11334_v53 = vpop.f32.mrf.mxu0  ;;  %11763 = vmatpush3.msra.mxu1 %v10508_v37 }
 0x7ad   :  { %11748 = vmatprep.subr.mxu1 %v10507_v5 }
 0x7ae   :  { %v11335_v3 = vpop.f32.mrf.mxu0  ;;  %11764 = vmatpush3.msra.mxu1 %v10507_v5 }
 0x7af   :  { %v17417_v6 = vadd.f32 %v11335_v3, %v11334_v53  ;;  %11698 = vmatmul.mubr.bf16.gmra.mxu1 %v8837_v25  ;;  %v10505_v25 = vld [vmem:[%s17664_s7 + $0x50] sm:$0xff]  ;;  %11749 = vmatprep.subr.mxu1 %v10506_v29 }
 0x7b0   :  { %v11365_v10 = vpop.f32.mrf.mxu0  ;;  %11765 = vmatpush3.msra.mxu1 %v10506_v29  ;;  %11711 = vmatprep.subr.mxu0 %v10505_v25 }
 0x7b1   :  { %11750 = vmatprep.subr.mxu1 %v10505_v25  ;;  %11712 = vmatpush3.msra.mxu0 %v10505_v25 }
 0x7b2   :  { %v11366_v15 = vpop.f32.mrf.mxu0  ;;  %11766 = vmatpush3.msra.mxu1 %v10505_v25  ;;  %11713 = vmatprep.subr.mxu0 %v10504_v61 }
 0x7b3   :  { %v17419_v35 = vadd.f32 %v11366_v15, %v11365_v10  ;;  %11751 = vmatprep.subr.mxu1 %v10504_v61  ;;  %11714 = vmatpush3.msra.mxu0 %v10504_v61  ;;  %v10500_v10 = vld [vmem:[%s17664_s7 + $0x28] sm:$0xff] }
 0x7b4   :  { %v11368_v59 = vpop.f32.mrf.mxu0  ;;  %11767 = vmatpush3.msra.mxu1 %v10504_v61  ;;  %11715 = vmatprep.subr.mxu0 %v10503_v45 }
 0x7b5   :  { %11752 = vmatprep.subr.mxu1 %v10503_v45  ;;  %11716 = vmatpush3.msra.mxu0 %v10503_v45 }
 0x7b6   :  { %v11369_v55 = vpop.f32.mrf.mxu0  ;;  %11768 = vmatpush3.msra.mxu1 %v10503_v45  ;;  %11717 = vmatprep.subr.mxu0 %v10502_v11 }
 0x7b7   :  { %v17421_v20 = vadd.f32 %v11369_v55, %v11368_v59  ;;  %11753 = vmatprep.subr.mxu1 %v10502_v11  ;;  %11718 = vmatpush3.msra.mxu0 %v10502_v11 }
 0x7b8   :  { %v11371_v43 = vpop.f32.mrf.mxu0  ;;  %11769 = vmatpush3.msra.mxu1 %v10502_v11  ;;  %11719 = vmatprep.subr.mxu0 %v10501_v23 }
 0x7b9   :  { %11754 = vmatprep.subr.mxu1 %v10501_v23  ;;  %11720 = vmatpush3.msra.mxu0 %v10501_v23 }
 0x7ba   :  { %v11372_v58 = vpop.f32.mrf.mxu0  ;;  %11770 = vmatpush3.msra.mxu1 %v10501_v23  ;;  %11721 = vmatprep.subr.mxu0 %v10500_v10 }
 0x7bb   :  { %v17423_v1 = vadd.f32 %v11372_v58, %v11371_v43  ;;  %11755 = vmatprep.subr.mxu1 %v10500_v10  ;;  %11722 = vmatpush3.msra.mxu0 %v10500_v10  ;;  %v10499_v43 = vld [vmem:[%s17664_s7 + $0x20] sm:$0xff] }
 0x7bc   :  { %v11374_v8 = vpop.f32.mrf.mxu0  ;;  %11771 = vmatpush3.msra.mxu1 %v10500_v10  ;;  %11723 = vmatprep.subr.mxu0 %v10499_v43 }
 0x7bd   :  { %11756 = vmatprep.subr.mxu1 %v10499_v43  ;;  %11724 = vmatpush3.msra.mxu0 %v10499_v43 }
 0x7be   :  { %v11375_v56 = vpop.f32.mrf.mxu0  ;;  %11772 = vmatpush3.msra.mxu1 %v10499_v43 }
 0x7bf   :  { %v17425_v54 = vadd.f32 %v11375_v56, %v11374_v8  ;;  %v10498_v56 = vld [vmem:[%s17664_s7 + $0x18] sm:$0xff] }
 0x7c0   :  { %v11377_v22 = vpop.f32.mrf.mxu0  ;;  %11725 = vmatprep.subr.mxu0 %v10498_v56  ;;  %11757 = vmatprep.subr.mxu1 %v10498_v56 }
 0x7c1   :  { %11726 = vmatpush3.msra.mxu0 %v10498_v56  ;;  %11773 = vmatpush3.msra.mxu1 %v10498_v56 }
 0x7c2   :  { %v11378_v26 = vpop.f32.mrf.mxu0 }
 0x7c3   :  { %v17427_v44 = vadd.f32 %v11378_v26, %v11377_v22 }
 0x7c4   :  { %v11380_v40 = vpop.f32.mrf.mxu0 }
 0x7c6   :  { %v11381_v36 = vpop.f32.mrf.mxu0 }
 0x7c7   :  { %v17429_v30 = vadd.f32 %v11381_v36, %v11380_v40 }
 0x7c8   :  { %v11383_v18 = vpop.f32.mrf.mxu0 }
 0x7ca   :  { %v11384_v32 = vpop.f32.mrf.mxu0 }
 0x7cb   :  { %v17431_v42 = vadd.f32 %v11384_v32, %v11383_v18 }
 0x7cc   :  { %v11386_v19 = vpop.f32.mrf.mxu0 }
 0x7ce   :  { %v11387_v24 = vpop.f32.mrf.mxu0 }
 0x7cf   :  { %v17433_v33 = vadd.f32 %v11387_v24, %v11386_v19 }
 0x7d0   :  { %v11417_v31 = vpop.f32.mrf.mxu0 }
 0x7d2   :  { %v11418_v48 = vpop.f32.mrf.mxu0 }
 0x7d3   :  { %v17435_v38 = vadd.f32 %v11418_v48, %v11417_v31 }
 0x7d4   :  { %v11420_v49 = vpop.f32.mrf.mxu0 }
 0x7d6   :  { %v11421_v28 = vpop.f32.mrf.mxu0 }
 0x7d7   :  { %v17440_v2 = vadd.f32 %v11421_v28, %v11420_v49 }
 0x7d8   :  { %v11423_v62 = vpop.f32.mrf.mxu0 }
 0x7da   :  { %v11424_v60 = vpop.f32.mrf.mxu0 }
 0x7db   :  { %v17451_v57 = vadd.f32 %v11424_v60, %v11423_v62 }
 0x7dc   :  { %v11426_v51 = vpop.f32.mrf.mxu0 }
 0x7de   :  { %v11427_v39 = vpop.f32.mrf.mxu0 }
 0x7df   :  { %v17459_v46 = vadd.f32 %v11427_v39, %v11426_v51 }
 0x7e0   :  { %v11429_v13 = vpop.f32.mrf.mxu0 }
 0x7e2   :  { %v11430_v21 = vpop.f32.mrf.mxu0 }
 0x7e3   :  { %v17467_v34 = vadd.f32 %v11430_v21, %v11429_v13 }
 0x7e4   :  { %v11432_v7 = vpop.f32.mrf.mxu0 }
 0x7e6   :  { %v11433_v12 = vpop.f32.mrf.mxu0 }
 0x7e7   :  { %v17472_v63 = vadd.f32 %v11433_v12, %v11432_v7  ;;  %v11599_v9 = vpop.f32.mrf.mxu1 }
 0x7e8   :  { %v9186_v0 = vadd.f32 %v11599_v9, %v17403_v52  ;;  %v17478_v53 = vpop.f32.mrf.mxu0 }
 0x7e9   :  { %v9177_v3 = vpop.f32.mrf.mxu1 }
 0x7ea   :  { %v9178_v15 = vadd.f32 %v17393_v47, %v9177_v3  ;;  %v17484_v59 = vpop.f32.mrf.mxu0  ;;  %v17487_v55 = vadd.f32 %v17423_v1, %v9186_v0 }
 0x7eb   :  { %v11600_v52 = vpop.f32.mrf.mxu1 }
 0x7ec   :  { %v9189_v58 = vadd.f32 %v11600_v52, %v17408_v4  ;;  %v17493_v8 = vpop.f32.mrf.mxu0  ;;  %v17496_v47 = vadd.f32 %v17419_v35, %v9178_v15  ;;  %v10497_v35 = vld [vmem:[%s17664_s7 + $0x10] sm:$0xff] }
 0x7ed   :  { %v9180_v1 = vpop.f32.mrf.mxu1  ;;  %11727 = vmatprep.subr.mxu0 %v10497_v35  ;;  %11758 = vmatprep.subr.mxu1 %v10497_v35 }
 0x7ee   :  { %v9181_v22 = vadd.f32 %v17398_v41, %v9180_v1  ;;  %v17502_v26 = vpop.f32.mrf.mxu0  ;;  %v17505_v4 = vadd.f32 %v17425_v54, %v9189_v58  ;;  %11728 = vmatpush3.msra.mxu0 %v10497_v35  ;;  %v10496_v41 = vld [vmem:[%s17664_s7 + $0x8] sm:$0xff]  ;;  %11774 = vmatpush3.msra.mxu1 %v10497_v35  ;;  %v10495_v54 = vld [vmem:[%s17664_s7] sm:$0xff] }
 0x7ef   :  { %11729 = vmatprep.subr.mxu0 %v10496_v41  ;;  %11759 = vmatprep.subr.mxu1 %v10496_v41 }
 0x7f0   :  { %v17511_v40 = vadd.f32 %v17421_v20, %v9181_v22  ;;  %v17513_v36 = vpop.f32.mrf.mxu0  ;;  %11730 = vmatpush3.msra.mxu0 %v10496_v41  ;;  %11775 = vmatpush3.msra.mxu1 %v10496_v41 }
 0x7f1   :  { %11731 = vmatprep.subr.mxu0 %v10495_v54  ;;  %11760 = vmatprep.subr.mxu1 %v10495_v54 }
 0x7f2   :  { %v17521_v20 = vpop.f32.mrf.mxu0  ;;  %11732 = vmatpush3.msra.mxu0 %v10495_v54  ;;  %11776 = vmatpush3.msra.mxu1 %v10495_v54 }
 0x7f4   :  { %v17524_v19 = vpop.f32.mrf.mxu0 }
 0x7f6   :  { %v17532_v14 = vpop.f32.mrf.mxu0 }
 0x7f7   :  { %v11603_v18 = vpop.f32.mrf.mxu1 }
 0x7f8   :  { %v9202_v32 = vadd.f32 %v11603_v18, %v17415_v16 }
 0x7f9   :  { %v9193_v24 = vpop.f32.mrf.mxu1  ;;  %v17539_v60 = vpop.f32.mrf.mxu0 }
 0x7fa   :  { %v9194_v31 = vadd.f32 %v17410_v17, %v9193_v24  ;;  %v17528_v48 = vadd.f32 %v17431_v42, %v9202_v32 }
 0x7fb   :  { %v11604_v49 = vpop.f32.mrf.mxu1  ;;  %v17541_v17 = vpop.f32.mrf.mxu0 }
 0x7fc   :  { %v9205_v27 = vadd.f32 %v11604_v49, %v17417_v6  ;;  %v9403_v28 = vadd.f32 %v17427_v44, %v9194_v31 }
 0x7fd   :  { %v9196_v62 = vpop.f32.mrf.mxu1  ;;  %v17543_v42 = vpop.f32.mrf.mxu0 }
 0x7fe   :  { %v9197_v37 = vadd.f32 %v17412_v50, %v9196_v62  ;;  %v17536_v16 = vadd.f32 %v17433_v33, %v9205_v27 }
 0x7ff   :  { %v17545_v6 = vpop.f32.mrf.mxu0 }
 0x800   :  { %v9406_v5 = vadd.f32 %v17429_v30, %v9197_v37 }
 0x801   :  { %v17547_v51 = vpop.f32.mrf.mxu0 }
 0x803   :  { %v17549_v39 = vpop.f32.mrf.mxu0 }
 0x805   :  { %v17551_v33 = vpop.f32.mrf.mxu0 }
 0x807   :  { %v11623_v29 = vpop.f32.mrf.mxu1  ;;  %v17555_v30 = vpop.f32.mrf.mxu0 }
 0x808   :  { %v9460_v9 = vadd.f32 %v11623_v29, %v17487_v55 }
 0x809   :  { %v9451_v44 = vpop.f32.mrf.mxu1  ;;  %v17557_v45 = vpop.f32.mrf.mxu0 }
 0x80a   :  { %v9452_v10 = vadd.f32 %v9451_v44, %v17496_v47 }
 0x80b   :  { %v11624_v25 = vpop.f32.mrf.mxu1  ;;  %v17561_v11 = vpop.f32.mrf.mxu0 }
 0x80c   :  { %v9463_v58 = vadd.f32 %v11624_v25, %v17505_v4 }
 0x80d   :  { %v9454_v50 = vpop.f32.mrf.mxu1  ;;  %v17565_v0 = vpop.f32.mrf.mxu0 }
 0x80f   :  { %v17553_v61 = vpop.f32.mrf.mxu1  ;;  %v17573_v22 = vpop.f32.mrf.mxu0 }
 0x811   :  { %v9467_v13 = vpop.f32.mrf.mxu1 }
 0x812   :  { %v9468_v32 = vadd.f32 %v9467_v13, %v9403_v28 }
 0x813   :  { %v17559_v21 = vpop.f32.mrf.mxu1 }
 0x815   :  { %v9470_v7 = vpop.f32.mrf.mxu1 }
 0x827   :  { %v11647_v12 = vpop.f32.mrf.mxu1 }
 0x828   :  { %v9782_v23 = vadd.f32 %v11647_v12, %v17451_v57  ;;  %v9455_v57 = vadd.f32 %v9454_v50, %v17511_v40  ;;  %v9471_v40 = vadd.f32 %v9470_v7, %v9406_v5 }
 0x829   :  { %v9773_v3 = vpop.f32.mrf.mxu1 }
 0x82a   :  { %v17568_v15 = vadd.f32 %v9782_v23, %v9460_v9  ;;  %v9774_v52 = vadd.f32 %v17435_v38, %v9773_v3  ;;  %v11521_v38 = vpop.f32.mrf.mxu0 }
 0x82b   :  { %v11648_v43 = vpop.f32.mrf.mxu1 }
 0x82c   :  { %v9804_v1 = vadd.f32 %v9774_v52, %v9452_v10  ;;  %v9785_v56 = vadd.f32 %v11648_v43, %v17459_v46  ;;  %v11522_v31 = vpop.f32.mrf.mxu0  ;;  %v11471_v43 = vadd.f32 %v17521_v20, %v17513_v36  ;;  %v11440_v36 = vadd.f32 %v17502_v26, %v17493_v8 }
 0x82d   :  { %v9776_v55 = vpop.f32.mrf.mxu1  ;;  %v11483_v20 = vadd.f32 %v17549_v39, %v17547_v51  ;;  %v9476_v8 = vadd.f32 %v17553_v61, %v17528_v48  ;;  %v11295_v48 = vld [vmem:[%s17665_s6] ss:$0 sm:$0xff] }
 0x82e   :  { %v17576_v35 = vadd.f32 %v9785_v56, %v9463_v58  ;;  %v9777_v41 = vadd.f32 %v17440_v2, %v9776_v55  ;;  %v11524_v2 = vpop.f32.mrf.mxu0  ;;  %v11477_v58 = vadd.f32 %v17541_v17, %v17539_v60 }
 0x82f   :  { %v17579_v47 = vpop.f32.mrf.mxu1 }
 0x830   :  { %v17581_v54 = vadd.f32 %v9777_v41, %v9455_v57  ;;  %v11525_v37 = vpop.f32.mrf.mxu0 }
 0x831   :  { %v9789_v18 = vpop.f32.mrf.mxu1  ;;  %v11526_v51 = vadd.f32 %v11525_v37, %v11524_v2 }
 0x832   :  { %v9790_v4 = vadd.f32 %v17467_v34, %v9789_v18  ;;  %v11527_v29 = vpop.f32.mrf.mxu0 }
 0x833   :  { %v17584_v24 = vpop.f32.mrf.mxu1 }
 0x834   :  { %v17586_v46 = vadd.f32 %v9790_v4, %v9468_v32  ;;  %v11528_v44 = vpop.f32.mrf.mxu0  ;;  %v11437_v4 = vadd.f32 %v17484_v59, %v17478_v53 }
 0x835   :  { %v9792_v49 = vpop.f32.mrf.mxu1  ;;  %v11529_v41 = vadd.f32 %v11528_v44, %v11527_v29 }
 0x836   :  { %v9793_v27 = vadd.f32 %v17472_v63, %v9792_v49  ;;  %v11530_v25 = vpop.f32.mrf.mxu0  ;;  %v11474_v49 = vadd.f32 %v17532_v14, %v17524_v19  ;;  %v11486_v19 = vadd.f32 %v17555_v30, %v17551_v33  ;;  %v11489_v14 = vadd.f32 %v17561_v11, %v17557_v45 }
 0x837   :  { %v9798_v33 = vadd.f32 %v17579_v47, %v11437_v4 }
 0x838   :  { %v17589_v62 = vadd.f32 %v9793_v27, %v9471_v40  ;;  %v11531_v28 = vpop.f32.mrf.mxu0  ;;  %v11480_v40 = vadd.f32 %v17545_v6, %v17543_v42  ;;  %v11523_v27 = vadd.f32 %v11522_v31, %v11521_v38  ;;  %v11492_v6 = vadd.f32 %v17573_v22, %v17565_v0 }
 0x839   :  { %v11532_v60 = vadd.f32 %v11531_v28, %v11530_v25  ;;  %v9479_v38 = vadd.f32 %v17559_v21, %v17536_v16  ;;  %v9801_v16 = vadd.f32 %v17584_v24, %v11440_v36 }
 0x83a   :  { %v11533_v34 = vpop.f32.mrf.mxu0 }
 0x83c   :  { %v11534_v9 = vpop.f32.mrf.mxu0 }
 0x83d   :  { %v11535_v2 = vadd.f32 %v11534_v9, %v11533_v34  ;;  %v9811_v34 = vadd.f32 %v9801_v16, %v9479_v38 }
 0x83e   :  { %v17591_v3 = vpop.f32.mrf.mxu0 }
 0x840   :  { %v17593_v5 = vpop.f32.mrf.mxu0 }
 0x841   :  { %v11538_v24 = vadd.f32 %v17593_v5, %v17591_v3 }
 0x842   :  { %v11539_v7 = vpop.f32.mrf.mxu0 }
 0x844   :  { %v11540_v56 = vpop.f32.mrf.mxu0 }
 0x845   :  { %v11541_v37 = vadd.f32 %v11540_v56, %v11539_v7 }
 0x846   :  { %v11542_v17 = vpop.f32.mrf.mxu0 }
 0x847   :  { %v11671_v50 = vpop.f32.mrf.mxu1 }
 0x848   :  { %v10112_v18 = vadd.f32 %v11671_v50, %v11477_v58  ;;  %v11543_v30 = vpop.f32.mrf.mxu0 }
 0x849   :  { %v10103_v13 = vpop.f32.mrf.mxu1  ;;  %v11544_v25 = vadd.f32 %v11543_v30, %v11542_v17 }
 0x84a   :  { %v10104_v57 = vadd.f32 %v11471_v43, %v10103_v13  ;;  %v10136_v26 = vadd.f32 %v10112_v18, %v17568_v15 }
 0x84b   :  { %v11672_v12 = vpop.f32.mrf.mxu1 }
 0x84c   :  { %v10134_v50 = vadd.f32 %v10104_v57, %v9804_v1  ;;  %v10115_v13 = vadd.f32 %v11672_v12, %v11480_v40 }
 0x84d   :  { %v10106_v23 = vpop.f32.mrf.mxu1 }
 0x84e   :  { %v10107_v53 = vadd.f32 %v11474_v49, %v10106_v23  ;;  %v10137_v11 = vadd.f32 %v10115_v13, %v17576_v35 }
 0x84f   :  { %v11675_v10 = vpop.f32.mrf.mxu1 }
 0x850   :  { %v10135_v0 = vadd.f32 %v10107_v53, %v17581_v54  ;;  %v10128_v21 = vadd.f32 %v11675_v10, %v11489_v14 }
 0x851   :  { %v10119_v63 = vpop.f32.mrf.mxu1 }
 0x852   :  { %v10120_v31 = vadd.f32 %v11483_v20, %v10119_v63  ;;  %v9810_v63 = vadd.f32 %v9798_v33, %v9476_v8 }
 0x853   :  { %v11676_v52 = vpop.f32.mrf.mxu1 }
 0x854   :  { %v10138_v43 = vadd.f32 %v10120_v31, %v17586_v46  ;;  %v10140_v9 = vadd.f32 %v10128_v21, %v9810_v63 }
 0x855   :  { %v10122_v55 = vpop.f32.mrf.mxu1 }
 0x856   :  { %v10123_v54 = vadd.f32 %v11486_v19, %v10122_v55 }
 0x867   :  { %v11695_v32 = vpop.f32.mrf.mxu1 }
 0x868   :  { %v10442_v29 = vadd.f32 %v11695_v32, %v11529_v41  ;;  %v10131_v41 = vadd.f32 %v11676_v52, %v11492_v6  ;;  %v10139_v52 = vadd.f32 %v10123_v54, %v17589_v62  ;;  %v11296_v62 = vld [vmem:[%s17666_s8] ss:$0 sm:$0xff] }
 0x869   :  { %v10433_v44 = vpop.f32.mrf.mxu1 }
 0x86a   :  { %v10434_v59 = vadd.f32 %v11523_v27, %v10433_v44  ;;  %v10466_v45 = vadd.f32 %v10442_v29, %v10136_v26  ;;  %v10141_v36 = vadd.f32 %v10131_v41, %v9811_v34 }
 0x86b   :  { %v11696_v42 = vpop.f32.mrf.mxu1 }
 0x86c   :  { %v10464_v39 = vadd.f32 %v10434_v59, %v10134_v50  ;;  %v10445_v1 = vadd.f32 %v11696_v42, %v11532_v60  ;;  %v10481_v35 = vadd.f32 %v11295_v48, %v10466_v45 }
 0x86d   :  { %v10436_v61 = vpop.f32.mrf.mxu1 }
 0x86e   :  { %v10437_v15 = vadd.f32 %v11526_v51, %v10436_v61  ;;  %v10479_v22 = vadd.f32 %v11295_v48, %v10464_v39  ;;  %v10467_v28 = vadd.f32 %v10445_v1, %v10137_v11  ;;  %v10489_v27 = vmax.f32 %v10481_v35, 0.0 }
 0x86f   :  { %v11699_v47 = vpop.f32.mrf.mxu1 }
 0x870   :  { %v10465_v12 = vadd.f32 %v10437_v15, %v10135_v0  ;;  %v10487_v23 = vmax.f32 %v10479_v22, 0.0  ;;  %v10458_v58 = vadd.f32 %v11699_v47, %v11541_v37  ;;  %v10482_v7 = vadd.f32 %v11295_v48, %v10467_v28 }
 0x871   :  { %v10449_v57 = vpop.f32.mrf.mxu1 }
 0x872   :  { %v10480_v18 = vadd.f32 %v11295_v48, %v10465_v12  ;;  %v10450_v32 = vadd.f32 %v11535_v2, %v10449_v57  ;;  %11733 = vmatprep.mubr.f32.mxu0 %v10487_v23  ;;  %v10470_v40 = vadd.f32 %v10458_v58, %v10140_v9  ;;  %v10490_v60 = vmax.f32 %v10482_v7, 0.0 }
 0x873   :  { %v11700_v10 = vpop.f32.mrf.mxu1 }
 0x874   :  { %v10488_v56 = vmax.f32 %v10480_v18, 0.0  ;;  %v10468_v4 = vadd.f32 %v10450_v32, %v10138_v43  ;;  %v10461_v49 = vadd.f32 %v11700_v10, %v11544_v25  ;;  %v10485_v29 = vadd.f32 %v11295_v48, %v10470_v40 }
 0x875   :  { %v10452_v46 = vpop.f32.mrf.mxu1 }
 0x876   :  { %v10453_v55 = vadd.f32 %v11538_v24, %v10452_v46  ;;  %11734 = vmatmul.mubr.f32.vlgmr.msra.gmra.mxu0 %v10488_v56  ;;  %v10483_v20 = vadd.f32 %v11295_v48, %v10468_v4  ;;  %v10471_v17 = vadd.f32 %v10461_v49, %v10141_v36  ;;  %v10493_v53 = vmax.f32 %v10485_v29, 0.0 }
 0x877   :  { %11736 = vmatprep.mubr.f32.mxu0 %v10489_v27 }
 0x878   :  { %v10469_v3 = vadd.f32 %v10453_v55, %v10139_v52  ;;  %v10491_v5 = vmax.f32 %v10483_v20, 0.0  ;;  %v10486_v50 = vadd.f32 %v11295_v48, %v10471_v17 }
 0x87a   :  { %v10484_v44 = vadd.f32 %v11295_v48, %v10469_v3  ;;  %11737 = vmatmul.mubr.f32.gmra.mxu0 %v10490_v60  ;;  %11739 = vmatprep.mubr.f32.mxu1 %v10491_v5  ;;  %v10494_v59 = vmax.f32 %v10486_v50, 0.0 }
 0x87c   :  { %v10492_v13 = vmax.f32 %v10484_v44, 0.0 }
 0x87e   :  { %11740 = vmatmul.mubr.f32.vlgmr.msra.gmra.mxu1 %v10492_v13 }
 0x87f   :  { %11742 = vmatprep.mubr.f32.mxu1 %v10493_v53 }
 0x882   :  { %11743 = vmatmul.mubr.f32.gmra.mxu1 %v10494_v59 }
 0x936   :  { %v11735_v19 = vpop.f32.mrf.mxu0 }
 0x937   :  { %v10590_v14 = vadd.f32 %v11735_v19, %v11296_v62 }
 0x938   :  { %v10584_v8 = vpop.f32.mrf.mxu0 }
 0x939   :  { %10625 = vmax.xlane.f32.xlu0 %v10590_v14  ;;  %v10585_v42 = vadd.f32 %v11296_v62, %v10584_v8 }
 0x93a   :  { %v11738_v26 = vpop.f32.mrf.mxu0 }
 0x93b   :  { %v10600_v6 = vadd.f32 %v11738_v26, %v11296_v62 }
 0x93c   :  { %v10594_v51 = vpop.f32.mrf.mxu0 }
 0x93d   :  { %10629 = vmax.xlane.f32.xlu1 %v10600_v6  ;;  %10623 = vmax.xlane.f32.xlu0 %v10585_v42  ;;  %v10595_v1 = vadd.f32 %v11296_v62, %v10594_v51 }
 0x93e   :  { %v11741_v39 = vpop.f32.mrf.mxu1 }
 0x93f   :  { %v10610_v31 = vadd.f32 %v11741_v39, %v11296_v62 }
 0x940   :  { %v10604_v38 = vpop.f32.mrf.mxu1 }
 0x941   :  { %v10605_v33 = vadd.f32 %v11296_v62, %v10604_v38  ;;  %10627 = vmax.xlane.f32.xlu1 %v10595_v1 }
 0x942   :  { %v11744_v30 = vpop.f32.mrf.mxu1 }
 0x943   :  { %10631 = vmax.xlane.f32.xlu0 %v10605_v33  ;;  %v10620_v61 = vadd.f32 %v11744_v30, %v11296_v62 }
 0x944   :  { %v10614_v45 = vpop.f32.mrf.mxu1 }
 0x945   :  { %v10615_v48 = vadd.f32 %v11296_v62, %v10614_v45  ;;  %10633 = vmax.xlane.f32.xlu1 %v10610_v31 }
 0x947   :  { %10635 = vmax.xlane.f32.xlu0 %v10615_v48 }
 0x949   :  { %10637 = vmax.xlane.f32.xlu1 %v10620_v61 }
 0x9c2   :  { %v10626_v11 = vpop.xlane.xlu0 %10625 }
 0x9c3   :  { %v10640_v0 = vsub.f32 %v10590_v14, %v10626_v11 }
 0x9c5   :  { %v10649_v15 = vmul.f32 1.442695, %v10640_v0 }
 0x9c6   :  { %v10630_v22 = vpop.xlane.xlu1 %10629  ;;  %v10624_v2 = vpop.xlane.xlu0 %10623 }
 0x9c7   :  { %12510 = vpow2.f32 %v10649_v15  ;;  %v10642_v37 = vsub.f32 %v10600_v6, %v10630_v22  ;;  %v10639_v16 = vsub.f32 %v10585_v42, %v10624_v2 }
 0x9c9   :  { %v10653_v21 = vmul.f32 1.442695, %v10642_v37  ;;  %v10647_v47 = vmul.f32 1.442695, %v10639_v16 }
 0x9ca   :  { %v10628_v25 = vpop.xlane.xlu1 %10627 }
 0x9cb   :  { %12512 = vpow2.f32 %v10653_v21  ;;  %v10641_v28 = vsub.f32 %v10595_v1, %v10628_v25 }
 0x9cc   :  { %12514 = vpow2.f32 %v10647_v47  ;;  %v10632_v12 = vpop.xlane.xlu0 %10631 }
 0x9cd   :  { %v10651_v23 = vmul.f32 1.442695, %v10641_v28  ;;  %v10643_v63 = vsub.f32 %v10605_v33, %v10632_v12 }
 0x9ce   :  { %v10634_v43 = vpop.xlane.xlu1 %10633 }
 0x9cf   :  { %12516 = vpow2.f32 %v10651_v23  ;;  %v10644_v58 = vsub.f32 %v10610_v31, %v10634_v43  ;;  %v10655_v57 = vmul.f32 1.442695, %v10643_v63 }
 0x9d0   :  { %v10636_v35 = vpop.xlane.xlu0 %10635 }
 0x9d1   :  { %v10657_v41 = vmul.f32 1.442695, %v10644_v58  ;;  %v10645_v54 = vsub.f32 %v10615_v48, %v10636_v35 }
 0x9d2   :  { %v10638_v18 = vpop.xlane.xlu1 %10637 }
 0x9d3   :  { %12518 = vpow2.f32 %v10657_v41  ;;  %v10646_v32 = vsub.f32 %v10620_v61, %v10638_v18  ;;  %v10659_v34 = vmul.f32 1.442695, %v10645_v54 }
 0x9d4   :  { %v12511_v24 = vpop.eup %12510  ;;  %12520 = vpow2.f32 %v10655_v57 }
 0x9d5   :  { %v10661_v9 = vmul.f32 1.442695, %v10646_v32  ;;  %10665 = vadd.xlane.f32.xlu1 %v12511_v24 }
 0x9d7   :  { %12522 = vpow2.f32 %v10661_v9 }
 0x9d8   :  { %v12513_v10 = vpop.eup %12512  ;;  %12524 = vpow2.f32 %v10659_v34 }
 0x9d9   :  { %v12515_v7 = vpop.eup %12514  ;;  %10669 = vadd.xlane.f32.xlu1 %v12513_v10 }
 0x9da   :  { %10663 = vadd.xlane.f32.xlu0 %v12515_v7 }
 0x9dc   :  { %v12517_v56 = vpop.eup %12516 }
 0x9de   :  { %10667 = vadd.xlane.f32.xlu0 %v12517_v56 }
 0x9e0   :  { %v12519_v4 = vpop.eup %12518 }
 0x9e1   :  { %v12521_v49 = vpop.eup %12520  ;;  %10673 = vadd.xlane.f32.xlu1 %v12519_v4 }
 0x9e2   :  { %10671 = vadd.xlane.f32.xlu0 %v12521_v49 }
 0x9e4   :  { %v12523_v40 = vpop.eup %12522 }
 0x9e5   :  { %v12525_v46 = vpop.eup %12524  ;;  %10677 = vadd.xlane.f32.xlu1 %v12523_v40 }
 0x9e6   :  { %10675 = vadd.xlane.f32.xlu0 %v12525_v46 }
 0xa5e   :  { %v10666_v27 = vpop.xlane.xlu1 %10665 }
 0xa5f   :  { %12526 = vrcp.f32 %v10666_v27 }
 0xa62   :  { %v10670_v36 = vpop.xlane.xlu1 %10669 }
 0xa63   :  { %12528 = vrcp.f32 %v10670_v36  ;;  %v10664_v52 = vpop.xlane.xlu0 %10663 }
 0xa64   :  { %12530 = vrcp.f32 %v10664_v52 }
 0xa67   :  { %v10668_v55 = vpop.xlane.xlu0 %10667 }
 0xa68   :  { %12532 = vrcp.f32 %v10668_v55 }
 0xa6a   :  { %v10674_v20 = vpop.xlane.xlu1 %10673 }
 0xa6b   :  { %12534 = vrcp.f32 %v10674_v20  ;;  %v10672_v60 = vpop.xlane.xlu0 %10671 }
 0xa6c   :  { %v12527_v17 = vpop.eup %12526  ;;  %12536 = vrcp.f32 %v10672_v60 }
 0xa6d   :  { %v10688_v3 = vmul.f32 %v12527_v17, %v12511_v24 }
 0xa6e   :  { %v10678_v5 = vpop.xlane.xlu1 %10677 }
 0xa6f   :  { %10696 = vst [vmem:[%s17667_s9 + $0x8] sm:$0xff] %v10688_v3  ;;  %12538 = vrcp.f32 %v10678_v5  ;;  %v10676_v29 = vpop.xlane.xlu0 %10675 }
 0xa70   :  { %v12529_v44 = vpop.eup %12528  ;;  %12540 = vrcp.f32 %v10676_v29 }
 0xa71   :  { %v12531_v50 = vpop.eup %12530  ;;  %v10690_v13 = vmul.f32 %v12529_v44, %v12513_v10 }
 0xa72   :  { %v10687_v53 = vmul.f32 %v12531_v50, %v12515_v7 }
 0xa73   :  { %10698 = vst [vmem:[%s17667_s9 + $0x18] sm:$0xff] %v10690_v13 }
 0xa74   :  { %10695 = vst [vmem:[%s17667_s9] sm:$0xff] %v10687_v53 }
 0xa75   :  { %v12533_v59 = vpop.eup %12532 }
 0xa76   :  { %v10689_v62 = vmul.f32 %v12533_v59, %v12517_v56 }
 0xa78   :  { %v12535_v19 = vpop.eup %12534  ;;  %10697 = vst [vmem:[%s17667_s9 + $0x10] sm:$0xff] %v10689_v62 }
 0xa79   :  { %v12537_v14 = vpop.eup %12536  ;;  %v10692_v8 = vmul.f32 %v12535_v19, %v12519_v4 }
 0xa7a   :  { %v10691_v26 = vmul.f32 %v12537_v14, %v12521_v49 }
 0xa7b   :  { %10700 = vst [vmem:[%s17667_s9 + $0x28] sm:$0xff] %v10692_v8 }
 0xa7c   :  { %v12539_v42 = vpop.eup %12538  ;;  %10699 = vst [vmem:[%s17667_s9 + $0x20] sm:$0xff] %v10691_v26 }
 0xa7d   :  { %v12541_v6 = vpop.eup %12540  ;;  %v10694_v51 = vmul.f32 %v12539_v42, %v12523_v40 }
 0xa7e   :  { %v10693_v39 = vmul.f32 %v12541_v6, %v12525_v46 }
 0xa7f   :  { %10702 = vst [vmem:[%s17667_s9 + $0x38] sm:$0xff] %v10694_v51 }
 0xa80   :  { %10701 = vst [vmem:[%s17667_s9 + $0x30] sm:$0xff] %v10693_v39 }

</bundles_post_ra>
